<compile_context>
chip_gen: v7x
topology: tpu7x:2x2x1
jax: 0.10.0
libtpu: 0.0.40
codegen_flags: <defaults>
</compile_context>

<pallas_src>
import functools

import jax
import jax.numpy as jnp
from jax.experimental import pallas as pl
from jax.experimental.pallas import tpu as pltpu

_VMEM_LIMIT = 32 * 1024 * 1024
_LANE = 128


def _round_up(x, m):
    return ((x + m - 1) // m) * m


def _tile_rows(m):
    """Row-tile size and padded row count (512-row tiles, ragged tail zero-padded)."""
    tm = 512 if m > 512 else m
    return tm, _round_up(m, tm)


def _cparams(dimsem):
    return pltpu.CompilerParams(dimension_semantics=dimsem,
                                vmem_limit_bytes=_VMEM_LIMIT)


def _apply_act(x, act):
    if act == "leaky":          # nn.LeakyReLU(0.2)
        return jnp.where(x > 0, x, 0.2 * x)
    if act == "relu":
        return jnp.maximum(x, 0.0)
    if act == "tanh":
        return jnp.tanh(x)
    return x


def _sigmoid(v):
    # exp on the EUP, divide replaced by approximate reciprocal (also EUP).
    return pl.reciprocal(1.0 + jnp.exp(-v), approx=True)


# ----------------------------------------------------------------------------------
# Pallas kernels
# ----------------------------------------------------------------------------------
def _ggemm_act_kernel(a_ref, w_ref, o_ref, *, act):
    """Grouped GEMM + activation (no BatchNorm, no bias). grid=(G, m_tiles)."""
    y = jnp.dot(a_ref[0], w_ref[0], preferred_element_type=jnp.float32)
    o_ref[0] = _apply_act(y, act)


def _ggemm_bn_act_kernel(a_ref, w_ref, g_ref, b_ref, o_ref, sum_ref, sq_ref,
                         *, act, inv_n):
    """Grouped GEMM + train-mode BatchNorm + activation.

    grid = (2, G, m_tiles): phase 0 accumulates per-channel sum / sum-of-squares over
    all groups and row tiles into VMEM scratch; phase 1 recomputes the tile GEMM,
    normalizes with the global batch statistics, applies the activation and writes.
    """
    phase = pl.program_id(0)
    first = jnp.logical_and(pl.program_id(1) == 0, pl.program_id(2) == 0)
    y = jnp.dot(a_ref[0], w_ref[0], preferred_element_type=jnp.float32)

    @pl.when(jnp.logical_and(phase == 0, first))
    def _():
        sum_ref[...] = jnp.zeros_like(sum_ref)
        sq_ref[...] = jnp.zeros_like(sq_ref)

    @pl.when(phase == 0)
    def _():
        sum_ref[...] += jnp.sum(y, axis=0, keepdims=True)
        sq_ref[...] += jnp.sum(y * y, axis=0, keepdims=True)
        o_ref[0] = y                        # placeholder; overwritten in phase 1

    @pl.when(phase == 1)
    def _():
        mean = sum_ref[...] * inv_n
        var = sq_ref[...] * inv_n - mean * mean
        xh = (y - mean) * jax.lax.rsqrt(var + 1e-5) * g_ref[...] + b_ref[...]
        o_ref[0] = _apply_act(xh, act)


def _linear_bias_kernel(a_ref, w_ref, b_ref, o_ref):
    o_ref[...] = (jnp.dot(a_ref[...], w_ref[...], preferred_element_type=jnp.float32)
                  + b_ref[...])


def _gru_seq_kernel(gi_ref, h0_ref, len_ref, whh_ref, bhh_ref,
                    out_ref, hfin_ref, h_state, *, hp):
    """One GRU time step per grid iteration; the input projection gi = x@Wih + bih is
    precomputed outside the loop, so only the recurrent matmul runs serially."""
    t = pl.program_id(0)

    @pl.when(t == 0)
    def _():
        h_state[...] = h0_ref[...]

    gi = gi_ref[0]                                 # (B, 3Hp) f32, precomputed
    h = h_state[...]                               # (B, Hp) f32
    gh = jnp.dot(h.astype(jnp.bfloat16), whh_ref[...],
                 preferred_element_type=jnp.float32) + bhh_ref[...]

    r = _sigmoid(gi[:, :hp] + gh[:, :hp])
    z = _sigmoid(gi[:, hp:2 * hp] + gh[:, hp:2 * hp])
    n = jnp.tanh(gi[:, 2 * hp:] + r * gh[:, 2 * hp:])
    h_new = (1.0 - z) * n + z * h

    m = (len_ref[...] > t).astype(jnp.float32)     # (B, 1) packed-sequence mask
    h_new = m * h_new + (1.0 - m) * h

    h_state[...] = h_new
    out_ref[0] = m * h_new                         # pad_packed_sequence zeros past length
    hfin_ref[...] = h_new


# ----------------------------------------------------------------------------------
# Pallas wrappers
# ----------------------------------------------------------------------------------
def pallas_grouped_gemm_bn_act(a_g, w_g, gamma, beta, use_bn, act):
    """(G,M,K)@(G,K,N) per-group GEMM with fused (optional) train-mode BN + activation.

    BN statistics are global over all groups and rows (all output pixels of the layer).
    Returns f32 (G, M, N).
    """
    g, m_true, k = a_g.shape
    n = w_g.shape[2]
    tm, m_pad = _tile_rows(m_true)
    if m_pad != m_true:
        a_g = jnp.pad(a_g, ((0, 0), (0, m_pad - m_true), (0, 0)))
    mt = m_pad // tm

    if use_bn:
        kernel = functools.partial(_ggemm_bn_act_kernel, act=act,
                                   inv_n=1.0 / (g * m_true))
        y = pl.pallas_call(
            kernel,
            out_shape=jax.ShapeDtypeStruct((g, m_pad, n), jnp.float32),
            grid=(2, g, mt),
            in_specs=[
                pl.BlockSpec((1, tm, k), lambda p, f, i: (f, i, 0)),
                pl.BlockSpec((1, k, n), lambda p, f, i: (f, 0, 0)),
                pl.BlockSpec((1, n), lambda p, f, i: (0, 0)),
                pl.BlockSpec((1, n), lambda p, f, i: (0, 0)),
            ],
            out_specs=pl.BlockSpec((1, tm, n), lambda p, f, i: (f, i, 0)),
            scratch_shapes=[pltpu.VMEM((1, n), jnp.float32),
                            pltpu.VMEM((1, n), jnp.float32)],
            compiler_params=_cparams(("arbitrary", "arbitrary", "arbitrary")),
        )(a_g, w_g, gamma, beta)
    else:
        kernel = functools.partial(_ggemm_act_kernel, act=act)
        y = pl.pallas_call(
            kernel,
            out_shape=jax.ShapeDtypeStruct((g, m_pad, n), jnp.float32),
            grid=(g, mt),
            in_specs=[
                pl.BlockSpec((1, tm, k), lambda f, i: (f, i, 0)),
                pl.BlockSpec((1, k, n), lambda f, i: (f, 0, 0)),
            ],
            out_specs=pl.BlockSpec((1, tm, n), lambda f, i: (f, i, 0)),
            compiler_params=_cparams(("parallel", "parallel")),
        )(a_g, w_g)

    return y[:, :m_true] if m_pad != m_true else y


def pallas_linear(a, w_bf16, bias):
    """a @ w + bias; lane dimension of w is pre-padded to a multiple of 128."""
    m_true, k = a.shape
    n = w_bf16.shape[1]
    tm, m_pad = _tile_rows(m_true)
    a = a.astype(jnp.bfloat16)
    if m_pad != m_true:
        a = jnp.pad(a, ((0, m_pad - m_true), (0, 0)))
    y = pl.pallas_call(
        _linear_bias_kernel,
        out_shape=jax.ShapeDtypeStruct((m_pad, n), jnp.float32),
        grid=(m_pad // tm,),
        in_specs=[
            pl.BlockSpec((tm, k), lambda i: (i, 0)),
            pl.BlockSpec((k, n), lambda i: (0, 0)),
            pl.BlockSpec((1, n), lambda i: (0, 0)),
        ],
        out_specs=pl.BlockSpec((tm, n), lambda i: (i, 0)),
        compiler_params=_cparams(("parallel",)),
    )(a, w_bf16, bias)
    return y[:m_true] if m_pad != m_true else y


def gru_input_proj(emb_bte, gp):
    """One big parallel GEMM for the GRU input projection: (B*T,E)@(E,3Hp)+bih."""
    b, t, e = emb_bte.shape
    gi = pallas_linear(emb_bte.reshape(b * t, e), gp["wih"], gp["bih"])
    return gi.reshape(b, t, 3 * gp["Hp"])


def run_gru(lengths, gp, emb=None, h0_p=None, gi=None):
    """Fused GRU over a whole sequence with packed-sequence masking.

    Returns (final hidden (B, Hp) padded, outputs (B, T, H) zeroed past `lengths`).
    """
    h, hp = gp["H"], gp["Hp"]
    if gi is None:
        gi = gru_input_proj(emb, gp)                       # (B, T, 3Hp) f32
    b, t, _ = gi.shape
    gis = jnp.transpose(gi, (1, 0, 2))                     # (T, B, 3Hp)
    if h0_p is None:
        h0_p = jnp.zeros((b, hp), jnp.float32)
    len_col = lengths.astype(jnp.int32).reshape(b, 1)

    kernel = functools.partial(_gru_seq_kernel, hp=hp)
    out_seq, h_fin = pl.pallas_call(
        kernel,
        out_shape=(jax.ShapeDtypeStruct((t, b, hp), jnp.float32),
                   jax.ShapeDtypeStruct((b, hp), jnp.float32)),
        grid=(t,),
        in_specs=[
            pl.BlockSpec((1, b, 3 * hp), lambda i: (i, 0, 0)),
            pl.BlockSpec((b, hp), lambda i: (0, 0)),
            pl.BlockSpec((b, 1), lambda i: (0, 0)),
            pl.BlockSpec((hp, 3 * hp), lambda i: (0, 0)),
            pl.BlockSpec((1, 3 * hp), lambda i: (0, 0)),
        ],
        out_specs=[
            pl.BlockSpec((1, b, hp), lambda i: (i, 0, 0)),
            pl.BlockSpec((b, hp), lambda i: (0, 0)),
        ],
        scratch_shapes=[pltpu.VMEM((b, hp), jnp.float32)],
        compiler_params=_cparams(("arbitrary",)),
    )(gis, h0_p, len_col, gp["whh"], gp["bhh"])

    outs = jnp.transpose(out_seq, (1, 0, 2))[:, :, :h]     # (B, T, H)
    return h_fin, outs


# ----------------------------------------------------------------------------------
# Conv / conv-transpose glue (im2col in XLA, grouped GEMM+BN+act in Pallas)
# ----------------------------------------------------------------------------------
def _im2col(x_nhwc, k, stride, pad):
    x = jnp.pad(x_nhwc, ((0, 0), (pad, pad), (pad, pad), (0, 0)))
    b, hp_, wp_, c = x.shape
    oh = (hp_ - k) // stride + 1
    ow = (wp_ - k) // stride + 1
    idx_h = (jnp.arange(oh) * stride)[:, None] + jnp.arange(k)[None, :]   # (oh, k)
    idx_w = (jnp.arange(ow) * stride)[:, None] + jnp.arange(k)[None, :]   # (ow, k)
    p = x[:, idx_h]              # (B, oh, k, Wp, C)
    p = p[:, :, :, idx_w]        # (B, oh, k, ow, k, C)
    p = jnp.transpose(p, (0, 1, 3, 2, 4, 5))  # (B, oh, ow, kH, kW, C)
    return p.reshape(b * oh * ow, k * k * c), oh, ow


def conv_bn_act(x_nhwc, layer, stride, pad, use_bn, act):
    k, cout = layer["k"], layer["cout"]
    patches, oh, ow = _im2col(x_nhwc.astype(jnp.bfloat16), k, stride, pad)
    y = pallas_grouped_gemm_bn_act(patches[None], layer["w"], layer.get("g"),
                                   layer.get("b"), use_bn, act)
    b = x_nhwc.shape[0]
    return y[0].reshape(b, oh, ow, cout)


def convT_1x1_bn_act(h2d, layer, use_bn, act):
    """ConvTranspose2d(k, stride=1, pad=0) on a 1x1 map == 16 independent linear maps."""
    b, cin = h2d.shape
    k, cout = layer["k"], layer["cout"]
    a = jnp.broadcast_to(h2d.astype(jnp.bfloat16)[None], (k * k, b, cin))
    y = pallas_grouped_gemm_bn_act(a, layer["w"], layer.get("g"), layer.get("b"),
                                   use_bn, act)                     # (k*k, B, Cout)
    return jnp.transpose(y, (1, 0, 2)).reshape(b, k, k, cout)


def convT_s2_bn_act(x_nhwc, layer, use_bn, act):
    """ConvTranspose2d(k=4, stride=2, pad=1) via 4-phase sub-pixel decomposition:
    out[2i+ry, 2j+rx] = stride-1 conv of x with the (ry,rx) 2x2 sub-kernel."""
    b, hh, ww, _ = x_nhwc.shape
    cout = layer["cout"]
    x = x_nhwc.astype(jnp.bfloat16)
    groups = []
    for ry in range(2):
        for rx in range(2):
            xp = jnp.pad(x, ((0, 0), (1 - ry, ry), (1 - rx, rx), (0, 0)))
            p, _, _ = _im2col(xp, 2, 1, 0)
            groups.append(p)
    a = jnp.stack(groups, axis=0)                                    # (4, B*H*W, 4*Cin)
    y = pallas_grouped_gemm_bn_act(a, layer["w"], layer.get("g"), layer.get("b"),
                                   use_bn, act)                      # (4, B*H*W, Cout)
    y = y.reshape(2, 2, b, hh, ww, cout)
    return jnp.transpose(y, (2, 3, 0, 4, 1, 5)).reshape(b, 2 * hh, 2 * ww, cout)


# ----------------------------------------------------------------------------------
# Model pieces
# ----------------------------------------------------------------------------------
def img_encoder(x_nchw, p):
    x = jnp.transpose(x_nchw, (0, 2, 3, 1)).astype(jnp.float32)   # NHWC
    x = conv_bn_act(x, p["enc"][0], 2, 1, False, "leaky")
    for i in range(1, 4):
        x = conv_bn_act(x, p["enc"][i], 2, 1, True, "leaky")
    x = conv_bn_act(x, p["enc"][4], 1, 0, True, "leaky")
    return x.reshape(x.shape[0], -1)          # final spatial is 1x1 -> (B, hidden)


def img_decoder(h2d, p):
    x = convT_1x1_bn_act(h2d, p["dec"][0], True, "relu")          # (B, 4, 4, 8D)
    for i in range(1, 4):
        x = convT_s2_bn_act(x, p["dec"][i], True, "relu")
    x = convT_s2_bn_act(x, p["dec"][4], False, "tanh")
    return jnp.transpose(x, (0, 3, 1, 2))                          # back to NCHW


def txt_decoder_pair(hid_a, hid_b, sorted_lengths, sorted_idx, gi_cap, p, t_len):
    """Both txt_decoder_forward calls batched into one recurrence (shared decoder GRU,
    no batch-coupled ops => identical semantics).  The module's 1-step GRU over the
    hidden vector is folded in as step 0 of the same sequence."""
    b, h = hid_a.shape
    v = p["V"]
    gp = p["dec_rnn"]

    hid2 = jnp.concatenate([hid_a, hid_b], axis=0)                 # (2B, H)
    gi_hid = gru_input_proj(hid2[:, None, :], gp)                  # (2B, 1, 3Hp)
    gi_cap2 = jnp.concatenate([gi_cap, gi_cap], axis=0)            # (2B, T, 3Hp)
    gi_full = jnp.concatenate([gi_hid, gi_cap2], axis=1)           # (2B, T+1, 3Hp)
    len_full = jnp.concatenate([sorted_lengths, sorted_lengths], axis=0) + 1

    _, outs_full = run_gru(len_full, gp, gi=gi_full)               # (2B, T+1, H)
    outs_st = outs_full[:, :1]                                     # decoder output on hidden
    outs = outs_full[:, 1:]                                        # outputs over captions

    reversed_idx = jnp.argsort(sorted_idx)
    ridx2 = jnp.concatenate([reversed_idx, reversed_idx + b], axis=0)
    padded = outs[ridx2]
    padded = jnp.concatenate([outs_st, padded[:, :-1]], axis=1)    # (2B, T, H)

    logp = pallas_linear(padded.reshape(-1, h), p["out_w"], p["out_b"])
    logp = logp[:, :v].reshape(2 * b, t_len, v)
    return logp[:b], logp[b:]


def coupled_vae_forward(input_images, input_captions, lengths, rng, *, params, cfg, t_len):
    b = input_images.shape[0]
    h = params["H"]
    common_z = int(cfg["mask"] * cfg["latent"])
    left_z = cfg["latent"] - common_z

    # prepare_input (sort by length, embed) -- sorting / embedding gather is XLA glue
    sorted_idx = jnp.argsort(-lengths)
    sorted_lengths = lengths[sorted_idx]
    sorted_captions = input_captions[sorted_idx]
    sorted_emb = params["embedding"][sorted_captions][:, :t_len, :]

    # image branch
    img_enc = img_encoder(input_images, params)                    # (B, hidden)
    img2img_out = img_decoder(img_enc, params)                     # (B, 3, 64, 64)

    # text encoder (stays in sorted order, as in the reference module)
    h_fin, _ = run_gru(sorted_lengths, params["enc_rnn"], emb=sorted_emb)
    txt_enc = h_fin[:, :h]

    # cross hiddens (non-variational path: cat(enc[:, :common], noise))
    k1, k2 = jax.random.split(rng)
    img_noise = jax.random.normal(k1, (b, left_z), jnp.float32)
    hidden4txt2img = jnp.concatenate([txt_enc[:, :common_z], img_noise], axis=1)
    txt2img_out = img_decoder(hidden4txt2img, params)

    txt_noise = jax.random.normal(k2, (b, left_z), jnp.float32)
    hidden4img2txt = jnp.concatenate([img_enc[:, :common_z], txt_noise], axis=1)

    # both text decoders share the caption input projection and run as one recurrence
    gi_cap_dec = gru_input_proj(sorted_emb, params["dec_rnn"])
    txt2txt_out, img2txt_out = txt_decoder_pair(txt_enc, hidden4img2txt,
                                                sorted_lengths, sorted_idx,
                                                gi_cap_dec, params, t_len)

    return img2img_out, txt2img_out, img2txt_out, txt2txt_out, img_enc, txt_enc


# ----------------------------------------------------------------------------------
# Deterministic parameter init (PyTorch layouts generated, then pre-packed once into
# the lane-padded / transposed / phase-split layouts the kernels consume)
# ----------------------------------------------------------------------------------
def init_params(key, cfg):
    v, e, h, d = cfg["vocab"], cfg["emb"], cfg["hidden"], cfg["img_dim"]
    hp = _round_up(h, _LANE)
    vp = _round_up(v, _LANE)
    keys = iter(jax.random.split(key, 64))

    def nrm(shape, s=0.05):
        return jax.random.normal(next(keys), shape, jnp.float32) * s

    p = {"embedding": nrm((v, e), 0.1), "H": h, "Hp": hp, "V": v, "Vp": vp}

    def gru_params(in_dim):
        # PyTorch GRU layout: weight_ih (3H, in), weight_hh (3H, H), gate order [r,z,n]
        wih, whh = nrm((3 * h, in_dim)), nrm((3 * h, h))
        bih, bhh = nrm((3 * h,)), nrm((3 * h,))
        wih_p = jnp.zeros((in_dim, 3 * hp), jnp.float32)
        whh_p = jnp.zeros((hp, 3 * hp), jnp.float32)
        bih_p = jnp.zeros((1, 3 * hp), jnp.float32)
        bhh_p = jnp.zeros((1, 3 * hp), jnp.float32)
        for g in range(3):
            wih_p = wih_p.at[:, g * hp:g * hp + h].set(wih[g * h:(g + 1) * h].T)
            whh_p = whh_p.at[:h, g * hp:g * hp + h].set(whh[g * h:(g + 1) * h].T)
            bih_p = bih_p.at[0, g * hp:g * hp + h].set(bih[g * h:(g + 1) * h])
            bhh_p = bhh_p.at[0, g * hp:g * hp + h].set(bhh[g * h:(g + 1) * h])
        return {"wih": wih_p.astype(jnp.bfloat16), "whh": whh_p.astype(jnp.bfloat16),
                "bih": bih_p, "bhh": bhh_p, "H": h, "Hp": hp}

    p["enc_rnn"] = gru_params(e)
    p["dec_rnn"] = gru_params(e)

    # outputs2vocab: Linear(H, V) -> stored transposed and lane-padded to 128
    out_w = nrm((v, h))
    out_b = nrm((v,), 0.01)
    p["out_w"] = jnp.zeros((h, vp), jnp.float32).at[:, :v].set(out_w.T).astype(jnp.bfloat16)
    p["out_b"] = jnp.zeros((1, vp), jnp.float32).at[0, :v].set(out_b)

    def bn_params(cout):
        return {"g": 1.0 + nrm((1, cout), 0.01), "b": nrm((1, cout), 0.01)}

    def prep_conv(w_oihw, with_bn):
        cout, cin, k, _ = w_oihw.shape
        wmat = jnp.transpose(w_oihw, (2, 3, 1, 0)).reshape(1, k * k * cin, cout)
        layer = {"w": wmat.astype(jnp.bfloat16), "k": k, "cout": cout}
        if with_bn:
            layer.update(bn_params(cout))
        return layer

    def prep_convT_1x1(w_iohw, with_bn):
        # ConvTranspose2d(k, s=1, p=0) on 1x1 input: out[:, c, i, j] = h @ W[:, c, i, j]
        cin, cout, k, _ = w_iohw.shape
        wg = jnp.transpose(w_iohw, (2, 3, 0, 1)).reshape(k * k, cin, cout)
        layer = {"w": wg.astype(jnp.bfloat16), "k": k, "cout": cout}
        if with_bn:
            layer.update(bn_params(cout))
        return layer

    def prep_convT_s2(w_iohw, with_bn):
        # stride-2 / pad-1 / k=4 transpose-conv -> 4 stride-1 2x2 sub-kernels (sub-pixel)
        cin, cout, k, _ = w_iohw.shape
        wf = jnp.flip(jnp.transpose(w_iohw, (1, 0, 2, 3)), axis=(2, 3))  # (Cout,Cin,4,4)
        mats = []
        for ry in range(2):
            for rx in range(2):
                sub = wf[:, :, ry::2, rx::2]                             # (Cout,Cin,2,2)
                mats.append(jnp.transpose(sub, (2, 3, 1, 0)).reshape(4 * cin, cout))
        layer = {"w": jnp.stack(mats, axis=0).astype(jnp.bfloat16), "k": k, "cout": cout}
        if with_bn:
            layer.update(bn_params(cout))
        return layer

    # encoder_cnn: Conv2d(3,D) Conv2d(D,2D) Conv2d(2D,4D) Conv2d(4D,8D) Conv2d(8D,H)
    echans = [3, d, 2 * d, 4 * d, 8 * d, h]
    p["enc"] = [prep_conv(nrm((echans[i + 1], echans[i], 4, 4)), with_bn=(i > 0))
                for i in range(5)]

    # decoder_cnn: ConvTranspose2d chain H -> 8D -> 4D -> 2D -> D -> 3
    dchans = [h, 8 * d, 4 * d, 2 * d, d, 3]
    dec = [prep_convT_1x1(nrm((dchans[0], dchans[1], 4, 4)), with_bn=True)]
    for i in range(1, 5):
        dec.append(prep_convT_s2(nrm((dchans[i], dchans[i + 1], 4, 4)), with_bn=(i < 4)))
    p["dec"] = dec
    return p


# ----------------------------------------------------------------------------------
if __name__ == "__main__":
    # small, consistent config: embedding == hidden == latent (required by the module)
    cfg = dict(vocab=50, emb=32, hidden=32, latent=32, img_dim=8,
               batch=2, img_size=64, seq=8, mask=0.3)

    key = jax.random.PRNGKey(0)
    kp, ki, kc, kn = jax.random.split(key, 4)
    params = init_params(kp, cfg)

    input_images = jax.random.normal(ki, (cfg["batch"], 3, 64, 64), jnp.float32)
    input_captions = jax.random.randint(kc, (cfg["batch"], cfg["seq"]), 0, cfg["vocab"])
    lengths = jnp.array([5, 8], dtype=jnp.int32)     # distinct lengths, max == seq
    T = int(lengths.max())

    fwd = jax.jit(functools.partial(coupled_vae_forward, params=params, cfg=cfg, t_len=T))
    outs = jax.block_until_ready(fwd(input_images, input_captions, lengths, kn))

    img2img, txt2img, img2txt, txt2txt, img_enc, txt_enc = outs
    assert img2img.shape == (2, 3, 64, 64)
    assert txt2img.shape == (2, 3, 64, 64)
    assert img2txt.shape == (2, T, cfg["vocab"])
    assert txt2txt.shape == (2, T, cfg["vocab"])
    assert img_enc.shape == (2, cfg["hidden"])
    assert txt_enc.shape == (2, cfg["hidden"])
    assert all(bool(jnp.all(jnp.isfinite(o))) for o in outs)
    print("KERNEL_OK")
</pallas_src>

<mosaic_0001>
module attributes {stable_mosaic.version = 11 : i64} {
  func.func @_linear_bias_kernel(%arg0: i32, %arg1: memref<16x32xbf16, #tpu.memory_space<vmem>>, %arg2: memref<32x384xbf16, #tpu.memory_space<vmem>>, %arg3: memref<1x384xf32, #tpu.memory_space<vmem>>, %arg4: memref<16x384xf32, #tpu.memory_space<vmem>>) attributes {dimension_semantics = [#tpu.dimension_semantics<parallel>], iteration_bounds = array<i64: 1>, scalar_prefetch = 0 : i64, scratch_operands = 0 : i64, tpu.core_type = #tpu.core_type<tc>, window_params = [{transform_indices = @transform_0, window_bounds = array<i64: 16, 32>}, {pipeline_mode = #tpu.pipeline_mode<synchronous>, transform_indices = @transform_1, window_bounds = array<i64: 32, 384>}, {pipeline_mode = #tpu.pipeline_mode<synchronous>, transform_indices = @transform_2, window_bounds = array<i64: 1, 384>}, {transform_indices = @transform_3, window_bounds = array<i64: 16, 384>}]} {
    %c0 = arith.constant 0 : index
    %c0_0 = arith.constant 0 : index
    %0 = vector.load %arg1[%c0, %c0_0] : memref<16x32xbf16, #tpu.memory_space<vmem>>, vector<16x32xbf16>
    %c0_1 = arith.constant 0 : index
    %c0_2 = arith.constant 0 : index
    %1 = vector.load %arg2[%c0_1, %c0_2] : memref<32x384xbf16, #tpu.memory_space<vmem>>, vector<32x384xbf16>
    %cst = arith.constant dense<0.000000e+00> : vector<16x384xf32>
    %2 = tpu.matmul %0, %1, %cst {dimension_numbers = #tpu.dot_dimension_numbers<[1], [0], [0], [1], [0, 0, 1, 1], [], []>} : vector<16x32xbf16>, vector<32x384xbf16>, vector<16x384xf32> -> vector<16x384xf32>
    %c0_3 = arith.constant 0 : index
    %c0_4 = arith.constant 0 : index
    %3 = vector.load %arg3[%c0_3, %c0_4] : memref<1x384xf32, #tpu.memory_space<vmem>>, vector<1x384xf32>
    %4 = vector.broadcast %3 : vector<1x384xf32> to vector<16x384xf32>
    %5 = arith.addf %2, %4 : vector<16x384xf32>
    %c0_5 = arith.constant 0 : index
    %c0_6 = arith.constant 0 : index
    %6 = vector.load %arg4[%c0_5, %c0_6] : memref<16x384xf32, #tpu.memory_space<vmem>>, vector<16x384xf32>
    tpu.vector_store %arg4[%c0_5, %c0_6], %5 {strides = array<i32>} : memref<16x384xf32, #tpu.memory_space<vmem>>, vector<16x384xf32>,
    return
  }
  func.func @transform_0(%arg0: i32) -> (i32, i32) {
    %c0_i32 = arith.constant 0 : i32
    %c0_i32_0 = arith.constant 0 : i32
    return %arg0, %c0_i32 : i32, i32
  }
  func.func @transform_1(%arg0: i32) -> (i32, i32) {
    %c0_i32 = arith.constant 0 : i32
    %c0_i32_0 = arith.constant 0 : i32
    %c0_i32_1 = arith.constant 0 : i32
    return %c0_i32, %c0_i32_0 : i32, i32
  }
  func.func @transform_2(%arg0: i32) -> (i32, i32) {
    %c0_i32 = arith.constant 0 : i32
    %c0_i32_0 = arith.constant 0 : i32
    %c0_i32_1 = arith.constant 0 : i32
    return %c0_i32, %c0_i32_0 : i32, i32
  }
  func.func @transform_3(%arg0: i32) -> (i32, i32) {
    %c0_i32 = arith.constant 0 : i32
    %c0_i32_0 = arith.constant 0 : i32
    return %arg0, %c0_i32 : i32, i32
  }
}

module attributes {stable_mosaic.version = 11 : i64} {
  func.func @_gru_seq_kernel(%arg0: i32, %arg1: memref<1x2x384xf32, #tpu.memory_space<vmem>>, %arg2: memref<2x128xf32, #tpu.memory_space<vmem>>, %arg3: memref<2x1xi32, #tpu.memory_space<vmem>>, %arg4: memref<128x384xbf16, #tpu.memory_space<vmem>>, %arg5: memref<1x384xf32, #tpu.memory_space<vmem>>, %arg6: memref<1x2x128xf32, #tpu.memory_space<vmem>>, %arg7: memref<2x128xf32, #tpu.memory_space<vmem>>, %arg8: memref<2x128xf32, #tpu.memory_space<vmem>>) attributes {dimension_semantics = [#tpu.dimension_semantics<arbitrary>], iteration_bounds = array<i64: 8>, scalar_prefetch = 0 : i64, scratch_operands = 1 : i64, tpu.core_type = #tpu.core_type<tc>, window_params = [{transform_indices = @transform_0, window_bounds = array<i64: 1, 2, 384>}, {pipeline_mode = #tpu.pipeline_mode<synchronous>, transform_indices = @transform_1, window_bounds = array<i64: 2, 128>}, {pipeline_mode = #tpu.pipeline_mode<synchronous>, transform_indices = @transform_2, window_bounds = array<i64: 2, 1>}, {pipeline_mode = #tpu.pipeline_mode<synchronous>, transform_indices = @transform_3, window_bounds = array<i64: 128, 384>}, {pipeline_mode = #tpu.pipeline_mode<synchronous>, transform_indices = @transform_4, window_bounds = array<i64: 1, 384>}, {transform_indices = @transform_5, window_bounds = array<i64: 1, 2, 128>}, {pipeline_mode = #tpu.pipeline_mode<synchronous>, transform_indices = @transform_6, window_bounds = array<i64: 2, 128>}]} {
    %c0_i32 = arith.constant 0 : i32
    %0 = arith.cmpi eq, %arg0, %c0_i32 : i32
    %1 = arith.extui %0 : i1 to i32
    %c0_i32_0 = arith.constant 0 : i32
    %2 = arith.cmpi ne, %1, %c0_i32_0 : i32
    scf.if %2 {
      %c0_24 = arith.constant 0 : index
      %c0_25 = arith.constant 0 : index
      %59 = vector.load %arg2[%c0_24, %c0_25] : memref<2x128xf32, #tpu.memory_space<vmem>>, vector<2x128xf32>
      %c0_26 = arith.constant 0 : index
      %c0_27 = arith.constant 0 : index
      %60 = vector.load %arg8[%c0_26, %c0_27] : memref<2x128xf32, #tpu.memory_space<vmem>>, vector<2x128xf32>
      tpu.vector_store %arg8[%c0_26, %c0_27], %59 {strides = array<i32>} : memref<2x128xf32, #tpu.memory_space<vmem>>, vector<2x128xf32>,
    } else {
    }
    %c0 = arith.constant 0 : index
    %c0_1 = arith.constant 0 : index
    %c0_2 = arith.constant 0 : index
    %3 = vector.load %arg1[%c0, %c0_1, %c0_2] : memref<1x2x384xf32, #tpu.memory_space<vmem>>, vector<1x2x384xf32>
    %4 = vector.shape_cast %3 : vector<1x2x384xf32> to vector<2x384xf32>
    %c0_3 = arith.constant 0 : index
    %c0_4 = arith.constant 0 : index
    %5 = vector.load %arg8[%c0_3, %c0_4] : memref<2x128xf32, #tpu.memory_space<vmem>>, vector<2x128xf32>
    %6 = arith.truncf %5 : vector<2x128xf32> to vector<2x128xbf16>
    %c0_5 = arith.constant 0 : index
    %c0_6 = arith.constant 0 : index
    %7 = vector.load %arg4[%c0_5, %c0_6] : memref<128x384xbf16, #tpu.memory_space<vmem>>, vector<128x384xbf16>
    %cst = arith.constant dense<0.000000e+00> : vector<2x384xf32>
    %8 = tpu.matmul %6, %7, %cst {dimension_numbers = #tpu.dot_dimension_numbers<[1], [0], [0], [1], [0, 0, 1, 1], [], []>} : vector<2x128xbf16>, vector<128x384xbf16>, vector<2x384xf32> -> vector<2x384xf32>
    %c0_7 = arith.constant 0 : index
    %c0_8 = arith.constant 0 : index
    %9 = vector.load %arg5[%c0_7, %c0_8] : memref<1x384xf32, #tpu.memory_space<vmem>>, vector<1x384xf32>
    %10 = vector.broadcast %9 : vector<1x384xf32> to vector<2x384xf32>
    %11 = arith.addf %8, %10 : vector<2x384xf32>
    %12 = vector.extract_strided_slice %4 {offsets = [0, 0], sizes = [2, 128], strides = [1, 1]} : vector<2x384xf32> to vector<2x128xf32>
    %13 = vector.extract_strided_slice %11 {offsets = [0, 0], sizes = [2, 128], strides = [1, 1]} : vector<2x384xf32> to vector<2x128xf32>
    %14 = arith.addf %12, %13 : vector<2x128xf32>
    %cst_9 = arith.constant 0.000000e+00 : f32
    %15 = vector.broadcast %cst_9 : f32 to vector<2x128xf32>
    %16 = arith.subf %15, %14 : vector<2x128xf32>
    %17 = math.exp %16 : vector<2x128xf32>
    %cst_10 = arith.constant 1.000000e+00 : f32
    %18 = vector.broadcast %cst_10 : f32 to vector<2x128xf32>
    %19 = arith.addf %18, %17 : vector<2x128xf32>
    %20 = tpu.reciprocal %19 {approx = true} : vector<2x128xf32> -> vector<2x128xf32>
    %21 = vector.extract_strided_slice %4 {offsets = [0, 128], sizes = [2, 128], strides = [1, 1]} : vector<2x384xf32> to vector<2x128xf32>
    %22 = vector.extract_strided_slice %11 {offsets = [0, 128], sizes = [2, 128], strides = [1, 1]} : vector<2x384xf32> to vector<2x128xf32>
    %23 = arith.addf %21, %22 : vector<2x128xf32>
    %cst_11 = arith.constant 0.000000e+00 : f32
    %24 = vector.broadcast %cst_11 : f32 to vector<2x128xf32>
    %25 = arith.subf %24, %23 : vector<2x128xf32>
    %26 = math.exp %25 : vector<2x128xf32>
    %cst_12 = arith.constant 1.000000e+00 : f32
    %27 = vector.broadcast %cst_12 : f32 to vector<2x128xf32>
    %28 = arith.addf %27, %26 : vector<2x128xf32>
    %29 = tpu.reciprocal %28 {approx = true} : vector<2x128xf32> -> vector<2x128xf32>
    %30 = vector.extract_strided_slice %4 {offsets = [0, 256], sizes = [2, 128], strides = [1, 1]} : vector<2x384xf32> to vector<2x128xf32>
    %31 = vector.extract_strided_slice %11 {offsets = [0, 256], sizes = [2, 128], strides = [1, 1]} : vector<2x384xf32> to vector<2x128xf32>
    %32 = arith.mulf %20, %31 : vector<2x128xf32>
    %33 = arith.addf %30, %32 : vector<2x128xf32>
    %34 = math.tanh %33 : vector<2x128xf32>
    %cst_13 = arith.constant 1.000000e+00 : f32
    %35 = vector.broadcast %cst_13 : f32 to vector<2x128xf32>
    %36 = arith.subf %35, %29 : vector<2x128xf32>
    %37 = arith.mulf %36, %34 : vector<2x128xf32>
    %38 = arith.mulf %29, %5 : vector<2x128xf32>
    %39 = arith.addf %37, %38 : vector<2x128xf32>
    %c0_14 = arith.constant 0 : index
    %c0_15 = arith.constant 0 : index
    %40 = vector.load %arg3[%c0_14, %c0_15] : memref<2x1xi32, #tpu.memory_space<vmem>>, vector<2x1xi32>
    %41 = vector.broadcast %arg0 : i32 to vector<2x1xi32>
    %42 = arith.cmpi sgt, %40, %41 : vector<2x1xi32>
    %43 = arith.extui %42 : vector<2x1xi1> to vector<2x1xi32>
    %44 = arith.sitofp %43 : vector<2x1xi32> to vector<2x1xf32>
    %45 = vector.broadcast %44 : vector<2x1xf32> to vector<2x128xf32>
    %46 = arith.mulf %45, %39 : vector<2x128xf32>
    %cst_16 = arith.constant 1.000000e+00 : f32
    %47 = vector.broadcast %cst_16 : f32 to vector<2x1xf32>
    %48 = arith.subf %47, %44 : vector<2x1xf32>
    %49 = vector.broadcast %48 : vector<2x1xf32> to vector<2x128xf32>
    %50 = arith.mulf %49, %5 : vector<2x128xf32>
    %51 = arith.addf %46, %50 : vector<2x128xf32>
    %c0_17 = arith.constant 0 : index
    %c0_18 = arith.constant 0 : index
    %52 = vector.load %arg8[%c0_17, %c0_18] : memref<2x128xf32, #tpu.memory_space<vmem>>, vector<2x128xf32>
    tpu.vector_store %arg8[%c0_17, %c0_18], %51 {strides = array<i32>} : memref<2x128xf32, #tpu.memory_space<vmem>>, vector<2x128xf32>,
    %53 = vector.broadcast %44 : vector<2x1xf32> to vector<2x128xf32>
    %54 = arith.mulf %53, %51 : vector<2x128xf32>
    %c0_19 = arith.constant 0 : index
    %c0_20 = arith.constant 0 : index
    %c0_21 = arith.constant 0 : index
    %55 = vector.load %arg6[%c0_19, %c0_20, %c0_21] : memref<1x2x128xf32, #tpu.memory_space<vmem>>, vector<1x2x128xf32>
    %56 = vector.shape_cast %55 : vector<1x2x128xf32> to vector<2x128xf32>
    %57 = vector.shape_cast %54 : vector<2x128xf32> to vector<1x2x128xf32>
    tpu.vector_store %arg6[%c0_19, %c0_20, %c0_21], %57 {strides = array<i32>} : memref<1x2x128xf32, #tpu.memory_space<vmem>>, vector<1x2x128xf32>,
    %c0_22 = arith.constant 0 : index
    %c0_23 = arith.constant 0 : index
    %58 = vector.load %arg7[%c0_22, %c0_23] : memref<2x128xf32, #tpu.memory_space<vmem>>, vector<2x128xf32>
    tpu.vector_store %arg7[%c0_22, %c0_23], %51 {strides = array<i32>} : memref<2x128xf32, #tpu.memory_space<vmem>>, vector<2x128xf32>,
    return
  }
  func.func @transform_0(%arg0: i32) -> (i32, i32, i32) {
    %c0_i32 = arith.constant 0 : i32
    %c0_i32_0 = arith.constant 0 : i32
    %c0_i32_1 = arith.constant 0 : i32
    return %arg0, %c0_i32, %c0_i32_0 : i32, i32, i32
  }
  func.func @transform_1(%arg0: i32) -> (i32, i32) {
    %c0_i32 = arith.constant 0 : i32
    %c0_i32_0 = arith.constant 0 : i32
    %c0_i32_1 = arith.constant 0 : i32
    return %c0_i32, %c0_i32_0 : i32, i32
  }
  func.func @transform_2(%arg0: i32) -> (i32, i32) {
    %c0_i32 = arith.constant 0 : i32
    %c0_i32_0 = arith.constant 0 : i32
    %c0_i32_1 = arith.constant 0 : i32
    return %c0_i32, %c0_i32_0 : i32, i32
  }
  func.func @transform_3(%arg0: i32) -> (i32, i32) {
    %c0_i32 = arith.constant 0 : i32
    %c0_i32_0 = arith.constant 0 : i32
    %c0_i32_1 = arith.constant 0 : i32
    return %c0_i32, %c0_i32_0 : i32, i32
  }
  func.func @transform_4(%arg0: i32) -> (i32, i32) {
    %c0_i32 = arith.constant 0 : i32
    %c0_i32_0 = arith.constant 0 : i32
    %c0_i32_1 = arith.constant 0 : i32
    return %c0_i32, %c0_i32_0 : i32, i32
  }
  func.func @transform_5(%arg0: i32) -> (i32, i32, i32) {
    %c0_i32 = arith.constant 0 : i32
    %c0_i32_0 = arith.constant 0 : i32
    %c0_i32_1 = arith.constant 0 : i32
    return %arg0, %c0_i32, %c0_i32_0 : i32, i32, i32
  }
  func.func @transform_6(%arg0: i32) -> (i32, i32) {
    %c0_i32 = arith.constant 0 : i32
    %c0_i32_0 = arith.constant 0 : i32
    %c0_i32_1 = arith.constant 0 : i32
    return %c0_i32, %c0_i32_0 : i32, i32
  }
}

module attributes {stable_mosaic.version = 11 : i64} {
  func.func @_ggemm_bn_act_kernel(%arg0: i32, %arg1: i32, %arg2: i32, %arg3: memref<1x2x32xbf16, #tpu.memory_space<vmem>>, %arg4: memref<1x32x64xbf16, #tpu.memory_space<vmem>>, %arg5: memref<1x64xf32, #tpu.memory_space<vmem>>, %arg6: memref<1x64xf32, #tpu.memory_space<vmem>>, %arg7: memref<1x2x64xf32, #tpu.memory_space<vmem>>, %arg8: memref<1x64xf32, #tpu.memory_space<vmem>>, %arg9: memref<1x64xf32, #tpu.memory_space<vmem>>) attributes {dimension_semantics = [#tpu.dimension_semantics<arbitrary>, #tpu.dimension_semantics<arbitrary>, #tpu.dimension_semantics<arbitrary>], iteration_bounds = array<i64: 2, 16, 1>, scalar_prefetch = 0 : i64, scratch_operands = 2 : i64, tpu.core_type = #tpu.core_type<tc>, window_params = [{transform_indices = @transform_0, window_bounds = array<i64: 1, 2, 32>}, {transform_indices = @transform_1, window_bounds = array<i64: 1, 32, 64>}, {pipeline_mode = #tpu.pipeline_mode<synchronous>, transform_indices = @transform_2, window_bounds = array<i64: 1, 64>}, {pipeline_mode = #tpu.pipeline_mode<synchronous>, transform_indices = @transform_3, window_bounds = array<i64: 1, 64>}, {transform_indices = @transform_4, window_bounds = array<i64: 1, 2, 64>}]} {
    %c0_i32 = arith.constant 0 : i32
    %0 = arith.cmpi eq, %arg1, %c0_i32 : i32
    %c0_i32_0 = arith.constant 0 : i32
    %1 = arith.cmpi eq, %arg2, %c0_i32_0 : i32
    %2 = arith.andi %0, %1 : i1
    %c0 = arith.constant 0 : index
    %c0_1 = arith.constant 0 : index
    %c0_2 = arith.constant 0 : index
    %3 = vector.load %arg3[%c0, %c0_1, %c0_2] : memref<1x2x32xbf16, #tpu.memory_space<vmem>>, vector<1x2x32xbf16>
    %4 = vector.shape_cast %3 : vector<1x2x32xbf16> to vector<2x32xbf16>
    %c0_3 = arith.constant 0 : index
    %c0_4 = arith.constant 0 : index
    %c0_5 = arith.constant 0 : index
    %5 = vector.load %arg4[%c0_3, %c0_4, %c0_5] : memref<1x32x64xbf16, #tpu.memory_space<vmem>>, vector<1x32x64xbf16>
    %6 = vector.shape_cast %5 : vector<1x32x64xbf16> to vector<32x64xbf16>
    %cst = arith.constant dense<0.000000e+00> : vector<2x64xf32>
    %7 = tpu.matmul %4, %6, %cst {dimension_numbers = #tpu.dot_dimension_numbers<[1], [0], [0], [1], [0, 0, 1, 1], [], []>} : vector<2x32xbf16>, vector<32x64xbf16>, vector<2x64xf32> -> vector<2x64xf32>
    %c0_i32_6 = arith.constant 0 : i32
    %8 = arith.cmpi eq, %arg0, %c0_i32_6 : i32
    %9 = arith.andi %8, %2 : i1
    %10 = arith.extui %9 : i1 to i32
    %c0_i32_7 = arith.constant 0 : i32
    %11 = arith.cmpi ne, %10, %c0_i32_7 : i32
    scf.if %11 {
      %cst_11 = arith.constant 0.000000e+00 : f32
      %18 = vector.broadcast %cst_11 : f32 to vector<1x64xf32>
      %c0_12 = arith.constant 0 : index
      %c0_13 = arith.constant 0 : index
      %19 = vector.load %arg8[%c0_12, %c0_13] : memref<1x64xf32, #tpu.memory_space<vmem>>, vector<1x64xf32>
      tpu.vector_store %arg8[%c0_12, %c0_13], %18 {strides = array<i32>} : memref<1x64xf32, #tpu.memory_space<vmem>>, vector<1x64xf32>,
      %cst_14 = arith.constant 0.000000e+00 : f32
      %20 = vector.broadcast %cst_14 : f32 to vector<1x64xf32>
      %c0_15 = arith.constant 0 : index
      %c0_16 = arith.constant 0 : index
      %21 = vector.load %arg9[%c0_15, %c0_16] : memref<1x64xf32, #tpu.memory_space<vmem>>, vector<1x64xf32>
      tpu.vector_store %arg9[%c0_15, %c0_16], %20 {strides = array<i32>} : memref<1x64xf32, #tpu.memory_space<vmem>>, vector<1x64xf32>,
    } else {
    }
    %c0_i32_8 = arith.constant 0 : i32
    %12 = arith.cmpi eq, %arg0, %c0_i32_8 : i32
    %13 = arith.extui %12 : i1 to i32
    %c0_i32_9 = arith.constant 0 : i32
    %14 = arith.cmpi ne, %13, %c0_i32_9 : i32
    scf.if %14 {
      %c0_11 = arith.constant 0 : index
      %c0_12 = arith.constant 0 : index
      %18 = vector.load %arg8[%c0_11, %c0_12] : memref<1x64xf32, #tpu.memory_space<vmem>>, vector<1x64xf32>
      %cst_13 = arith.constant dense<0.000000e+00> : vector<64xf32>
      %19 = vector.multi_reduction <add>, %7, %cst_13 [0] : vector<2x64xf32> to vector<64xf32>
      %20 = vector.shape_cast %19 : vector<64xf32> to vector<1x64xf32>
      %21 = arith.addf %18, %20 : vector<1x64xf32>
      %c0_14 = arith.constant 0 : index
      %c0_15 = arith.constant 0 : index
      %22 = vector.load %arg8[%c0_14, %c0_15] : memref<1x64xf32, #tpu.memory_space<vmem>>, vector<1x64xf32>
      tpu.vector_store %arg8[%c0_14, %c0_15], %21 {strides = array<i32>} : memref<1x64xf32, #tpu.memory_space<vmem>>, vector<1x64xf32>,
      %c0_16 = arith.constant 0 : index
      %c0_17 = arith.constant 0 : index
      %23 = vector.load %arg9[%c0_16, %c0_17] : memref<1x64xf32, #tpu.memory_space<vmem>>, vector<1x64xf32>
      %24 = arith.mulf %7, %7 : vector<2x64xf32>
      %cst_18 = arith.constant dense<0.000000e+00> : vector<64xf32>
      %25 = vector.multi_reduction <add>, %24, %cst_18 [0] : vector<2x64xf32> to vector<64xf32>
      %26 = vector.shape_cast %25 : vector<64xf32> to vector<1x64xf32>
      %27 = arith.addf %23, %26 : vector<1x64xf32>
      %c0_19 = arith.constant 0 : index
      %c0_20 = arith.constant 0 : index
      %28 = vector.load %arg9[%c0_19, %c0_20] : memref<1x64xf32, #tpu.memory_space<vmem>>, vector<1x64xf32>
      tpu.vector_store %arg9[%c0_19, %c0_20], %27 {strides = array<i32>} : memref<1x64xf32, #tpu.memory_space<vmem>>, vector<1x64xf32>,
      %c0_21 = arith.constant 0 : index
      %c0_22 = arith.constant 0 : index
      %c0_23 = arith.constant 0 : index
      %29 = vector.load %arg7[%c0_21, %c0_22, %c0_23] : memref<1x2x64xf32, #tpu.memory_space<vmem>>, vector<1x2x64xf32>
      %30 = vector.shape_cast %29 : vector<1x2x64xf32> to vector<2x64xf32>
      %31 = vector.shape_cast %7 : vector<2x64xf32> to vector<1x2x64xf32>
      tpu.vector_store %arg7[%c0_21, %c0_22, %c0_23], %31 {strides = array<i32>} : memref<1x2x64xf32, #tpu.memory_space<vmem>>, vector<1x2x64xf32>,
    } else {
    }
    %c1_i32 = arith.constant 1 : i32
    %15 = arith.cmpi eq, %arg0, %c1_i32 : i32
    %16 = arith.extui %15 : i1 to i32
    %c0_i32_10 = arith.constant 0 : i32
    %17 = arith.cmpi ne, %16, %c0_i32_10 : i32
    scf.if %17 {
      %c0_11 = arith.constant 0 : index
      %c0_12 = arith.constant 0 : index
      %18 = vector.load %arg8[%c0_11, %c0_12] : memref<1x64xf32, #tpu.memory_space<vmem>>, vector<1x64xf32>
      %cst_13 = arith.constant 3.125000e-02 : f32
      %19 = vector.broadcast %cst_13 : f32 to vector<1x64xf32>
      %20 = arith.mulf %18, %19 : vector<1x64xf32>
      %c0_14 = arith.constant 0 : index
      %c0_15 = arith.constant 0 : index
      %21 = vector.load %arg9[%c0_14, %c0_15] : memref<1x64xf32, #tpu.memory_space<vmem>>, vector<1x64xf32>
      %cst_16 = arith.constant 3.125000e-02 : f32
      %22 = vector.broadcast %cst_16 : f32 to vector<1x64xf32>
      %23 = arith.mulf %21, %22 : vector<1x64xf32>
      %24 = arith.mulf %20, %20 : vector<1x64xf32>
      %25 = arith.subf %23, %24 : vector<1x64xf32>
      %26 = vector.broadcast %20 : vector<1x64xf32> to vector<2x64xf32>
      %27 = arith.subf %7, %26 : vector<2x64xf32>
      %cst_17 = arith.constant 9.99999974E-6 : f32
      %28 = vector.broadcast %cst_17 : f32 to vector<1x64xf32>
      %29 = arith.addf %25, %28 : vector<1x64xf32>
      %30 = math.rsqrt %29 : vector<1x64xf32>
      %31 = vector.broadcast %30 : vector<1x64xf32> to vector<2x64xf32>
      %32 = arith.mulf %27, %31 : vector<2x64xf32>
      %c0_18 = arith.constant 0 : index
      %c0_19 = arith.constant 0 : index
      %33 = vector.load %arg5[%c0_18, %c0_19] : memref<1x64xf32, #tpu.memory_space<vmem>>, vector<1x64xf32>
      %34 = vector.broadcast %33 : vector<1x64xf32> to vector<2x64xf32>
      %35 = arith.mulf %32, %34 : vector<2x64xf32>
      %c0_20 = arith.constant 0 : index
      %c0_21 = arith.constant 0 : index
      %36 = vector.load %arg6[%c0_20, %c0_21] : memref<1x64xf32, #tpu.memory_space<vmem>>, vector<1x64xf32>
      %37 = vector.broadcast %36 : vector<1x64xf32> to vector<2x64xf32>
      %38 = arith.addf %35, %37 : vector<2x64xf32>
      %cst_22 = arith.constant 0.000000e+00 : f32
      %39 = vector.broadcast %cst_22 : f32 to vector<2x64xf32>
      %40 = arith.maximumf %38, %39 : vector<2x64xf32>
      %c0_23 = arith.constant 0 : index
      %c0_24 = arith.constant 0 : index
      %c0_25 = arith.constant 0 : index
      %41 = vector.load %arg7[%c0_23, %c0_24, %c0_25] : memref<1x2x64xf32, #tpu.memory_space<vmem>>, vector<1x2x64xf32>
      %42 = vector.shape_cast %41 : vector<1x2x64xf32> to vector<2x64xf32>
      %43 = vector.shape_cast %40 : vector<2x64xf32> to vector<1x2x64xf32>
      tpu.vector_store %arg7[%c0_23, %c0_24, %c0_25], %43 {strides = array<i32>} : memref<1x2x64xf32, #tpu.memory_space<vmem>>, vector<1x2x64xf32>,
    } else {
    }
    return
  }
  func.func @transform_0(%arg0: i32, %arg1: i32, %arg2: i32) -> (i32, i32, i32) {
    %c0_i32 = arith.constant 0 : i32
    %c0_i32_0 = arith.constant 0 : i32
    return %arg1, %arg2, %c0_i32 : i32, i32, i32
  }
  func.func @transform_1(%arg0: i32, %arg1: i32, %arg2: i32) -> (i32, i32, i32) {
    %c0_i32 = arith.constant 0 : i32
    %c0_i32_0 = arith.constant 0 : i32
    %c0_i32_1 = arith.constant 0 : i32
    return %arg1, %c0_i32, %c0_i32_0 : i32, i32, i32
  }
  func.func @transform_2(%arg0: i32, %arg1: i32, %arg2: i32) -> (i32, i32) {
    %c0_i32 = arith.constant 0 : i32
    %c0_i32_0 = arith.constant 0 : i32
    %c0_i32_1 = arith.constant 0 : i32
    return %c0_i32, %c0_i32_0 : i32, i32
  }
  func.func @transform_3(%arg0: i32, %arg1: i32, %arg2: i32) -> (i32, i32) {
    %c0_i32 = arith.constant 0 : i32
    %c0_i32_0 = arith.constant 0 : i32
    %c0_i32_1 = arith.constant 0 : i32
    return %c0_i32, %c0_i32_0 : i32, i32
  }
  func.func @transform_4(%arg0: i32, %arg1: i32, %arg2: i32) -> (i32, i32, i32) {
    %c0_i32 = arith.constant 0 : i32
    %c0_i32_0 = arith.constant 0 : i32
    return %arg1, %arg2, %c0_i32 : i32, i32, i32
  }
}

module attributes {stable_mosaic.version = 11 : i64} {
  func.func @_ggemm_bn_act_kernel(%arg0: i32, %arg1: i32, %arg2: i32, %arg3: memref<1x32x256xbf16, #tpu.memory_space<vmem>>, %arg4: memref<1x256x32xbf16, #tpu.memory_space<vmem>>, %arg5: memref<1x32xf32, #tpu.memory_space<vmem>>, %arg6: memref<1x32xf32, #tpu.memory_space<vmem>>, %arg7: memref<1x32x32xf32, #tpu.memory_space<vmem>>, %arg8: memref<1x32xf32, #tpu.memory_space<vmem>>, %arg9: memref<1x32xf32, #tpu.memory_space<vmem>>) attributes {dimension_semantics = [#tpu.dimension_semantics<arbitrary>, #tpu.dimension_semantics<arbitrary>, #tpu.dimension_semantics<arbitrary>], iteration_bounds = array<i64: 2, 4, 1>, scalar_prefetch = 0 : i64, scratch_operands = 2 : i64, tpu.core_type = #tpu.core_type<tc>, window_params = [{transform_indices = @transform_0, window_bounds = array<i64: 1, 32, 256>}, {transform_indices = @transform_1, window_bounds = array<i64: 1, 256, 32>}, {pipeline_mode = #tpu.pipeline_mode<synchronous>, transform_indices = @transform_2, window_bounds = array<i64: 1, 32>}, {pipeline_mode = #tpu.pipeline_mode<synchronous>, transform_indices = @transform_3, window_bounds = array<i64: 1, 32>}, {transform_indices = @transform_4, window_bounds = array<i64: 1, 32, 32>}]} {
    %c0_i32 = arith.constant 0 : i32
    %0 = arith.cmpi eq, %arg1, %c0_i32 : i32
    %c0_i32_0 = arith.constant 0 : i32
    %1 = arith.cmpi eq, %arg2, %c0_i32_0 : i32
    %2 = arith.andi %0, %1 : i1
    %c0 = arith.constant 0 : index
    %c0_1 = arith.constant 0 : index
    %c0_2 = arith.constant 0 : index
    %3 = vector.load %arg3[%c0, %c0_1, %c0_2] : memref<1x32x256xbf16, #tpu.memory_space<vmem>>, vector<1x32x256xbf16>
    %4 = vector.shape_cast %3 : vector<1x32x256xbf16> to vector<32x256xbf16>
    %c0_3 = arith.constant 0 : index
    %c0_4 = arith.constant 0 : index
    %c0_5 = arith.constant 0 : index
    %5 = vector.load %arg4[%c0_3, %c0_4, %c0_5] : memref<1x256x32xbf16, #tpu.memory_space<vmem>>, vector<1x256x32xbf16>
    %6 = vector.shape_cast %5 : vector<1x256x32xbf16> to vector<256x32xbf16>
    %cst = arith.constant dense<0.000000e+00> : vector<32x32xf32>
    %7 = tpu.matmul %4, %6, %cst {dimension_numbers = #tpu.dot_dimension_numbers<[1], [0], [0], [1], [0, 0, 1, 1], [], []>} : vector<32x256xbf16>, vector<256x32xbf16>, vector<32x32xf32> -> vector<32x32xf32>
    %c0_i32_6 = arith.constant 0 : i32
    %8 = arith.cmpi eq, %arg0, %c0_i32_6 : i32
    %9 = arith.andi %8, %2 : i1
    %10 = arith.extui %9 : i1 to i32
    %c0_i32_7 = arith.constant 0 : i32
    %11 = arith.cmpi ne, %10, %c0_i32_7 : i32
    scf.if %11 {
      %cst_11 = arith.constant 0.000000e+00 : f32
      %18 = vector.broadcast %cst_11 : f32 to vector<1x32xf32>
      %c0_12 = arith.constant 0 : index
      %c0_13 = arith.constant 0 : index
      %19 = vector.load %arg8[%c0_12, %c0_13] : memref<1x32xf32, #tpu.memory_space<vmem>>, vector<1x32xf32>
      tpu.vector_store %arg8[%c0_12, %c0_13], %18 {strides = array<i32>} : memref<1x32xf32, #tpu.memory_space<vmem>>, vector<1x32xf32>,
      %cst_14 = arith.constant 0.000000e+00 : f32
      %20 = vector.broadcast %cst_14 : f32 to vector<1x32xf32>
      %c0_15 = arith.constant 0 : index
      %c0_16 = arith.constant 0 : index
      %21 = vector.load %arg9[%c0_15, %c0_16] : memref<1x32xf32, #tpu.memory_space<vmem>>, vector<1x32xf32>
      tpu.vector_store %arg9[%c0_15, %c0_16], %20 {strides = array<i32>} : memref<1x32xf32, #tpu.memory_space<vmem>>, vector<1x32xf32>,
    } else {
    }
    %c0_i32_8 = arith.constant 0 : i32
    %12 = arith.cmpi eq, %arg0, %c0_i32_8 : i32
    %13 = arith.extui %12 : i1 to i32
    %c0_i32_9 = arith.constant 0 : i32
    %14 = arith.cmpi ne, %13, %c0_i32_9 : i32
    scf.if %14 {
      %c0_11 = arith.constant 0 : index
      %c0_12 = arith.constant 0 : index
      %18 = vector.load %arg8[%c0_11, %c0_12] : memref<1x32xf32, #tpu.memory_space<vmem>>, vector<1x32xf32>
      %cst_13 = arith.constant dense<0.000000e+00> : vector<32xf32>
      %19 = vector.multi_reduction <add>, %7, %cst_13 [0] : vector<32x32xf32> to vector<32xf32>
      %20 = vector.shape_cast %19 : vector<32xf32> to vector<1x32xf32>
      %21 = arith.addf %18, %20 : vector<1x32xf32>
      %c0_14 = arith.constant 0 : index
      %c0_15 = arith.constant 0 : index
      %22 = vector.load %arg8[%c0_14, %c0_15] : memref<1x32xf32, #tpu.memory_space<vmem>>, vector<1x32xf32>
      tpu.vector_store %arg8[%c0_14, %c0_15], %21 {strides = array<i32>} : memref<1x32xf32, #tpu.memory_space<vmem>>, vector<1x32xf32>,
      %c0_16 = arith.constant 0 : index
      %c0_17 = arith.constant 0 : index
      %23 = vector.load %arg9[%c0_16, %c0_17] : memref<1x32xf32, #tpu.memory_space<vmem>>, vector<1x32xf32>
      %24 = arith.mulf %7, %7 : vector<32x32xf32>
      %cst_18 = arith.constant dense<0.000000e+00> : vector<32xf32>
      %25 = vector.multi_reduction <add>, %24, %cst_18 [0] : vector<32x32xf32> to vector<32xf32>
      %26 = vector.shape_cast %25 : vector<32xf32> to vector<1x32xf32>
      %27 = arith.addf %23, %26 : vector<1x32xf32>
      %c0_19 = arith.constant 0 : index
      %c0_20 = arith.constant 0 : index
      %28 = vector.load %arg9[%c0_19, %c0_20] : memref<1x32xf32, #tpu.memory_space<vmem>>, vector<1x32xf32>
      tpu.vector_store %arg9[%c0_19, %c0_20], %27 {strides = array<i32>} : memref<1x32xf32, #tpu.memory_space<vmem>>, vector<1x32xf32>,
      %c0_21 = arith.constant 0 : index
      %c0_22 = arith.constant 0 : index
      %c0_23 = arith.constant 0 : index
      %29 = vector.load %arg7[%c0_21, %c0_22, %c0_23] : memref<1x32x32xf32, #tpu.memory_space<vmem>>, vector<1x32x32xf32>
      %30 = vector.shape_cast %29 : vector<1x32x32xf32> to vector<32x32xf32>
      %31 = vector.shape_cast %7 : vector<32x32xf32> to vector<1x32x32xf32>
      tpu.vector_store %arg7[%c0_21, %c0_22, %c0_23], %31 {strides = array<i32>} : memref<1x32x32xf32, #tpu.memory_space<vmem>>, vector<1x32x32xf32>,
    } else {
    }
    %c1_i32 = arith.constant 1 : i32
    %15 = arith.cmpi eq, %arg0, %c1_i32 : i32
    %16 = arith.extui %15 : i1 to i32
    %c0_i32_10 = arith.constant 0 : i32
    %17 = arith.cmpi ne, %16, %c0_i32_10 : i32
    scf.if %17 {
      %c0_11 = arith.constant 0 : index
      %c0_12 = arith.constant 0 : index
      %18 = vector.load %arg8[%c0_11, %c0_12] : memref<1x32xf32, #tpu.memory_space<vmem>>, vector<1x32xf32>
      %cst_13 = arith.constant 7.812500e-03 : f32
      %19 = vector.broadcast %cst_13 : f32 to vector<1x32xf32>
      %20 = arith.mulf %18, %19 : vector<1x32xf32>
      %c0_14 = arith.constant 0 : index
      %c0_15 = arith.constant 0 : index
      %21 = vector.load %arg9[%c0_14, %c0_15] : memref<1x32xf32, #tpu.memory_space<vmem>>, vector<1x32xf32>
      %cst_16 = arith.constant 7.812500e-03 : f32
      %22 = vector.broadcast %cst_16 : f32 to vector<1x32xf32>
      %23 = arith.mulf %21, %22 : vector<1x32xf32>
      %24 = arith.mulf %20, %20 : vector<1x32xf32>
      %25 = arith.subf %23, %24 : vector<1x32xf32>
      %26 = vector.broadcast %20 : vector<1x32xf32> to vector<32x32xf32>
      %27 = arith.subf %7, %26 : vector<32x32xf32>
      %cst_17 = arith.constant 9.99999974E-6 : f32
      %28 = vector.broadcast %cst_17 : f32 to vector<1x32xf32>
      %29 = arith.addf %25, %28 : vector<1x32xf32>
      %30 = math.rsqrt %29 : vector<1x32xf32>
      %31 = vector.broadcast %30 : vector<1x32xf32> to vector<32x32xf32>
      %32 = arith.mulf %27, %31 : vector<32x32xf32>
      %c0_18 = arith.constant 0 : index
      %c0_19 = arith.constant 0 : index
      %33 = vector.load %arg5[%c0_18, %c0_19] : memref<1x32xf32, #tpu.memory_space<vmem>>, vector<1x32xf32>
      %34 = vector.broadcast %33 : vector<1x32xf32> to vector<32x32xf32>
      %35 = arith.mulf %32, %34 : vector<32x32xf32>
      %c0_20 = arith.constant 0 : index
      %c0_21 = arith.constant 0 : index
      %36 = vector.load %arg6[%c0_20, %c0_21] : memref<1x32xf32, #tpu.memory_space<vmem>>, vector<1x32xf32>
      %37 = vector.broadcast %36 : vector<1x32xf32> to vector<32x32xf32>
      %38 = arith.addf %35, %37 : vector<32x32xf32>
      %cst_22 = arith.constant 0.000000e+00 : f32
      %39 = vector.broadcast %cst_22 : f32 to vector<32x32xf32>
      %40 = arith.maximumf %38, %39 : vector<32x32xf32>
      %c0_23 = arith.constant 0 : index
      %c0_24 = arith.constant 0 : index
      %c0_25 = arith.constant 0 : index
      %41 = vector.load %arg7[%c0_23, %c0_24, %c0_25] : memref<1x32x32xf32, #tpu.memory_space<vmem>>, vector<1x32x32xf32>
      %42 = vector.shape_cast %41 : vector<1x32x32xf32> to vector<32x32xf32>
      %43 = vector.shape_cast %40 : vector<32x32xf32> to vector<1x32x32xf32>
      tpu.vector_store %arg7[%c0_23, %c0_24, %c0_25], %43 {strides = array<i32>} : memref<1x32x32xf32, #tpu.memory_space<vmem>>, vector<1x32x32xf32>,
    } else {
    }
    return
  }
  func.func @transform_0(%arg0: i32, %arg1: i32, %arg2: i32) -> (i32, i32, i32) {
    %c0_i32 = arith.constant 0 : i32
    %c0_i32_0 = arith.constant 0 : i32
    return %arg1, %arg2, %c0_i32 : i32, i32, i32
  }
  func.func @transform_1(%arg0: i32, %arg1: i32, %arg2: i32) -> (i32, i32, i32) {
    %c0_i32 = arith.constant 0 : i32
    %c0_i32_0 = arith.constant 0 : i32
    %c0_i32_1 = arith.constant 0 : i32
    return %arg1, %c0_i32, %c0_i32_0 : i32, i32, i32
  }
  func.func @transform_2(%arg0: i32, %arg1: i32, %arg2: i32) -> (i32, i32) {
    %c0_i32 = arith.constant 0 : i32
    %c0_i32_0 = arith.constant 0 : i32
    %c0_i32_1 = arith.constant 0 : i32
    return %c0_i32, %c0_i32_0 : i32, i32
  }
  func.func @transform_3(%arg0: i32, %arg1: i32, %arg2: i32) -> (i32, i32) {
    %c0_i32 = arith.constant 0 : i32
    %c0_i32_0 = arith.constant 0 : i32
    %c0_i32_1 = arith.constant 0 : i32
    return %c0_i32, %c0_i32_0 : i32, i32
  }
  func.func @transform_4(%arg0: i32, %arg1: i32, %arg2: i32) -> (i32, i32, i32) {
    %c0_i32 = arith.constant 0 : i32
    %c0_i32_0 = arith.constant 0 : i32
    return %arg1, %arg2, %c0_i32 : i32, i32, i32
  }
}

module attributes {stable_mosaic.version = 11 : i64} {
  func.func @_ggemm_bn_act_kernel(%arg0: i32, %arg1: i32, %arg2: i32, %arg3: memref<1x128x128xbf16, #tpu.memory_space<vmem>>, %arg4: memref<1x128x16xbf16, #tpu.memory_space<vmem>>, %arg5: memref<1x16xf32, #tpu.memory_space<vmem>>, %arg6: memref<1x16xf32, #tpu.memory_space<vmem>>, %arg7: memref<1x128x16xf32, #tpu.memory_space<vmem>>, %arg8: memref<1x16xf32, #tpu.memory_space<vmem>>, %arg9: memref<1x16xf32, #tpu.memory_space<vmem>>) attributes {dimension_semantics = [#tpu.dimension_semantics<arbitrary>, #tpu.dimension_semantics<arbitrary>, #tpu.dimension_semantics<arbitrary>], iteration_bounds = array<i64: 2, 4, 1>, scalar_prefetch = 0 : i64, scratch_operands = 2 : i64, tpu.core_type = #tpu.core_type<tc>, window_params = [{transform_indices = @transform_0, window_bounds = array<i64: 1, 128, 128>}, {transform_indices = @transform_1, window_bounds = array<i64: 1, 128, 16>}, {pipeline_mode = #tpu.pipeline_mode<synchronous>, transform_indices = @transform_2, window_bounds = array<i64: 1, 16>}, {pipeline_mode = #tpu.pipeline_mode<synchronous>, transform_indices = @transform_3, window_bounds = array<i64: 1, 16>}, {transform_indices = @transform_4, window_bounds = array<i64: 1, 128, 16>}]} {
    %c0_i32 = arith.constant 0 : i32
    %0 = arith.cmpi eq, %arg1, %c0_i32 : i32
    %c0_i32_0 = arith.constant 0 : i32
    %1 = arith.cmpi eq, %arg2, %c0_i32_0 : i32
    %2 = arith.andi %0, %1 : i1
    %c0 = arith.constant 0 : index
    %c0_1 = arith.constant 0 : index
    %c0_2 = arith.constant 0 : index
    %3 = vector.load %arg3[%c0, %c0_1, %c0_2] : memref<1x128x128xbf16, #tpu.memory_space<vmem>>, vector<1x128x128xbf16>
    %4 = vector.shape_cast %3 : vector<1x128x128xbf16> to vector<128x128xbf16>
    %c0_3 = arith.constant 0 : index
    %c0_4 = arith.constant 0 : index
    %c0_5 = arith.constant 0 : index
    %5 = vector.load %arg4[%c0_3, %c0_4, %c0_5] : memref<1x128x16xbf16, #tpu.memory_space<vmem>>, vector<1x128x16xbf16>
    %6 = vector.shape_cast %5 : vector<1x128x16xbf16> to vector<128x16xbf16>
    %cst = arith.constant dense<0.000000e+00> : vector<128x16xf32>
    %7 = tpu.matmul %4, %6, %cst {dimension_numbers = #tpu.dot_dimension_numbers<[1], [0], [0], [1], [0, 0, 1, 1], [], []>} : vector<128x128xbf16>, vector<128x16xbf16>, vector<128x16xf32> -> vector<128x16xf32>
    %c0_i32_6 = arith.constant 0 : i32
    %8 = arith.cmpi eq, %arg0, %c0_i32_6 : i32
    %9 = arith.andi %8, %2 : i1
    %10 = arith.extui %9 : i1 to i32
    %c0_i32_7 = arith.constant 0 : i32
    %11 = arith.cmpi ne, %10, %c0_i32_7 : i32
    scf.if %11 {
      %cst_11 = arith.constant 0.000000e+00 : f32
      %18 = vector.broadcast %cst_11 : f32 to vector<1x16xf32>
      %c0_12 = arith.constant 0 : index
      %c0_13 = arith.constant 0 : index
      %19 = vector.load %arg8[%c0_12, %c0_13] : memref<1x16xf32, #tpu.memory_space<vmem>>, vector<1x16xf32>
      tpu.vector_store %arg8[%c0_12, %c0_13], %18 {strides = array<i32>} : memref<1x16xf32, #tpu.memory_space<vmem>>, vector<1x16xf32>,
      %cst_14 = arith.constant 0.000000e+00 : f32
      %20 = vector.broadcast %cst_14 : f32 to vector<1x16xf32>
      %c0_15 = arith.constant 0 : index
      %c0_16 = arith.constant 0 : index
      %21 = vector.load %arg9[%c0_15, %c0_16] : memref<1x16xf32, #tpu.memory_space<vmem>>, vector<1x16xf32>
      tpu.vector_store %arg9[%c0_15, %c0_16], %20 {strides = array<i32>} : memref<1x16xf32, #tpu.memory_space<vmem>>, vector<1x16xf32>,
    } else {
    }
    %c0_i32_8 = arith.constant 0 : i32
    %12 = arith.cmpi eq, %arg0, %c0_i32_8 : i32
    %13 = arith.extui %12 : i1 to i32
    %c0_i32_9 = arith.constant 0 : i32
    %14 = arith.cmpi ne, %13, %c0_i32_9 : i32
    scf.if %14 {
      %c0_11 = arith.constant 0 : index
      %c0_12 = arith.constant 0 : index
      %18 = vector.load %arg8[%c0_11, %c0_12] : memref<1x16xf32, #tpu.memory_space<vmem>>, vector<1x16xf32>
      %cst_13 = arith.constant dense<0.000000e+00> : vector<16xf32>
      %19 = vector.multi_reduction <add>, %7, %cst_13 [0] : vector<128x16xf32> to vector<16xf32>
      %20 = vector.shape_cast %19 : vector<16xf32> to vector<1x16xf32>
      %21 = arith.addf %18, %20 : vector<1x16xf32>
      %c0_14 = arith.constant 0 : index
      %c0_15 = arith.constant 0 : index
      %22 = vector.load %arg8[%c0_14, %c0_15] : memref<1x16xf32, #tpu.memory_space<vmem>>, vector<1x16xf32>
      tpu.vector_store %arg8[%c0_14, %c0_15], %21 {strides = array<i32>} : memref<1x16xf32, #tpu.memory_space<vmem>>, vector<1x16xf32>,
      %c0_16 = arith.constant 0 : index
      %c0_17 = arith.constant 0 : index
      %23 = vector.load %arg9[%c0_16, %c0_17] : memref<1x16xf32, #tpu.memory_space<vmem>>, vector<1x16xf32>
      %24 = arith.mulf %7, %7 : vector<128x16xf32>
      %cst_18 = arith.constant dense<0.000000e+00> : vector<16xf32>
      %25 = vector.multi_reduction <add>, %24, %cst_18 [0] : vector<128x16xf32> to vector<16xf32>
      %26 = vector.shape_cast %25 : vector<16xf32> to vector<1x16xf32>
      %27 = arith.addf %23, %26 : vector<1x16xf32>
      %c0_19 = arith.constant 0 : index
      %c0_20 = arith.constant 0 : index
      %28 = vector.load %arg9[%c0_19, %c0_20] : memref<1x16xf32, #tpu.memory_space<vmem>>, vector<1x16xf32>
      tpu.vector_store %arg9[%c0_19, %c0_20], %27 {strides = array<i32>} : memref<1x16xf32, #tpu.memory_space<vmem>>, vector<1x16xf32>,
      %c0_21 = arith.constant 0 : index
      %c0_22 = arith.constant 0 : index
      %c0_23 = arith.constant 0 : index
      %29 = vector.load %arg7[%c0_21, %c0_22, %c0_23] : memref<1x128x16xf32, #tpu.memory_space<vmem>>, vector<1x128x16xf32>
      %30 = vector.shape_cast %29 : vector<1x128x16xf32> to vector<128x16xf32>
      %31 = vector.shape_cast %7 : vector<128x16xf32> to vector<1x128x16xf32>
      tpu.vector_store %arg7[%c0_21, %c0_22, %c0_23], %31 {strides = array<i32>} : memref<1x128x16xf32, #tpu.memory_space<vmem>>, vector<1x128x16xf32>,
    } else {
    }
    %c1_i32 = arith.constant 1 : i32
    %15 = arith.cmpi eq, %arg0, %c1_i32 : i32
    %16 = arith.extui %15 : i1 to i32
    %c0_i32_10 = arith.constant 0 : i32
    %17 = arith.cmpi ne, %16, %c0_i32_10 : i32
    scf.if %17 {
      %c0_11 = arith.constant 0 : index
      %c0_12 = arith.constant 0 : index
      %18 = vector.load %arg8[%c0_11, %c0_12] : memref<1x16xf32, #tpu.memory_space<vmem>>, vector<1x16xf32>
      %cst_13 = arith.constant 0.001953125 : f32
      %19 = vector.broadcast %cst_13 : f32 to vector<1x16xf32>
      %20 = arith.mulf %18, %19 : vector<1x16xf32>
      %c0_14 = arith.constant 0 : index
      %c0_15 = arith.constant 0 : index
      %21 = vector.load %arg9[%c0_14, %c0_15] : memref<1x16xf32, #tpu.memory_space<vmem>>, vector<1x16xf32>
      %cst_16 = arith.constant 0.001953125 : f32
      %22 = vector.broadcast %cst_16 : f32 to vector<1x16xf32>
      %23 = arith.mulf %21, %22 : vector<1x16xf32>
      %24 = arith.mulf %20, %20 : vector<1x16xf32>
      %25 = arith.subf %23, %24 : vector<1x16xf32>
      %26 = vector.broadcast %20 : vector<1x16xf32> to vector<128x16xf32>
      %27 = arith.subf %7, %26 : vector<128x16xf32>
      %cst_17 = arith.constant 9.99999974E-6 : f32
      %28 = vector.broadcast %cst_17 : f32 to vector<1x16xf32>
      %29 = arith.addf %25, %28 : vector<1x16xf32>
      %30 = math.rsqrt %29 : vector<1x16xf32>
      %31 = vector.broadcast %30 : vector<1x16xf32> to vector<128x16xf32>
      %32 = arith.mulf %27, %31 : vector<128x16xf32>
      %c0_18 = arith.constant 0 : index
      %c0_19 = arith.constant 0 : index
      %33 = vector.load %arg5[%c0_18, %c0_19] : memref<1x16xf32, #tpu.memory_space<vmem>>, vector<1x16xf32>
      %34 = vector.broadcast %33 : vector<1x16xf32> to vector<128x16xf32>
      %35 = arith.mulf %32, %34 : vector<128x16xf32>
      %c0_20 = arith.constant 0 : index
      %c0_21 = arith.constant 0 : index
      %36 = vector.load %arg6[%c0_20, %c0_21] : memref<1x16xf32, #tpu.memory_space<vmem>>, vector<1x16xf32>
      %37 = vector.broadcast %36 : vector<1x16xf32> to vector<128x16xf32>
      %38 = arith.addf %35, %37 : vector<128x16xf32>
      %cst_22 = arith.constant 0.000000e+00 : f32
      %39 = vector.broadcast %cst_22 : f32 to vector<128x16xf32>
      %40 = arith.maximumf %38, %39 : vector<128x16xf32>
      %c0_23 = arith.constant 0 : index
      %c0_24 = arith.constant 0 : index
      %c0_25 = arith.constant 0 : index
      %41 = vector.load %arg7[%c0_23, %c0_24, %c0_25] : memref<1x128x16xf32, #tpu.memory_space<vmem>>, vector<1x128x16xf32>
      %42 = vector.shape_cast %41 : vector<1x128x16xf32> to vector<128x16xf32>
      %43 = vector.shape_cast %40 : vector<128x16xf32> to vector<1x128x16xf32>
      tpu.vector_store %arg7[%c0_23, %c0_24, %c0_25], %43 {strides = array<i32>} : memref<1x128x16xf32, #tpu.memory_space<vmem>>, vector<1x128x16xf32>,
    } else {
    }
    return
  }
  func.func @transform_0(%arg0: i32, %arg1: i32, %arg2: i32) -> (i32, i32, i32) {
    %c0_i32 = arith.constant 0 : i32
    %c0_i32_0 = arith.constant 0 : i32
    return %arg1, %arg2, %c0_i32 : i32, i32, i32
  }
  func.func @transform_1(%arg0: i32, %arg1: i32, %arg2: i32) -> (i32, i32, i32) {
    %c0_i32 = arith.constant 0 : i32
    %c0_i32_0 = arith.constant 0 : i32
    %c0_i32_1 = arith.constant 0 : i32
    return %arg1, %c0_i32, %c0_i32_0 : i32, i32, i32
  }
  func.func @transform_2(%arg0: i32, %arg1: i32, %arg2: i32) -> (i32, i32) {
    %c0_i32 = arith.constant 0 : i32
    %c0_i32_0 = arith.constant 0 : i32
    %c0_i32_1 = arith.constant 0 : i32
    return %c0_i32, %c0_i32_0 : i32, i32
  }
  func.func @transform_3(%arg0: i32, %arg1: i32, %arg2: i32) -> (i32, i32) {
    %c0_i32 = arith.constant 0 : i32
    %c0_i32_0 = arith.constant 0 : i32
    %c0_i32_1 = arith.constant 0 : i32
    return %c0_i32, %c0_i32_0 : i32, i32
  }
  func.func @transform_4(%arg0: i32, %arg1: i32, %arg2: i32) -> (i32, i32, i32) {
    %c0_i32 = arith.constant 0 : i32
    %c0_i32_0 = arith.constant 0 : i32
    return %arg1, %arg2, %c0_i32 : i32, i32, i32
  }
}

module attributes {stable_mosaic.version = 11 : i64} {
  func.func @_ggemm_act_kernel(%arg0: i32, %arg1: i32, %arg2: memref<1x512x48xbf16, #tpu.memory_space<vmem>>, %arg3: memref<1x48x8xbf16, #tpu.memory_space<vmem>>, %arg4: memref<1x512x8xf32, #tpu.memory_space<vmem>>) attributes {dimension_semantics = [#tpu.dimension_semantics<parallel>, #tpu.dimension_semantics<parallel>], iteration_bounds = array<i64: 1, 4>, scalar_prefetch = 0 : i64, scratch_operands = 0 : i64, tpu.core_type = #tpu.core_type<tc>, window_params = [{transform_indices = @transform_0, window_bounds = array<i64: 1, 512, 48>}, {transform_indices = @transform_1, window_bounds = array<i64: 1, 48, 8>}, {transform_indices = @transform_2, window_bounds = array<i64: 1, 512, 8>}]} {
    %c0 = arith.constant 0 : index
    %c0_0 = arith.constant 0 : index
    %c0_1 = arith.constant 0 : index
    %0 = vector.load %arg2[%c0, %c0_0, %c0_1] : memref<1x512x48xbf16, #tpu.memory_space<vmem>>, vector<1x512x48xbf16>
    %1 = vector.shape_cast %0 : vector<1x512x48xbf16> to vector<512x48xbf16>
    %c0_2 = arith.constant 0 : index
    %c0_3 = arith.constant 0 : index
    %c0_4 = arith.constant 0 : index
    %2 = vector.load %arg3[%c0_2, %c0_3, %c0_4] : memref<1x48x8xbf16, #tpu.memory_space<vmem>>, vector<1x48x8xbf16>
    %3 = vector.shape_cast %2 : vector<1x48x8xbf16> to vector<48x8xbf16>
    %cst = arith.constant dense<0.000000e+00> : vector<512x8xf32>
    %4 = tpu.matmul %1, %3, %cst {dimension_numbers = #tpu.dot_dimension_numbers<[1], [0], [0], [1], [0, 0, 1, 1], [], []>} : vector<512x48xbf16>, vector<48x8xbf16>, vector<512x8xf32> -> vector<512x8xf32>
    %cst_5 = arith.constant 0.000000e+00 : f32
    %5 = vector.broadcast %cst_5 : f32 to vector<512x8xf32>
    %6 = arith.cmpf ogt, %4, %5 : vector<512x8xf32>
    %cst_6 = arith.constant 2.000000e-01 : f32
    %7 = vector.broadcast %cst_6 : f32 to vector<512x8xf32>
    %8 = arith.mulf %7, %4 : vector<512x8xf32>
    %9 = arith.select %6, %4, %8 : vector<512x8xi1>, vector<512x8xf32>
    %c0_7 = arith.constant 0 : index
    %c0_8 = arith.constant 0 : index
    %c0_9 = arith.constant 0 : index
    %10 = vector.load %arg4[%c0_7, %c0_8, %c0_9] : memref<1x512x8xf32, #tpu.memory_space<vmem>>, vector<1x512x8xf32>
    %11 = vector.shape_cast %10 : vector<1x512x8xf32> to vector<512x8xf32>
    %12 = vector.shape_cast %9 : vector<512x8xf32> to vector<1x512x8xf32>
    tpu.vector_store %arg4[%c0_7, %c0_8, %c0_9], %12 {strides = array<i32>} : memref<1x512x8xf32, #tpu.memory_space<vmem>>, vector<1x512x8xf32>,
    return
  }
  func.func @transform_0(%arg0: i32, %arg1: i32) -> (i32, i32, i32) {
    %c0_i32 = arith.constant 0 : i32
    %c0_i32_0 = arith.constant 0 : i32
    return %arg0, %arg1, %c0_i32 : i32, i32, i32
  }
  func.func @transform_1(%arg0: i32, %arg1: i32) -> (i32, i32, i32) {
    %c0_i32 = arith.constant 0 : i32
    %c0_i32_0 = arith.constant 0 : i32
    %c0_i32_1 = arith.constant 0 : i32
    return %arg0, %c0_i32, %c0_i32_0 : i32, i32, i32
  }
  func.func @transform_2(%arg0: i32, %arg1: i32) -> (i32, i32, i32) {
    %c0_i32 = arith.constant 0 : i32
    %c0_i32_0 = arith.constant 0 : i32
    return %arg0, %arg1, %c0_i32 : i32, i32, i32
  }
}

module attributes {stable_mosaic.version = 11 : i64} {
  func.func @_ggemm_bn_act_kernel(%arg0: i32, %arg1: i32, %arg2: i32, %arg3: memref<1x512x128xbf16, #tpu.memory_space<vmem>>, %arg4: memref<1x128x16xbf16, #tpu.memory_space<vmem>>, %arg5: memref<1x16xf32, #tpu.memory_space<vmem>>, %arg6: memref<1x16xf32, #tpu.memory_space<vmem>>, %arg7: memref<1x512x16xf32, #tpu.memory_space<vmem>>, %arg8: memref<1x16xf32, #tpu.memory_space<vmem>>, %arg9: memref<1x16xf32, #tpu.memory_space<vmem>>) attributes {dimension_semantics = [#tpu.dimension_semantics<arbitrary>, #tpu.dimension_semantics<arbitrary>, #tpu.dimension_semantics<arbitrary>], iteration_bounds = array<i64: 2, 1, 1>, scalar_prefetch = 0 : i64, scratch_operands = 2 : i64, tpu.core_type = #tpu.core_type<tc>, window_params = [{transform_indices = @transform_0, window_bounds = array<i64: 1, 512, 128>}, {transform_indices = @transform_1, window_bounds = array<i64: 1, 128, 16>}, {pipeline_mode = #tpu.pipeline_mode<synchronous>, transform_indices = @transform_2, window_bounds = array<i64: 1, 16>}, {pipeline_mode = #tpu.pipeline_mode<synchronous>, transform_indices = @transform_3, window_bounds = array<i64: 1, 16>}, {transform_indices = @transform_4, window_bounds = array<i64: 1, 512, 16>}]} {
    %c0_i32 = arith.constant 0 : i32
    %0 = arith.cmpi eq, %arg1, %c0_i32 : i32
    %c0_i32_0 = arith.constant 0 : i32
    %1 = arith.cmpi eq, %arg2, %c0_i32_0 : i32
    %2 = arith.andi %0, %1 : i1
    %c0 = arith.constant 0 : index
    %c0_1 = arith.constant 0 : index
    %c0_2 = arith.constant 0 : index
    %3 = vector.load %arg3[%c0, %c0_1, %c0_2] : memref<1x512x128xbf16, #tpu.memory_space<vmem>>, vector<1x512x128xbf16>
    %4 = vector.shape_cast %3 : vector<1x512x128xbf16> to vector<512x128xbf16>
    %c0_3 = arith.constant 0 : index
    %c0_4 = arith.constant 0 : index
    %c0_5 = arith.constant 0 : index
    %5 = vector.load %arg4[%c0_3, %c0_4, %c0_5] : memref<1x128x16xbf16, #tpu.memory_space<vmem>>, vector<1x128x16xbf16>
    %6 = vector.shape_cast %5 : vector<1x128x16xbf16> to vector<128x16xbf16>
    %cst = arith.constant dense<0.000000e+00> : vector<512x16xf32>
    %7 = tpu.matmul %4, %6, %cst {dimension_numbers = #tpu.dot_dimension_numbers<[1], [0], [0], [1], [0, 0, 1, 1], [], []>} : vector<512x128xbf16>, vector<128x16xbf16>, vector<512x16xf32> -> vector<512x16xf32>
    %c0_i32_6 = arith.constant 0 : i32
    %8 = arith.cmpi eq, %arg0, %c0_i32_6 : i32
    %9 = arith.andi %8, %2 : i1
    %10 = arith.extui %9 : i1 to i32
    %c0_i32_7 = arith.constant 0 : i32
    %11 = arith.cmpi ne, %10, %c0_i32_7 : i32
    scf.if %11 {
      %cst_11 = arith.constant 0.000000e+00 : f32
      %18 = vector.broadcast %cst_11 : f32 to vector<1x16xf32>
      %c0_12 = arith.constant 0 : index
      %c0_13 = arith.constant 0 : index
      %19 = vector.load %arg8[%c0_12, %c0_13] : memref<1x16xf32, #tpu.memory_space<vmem>>, vector<1x16xf32>
      tpu.vector_store %arg8[%c0_12, %c0_13], %18 {strides = array<i32>} : memref<1x16xf32, #tpu.memory_space<vmem>>, vector<1x16xf32>,
      %cst_14 = arith.constant 0.000000e+00 : f32
      %20 = vector.broadcast %cst_14 : f32 to vector<1x16xf32>
      %c0_15 = arith.constant 0 : index
      %c0_16 = arith.constant 0 : index
      %21 = vector.load %arg9[%c0_15, %c0_16] : memref<1x16xf32, #tpu.memory_space<vmem>>, vector<1x16xf32>
      tpu.vector_store %arg9[%c0_15, %c0_16], %20 {strides = array<i32>} : memref<1x16xf32, #tpu.memory_space<vmem>>, vector<1x16xf32>,
    } else {
    }
    %c0_i32_8 = arith.constant 0 : i32
    %12 = arith.cmpi eq, %arg0, %c0_i32_8 : i32
    %13 = arith.extui %12 : i1 to i32
    %c0_i32_9 = arith.constant 0 : i32
    %14 = arith.cmpi ne, %13, %c0_i32_9 : i32
    scf.if %14 {
      %c0_11 = arith.constant 0 : index
      %c0_12 = arith.constant 0 : index
      %18 = vector.load %arg8[%c0_11, %c0_12] : memref<1x16xf32, #tpu.memory_space<vmem>>, vector<1x16xf32>
      %cst_13 = arith.constant dense<0.000000e+00> : vector<16xf32>
      %19 = vector.multi_reduction <add>, %7, %cst_13 [0] : vector<512x16xf32> to vector<16xf32>
      %20 = vector.shape_cast %19 : vector<16xf32> to vector<1x16xf32>
      %21 = arith.addf %18, %20 : vector<1x16xf32>
      %c0_14 = arith.constant 0 : index
      %c0_15 = arith.constant 0 : index
      %22 = vector.load %arg8[%c0_14, %c0_15] : memref<1x16xf32, #tpu.memory_space<vmem>>, vector<1x16xf32>
      tpu.vector_store %arg8[%c0_14, %c0_15], %21 {strides = array<i32>} : memref<1x16xf32, #tpu.memory_space<vmem>>, vector<1x16xf32>,
      %c0_16 = arith.constant 0 : index
      %c0_17 = arith.constant 0 : index
      %23 = vector.load %arg9[%c0_16, %c0_17] : memref<1x16xf32, #tpu.memory_space<vmem>>, vector<1x16xf32>
      %24 = arith.mulf %7, %7 : vector<512x16xf32>
      %cst_18 = arith.constant dense<0.000000e+00> : vector<16xf32>
      %25 = vector.multi_reduction <add>, %24, %cst_18 [0] : vector<512x16xf32> to vector<16xf32>
      %26 = vector.shape_cast %25 : vector<16xf32> to vector<1x16xf32>
      %27 = arith.addf %23, %26 : vector<1x16xf32>
      %c0_19 = arith.constant 0 : index
      %c0_20 = arith.constant 0 : index
      %28 = vector.load %arg9[%c0_19, %c0_20] : memref<1x16xf32, #tpu.memory_space<vmem>>, vector<1x16xf32>
      tpu.vector_store %arg9[%c0_19, %c0_20], %27 {strides = array<i32>} : memref<1x16xf32, #tpu.memory_space<vmem>>, vector<1x16xf32>,
      %c0_21 = arith.constant 0 : index
      %c0_22 = arith.constant 0 : index
      %c0_23 = arith.constant 0 : index
      %29 = vector.load %arg7[%c0_21, %c0_22, %c0_23] : memref<1x512x16xf32, #tpu.memory_space<vmem>>, vector<1x512x16xf32>
      %30 = vector.shape_cast %29 : vector<1x512x16xf32> to vector<512x16xf32>
      %31 = vector.shape_cast %7 : vector<512x16xf32> to vector<1x512x16xf32>
      tpu.vector_store %arg7[%c0_21, %c0_22, %c0_23], %31 {strides = array<i32>} : memref<1x512x16xf32, #tpu.memory_space<vmem>>, vector<1x512x16xf32>,
    } else {
    }
    %c1_i32 = arith.constant 1 : i32
    %15 = arith.cmpi eq, %arg0, %c1_i32 : i32
    %16 = arith.extui %15 : i1 to i32
    %c0_i32_10 = arith.constant 0 : i32
    %17 = arith.cmpi ne, %16, %c0_i32_10 : i32
    scf.if %17 {
      %c0_11 = arith.constant 0 : index
      %c0_12 = arith.constant 0 : index
      %18 = vector.load %arg8[%c0_11, %c0_12] : memref<1x16xf32, #tpu.memory_space<vmem>>, vector<1x16xf32>
      %cst_13 = arith.constant 0.001953125 : f32
      %19 = vector.broadcast %cst_13 : f32 to vector<1x16xf32>
      %20 = arith.mulf %18, %19 : vector<1x16xf32>
      %c0_14 = arith.constant 0 : index
      %c0_15 = arith.constant 0 : index
      %21 = vector.load %arg9[%c0_14, %c0_15] : memref<1x16xf32, #tpu.memory_space<vmem>>, vector<1x16xf32>
      %cst_16 = arith.constant 0.001953125 : f32
      %22 = vector.broadcast %cst_16 : f32 to vector<1x16xf32>
      %23 = arith.mulf %21, %22 : vector<1x16xf32>
      %24 = arith.mulf %20, %20 : vector<1x16xf32>
      %25 = arith.subf %23, %24 : vector<1x16xf32>
      %26 = vector.broadcast %20 : vector<1x16xf32> to vector<512x16xf32>
      %27 = arith.subf %7, %26 : vector<512x16xf32>
      %cst_17 = arith.constant 9.99999974E-6 : f32
      %28 = vector.broadcast %cst_17 : f32 to vector<1x16xf32>
      %29 = arith.addf %25, %28 : vector<1x16xf32>
      %30 = math.rsqrt %29 : vector<1x16xf32>
      %31 = vector.broadcast %30 : vector<1x16xf32> to vector<512x16xf32>
      %32 = arith.mulf %27, %31 : vector<512x16xf32>
      %c0_18 = arith.constant 0 : index
      %c0_19 = arith.constant 0 : index
      %33 = vector.load %arg5[%c0_18, %c0_19] : memref<1x16xf32, #tpu.memory_space<vmem>>, vector<1x16xf32>
      %34 = vector.broadcast %33 : vector<1x16xf32> to vector<512x16xf32>
      %35 = arith.mulf %32, %34 : vector<512x16xf32>
      %c0_20 = arith.constant 0 : index
      %c0_21 = arith.constant 0 : index
      %36 = vector.load %arg6[%c0_20, %c0_21] : memref<1x16xf32, #tpu.memory_space<vmem>>, vector<1x16xf32>
      %37 = vector.broadcast %36 : vector<1x16xf32> to vector<512x16xf32>
      %38 = arith.addf %35, %37 : vector<512x16xf32>
      %cst_22 = arith.constant 0.000000e+00 : f32
      %39 = vector.broadcast %cst_22 : f32 to vector<512x16xf32>
      %40 = arith.cmpf ogt, %38, %39 : vector<512x16xf32>
      %cst_23 = arith.constant 2.000000e-01 : f32
      %41 = vector.broadcast %cst_23 : f32 to vector<512x16xf32>
      %42 = arith.mulf %41, %38 : vector<512x16xf32>
      %43 = arith.select %40, %38, %42 : vector<512x16xi1>, vector<512x16xf32>
      %c0_24 = arith.constant 0 : index
      %c0_25 = arith.constant 0 : index
      %c0_26 = arith.constant 0 : index
      %44 = vector.load %arg7[%c0_24, %c0_25, %c0_26] : memref<1x512x16xf32, #tpu.memory_space<vmem>>, vector<1x512x16xf32>
      %45 = vector.shape_cast %44 : vector<1x512x16xf32> to vector<512x16xf32>
      %46 = vector.shape_cast %43 : vector<512x16xf32> to vector<1x512x16xf32>
      tpu.vector_store %arg7[%c0_24, %c0_25, %c0_26], %46 {strides = array<i32>} : memref<1x512x16xf32, #tpu.memory_space<vmem>>, vector<1x512x16xf32>,
    } else {
    }
    return
  }
  func.func @transform_0(%arg0: i32, %arg1: i32, %arg2: i32) -> (i32, i32, i32) {
    %c0_i32 = arith.constant 0 : i32
    %c0_i32_0 = arith.constant 0 : i32
    return %arg1, %arg2, %c0_i32 : i32, i32, i32
  }
  func.func @transform_1(%arg0: i32, %arg1: i32, %arg2: i32) -> (i32, i32, i32) {
    %c0_i32 = arith.constant 0 : i32
    %c0_i32_0 = arith.constant 0 : i32
    %c0_i32_1 = arith.constant 0 : i32
    return %arg1, %c0_i32, %c0_i32_0 : i32, i32, i32
  }
  func.func @transform_2(%arg0: i32, %arg1: i32, %arg2: i32) -> (i32, i32) {
    %c0_i32 = arith.constant 0 : i32
    %c0_i32_0 = arith.constant 0 : i32
    %c0_i32_1 = arith.constant 0 : i32
    return %c0_i32, %c0_i32_0 : i32, i32
  }
  func.func @transform_3(%arg0: i32, %arg1: i32, %arg2: i32) -> (i32, i32) {
    %c0_i32 = arith.constant 0 : i32
    %c0_i32_0 = arith.constant 0 : i32
    %c0_i32_1 = arith.constant 0 : i32
    return %c0_i32, %c0_i32_0 : i32, i32
  }
  func.func @transform_4(%arg0: i32, %arg1: i32, %arg2: i32) -> (i32, i32, i32) {
    %c0_i32 = arith.constant 0 : i32
    %c0_i32_0 = arith.constant 0 : i32
    return %arg1, %arg2, %c0_i32 : i32, i32, i32
  }
}

module attributes {stable_mosaic.version = 11 : i64} {
  func.func @_ggemm_bn_act_kernel(%arg0: i32, %arg1: i32, %arg2: i32, %arg3: memref<1x128x256xbf16, #tpu.memory_space<vmem>>, %arg4: memref<1x256x32xbf16, #tpu.memory_space<vmem>>, %arg5: memref<1x32xf32, #tpu.memory_space<vmem>>, %arg6: memref<1x32xf32, #tpu.memory_space<vmem>>, %arg7: memref<1x128x32xf32, #tpu.memory_space<vmem>>, %arg8: memref<1x32xf32, #tpu.memory_space<vmem>>, %arg9: memref<1x32xf32, #tpu.memory_space<vmem>>) attributes {dimension_semantics = [#tpu.dimension_semantics<arbitrary>, #tpu.dimension_semantics<arbitrary>, #tpu.dimension_semantics<arbitrary>], iteration_bounds = array<i64: 2, 1, 1>, scalar_prefetch = 0 : i64, scratch_operands = 2 : i64, tpu.core_type = #tpu.core_type<tc>, window_params = [{transform_indices = @transform_0, window_bounds = array<i64: 1, 128, 256>}, {transform_indices = @transform_1, window_bounds = array<i64: 1, 256, 32>}, {pipeline_mode = #tpu.pipeline_mode<synchronous>, transform_indices = @transform_2, window_bounds = array<i64: 1, 32>}, {pipeline_mode = #tpu.pipeline_mode<synchronous>, transform_indices = @transform_3, window_bounds = array<i64: 1, 32>}, {transform_indices = @transform_4, window_bounds = array<i64: 1, 128, 32>}]} {
    %c0_i32 = arith.constant 0 : i32
    %0 = arith.cmpi eq, %arg1, %c0_i32 : i32
    %c0_i32_0 = arith.constant 0 : i32
    %1 = arith.cmpi eq, %arg2, %c0_i32_0 : i32
    %2 = arith.andi %0, %1 : i1
    %c0 = arith.constant 0 : index
    %c0_1 = arith.constant 0 : index
    %c0_2 = arith.constant 0 : index
    %3 = vector.load %arg3[%c0, %c0_1, %c0_2] : memref<1x128x256xbf16, #tpu.memory_space<vmem>>, vector<1x128x256xbf16>
    %4 = vector.shape_cast %3 : vector<1x128x256xbf16> to vector<128x256xbf16>
    %c0_3 = arith.constant 0 : index
    %c0_4 = arith.constant 0 : index
    %c0_5 = arith.constant 0 : index
    %5 = vector.load %arg4[%c0_3, %c0_4, %c0_5] : memref<1x256x32xbf16, #tpu.memory_space<vmem>>, vector<1x256x32xbf16>
    %6 = vector.shape_cast %5 : vector<1x256x32xbf16> to vector<256x32xbf16>
    %cst = arith.constant dense<0.000000e+00> : vector<128x32xf32>
    %7 = tpu.matmul %4, %6, %cst {dimension_numbers = #tpu.dot_dimension_numbers<[1], [0], [0], [1], [0, 0, 1, 1], [], []>} : vector<128x256xbf16>, vector<256x32xbf16>, vector<128x32xf32> -> vector<128x32xf32>
    %c0_i32_6 = arith.constant 0 : i32
    %8 = arith.cmpi eq, %arg0, %c0_i32_6 : i32
    %9 = arith.andi %8, %2 : i1
    %10 = arith.extui %9 : i1 to i32
    %c0_i32_7 = arith.constant 0 : i32
    %11 = arith.cmpi ne, %10, %c0_i32_7 : i32
    scf.if %11 {
      %cst_11 = arith.constant 0.000000e+00 : f32
      %18 = vector.broadcast %cst_11 : f32 to vector<1x32xf32>
      %c0_12 = arith.constant 0 : index
      %c0_13 = arith.constant 0 : index
      %19 = vector.load %arg8[%c0_12, %c0_13] : memref<1x32xf32, #tpu.memory_space<vmem>>, vector<1x32xf32>
      tpu.vector_store %arg8[%c0_12, %c0_13], %18 {strides = array<i32>} : memref<1x32xf32, #tpu.memory_space<vmem>>, vector<1x32xf32>,
      %cst_14 = arith.constant 0.000000e+00 : f32
      %20 = vector.broadcast %cst_14 : f32 to vector<1x32xf32>
      %c0_15 = arith.constant 0 : index
      %c0_16 = arith.constant 0 : index
      %21 = vector.load %arg9[%c0_15, %c0_16] : memref<1x32xf32, #tpu.memory_space<vmem>>, vector<1x32xf32>
      tpu.vector_store %arg9[%c0_15, %c0_16], %20 {strides = array<i32>} : memref<1x32xf32, #tpu.memory_space<vmem>>, vector<1x32xf32>,
    } else {
    }
    %c0_i32_8 = arith.constant 0 : i32
    %12 = arith.cmpi eq, %arg0, %c0_i32_8 : i32
    %13 = arith.extui %12 : i1 to i32
    %c0_i32_9 = arith.constant 0 : i32
    %14 = arith.cmpi ne, %13, %c0_i32_9 : i32
    scf.if %14 {
      %c0_11 = arith.constant 0 : index
      %c0_12 = arith.constant 0 : index
      %18 = vector.load %arg8[%c0_11, %c0_12] : memref<1x32xf32, #tpu.memory_space<vmem>>, vector<1x32xf32>
      %cst_13 = arith.constant dense<0.000000e+00> : vector<32xf32>
      %19 = vector.multi_reduction <add>, %7, %cst_13 [0] : vector<128x32xf32> to vector<32xf32>
      %20 = vector.shape_cast %19 : vector<32xf32> to vector<1x32xf32>
      %21 = arith.addf %18, %20 : vector<1x32xf32>
      %c0_14 = arith.constant 0 : index
      %c0_15 = arith.constant 0 : index
      %22 = vector.load %arg8[%c0_14, %c0_15] : memref<1x32xf32, #tpu.memory_space<vmem>>, vector<1x32xf32>
      tpu.vector_store %arg8[%c0_14, %c0_15], %21 {strides = array<i32>} : memref<1x32xf32, #tpu.memory_space<vmem>>, vector<1x32xf32>,
      %c0_16 = arith.constant 0 : index
      %c0_17 = arith.constant 0 : index
      %23 = vector.load %arg9[%c0_16, %c0_17] : memref<1x32xf32, #tpu.memory_space<vmem>>, vector<1x32xf32>
      %24 = arith.mulf %7, %7 : vector<128x32xf32>
      %cst_18 = arith.constant dense<0.000000e+00> : vector<32xf32>
      %25 = vector.multi_reduction <add>, %24, %cst_18 [0] : vector<128x32xf32> to vector<32xf32>
      %26 = vector.shape_cast %25 : vector<32xf32> to vector<1x32xf32>
      %27 = arith.addf %23, %26 : vector<1x32xf32>
      %c0_19 = arith.constant 0 : index
      %c0_20 = arith.constant 0 : index
      %28 = vector.load %arg9[%c0_19, %c0_20] : memref<1x32xf32, #tpu.memory_space<vmem>>, vector<1x32xf32>
      tpu.vector_store %arg9[%c0_19, %c0_20], %27 {strides = array<i32>} : memref<1x32xf32, #tpu.memory_space<vmem>>, vector<1x32xf32>,
      %c0_21 = arith.constant 0 : index
      %c0_22 = arith.constant 0 : index
      %c0_23 = arith.constant 0 : index
      %29 = vector.load %arg7[%c0_21, %c0_22, %c0_23] : memref<1x128x32xf32, #tpu.memory_space<vmem>>, vector<1x128x32xf32>
      %30 = vector.shape_cast %29 : vector<1x128x32xf32> to vector<128x32xf32>
      %31 = vector.shape_cast %7 : vector<128x32xf32> to vector<1x128x32xf32>
      tpu.vector_store %arg7[%c0_21, %c0_22, %c0_23], %31 {strides = array<i32>} : memref<1x128x32xf32, #tpu.memory_space<vmem>>, vector<1x128x32xf32>,
    } else {
    }
    %c1_i32 = arith.constant 1 : i32
    %15 = arith.cmpi eq, %arg0, %c1_i32 : i32
    %16 = arith.extui %15 : i1 to i32
    %c0_i32_10 = arith.constant 0 : i32
    %17 = arith.cmpi ne, %16, %c0_i32_10 : i32
    scf.if %17 {
      %c0_11 = arith.constant 0 : index
      %c0_12 = arith.constant 0 : index
      %18 = vector.load %arg8[%c0_11, %c0_12] : memref<1x32xf32, #tpu.memory_space<vmem>>, vector<1x32xf32>
      %cst_13 = arith.constant 7.812500e-03 : f32
      %19 = vector.broadcast %cst_13 : f32 to vector<1x32xf32>
      %20 = arith.mulf %18, %19 : vector<1x32xf32>
      %c0_14 = arith.constant 0 : index
      %c0_15 = arith.constant 0 : index
      %21 = vector.load %arg9[%c0_14, %c0_15] : memref<1x32xf32, #tpu.memory_space<vmem>>, vector<1x32xf32>
      %cst_16 = arith.constant 7.812500e-03 : f32
      %22 = vector.broadcast %cst_16 : f32 to vector<1x32xf32>
      %23 = arith.mulf %21, %22 : vector<1x32xf32>
      %24 = arith.mulf %20, %20 : vector<1x32xf32>
      %25 = arith.subf %23, %24 : vector<1x32xf32>
      %26 = vector.broadcast %20 : vector<1x32xf32> to vector<128x32xf32>
      %27 = arith.subf %7, %26 : vector<128x32xf32>
      %cst_17 = arith.constant 9.99999974E-6 : f32
      %28 = vector.broadcast %cst_17 : f32 to vector<1x32xf32>
      %29 = arith.addf %25, %28 : vector<1x32xf32>
      %30 = math.rsqrt %29 : vector<1x32xf32>
      %31 = vector.broadcast %30 : vector<1x32xf32> to vector<128x32xf32>
      %32 = arith.mulf %27, %31 : vector<128x32xf32>
      %c0_18 = arith.constant 0 : index
      %c0_19 = arith.constant 0 : index
      %33 = vector.load %arg5[%c0_18, %c0_19] : memref<1x32xf32, #tpu.memory_space<vmem>>, vector<1x32xf32>
      %34 = vector.broadcast %33 : vector<1x32xf32> to vector<128x32xf32>
      %35 = arith.mulf %32, %34 : vector<128x32xf32>
      %c0_20 = arith.constant 0 : index
      %c0_21 = arith.constant 0 : index
      %36 = vector.load %arg6[%c0_20, %c0_21] : memref<1x32xf32, #tpu.memory_space<vmem>>, vector<1x32xf32>
      %37 = vector.broadcast %36 : vector<1x32xf32> to vector<128x32xf32>
      %38 = arith.addf %35, %37 : vector<128x32xf32>
      %cst_22 = arith.constant 0.000000e+00 : f32
      %39 = vector.broadcast %cst_22 : f32 to vector<128x32xf32>
      %40 = arith.cmpf ogt, %38, %39 : vector<128x32xf32>
      %cst_23 = arith.constant 2.000000e-01 : f32
      %41 = vector.broadcast %cst_23 : f32 to vector<128x32xf32>
      %42 = arith.mulf %41, %38 : vector<128x32xf32>
      %43 = arith.select %40, %38, %42 : vector<128x32xi1>, vector<128x32xf32>
      %c0_24 = arith.constant 0 : index
      %c0_25 = arith.constant 0 : index
      %c0_26 = arith.constant 0 : index
      %44 = vector.load %arg7[%c0_24, %c0_25, %c0_26] : memref<1x128x32xf32, #tpu.memory_space<vmem>>, vector<1x128x32xf32>
      %45 = vector.shape_cast %44 : vector<1x128x32xf32> to vector<128x32xf32>
      %46 = vector.shape_cast %43 : vector<128x32xf32> to vector<1x128x32xf32>
      tpu.vector_store %arg7[%c0_24, %c0_25, %c0_26], %46 {strides = array<i32>} : memref<1x128x32xf32, #tpu.memory_space<vmem>>, vector<1x128x32xf32>,
    } else {
    }
    return
  }
  func.func @transform_0(%arg0: i32, %arg1: i32, %arg2: i32) -> (i32, i32, i32) {
    %c0_i32 = arith.constant 0 : i32
    %c0_i32_0 = arith.constant 0 : i32
    return %arg1, %arg2, %c0_i32 : i32, i32, i32
  }
  func.func @transform_1(%arg0: i32, %arg1: i32, %arg2: i32) -> (i32, i32, i32) {
    %c0_i32 = arith.constant 0 : i32
    %c0_i32_0 = arith.constant 0 : i32
    %c0_i32_1 = arith.constant 0 : i32
    return %arg1, %c0_i32, %c0_i32_0 : i32, i32, i32
  }
  func.func @transform_2(%arg0: i32, %arg1: i32, %arg2: i32) -> (i32, i32) {
    %c0_i32 = arith.constant 0 : i32
    %c0_i32_0 = arith.constant 0 : i32
    %c0_i32_1 = arith.constant 0 : i32
    return %c0_i32, %c0_i32_0 : i32, i32
  }
  func.func @transform_3(%arg0: i32, %arg1: i32, %arg2: i32) -> (i32, i32) {
    %c0_i32 = arith.constant 0 : i32
    %c0_i32_0 = arith.constant 0 : i32
    %c0_i32_1 = arith.constant 0 : i32
    return %c0_i32, %c0_i32_0 : i32, i32
  }
  func.func @transform_4(%arg0: i32, %arg1: i32, %arg2: i32) -> (i32, i32, i32) {
    %c0_i32 = arith.constant 0 : i32
    %c0_i32_0 = arith.constant 0 : i32
    return %arg1, %arg2, %c0_i32 : i32, i32, i32
  }
}

module attributes {stable_mosaic.version = 11 : i64} {
  func.func @_ggemm_bn_act_kernel(%arg0: i32, %arg1: i32, %arg2: i32, %arg3: memref<1x32x512xbf16, #tpu.memory_space<vmem>>, %arg4: memref<1x512x64xbf16, #tpu.memory_space<vmem>>, %arg5: memref<1x64xf32, #tpu.memory_space<vmem>>, %arg6: memref<1x64xf32, #tpu.memory_space<vmem>>, %arg7: memref<1x32x64xf32, #tpu.memory_space<vmem>>, %arg8: memref<1x64xf32, #tpu.memory_space<vmem>>, %arg9: memref<1x64xf32, #tpu.memory_space<vmem>>) attributes {dimension_semantics = [#tpu.dimension_semantics<arbitrary>, #tpu.dimension_semantics<arbitrary>, #tpu.dimension_semantics<arbitrary>], iteration_bounds = array<i64: 2, 1, 1>, scalar_prefetch = 0 : i64, scratch_operands = 2 : i64, tpu.core_type = #tpu.core_type<tc>, window_params = [{transform_indices = @transform_0, window_bounds = array<i64: 1, 32, 512>}, {transform_indices = @transform_1, window_bounds = array<i64: 1, 512, 64>}, {pipeline_mode = #tpu.pipeline_mode<synchronous>, transform_indices = @transform_2, window_bounds = array<i64: 1, 64>}, {pipeline_mode = #tpu.pipeline_mode<synchronous>, transform_indices = @transform_3, window_bounds = array<i64: 1, 64>}, {transform_indices = @transform_4, window_bounds = array<i64: 1, 32, 64>}]} {
    %c0_i32 = arith.constant 0 : i32
    %0 = arith.cmpi eq, %arg1, %c0_i32 : i32
    %c0_i32_0 = arith.constant 0 : i32
    %1 = arith.cmpi eq, %arg2, %c0_i32_0 : i32
    %2 = arith.andi %0, %1 : i1
    %c0 = arith.constant 0 : index
    %c0_1 = arith.constant 0 : index
    %c0_2 = arith.constant 0 : index
    %3 = vector.load %arg3[%c0, %c0_1, %c0_2] : memref<1x32x512xbf16, #tpu.memory_space<vmem>>, vector<1x32x512xbf16>
    %4 = vector.shape_cast %3 : vector<1x32x512xbf16> to vector<32x512xbf16>
    %c0_3 = arith.constant 0 : index
    %c0_4 = arith.constant 0 : index
    %c0_5 = arith.constant 0 : index
    %5 = vector.load %arg4[%c0_3, %c0_4, %c0_5] : memref<1x512x64xbf16, #tpu.memory_space<vmem>>, vector<1x512x64xbf16>
    %6 = vector.shape_cast %5 : vector<1x512x64xbf16> to vector<512x64xbf16>
    %cst = arith.constant dense<0.000000e+00> : vector<32x64xf32>
    %7 = tpu.matmul %4, %6, %cst {dimension_numbers = #tpu.dot_dimension_numbers<[1], [0], [0], [1], [0, 0, 1, 1], [], []>} : vector<32x512xbf16>, vector<512x64xbf16>, vector<32x64xf32> -> vector<32x64xf32>
    %c0_i32_6 = arith.constant 0 : i32
    %8 = arith.cmpi eq, %arg0, %c0_i32_6 : i32
    %9 = arith.andi %8, %2 : i1
    %10 = arith.extui %9 : i1 to i32
    %c0_i32_7 = arith.constant 0 : i32
    %11 = arith.cmpi ne, %10, %c0_i32_7 : i32
    scf.if %11 {
      %cst_11 = arith.constant 0.000000e+00 : f32
      %18 = vector.broadcast %cst_11 : f32 to vector<1x64xf32>
      %c0_12 = arith.constant 0 : index
      %c0_13 = arith.constant 0 : index
      %19 = vector.load %arg8[%c0_12, %c0_13] : memref<1x64xf32, #tpu.memory_space<vmem>>, vector<1x64xf32>
      tpu.vector_store %arg8[%c0_12, %c0_13], %18 {strides = array<i32>} : memref<1x64xf32, #tpu.memory_space<vmem>>, vector<1x64xf32>,
      %cst_14 = arith.constant 0.000000e+00 : f32
      %20 = vector.broadcast %cst_14 : f32 to vector<1x64xf32>
      %c0_15 = arith.constant 0 : index
      %c0_16 = arith.constant 0 : index
      %21 = vector.load %arg9[%c0_15, %c0_16] : memref<1x64xf32, #tpu.memory_space<vmem>>, vector<1x64xf32>
      tpu.vector_store %arg9[%c0_15, %c0_16], %20 {strides = array<i32>} : memref<1x64xf32, #tpu.memory_space<vmem>>, vector<1x64xf32>,
    } else {
    }
    %c0_i32_8 = arith.constant 0 : i32
    %12 = arith.cmpi eq, %arg0, %c0_i32_8 : i32
    %13 = arith.extui %12 : i1 to i32
    %c0_i32_9 = arith.constant 0 : i32
    %14 = arith.cmpi ne, %13, %c0_i32_9 : i32
    scf.if %14 {
      %c0_11 = arith.constant 0 : index
      %c0_12 = arith.constant 0 : index
      %18 = vector.load %arg8[%c0_11, %c0_12] : memref<1x64xf32, #tpu.memory_space<vmem>>, vector<1x64xf32>
      %cst_13 = arith.constant dense<0.000000e+00> : vector<64xf32>
      %19 = vector.multi_reduction <add>, %7, %cst_13 [0] : vector<32x64xf32> to vector<64xf32>
      %20 = vector.shape_cast %19 : vector<64xf32> to vector<1x64xf32>
      %21 = arith.addf %18, %20 : vector<1x64xf32>
      %c0_14 = arith.constant 0 : index
      %c0_15 = arith.constant 0 : index
      %22 = vector.load %arg8[%c0_14, %c0_15] : memref<1x64xf32, #tpu.memory_space<vmem>>, vector<1x64xf32>
      tpu.vector_store %arg8[%c0_14, %c0_15], %21 {strides = array<i32>} : memref<1x64xf32, #tpu.memory_space<vmem>>, vector<1x64xf32>,
      %c0_16 = arith.constant 0 : index
      %c0_17 = arith.constant 0 : index
      %23 = vector.load %arg9[%c0_16, %c0_17] : memref<1x64xf32, #tpu.memory_space<vmem>>, vector<1x64xf32>
      %24 = arith.mulf %7, %7 : vector<32x64xf32>
      %cst_18 = arith.constant dense<0.000000e+00> : vector<64xf32>
      %25 = vector.multi_reduction <add>, %24, %cst_18 [0] : vector<32x64xf32> to vector<64xf32>
      %26 = vector.shape_cast %25 : vector<64xf32> to vector<1x64xf32>
      %27 = arith.addf %23, %26 : vector<1x64xf32>
      %c0_19 = arith.constant 0 : index
      %c0_20 = arith.constant 0 : index
      %28 = vector.load %arg9[%c0_19, %c0_20] : memref<1x64xf32, #tpu.memory_space<vmem>>, vector<1x64xf32>
      tpu.vector_store %arg9[%c0_19, %c0_20], %27 {strides = array<i32>} : memref<1x64xf32, #tpu.memory_space<vmem>>, vector<1x64xf32>,
      %c0_21 = arith.constant 0 : index
      %c0_22 = arith.constant 0 : index
      %c0_23 = arith.constant 0 : index
      %29 = vector.load %arg7[%c0_21, %c0_22, %c0_23] : memref<1x32x64xf32, #tpu.memory_space<vmem>>, vector<1x32x64xf32>
      %30 = vector.shape_cast %29 : vector<1x32x64xf32> to vector<32x64xf32>
      %31 = vector.shape_cast %7 : vector<32x64xf32> to vector<1x32x64xf32>
      tpu.vector_store %arg7[%c0_21, %c0_22, %c0_23], %31 {strides = array<i32>} : memref<1x32x64xf32, #tpu.memory_space<vmem>>, vector<1x32x64xf32>,
    } else {
    }
    %c1_i32 = arith.constant 1 : i32
    %15 = arith.cmpi eq, %arg0, %c1_i32 : i32
    %16 = arith.extui %15 : i1 to i32
    %c0_i32_10 = arith.constant 0 : i32
    %17 = arith.cmpi ne, %16, %c0_i32_10 : i32
    scf.if %17 {
      %c0_11 = arith.constant 0 : index
      %c0_12 = arith.constant 0 : index
      %18 = vector.load %arg8[%c0_11, %c0_12] : memref<1x64xf32, #tpu.memory_space<vmem>>, vector<1x64xf32>
      %cst_13 = arith.constant 3.125000e-02 : f32
      %19 = vector.broadcast %cst_13 : f32 to vector<1x64xf32>
      %20 = arith.mulf %18, %19 : vector<1x64xf32>
      %c0_14 = arith.constant 0 : index
      %c0_15 = arith.constant 0 : index
      %21 = vector.load %arg9[%c0_14, %c0_15] : memref<1x64xf32, #tpu.memory_space<vmem>>, vector<1x64xf32>
      %cst_16 = arith.constant 3.125000e-02 : f32
      %22 = vector.broadcast %cst_16 : f32 to vector<1x64xf32>
      %23 = arith.mulf %21, %22 : vector<1x64xf32>
      %24 = arith.mulf %20, %20 : vector<1x64xf32>
      %25 = arith.subf %23, %24 : vector<1x64xf32>
      %26 = vector.broadcast %20 : vector<1x64xf32> to vector<32x64xf32>
      %27 = arith.subf %7, %26 : vector<32x64xf32>
      %cst_17 = arith.constant 9.99999974E-6 : f32
      %28 = vector.broadcast %cst_17 : f32 to vector<1x64xf32>
      %29 = arith.addf %25, %28 : vector<1x64xf32>
      %30 = math.rsqrt %29 : vector<1x64xf32>
      %31 = vector.broadcast %30 : vector<1x64xf32> to vector<32x64xf32>
      %32 = arith.mulf %27, %31 : vector<32x64xf32>
      %c0_18 = arith.constant 0 : index
      %c0_19 = arith.constant 0 : index
      %33 = vector.load %arg5[%c0_18, %c0_19] : memref<1x64xf32, #tpu.memory_space<vmem>>, vector<1x64xf32>
      %34 = vector.broadcast %33 : vector<1x64xf32> to vector<32x64xf32>
      %35 = arith.mulf %32, %34 : vector<32x64xf32>
      %c0_20 = arith.constant 0 : index
      %c0_21 = arith.constant 0 : index
      %36 = vector.load %arg6[%c0_20, %c0_21] : memref<1x64xf32, #tpu.memory_space<vmem>>, vector<1x64xf32>
      %37 = vector.broadcast %36 : vector<1x64xf32> to vector<32x64xf32>
      %38 = arith.addf %35, %37 : vector<32x64xf32>
      %cst_22 = arith.constant 0.000000e+00 : f32
      %39 = vector.broadcast %cst_22 : f32 to vector<32x64xf32>
      %40 = arith.cmpf ogt, %38, %39 : vector<32x64xf32>
      %cst_23 = arith.constant 2.000000e-01 : f32
      %41 = vector.broadcast %cst_23 : f32 to vector<32x64xf32>
      %42 = arith.mulf %41, %38 : vector<32x64xf32>
      %43 = arith.select %40, %38, %42 : vector<32x64xi1>, vector<32x64xf32>
      %c0_24 = arith.constant 0 : index
      %c0_25 = arith.constant 0 : index
      %c0_26 = arith.constant 0 : index
      %44 = vector.load %arg7[%c0_24, %c0_25, %c0_26] : memref<1x32x64xf32, #tpu.memory_space<vmem>>, vector<1x32x64xf32>
      %45 = vector.shape_cast %44 : vector<1x32x64xf32> to vector<32x64xf32>
      %46 = vector.shape_cast %43 : vector<32x64xf32> to vector<1x32x64xf32>
      tpu.vector_store %arg7[%c0_24, %c0_25, %c0_26], %46 {strides = array<i32>} : memref<1x32x64xf32, #tpu.memory_space<vmem>>, vector<1x32x64xf32>,
    } else {
    }
    return
  }
  func.func @transform_0(%arg0: i32, %arg1: i32, %arg2: i32) -> (i32, i32, i32) {
    %c0_i32 = arith.constant 0 : i32
    %c0_i32_0 = arith.constant 0 : i32
    return %arg1, %arg2, %c0_i32 : i32, i32, i32
  }
  func.func @transform_1(%arg0: i32, %arg1: i32, %arg2: i32) -> (i32, i32, i32) {
    %c0_i32 = arith.constant 0 : i32
    %c0_i32_0 = arith.constant 0 : i32
    %c0_i32_1 = arith.constant 0 : i32
    return %arg1, %c0_i32, %c0_i32_0 : i32, i32, i32
  }
  func.func @transform_2(%arg0: i32, %arg1: i32, %arg2: i32) -> (i32, i32) {
    %c0_i32 = arith.constant 0 : i32
    %c0_i32_0 = arith.constant 0 : i32
    %c0_i32_1 = arith.constant 0 : i32
    return %c0_i32, %c0_i32_0 : i32, i32
  }
  func.func @transform_3(%arg0: i32, %arg1: i32, %arg2: i32) -> (i32, i32) {
    %c0_i32 = arith.constant 0 : i32
    %c0_i32_0 = arith.constant 0 : i32
    %c0_i32_1 = arith.constant 0 : i32
    return %c0_i32, %c0_i32_0 : i32, i32
  }
  func.func @transform_4(%arg0: i32, %arg1: i32, %arg2: i32) -> (i32, i32, i32) {
    %c0_i32 = arith.constant 0 : i32
    %c0_i32_0 = arith.constant 0 : i32
    return %arg1, %arg2, %c0_i32 : i32, i32, i32
  }
}

module attributes {stable_mosaic.version = 11 : i64} {
  func.func @_ggemm_bn_act_kernel(%arg0: i32, %arg1: i32, %arg2: i32, %arg3: memref<1x2x1024xbf16, #tpu.memory_space<vmem>>, %arg4: memref<1x1024x32xbf16, #tpu.memory_space<vmem>>, %arg5: memref<1x32xf32, #tpu.memory_space<vmem>>, %arg6: memref<1x32xf32, #tpu.memory_space<vmem>>, %arg7: memref<1x2x32xf32, #tpu.memory_space<vmem>>, %arg8: memref<1x32xf32, #tpu.memory_space<vmem>>, %arg9: memref<1x32xf32, #tpu.memory_space<vmem>>) attributes {dimension_semantics = [#tpu.dimension_semantics<arbitrary>, #tpu.dimension_semantics<arbitrary>, #tpu.dimension_semantics<arbitrary>], iteration_bounds = array<i64: 2, 1, 1>, scalar_prefetch = 0 : i64, scratch_operands = 2 : i64, tpu.core_type = #tpu.core_type<tc>, window_params = [{transform_indices = @transform_0, window_bounds = array<i64: 1, 2, 1024>}, {transform_indices = @transform_1, window_bounds = array<i64: 1, 1024, 32>}, {pipeline_mode = #tpu.pipeline_mode<synchronous>, transform_indices = @transform_2, window_bounds = array<i64: 1, 32>}, {pipeline_mode = #tpu.pipeline_mode<synchronous>, transform_indices = @transform_3, window_bounds = array<i64: 1, 32>}, {transform_indices = @transform_4, window_bounds = array<i64: 1, 2, 32>}]} {
    %c0_i32 = arith.constant 0 : i32
    %0 = arith.cmpi eq, %arg1, %c0_i32 : i32
    %c0_i32_0 = arith.constant 0 : i32
    %1 = arith.cmpi eq, %arg2, %c0_i32_0 : i32
    %2 = arith.andi %0, %1 : i1
    %c0 = arith.constant 0 : index
    %c0_1 = arith.constant 0 : index
    %c0_2 = arith.constant 0 : index
    %3 = vector.load %arg3[%c0, %c0_1, %c0_2] : memref<1x2x1024xbf16, #tpu.memory_space<vmem>>, vector<1x2x1024xbf16>
    %4 = vector.shape_cast %3 : vector<1x2x1024xbf16> to vector<2x1024xbf16>
    %c0_3 = arith.constant 0 : index
    %c0_4 = arith.constant 0 : index
    %c0_5 = arith.constant 0 : index
    %5 = vector.load %arg4[%c0_3, %c0_4, %c0_5] : memref<1x1024x32xbf16, #tpu.memory_space<vmem>>, vector<1x1024x32xbf16>
    %6 = vector.shape_cast %5 : vector<1x1024x32xbf16> to vector<1024x32xbf16>
    %cst = arith.constant dense<0.000000e+00> : vector<2x32xf32>
    %7 = tpu.matmul %4, %6, %cst {dimension_numbers = #tpu.dot_dimension_numbers<[1], [0], [0], [1], [0, 0, 1, 1], [], []>} : vector<2x1024xbf16>, vector<1024x32xbf16>, vector<2x32xf32> -> vector<2x32xf32>
    %c0_i32_6 = arith.constant 0 : i32
    %8 = arith.cmpi eq, %arg0, %c0_i32_6 : i32
    %9 = arith.andi %8, %2 : i1
    %10 = arith.extui %9 : i1 to i32
    %c0_i32_7 = arith.constant 0 : i32
    %11 = arith.cmpi ne, %10, %c0_i32_7 : i32
    scf.if %11 {
      %cst_11 = arith.constant 0.000000e+00 : f32
      %18 = vector.broadcast %cst_11 : f32 to vector<1x32xf32>
      %c0_12 = arith.constant 0 : index
      %c0_13 = arith.constant 0 : index
      %19 = vector.load %arg8[%c0_12, %c0_13] : memref<1x32xf32, #tpu.memory_space<vmem>>, vector<1x32xf32>
      tpu.vector_store %arg8[%c0_12, %c0_13], %18 {strides = array<i32>} : memref<1x32xf32, #tpu.memory_space<vmem>>, vector<1x32xf32>,
      %cst_14 = arith.constant 0.000000e+00 : f32
      %20 = vector.broadcast %cst_14 : f32 to vector<1x32xf32>
      %c0_15 = arith.constant 0 : index
      %c0_16 = arith.constant 0 : index
      %21 = vector.load %arg9[%c0_15, %c0_16] : memref<1x32xf32, #tpu.memory_space<vmem>>, vector<1x32xf32>
      tpu.vector_store %arg9[%c0_15, %c0_16], %20 {strides = array<i32>} : memref<1x32xf32, #tpu.memory_space<vmem>>, vector<1x32xf32>,
    } else {
    }
    %c0_i32_8 = arith.constant 0 : i32
    %12 = arith.cmpi eq, %arg0, %c0_i32_8 : i32
    %13 = arith.extui %12 : i1 to i32
    %c0_i32_9 = arith.constant 0 : i32
    %14 = arith.cmpi ne, %13, %c0_i32_9 : i32
    scf.if %14 {
      %c0_11 = arith.constant 0 : index
      %c0_12 = arith.constant 0 : index
      %18 = vector.load %arg8[%c0_11, %c0_12] : memref<1x32xf32, #tpu.memory_space<vmem>>, vector<1x32xf32>
      %cst_13 = arith.constant dense<0.000000e+00> : vector<32xf32>
      %19 = vector.multi_reduction <add>, %7, %cst_13 [0] : vector<2x32xf32> to vector<32xf32>
      %20 = vector.shape_cast %19 : vector<32xf32> to vector<1x32xf32>
      %21 = arith.addf %18, %20 : vector<1x32xf32>
      %c0_14 = arith.constant 0 : index
      %c0_15 = arith.constant 0 : index
      %22 = vector.load %arg8[%c0_14, %c0_15] : memref<1x32xf32, #tpu.memory_space<vmem>>, vector<1x32xf32>
      tpu.vector_store %arg8[%c0_14, %c0_15], %21 {strides = array<i32>} : memref<1x32xf32, #tpu.memory_space<vmem>>, vector<1x32xf32>,
      %c0_16 = arith.constant 0 : index
      %c0_17 = arith.constant 0 : index
      %23 = vector.load %arg9[%c0_16, %c0_17] : memref<1x32xf32, #tpu.memory_space<vmem>>, vector<1x32xf32>
      %24 = arith.mulf %7, %7 : vector<2x32xf32>
      %cst_18 = arith.constant dense<0.000000e+00> : vector<32xf32>
      %25 = vector.multi_reduction <add>, %24, %cst_18 [0] : vector<2x32xf32> to vector<32xf32>
      %26 = vector.shape_cast %25 : vector<32xf32> to vector<1x32xf32>
      %27 = arith.addf %23, %26 : vector<1x32xf32>
      %c0_19 = arith.constant 0 : index
      %c0_20 = arith.constant 0 : index
      %28 = vector.load %arg9[%c0_19, %c0_20] : memref<1x32xf32, #tpu.memory_space<vmem>>, vector<1x32xf32>
      tpu.vector_store %arg9[%c0_19, %c0_20], %27 {strides = array<i32>} : memref<1x32xf32, #tpu.memory_space<vmem>>, vector<1x32xf32>,
      %c0_21 = arith.constant 0 : index
      %c0_22 = arith.constant 0 : index
      %c0_23 = arith.constant 0 : index
      %29 = vector.load %arg7[%c0_21, %c0_22, %c0_23] : memref<1x2x32xf32, #tpu.memory_space<vmem>>, vector<1x2x32xf32>
      %30 = vector.shape_cast %29 : vector<1x2x32xf32> to vector<2x32xf32>
      %31 = vector.shape_cast %7 : vector<2x32xf32> to vector<1x2x32xf32>
      tpu.vector_store %arg7[%c0_21, %c0_22, %c0_23], %31 {strides = array<i32>} : memref<1x2x32xf32, #tpu.memory_space<vmem>>, vector<1x2x32xf32>,
    } else {
    }
    %c1_i32 = arith.constant 1 : i32
    %15 = arith.cmpi eq, %arg0, %c1_i32 : i32
    %16 = arith.extui %15 : i1 to i32
    %c0_i32_10 = arith.constant 0 : i32
    %17 = arith.cmpi ne, %16, %c0_i32_10 : i32
    scf.if %17 {
      %c0_11 = arith.constant 0 : index
      %c0_12 = arith.constant 0 : index
      %18 = vector.load %arg8[%c0_11, %c0_12] : memref<1x32xf32, #tpu.memory_space<vmem>>, vector<1x32xf32>
      %cst_13 = arith.constant 5.000000e-01 : f32
      %19 = vector.broadcast %cst_13 : f32 to vector<1x32xf32>
      %20 = arith.mulf %18, %19 : vector<1x32xf32>
      %c0_14 = arith.constant 0 : index
      %c0_15 = arith.constant 0 : index
      %21 = vector.load %arg9[%c0_14, %c0_15] : memref<1x32xf32, #tpu.memory_space<vmem>>, vector<1x32xf32>
      %cst_16 = arith.constant 5.000000e-01 : f32
      %22 = vector.broadcast %cst_16 : f32 to vector<1x32xf32>
      %23 = arith.mulf %21, %22 : vector<1x32xf32>
      %24 = arith.mulf %20, %20 : vector<1x32xf32>
      %25 = arith.subf %23, %24 : vector<1x32xf32>
      %26 = vector.broadcast %20 : vector<1x32xf32> to vector<2x32xf32>
      %27 = arith.subf %7, %26 : vector<2x32xf32>
      %cst_17 = arith.constant 9.99999974E-6 : f32
      %28 = vector.broadcast %cst_17 : f32 to vector<1x32xf32>
      %29 = arith.addf %25, %28 : vector<1x32xf32>
      %30 = math.rsqrt %29 : vector<1x32xf32>
      %31 = vector.broadcast %30 : vector<1x32xf32> to vector<2x32xf32>
      %32 = arith.mulf %27, %31 : vector<2x32xf32>
      %c0_18 = arith.constant 0 : index
      %c0_19 = arith.constant 0 : index
      %33 = vector.load %arg5[%c0_18, %c0_19] : memref<1x32xf32, #tpu.memory_space<vmem>>, vector<1x32xf32>
      %34 = vector.broadcast %33 : vector<1x32xf32> to vector<2x32xf32>
      %35 = arith.mulf %32, %34 : vector<2x32xf32>
      %c0_20 = arith.constant 0 : index
      %c0_21 = arith.constant 0 : index
      %36 = vector.load %arg6[%c0_20, %c0_21] : memref<1x32xf32, #tpu.memory_space<vmem>>, vector<1x32xf32>
      %37 = vector.broadcast %36 : vector<1x32xf32> to vector<2x32xf32>
      %38 = arith.addf %35, %37 : vector<2x32xf32>
      %cst_22 = arith.constant 0.000000e+00 : f32
      %39 = vector.broadcast %cst_22 : f32 to vector<2x32xf32>
      %40 = arith.cmpf ogt, %38, %39 : vector<2x32xf32>
      %cst_23 = arith.constant 2.000000e-01 : f32
      %41 = vector.broadcast %cst_23 : f32 to vector<2x32xf32>
      %42 = arith.mulf %41, %38 : vector<2x32xf32>
      %43 = arith.select %40, %38, %42 : vector<2x32xi1>, vector<2x32xf32>
      %c0_24 = arith.constant 0 : index
      %c0_25 = arith.constant 0 : index
      %c0_26 = arith.constant 0 : index
      %44 = vector.load %arg7[%c0_24, %c0_25, %c0_26] : memref<1x2x32xf32, #tpu.memory_space<vmem>>, vector<1x2x32xf32>
      %45 = vector.shape_cast %44 : vector<1x2x32xf32> to vector<2x32xf32>
      %46 = vector.shape_cast %43 : vector<2x32xf32> to vector<1x2x32xf32>
      tpu.vector_store %arg7[%c0_24, %c0_25, %c0_26], %46 {strides = array<i32>} : memref<1x2x32xf32, #tpu.memory_space<vmem>>, vector<1x2x32xf32>,
    } else {
    }
    return
  }
  func.func @transform_0(%arg0: i32, %arg1: i32, %arg2: i32) -> (i32, i32, i32) {
    %c0_i32 = arith.constant 0 : i32
    %c0_i32_0 = arith.constant 0 : i32
    return %arg1, %arg2, %c0_i32 : i32, i32, i32
  }
  func.func @transform_1(%arg0: i32, %arg1: i32, %arg2: i32) -> (i32, i32, i32) {
    %c0_i32 = arith.constant 0 : i32
    %c0_i32_0 = arith.constant 0 : i32
    %c0_i32_1 = arith.constant 0 : i32
    return %arg1, %c0_i32, %c0_i32_0 : i32, i32, i32
  }
  func.func @transform_2(%arg0: i32, %arg1: i32, %arg2: i32) -> (i32, i32) {
    %c0_i32 = arith.constant 0 : i32
    %c0_i32_0 = arith.constant 0 : i32
    %c0_i32_1 = arith.constant 0 : i32
    return %c0_i32, %c0_i32_0 : i32, i32
  }
  func.func @transform_3(%arg0: i32, %arg1: i32, %arg2: i32) -> (i32, i32) {
    %c0_i32 = arith.constant 0 : i32
    %c0_i32_0 = arith.constant 0 : i32
    %c0_i32_1 = arith.constant 0 : i32
    return %c0_i32, %c0_i32_0 : i32, i32
  }
  func.func @transform_4(%arg0: i32, %arg1: i32, %arg2: i32) -> (i32, i32, i32) {
    %c0_i32 = arith.constant 0 : i32
    %c0_i32_0 = arith.constant 0 : i32
    return %arg1, %arg2, %c0_i32 : i32, i32, i32
  }
}

module attributes {stable_mosaic.version = 11 : i64} {
  func.func @_linear_bias_kernel(%arg0: i32, %arg1: memref<4x32xbf16, #tpu.memory_space<vmem>>, %arg2: memref<32x384xbf16, #tpu.memory_space<vmem>>, %arg3: memref<1x384xf32, #tpu.memory_space<vmem>>, %arg4: memref<4x384xf32, #tpu.memory_space<vmem>>) attributes {dimension_semantics = [#tpu.dimension_semantics<parallel>], iteration_bounds = array<i64: 1>, scalar_prefetch = 0 : i64, scratch_operands = 0 : i64, tpu.core_type = #tpu.core_type<tc>, window_params = [{transform_indices = @transform_0, window_bounds = array<i64: 4, 32>}, {pipeline_mode = #tpu.pipeline_mode<synchronous>, transform_indices = @transform_1, window_bounds = array<i64: 32, 384>}, {pipeline_mode = #tpu.pipeline_mode<synchronous>, transform_indices = @transform_2, window_bounds = array<i64: 1, 384>}, {transform_indices = @transform_3, window_bounds = array<i64: 4, 384>}]} {
    %c0 = arith.constant 0 : index
    %c0_0 = arith.constant 0 : index
    %0 = vector.load %arg1[%c0, %c0_0] : memref<4x32xbf16, #tpu.memory_space<vmem>>, vector<4x32xbf16>
    %c0_1 = arith.constant 0 : index
    %c0_2 = arith.constant 0 : index
    %1 = vector.load %arg2[%c0_1, %c0_2] : memref<32x384xbf16, #tpu.memory_space<vmem>>, vector<32x384xbf16>
    %cst = arith.constant dense<0.000000e+00> : vector<4x384xf32>
    %2 = tpu.matmul %0, %1, %cst {dimension_numbers = #tpu.dot_dimension_numbers<[1], [0], [0], [1], [0, 0, 1, 1], [], []>} : vector<4x32xbf16>, vector<32x384xbf16>, vector<4x384xf32> -> vector<4x384xf32>
    %c0_3 = arith.constant 0 : index
    %c0_4 = arith.constant 0 : index
    %3 = vector.load %arg3[%c0_3, %c0_4] : memref<1x384xf32, #tpu.memory_space<vmem>>, vector<1x384xf32>
    %4 = vector.broadcast %3 : vector<1x384xf32> to vector<4x384xf32>
    %5 = arith.addf %2, %4 : vector<4x384xf32>
    %c0_5 = arith.constant 0 : index
    %c0_6 = arith.constant 0 : index
    %6 = vector.load %arg4[%c0_5, %c0_6] : memref<4x384xf32, #tpu.memory_space<vmem>>, vector<4x384xf32>
    tpu.vector_store %arg4[%c0_5, %c0_6], %5 {strides = array<i32>} : memref<4x384xf32, #tpu.memory_space<vmem>>, vector<4x384xf32>,
    return
  }
  func.func @transform_0(%arg0: i32) -> (i32, i32) {
    %c0_i32 = arith.constant 0 : i32
    %c0_i32_0 = arith.constant 0 : i32
    return %arg0, %c0_i32 : i32, i32
  }
  func.func @transform_1(%arg0: i32) -> (i32, i32) {
    %c0_i32 = arith.constant 0 : i32
    %c0_i32_0 = arith.constant 0 : i32
    %c0_i32_1 = arith.constant 0 : i32
    return %c0_i32, %c0_i32_0 : i32, i32
  }
  func.func @transform_2(%arg0: i32) -> (i32, i32) {
    %c0_i32 = arith.constant 0 : i32
    %c0_i32_0 = arith.constant 0 : i32
    %c0_i32_1 = arith.constant 0 : i32
    return %c0_i32, %c0_i32_0 : i32, i32
  }
  func.func @transform_3(%arg0: i32) -> (i32, i32) {
    %c0_i32 = arith.constant 0 : i32
    %c0_i32_0 = arith.constant 0 : i32
    return %arg0, %c0_i32 : i32, i32
  }
}

module attributes {stable_mosaic.version = 11 : i64} {
  func.func @_gru_seq_kernel(%arg0: i32, %arg1: memref<1x4x384xf32, #tpu.memory_space<vmem>>, %arg2: memref<4x128xf32, #tpu.memory_space<vmem>>, %arg3: memref<4x1xi32, #tpu.memory_space<vmem>>, %arg4: memref<128x384xbf16, #tpu.memory_space<vmem>>, %arg5: memref<1x384xf32, #tpu.memory_space<vmem>>, %arg6: memref<1x4x128xf32, #tpu.memory_space<vmem>>, %arg7: memref<4x128xf32, #tpu.memory_space<vmem>>, %arg8: memref<4x128xf32, #tpu.memory_space<vmem>>) attributes {dimension_semantics = [#tpu.dimension_semantics<arbitrary>], iteration_bounds = array<i64: 9>, scalar_prefetch = 0 : i64, scratch_operands = 1 : i64, tpu.core_type = #tpu.core_type<tc>, window_params = [{transform_indices = @transform_0, window_bounds = array<i64: 1, 4, 384>}, {pipeline_mode = #tpu.pipeline_mode<synchronous>, transform_indices = @transform_1, window_bounds = array<i64: 4, 128>}, {pipeline_mode = #tpu.pipeline_mode<synchronous>, transform_indices = @transform_2, window_bounds = array<i64: 4, 1>}, {pipeline_mode = #tpu.pipeline_mode<synchronous>, transform_indices = @transform_3, window_bounds = array<i64: 128, 384>}, {pipeline_mode = #tpu.pipeline_mode<synchronous>, transform_indices = @transform_4, window_bounds = array<i64: 1, 384>}, {transform_indices = @transform_5, window_bounds = array<i64: 1, 4, 128>}, {pipeline_mode = #tpu.pipeline_mode<synchronous>, transform_indices = @transform_6, window_bounds = array<i64: 4, 128>}]} {
    %c0_i32 = arith.constant 0 : i32
    %0 = arith.cmpi eq, %arg0, %c0_i32 : i32
    %1 = arith.extui %0 : i1 to i32
    %c0_i32_0 = arith.constant 0 : i32
    %2 = arith.cmpi ne, %1, %c0_i32_0 : i32
    scf.if %2 {
      %c0_24 = arith.constant 0 : index
      %c0_25 = arith.constant 0 : index
      %59 = vector.load %arg2[%c0_24, %c0_25] : memref<4x128xf32, #tpu.memory_space<vmem>>, vector<4x128xf32>
      %c0_26 = arith.constant 0 : index
      %c0_27 = arith.constant 0 : index
      %60 = vector.load %arg8[%c0_26, %c0_27] : memref<4x128xf32, #tpu.memory_space<vmem>>, vector<4x128xf32>
      tpu.vector_store %arg8[%c0_26, %c0_27], %59 {strides = array<i32>} : memref<4x128xf32, #tpu.memory_space<vmem>>, vector<4x128xf32>,
    } else {
    }
    %c0 = arith.constant 0 : index
    %c0_1 = arith.constant 0 : index
    %c0_2 = arith.constant 0 : index
    %3 = vector.load %arg1[%c0, %c0_1, %c0_2] : memref<1x4x384xf32, #tpu.memory_space<vmem>>, vector<1x4x384xf32>
    %4 = vector.shape_cast %3 : vector<1x4x384xf32> to vector<4x384xf32>
    %c0_3 = arith.constant 0 : index
    %c0_4 = arith.constant 0 : index
    %5 = vector.load %arg8[%c0_3, %c0_4] : memref<4x128xf32, #tpu.memory_space<vmem>>, vector<4x128xf32>
    %6 = arith.truncf %5 : vector<4x128xf32> to vector<4x128xbf16>
    %c0_5 = arith.constant 0 : index
    %c0_6 = arith.constant 0 : index
    %7 = vector.load %arg4[%c0_5, %c0_6] : memref<128x384xbf16, #tpu.memory_space<vmem>>, vector<128x384xbf16>
    %cst = arith.constant dense<0.000000e+00> : vector<4x384xf32>
    %8 = tpu.matmul %6, %7, %cst {dimension_numbers = #tpu.dot_dimension_numbers<[1], [0], [0], [1], [0, 0, 1, 1], [], []>} : vector<4x128xbf16>, vector<128x384xbf16>, vector<4x384xf32> -> vector<4x384xf32>
    %c0_7 = arith.constant 0 : index
    %c0_8 = arith.constant 0 : index
    %9 = vector.load %arg5[%c0_7, %c0_8] : memref<1x384xf32, #tpu.memory_space<vmem>>, vector<1x384xf32>
    %10 = vector.broadcast %9 : vector<1x384xf32> to vector<4x384xf32>
    %11 = arith.addf %8, %10 : vector<4x384xf32>
    %12 = vector.extract_strided_slice %4 {offsets = [0, 0], sizes = [4, 128], strides = [1, 1]} : vector<4x384xf32> to vector<4x128xf32>
    %13 = vector.extract_strided_slice %11 {offsets = [0, 0], sizes = [4, 128], strides = [1, 1]} : vector<4x384xf32> to vector<4x128xf32>
    %14 = arith.addf %12, %13 : vector<4x128xf32>
    %cst_9 = arith.constant 0.000000e+00 : f32
    %15 = vector.broadcast %cst_9 : f32 to vector<4x128xf32>
    %16 = arith.subf %15, %14 : vector<4x128xf32>
    %17 = math.exp %16 : vector<4x128xf32>
    %cst_10 = arith.constant 1.000000e+00 : f32
    %18 = vector.broadcast %cst_10 : f32 to vector<4x128xf32>
    %19 = arith.addf %18, %17 : vector<4x128xf32>
    %20 = tpu.reciprocal %19 {approx = true} : vector<4x128xf32> -> vector<4x128xf32>
    %21 = vector.extract_strided_slice %4 {offsets = [0, 128], sizes = [4, 128], strides = [1, 1]} : vector<4x384xf32> to vector<4x128xf32>
    %22 = vector.extract_strided_slice %11 {offsets = [0, 128], sizes = [4, 128], strides = [1, 1]} : vector<4x384xf32> to vector<4x128xf32>
    %23 = arith.addf %21, %22 : vector<4x128xf32>
    %cst_11 = arith.constant 0.000000e+00 : f32
    %24 = vector.broadcast %cst_11 : f32 to vector<4x128xf32>
    %25 = arith.subf %24, %23 : vector<4x128xf32>
    %26 = math.exp %25 : vector<4x128xf32>
    %cst_12 = arith.constant 1.000000e+00 : f32
    %27 = vector.broadcast %cst_12 : f32 to vector<4x128xf32>
    %28 = arith.addf %27, %26 : vector<4x128xf32>
    %29 = tpu.reciprocal %28 {approx = true} : vector<4x128xf32> -> vector<4x128xf32>
    %30 = vector.extract_strided_slice %4 {offsets = [0, 256], sizes = [4, 128], strides = [1, 1]} : vector<4x384xf32> to vector<4x128xf32>
    %31 = vector.extract_strided_slice %11 {offsets = [0, 256], sizes = [4, 128], strides = [1, 1]} : vector<4x384xf32> to vector<4x128xf32>
    %32 = arith.mulf %20, %31 : vector<4x128xf32>
    %33 = arith.addf %30, %32 : vector<4x128xf32>
    %34 = math.tanh %33 : vector<4x128xf32>
    %cst_13 = arith.constant 1.000000e+00 : f32
    %35 = vector.broadcast %cst_13 : f32 to vector<4x128xf32>
    %36 = arith.subf %35, %29 : vector<4x128xf32>
    %37 = arith.mulf %36, %34 : vector<4x128xf32>
    %38 = arith.mulf %29, %5 : vector<4x128xf32>
    %39 = arith.addf %37, %38 : vector<4x128xf32>
    %c0_14 = arith.constant 0 : index
    %c0_15 = arith.constant 0 : index
    %40 = vector.load %arg3[%c0_14, %c0_15] : memref<4x1xi32, #tpu.memory_space<vmem>>, vector<4x1xi32>
    %41 = vector.broadcast %arg0 : i32 to vector<4x1xi32>
    %42 = arith.cmpi sgt, %40, %41 : vector<4x1xi32>
    %43 = arith.extui %42 : vector<4x1xi1> to vector<4x1xi32>
    %44 = arith.sitofp %43 : vector<4x1xi32> to vector<4x1xf32>
    %45 = vector.broadcast %44 : vector<4x1xf32> to vector<4x128xf32>
    %46 = arith.mulf %45, %39 : vector<4x128xf32>
    %cst_16 = arith.constant 1.000000e+00 : f32
    %47 = vector.broadcast %cst_16 : f32 to vector<4x1xf32>
    %48 = arith.subf %47, %44 : vector<4x1xf32>
    %49 = vector.broadcast %48 : vector<4x1xf32> to vector<4x128xf32>
    %50 = arith.mulf %49, %5 : vector<4x128xf32>
    %51 = arith.addf %46, %50 : vector<4x128xf32>
    %c0_17 = arith.constant 0 : index
    %c0_18 = arith.constant 0 : index
    %52 = vector.load %arg8[%c0_17, %c0_18] : memref<4x128xf32, #tpu.memory_space<vmem>>, vector<4x128xf32>
    tpu.vector_store %arg8[%c0_17, %c0_18], %51 {strides = array<i32>} : memref<4x128xf32, #tpu.memory_space<vmem>>, vector<4x128xf32>,
    %53 = vector.broadcast %44 : vector<4x1xf32> to vector<4x128xf32>
    %54 = arith.mulf %53, %51 : vector<4x128xf32>
    %c0_19 = arith.constant 0 : index
    %c0_20 = arith.constant 0 : index
    %c0_21 = arith.constant 0 : index
    %55 = vector.load %arg6[%c0_19, %c0_20, %c0_21] : memref<1x4x128xf32, #tpu.memory_space<vmem>>, vector<1x4x128xf32>
    %56 = vector.shape_cast %55 : vector<1x4x128xf32> to vector<4x128xf32>
    %57 = vector.shape_cast %54 : vector<4x128xf32> to vector<1x4x128xf32>
    tpu.vector_store %arg6[%c0_19, %c0_20, %c0_21], %57 {strides = array<i32>} : memref<1x4x128xf32, #tpu.memory_space<vmem>>, vector<1x4x128xf32>,
    %c0_22 = arith.constant 0 : index
    %c0_23 = arith.constant 0 : index
    %58 = vector.load %arg7[%c0_22, %c0_23] : memref<4x128xf32, #tpu.memory_space<vmem>>, vector<4x128xf32>
    tpu.vector_store %arg7[%c0_22, %c0_23], %51 {strides = array<i32>} : memref<4x128xf32, #tpu.memory_space<vmem>>, vector<4x128xf32>,
    return
  }
  func.func @transform_0(%arg0: i32) -> (i32, i32, i32) {
    %c0_i32 = arith.constant 0 : i32
    %c0_i32_0 = arith.constant 0 : i32
    %c0_i32_1 = arith.constant 0 : i32
    return %arg0, %c0_i32, %c0_i32_0 : i32, i32, i32
  }
  func.func @transform_1(%arg0: i32) -> (i32, i32) {
    %c0_i32 = arith.constant 0 : i32
    %c0_i32_0 = arith.constant 0 : i32
    %c0_i32_1 = arith.constant 0 : i32
    return %c0_i32, %c0_i32_0 : i32, i32
  }
  func.func @transform_2(%arg0: i32) -> (i32, i32) {
    %c0_i32 = arith.constant 0 : i32
    %c0_i32_0 = arith.constant 0 : i32
    %c0_i32_1 = arith.constant 0 : i32
    return %c0_i32, %c0_i32_0 : i32, i32
  }
  func.func @transform_3(%arg0: i32) -> (i32, i32) {
    %c0_i32 = arith.constant 0 : i32
    %c0_i32_0 = arith.constant 0 : i32
    %c0_i32_1 = arith.constant 0 : i32
    return %c0_i32, %c0_i32_0 : i32, i32
  }
  func.func @transform_4(%arg0: i32) -> (i32, i32) {
    %c0_i32 = arith.constant 0 : i32
    %c0_i32_0 = arith.constant 0 : i32
    %c0_i32_1 = arith.constant 0 : i32
    return %c0_i32, %c0_i32_0 : i32, i32
  }
  func.func @transform_5(%arg0: i32) -> (i32, i32, i32) {
    %c0_i32 = arith.constant 0 : i32
    %c0_i32_0 = arith.constant 0 : i32
    %c0_i32_1 = arith.constant 0 : i32
    return %arg0, %c0_i32, %c0_i32_0 : i32, i32, i32
  }
  func.func @transform_6(%arg0: i32) -> (i32, i32) {
    %c0_i32 = arith.constant 0 : i32
    %c0_i32_0 = arith.constant 0 : i32
    %c0_i32_1 = arith.constant 0 : i32
    return %c0_i32, %c0_i32_0 : i32, i32
  }
}

module attributes {stable_mosaic.version = 11 : i64} {
  func.func @_linear_bias_kernel(%arg0: i32, %arg1: memref<32x32xbf16, #tpu.memory_space<vmem>>, %arg2: memref<32x128xbf16, #tpu.memory_space<vmem>>, %arg3: memref<1x128xf32, #tpu.memory_space<vmem>>, %arg4: memref<32x128xf32, #tpu.memory_space<vmem>>) attributes {dimension_semantics = [#tpu.dimension_semantics<parallel>], iteration_bounds = array<i64: 1>, scalar_prefetch = 0 : i64, scratch_operands = 0 : i64, tpu.core_type = #tpu.core_type<tc>, window_params = [{transform_indices = @transform_0, window_bounds = array<i64: 32, 32>}, {pipeline_mode = #tpu.pipeline_mode<synchronous>, transform_indices = @transform_1, window_bounds = array<i64: 32, 128>}, {pipeline_mode = #tpu.pipeline_mode<synchronous>, transform_indices = @transform_2, window_bounds = array<i64: 1, 128>}, {transform_indices = @transform_3, window_bounds = array<i64: 32, 128>}]} {
    %c0 = arith.constant 0 : index
    %c0_0 = arith.constant 0 : index
    %0 = vector.load %arg1[%c0, %c0_0] : memref<32x32xbf16, #tpu.memory_space<vmem>>, vector<32x32xbf16>
    %c0_1 = arith.constant 0 : index
    %c0_2 = arith.constant 0 : index
    %1 = vector.load %arg2[%c0_1, %c0_2] : memref<32x128xbf16, #tpu.memory_space<vmem>>, vector<32x128xbf16>
    %cst = arith.constant dense<0.000000e+00> : vector<32x128xf32>
    %2 = tpu.matmul %0, %1, %cst {dimension_numbers = #tpu.dot_dimension_numbers<[1], [0], [0], [1], [0, 0, 1, 1], [], []>} : vector<32x32xbf16>, vector<32x128xbf16>, vector<32x128xf32> -> vector<32x128xf32>
    %c0_3 = arith.constant 0 : index
    %c0_4 = arith.constant 0 : index
    %3 = vector.load %arg3[%c0_3, %c0_4] : memref<1x128xf32, #tpu.memory_space<vmem>>, vector<1x128xf32>
    %4 = vector.broadcast %3 : vector<1x128xf32> to vector<32x128xf32>
    %5 = arith.addf %2, %4 : vector<32x128xf32>
    %c0_5 = arith.constant 0 : index
    %c0_6 = arith.constant 0 : index
    %6 = vector.load %arg4[%c0_5, %c0_6] : memref<32x128xf32, #tpu.memory_space<vmem>>, vector<32x128xf32>
    tpu.vector_store %arg4[%c0_5, %c0_6], %5 {strides = array<i32>} : memref<32x128xf32, #tpu.memory_space<vmem>>, vector<32x128xf32>,
    return
  }
  func.func @transform_0(%arg0: i32) -> (i32, i32) {
    %c0_i32 = arith.constant 0 : i32
    %c0_i32_0 = arith.constant 0 : i32
    return %arg0, %c0_i32 : i32, i32
  }
  func.func @transform_1(%arg0: i32) -> (i32, i32) {
    %c0_i32 = arith.constant 0 : i32
    %c0_i32_0 = arith.constant 0 : i32
    %c0_i32_1 = arith.constant 0 : i32
    return %c0_i32, %c0_i32_0 : i32, i32
  }
  func.func @transform_2(%arg0: i32) -> (i32, i32) {
    %c0_i32 = arith.constant 0 : i32
    %c0_i32_0 = arith.constant 0 : i32
    %c0_i32_1 = arith.constant 0 : i32
    return %c0_i32, %c0_i32_0 : i32, i32
  }
  func.func @transform_3(%arg0: i32) -> (i32, i32) {
    %c0_i32 = arith.constant 0 : i32
    %c0_i32_0 = arith.constant 0 : i32
    return %arg0, %c0_i32 : i32, i32
  }
}

module attributes {stable_mosaic.version = 11 : i64} {
  func.func @_ggemm_bn_act_kernel(%arg0: i32, %arg1: i32, %arg2: i32, %arg3: memref<1x512x64xbf16, #tpu.memory_space<vmem>>, %arg4: memref<1x64x8xbf16, #tpu.memory_space<vmem>>, %arg5: memref<1x8xf32, #tpu.memory_space<vmem>>, %arg6: memref<1x8xf32, #tpu.memory_space<vmem>>, %arg7: memref<1x512x8xf32, #tpu.memory_space<vmem>>, %arg8: memref<1x8xf32, #tpu.memory_space<vmem>>, %arg9: memref<1x8xf32, #tpu.memory_space<vmem>>) attributes {dimension_semantics = [#tpu.dimension_semantics<arbitrary>, #tpu.dimension_semantics<arbitrary>, #tpu.dimension_semantics<arbitrary>], iteration_bounds = array<i64: 2, 4, 1>, scalar_prefetch = 0 : i64, scratch_operands = 2 : i64, tpu.core_type = #tpu.core_type<tc>, window_params = [{transform_indices = @transform_0, window_bounds = array<i64: 1, 512, 64>}, {transform_indices = @transform_1, window_bounds = array<i64: 1, 64, 8>}, {pipeline_mode = #tpu.pipeline_mode<synchronous>, transform_indices = @transform_2, window_bounds = array<i64: 1, 8>}, {pipeline_mode = #tpu.pipeline_mode<synchronous>, transform_indices = @transform_3, window_bounds = array<i64: 1, 8>}, {transform_indices = @transform_4, window_bounds = array<i64: 1, 512, 8>}]} {
    %c0_i32 = arith.constant 0 : i32
    %0 = arith.cmpi eq, %arg1, %c0_i32 : i32
    %c0_i32_0 = arith.constant 0 : i32
    %1 = arith.cmpi eq, %arg2, %c0_i32_0 : i32
    %2 = arith.andi %0, %1 : i1
    %c0 = arith.constant 0 : index
    %c0_1 = arith.constant 0 : index
    %c0_2 = arith.constant 0 : index
    %3 = vector.load %arg3[%c0, %c0_1, %c0_2] : memref<1x512x64xbf16, #tpu.memory_space<vmem>>, vector<1x512x64xbf16>
    %4 = vector.shape_cast %3 : vector<1x512x64xbf16> to vector<512x64xbf16>
    %c0_3 = arith.constant 0 : index
    %c0_4 = arith.constant 0 : index
    %c0_5 = arith.constant 0 : index
    %5 = vector.load %arg4[%c0_3, %c0_4, %c0_5] : memref<1x64x8xbf16, #tpu.memory_space<vmem>>, vector<1x64x8xbf16>
    %6 = vector.shape_cast %5 : vector<1x64x8xbf16> to vector<64x8xbf16>
    %cst = arith.constant dense<0.000000e+00> : vector<512x8xf32>
    %7 = tpu.matmul %4, %6, %cst {dimension_numbers = #tpu.dot_dimension_numbers<[1], [0], [0], [1], [0, 0, 1, 1], [], []>} : vector<512x64xbf16>, vector<64x8xbf16>, vector<512x8xf32> -> vector<512x8xf32>
    %c0_i32_6 = arith.constant 0 : i32
    %8 = arith.cmpi eq, %arg0, %c0_i32_6 : i32
    %9 = arith.andi %8, %2 : i1
    %10 = arith.extui %9 : i1 to i32
    %c0_i32_7 = arith.constant 0 : i32
    %11 = arith.cmpi ne, %10, %c0_i32_7 : i32
    scf.if %11 {
      %cst_11 = arith.constant 0.000000e+00 : f32
      %18 = vector.broadcast %cst_11 : f32 to vector<1x8xf32>
      %c0_12 = arith.constant 0 : index
      %c0_13 = arith.constant 0 : index
      %19 = vector.load %arg8[%c0_12, %c0_13] : memref<1x8xf32, #tpu.memory_space<vmem>>, vector<1x8xf32>
      tpu.vector_store %arg8[%c0_12, %c0_13], %18 {strides = array<i32>} : memref<1x8xf32, #tpu.memory_space<vmem>>, vector<1x8xf32>,
      %cst_14 = arith.constant 0.000000e+00 : f32
      %20 = vector.broadcast %cst_14 : f32 to vector<1x8xf32>
      %c0_15 = arith.constant 0 : index
      %c0_16 = arith.constant 0 : index
      %21 = vector.load %arg9[%c0_15, %c0_16] : memref<1x8xf32, #tpu.memory_space<vmem>>, vector<1x8xf32>
      tpu.vector_store %arg9[%c0_15, %c0_16], %20 {strides = array<i32>} : memref<1x8xf32, #tpu.memory_space<vmem>>, vector<1x8xf32>,
    } else {
    }
    %c0_i32_8 = arith.constant 0 : i32
    %12 = arith.cmpi eq, %arg0, %c0_i32_8 : i32
    %13 = arith.extui %12 : i1 to i32
    %c0_i32_9 = arith.constant 0 : i32
    %14 = arith.cmpi ne, %13, %c0_i32_9 : i32
    scf.if %14 {
      %c0_11 = arith.constant 0 : index
      %c0_12 = arith.constant 0 : index
      %18 = vector.load %arg8[%c0_11, %c0_12] : memref<1x8xf32, #tpu.memory_space<vmem>>, vector<1x8xf32>
      %cst_13 = arith.constant dense<0.000000e+00> : vector<8xf32>
      %19 = vector.multi_reduction <add>, %7, %cst_13 [0] : vector<512x8xf32> to vector<8xf32>
      %20 = vector.shape_cast %19 : vector<8xf32> to vector<1x8xf32>
      %21 = arith.addf %18, %20 : vector<1x8xf32>
      %c0_14 = arith.constant 0 : index
      %c0_15 = arith.constant 0 : index
      %22 = vector.load %arg8[%c0_14, %c0_15] : memref<1x8xf32, #tpu.memory_space<vmem>>, vector<1x8xf32>
      tpu.vector_store %arg8[%c0_14, %c0_15], %21 {strides = array<i32>} : memref<1x8xf32, #tpu.memory_space<vmem>>, vector<1x8xf32>,
      %c0_16 = arith.constant 0 : index
      %c0_17 = arith.constant 0 : index
      %23 = vector.load %arg9[%c0_16, %c0_17] : memref<1x8xf32, #tpu.memory_space<vmem>>, vector<1x8xf32>
      %24 = arith.mulf %7, %7 : vector<512x8xf32>
      %cst_18 = arith.constant dense<0.000000e+00> : vector<8xf32>
      %25 = vector.multi_reduction <add>, %24, %cst_18 [0] : vector<512x8xf32> to vector<8xf32>
      %26 = vector.shape_cast %25 : vector<8xf32> to vector<1x8xf32>
      %27 = arith.addf %23, %26 : vector<1x8xf32>
      %c0_19 = arith.constant 0 : index
      %c0_20 = arith.constant 0 : index
      %28 = vector.load %arg9[%c0_19, %c0_20] : memref<1x8xf32, #tpu.memory_space<vmem>>, vector<1x8xf32>
      tpu.vector_store %arg9[%c0_19, %c0_20], %27 {strides = array<i32>} : memref<1x8xf32, #tpu.memory_space<vmem>>, vector<1x8xf32>,
      %c0_21 = arith.constant 0 : index
      %c0_22 = arith.constant 0 : index
      %c0_23 = arith.constant 0 : index
      %29 = vector.load %arg7[%c0_21, %c0_22, %c0_23] : memref<1x512x8xf32, #tpu.memory_space<vmem>>, vector<1x512x8xf32>
      %30 = vector.shape_cast %29 : vector<1x512x8xf32> to vector<512x8xf32>
      %31 = vector.shape_cast %7 : vector<512x8xf32> to vector<1x512x8xf32>
      tpu.vector_store %arg7[%c0_21, %c0_22, %c0_23], %31 {strides = array<i32>} : memref<1x512x8xf32, #tpu.memory_space<vmem>>, vector<1x512x8xf32>,
    } else {
    }
    %c1_i32 = arith.constant 1 : i32
    %15 = arith.cmpi eq, %arg0, %c1_i32 : i32
    %16 = arith.extui %15 : i1 to i32
    %c0_i32_10 = arith.constant 0 : i32
    %17 = arith.cmpi ne, %16, %c0_i32_10 : i32
    scf.if %17 {
      %c0_11 = arith.constant 0 : index
      %c0_12 = arith.constant 0 : index
      %18 = vector.load %arg8[%c0_11, %c0_12] : memref<1x8xf32, #tpu.memory_space<vmem>>, vector<1x8xf32>
      %cst_13 = arith.constant 4.8828125E-4 : f32
      %19 = vector.broadcast %cst_13 : f32 to vector<1x8xf32>
      %20 = arith.mulf %18, %19 : vector<1x8xf32>
      %c0_14 = arith.constant 0 : index
      %c0_15 = arith.constant 0 : index
      %21 = vector.load %arg9[%c0_14, %c0_15] : memref<1x8xf32, #tpu.memory_space<vmem>>, vector<1x8xf32>
      %cst_16 = arith.constant 4.8828125E-4 : f32
      %22 = vector.broadcast %cst_16 : f32 to vector<1x8xf32>
      %23 = arith.mulf %21, %22 : vector<1x8xf32>
      %24 = arith.mulf %20, %20 : vector<1x8xf32>
      %25 = arith.subf %23, %24 : vector<1x8xf32>
      %26 = vector.broadcast %20 : vector<1x8xf32> to vector<512x8xf32>
      %27 = arith.subf %7, %26 : vector<512x8xf32>
      %cst_17 = arith.constant 9.99999974E-6 : f32
      %28 = vector.broadcast %cst_17 : f32 to vector<1x8xf32>
      %29 = arith.addf %25, %28 : vector<1x8xf32>
      %30 = math.rsqrt %29 : vector<1x8xf32>
      %31 = vector.broadcast %30 : vector<1x8xf32> to vector<512x8xf32>
      %32 = arith.mulf %27, %31 : vector<512x8xf32>
      %c0_18 = arith.constant 0 : index
      %c0_19 = arith.constant 0 : index
      %33 = vector.load %arg5[%c0_18, %c0_19] : memref<1x8xf32, #tpu.memory_space<vmem>>, vector<1x8xf32>
      %34 = vector.broadcast %33 : vector<1x8xf32> to vector<512x8xf32>
      %35 = arith.mulf %32, %34 : vector<512x8xf32>
      %c0_20 = arith.constant 0 : index
      %c0_21 = arith.constant 0 : index
      %36 = vector.load %arg6[%c0_20, %c0_21] : memref<1x8xf32, #tpu.memory_space<vmem>>, vector<1x8xf32>
      %37 = vector.broadcast %36 : vector<1x8xf32> to vector<512x8xf32>
      %38 = arith.addf %35, %37 : vector<512x8xf32>
      %cst_22 = arith.constant 0.000000e+00 : f32
      %39 = vector.broadcast %cst_22 : f32 to vector<512x8xf32>
      %40 = arith.maximumf %38, %39 : vector<512x8xf32>
      %c0_23 = arith.constant 0 : index
      %c0_24 = arith.constant 0 : index
      %c0_25 = arith.constant 0 : index
      %41 = vector.load %arg7[%c0_23, %c0_24, %c0_25] : memref<1x512x8xf32, #tpu.memory_space<vmem>>, vector<1x512x8xf32>
      %42 = vector.shape_cast %41 : vector<1x512x8xf32> to vector<512x8xf32>
      %43 = vector.shape_cast %40 : vector<512x8xf32> to vector<1x512x8xf32>
      tpu.vector_store %arg7[%c0_23, %c0_24, %c0_25], %43 {strides = array<i32>} : memref<1x512x8xf32, #tpu.memory_space<vmem>>, vector<1x512x8xf32>,
    } else {
    }
    return
  }
  func.func @transform_0(%arg0: i32, %arg1: i32, %arg2: i32) -> (i32, i32, i32) {
    %c0_i32 = arith.constant 0 : i32
    %c0_i32_0 = arith.constant 0 : i32
    return %arg1, %arg2, %c0_i32 : i32, i32, i32
  }
  func.func @transform_1(%arg0: i32, %arg1: i32, %arg2: i32) -> (i32, i32, i32) {
    %c0_i32 = arith.constant 0 : i32
    %c0_i32_0 = arith.constant 0 : i32
    %c0_i32_1 = arith.constant 0 : i32
    return %arg1, %c0_i32, %c0_i32_0 : i32, i32, i32
  }
  func.func @transform_2(%arg0: i32, %arg1: i32, %arg2: i32) -> (i32, i32) {
    %c0_i32 = arith.constant 0 : i32
    %c0_i32_0 = arith.constant 0 : i32
    %c0_i32_1 = arith.constant 0 : i32
    return %c0_i32, %c0_i32_0 : i32, i32
  }
  func.func @transform_3(%arg0: i32, %arg1: i32, %arg2: i32) -> (i32, i32) {
    %c0_i32 = arith.constant 0 : i32
    %c0_i32_0 = arith.constant 0 : i32
    %c0_i32_1 = arith.constant 0 : i32
    return %c0_i32, %c0_i32_0 : i32, i32
  }
  func.func @transform_4(%arg0: i32, %arg1: i32, %arg2: i32) -> (i32, i32, i32) {
    %c0_i32 = arith.constant 0 : i32
    %c0_i32_0 = arith.constant 0 : i32
    return %arg1, %arg2, %c0_i32 : i32, i32, i32
  }
}

module attributes {stable_mosaic.version = 11 : i64} {
  func.func @_ggemm_act_kernel(%arg0: i32, %arg1: i32, %arg2: memref<1x512x32xbf16, #tpu.memory_space<vmem>>, %arg3: memref<1x32x3xbf16, #tpu.memory_space<vmem>>, %arg4: memref<1x512x3xf32, #tpu.memory_space<vmem>>) attributes {dimension_semantics = [#tpu.dimension_semantics<parallel>, #tpu.dimension_semantics<parallel>], iteration_bounds = array<i64: 4, 4>, scalar_prefetch = 0 : i64, scratch_operands = 0 : i64, tpu.core_type = #tpu.core_type<tc>, window_params = [{transform_indices = @transform_0, window_bounds = array<i64: 1, 512, 32>}, {transform_indices = @transform_1, window_bounds = array<i64: 1, 32, 3>}, {transform_indices = @transform_2, window_bounds = array<i64: 1, 512, 3>}]} {
    %c0 = arith.constant 0 : index
    %c0_0 = arith.constant 0 : index
    %c0_1 = arith.constant 0 : index
    %0 = vector.load %arg2[%c0, %c0_0, %c0_1] : memref<1x512x32xbf16, #tpu.memory_space<vmem>>, vector<1x512x32xbf16>
    %1 = vector.shape_cast %0 : vector<1x512x32xbf16> to vector<512x32xbf16>
    %c0_2 = arith.constant 0 : index
    %c0_3 = arith.constant 0 : index
    %c0_4 = arith.constant 0 : index
    %2 = vector.load %arg3[%c0_2, %c0_3, %c0_4] : memref<1x32x3xbf16, #tpu.memory_space<vmem>>, vector<1x32x3xbf16>
    %3 = vector.shape_cast %2 : vector<1x32x3xbf16> to vector<32x3xbf16>
    %cst = arith.constant dense<0.000000e+00> : vector<512x3xf32>
    %4 = tpu.matmul %1, %3, %cst {dimension_numbers = #tpu.dot_dimension_numbers<[1], [0], [0], [1], [0, 0, 1, 1], [], []>} : vector<512x32xbf16>, vector<32x3xbf16>, vector<512x3xf32> -> vector<512x3xf32>
    %5 = math.tanh %4 : vector<512x3xf32>
    %c0_5 = arith.constant 0 : index
    %c0_6 = arith.constant 0 : index
    %c0_7 = arith.constant 0 : index
    %6 = vector.load %arg4[%c0_5, %c0_6, %c0_7] : memref<1x512x3xf32, #tpu.memory_space<vmem>>, vector<1x512x3xf32>
    %7 = vector.shape_cast %6 : vector<1x512x3xf32> to vector<512x3xf32>
    %8 = vector.shape_cast %5 : vector<512x3xf32> to vector<1x512x3xf32>
    tpu.vector_store %arg4[%c0_5, %c0_6, %c0_7], %8 {strides = array<i32>} : memref<1x512x3xf32, #tpu.memory_space<vmem>>, vector<1x512x3xf32>,
    return
  }
  func.func @transform_0(%arg0: i32, %arg1: i32) -> (i32, i32, i32) {
    %c0_i32 = arith.constant 0 : i32
    %c0_i32_0 = arith.constant 0 : i32
    return %arg0, %arg1, %c0_i32 : i32, i32, i32
  }
  func.func @transform_1(%arg0: i32, %arg1: i32) -> (i32, i32, i32) {
    %c0_i32 = arith.constant 0 : i32
    %c0_i32_0 = arith.constant 0 : i32
    %c0_i32_1 = arith.constant 0 : i32
    return %arg0, %c0_i32, %c0_i32_0 : i32, i32, i32
  }
  func.func @transform_2(%arg0: i32, %arg1: i32) -> (i32, i32, i32) {
    %c0_i32 = arith.constant 0 : i32
    %c0_i32_0 = arith.constant 0 : i32
    return %arg0, %arg1, %c0_i32 : i32, i32, i32
  }
}

</mosaic_0001>

<bundles_post_ra>
// kernel: neg.1
= control target key start
LH: loop header
LB: loop body
LE: loop exit
PB: predicated region body
PF: predicated region fallthrough
CT: control target
= control target key end

     0   :  { %2 = vsyncpa [#allocation1], 0  ;;  %s44_s6 = smov [#allocation0]   ;;  %s70_s0 = inlined_call_operand.hbm [shape: s32[2], index: 0, kind: input, shape index: {}]   ;;  %s71_s1 = inlined_call_operand.vmem [shape: s32[2], index: 1, kind: output, shape index: {}]  }
   0x1   :  { %s7_s7 = sshll.u32 %s44_s6, 4  ;;  %s20_s10 = scalar_lea.hbm %s70_s0, 16  ;;  %s8_s7 = int_to_ptr.vmem [resolvable:$true] %s7_s7 }
   0x2   :  { %p21_p0 = scmp.ne.s32.totalorder %s70_s0, %s20_s10  ;;  %p24_p1 = scmp.lt.u32.totalorder %s20_s10, %s70_s0 }
   0x4   :  { %p26_p2 = pnand %p24_p1, %p21_p0 }
   0x6   :  { %29 = shalt.err (!%p26_p2)
}
   0x7   :  { %s30_s15 = scalar_lea.vmem %s8_s7, 16  ;;  %s34_s16 = scalar_lea.vmem %s8_s7, 32 }
   0x8   :  { %p31_p3 = scmp.ne.s32.totalorder %s8_s7, %s30_s15  ;;  %p35_p4 = scmp.lt.s32.totalorder %s8_s7, %s8_s7 }
   0x9   :  { %p36_p5 = scmp.lt.s32.totalorder %s34_s16, %s30_s15 }
   0xb   :  { %p37_p6 = por %p36_p5, %p35_p4 }
   0xd   :  { %p38_p7 = pnand %p37_p6, %p31_p3 }
   0xf   :  { %41 = shalt.err (!%p38_p7)
}
  0x10   :  { %10 = dma.hbm_to_vmem [thread:$0]  %s70_s0, 16, %s8_s7, [#allocation1]  }
  0x11   :  { %42 = dma.done.wait [#allocation1], 16  }
  0x12   :  { %43 = vsyncadd [#allocation1], 4294967280  ;;  %v12_v0 = vld [vmem:[#allocation0] sm:$0x1] }
  0x13   :  { %v15_v1 = vsub.s32 0, %v12_v0 }
  0x15   :  { %17 = vst [vmem:[%s71_s1] sm:$0x1] %v15_v1 }
  0x16   :  { %18 = vsyncpa [#allocation1], 1 }

// kernel: coupled_vae_forward.39
= control target key start
LH: loop header
LB: loop body
LE: loop exit
PB: predicated region body
PF: predicated region fallthrough
CT: control target
= control target key end

     0   :  { %8 = vsyncpa [#allocation3], 0  ;;  %s247_s12 = smov [#allocation2]   ;;  %s322_s0 = inlined_call_operand.vmem [shape: bf16[16,32], index: 0, kind: input, shape index: {}]   ;;  %s323_s1 = inlined_call_operand.vmem [shape: bf16[32,384], index: 1, kind: input, shape index: {}]   ;;  %s324_s2 = inlined_call_operand.hbm [shape: f32[1,384], index: 2, kind: input, shape index: {}]   ;;  %s325_s3 = inlined_call_operand.vmem [shape: f32[16,384], index: 3, kind: output, shape index: {}]  }
   0x1   :  { %s19_s13 = sshll.u32 %s247_s12, 4  ;;  %s223_s16 = scalar_lea.hbm %s324_s2, 48  ;;  %s20_s13 = int_to_ptr.vmem [resolvable:$true] %s19_s13 }
   0x2   :  { %p224_p0 = scmp.ne.s32.totalorder %s324_s2, %s223_s16  ;;  %p227_p1 = scmp.lt.u32.totalorder %s223_s16, %s324_s2 }
   0x4   :  { %p229_p2 = pnand %p227_p1, %p224_p0 }
   0x6   :  { %232 = shalt.err (!%p229_p2)
}
   0x7   :  { %s233_s21 = scalar_lea.vmem %s20_s13, 48  ;;  %s237_s22 = scalar_lea.vmem %s20_s13, 64 }
   0x8   :  { %p234_p3 = scmp.ne.s32.totalorder %s20_s13, %s233_s21  ;;  %p238_p4 = scmp.lt.s32.totalorder %s20_s13, %s20_s13 }
   0x9   :  { %p239_p5 = scmp.lt.s32.totalorder %s237_s22, %s233_s21 }
   0xb   :  { %p240_p6 = por %p239_p5, %p238_p4 }
   0xd   :  { %p241_p7 = pnand %p240_p6, %p234_p3 }
   0xf   :  { %244 = shalt.err (!%p241_p7)
}
  0x10   :  { %22 = dma.hbm_to_vmem [thread:$0]  %s324_s2, 48, %s20_s13, [#allocation3]  }
  0x11   :  { %245 = dma.done.wait [#allocation3], 48  }
  0x12   :  { %246 = vsyncadd [#allocation3], 4294967248  ;;  %v248_v0 = vmov 0.0   ;;  %vm249_vm0 = vmmov 0   ;;  %v250_v1 = vmov 0   ;;  %v222_v8 = vld [vmem:[%s322_s0] sm:$0xff]   ;;  %v39_v9 = vlaneseq }
  0x13   :  { %202 = vmatprep.subr.bf16.mxu1 %v248_v0  ;;  %206 = vmatprep.mubr.msk.bf16.mxu1 %vm249_vm0, %v248_v0  ;;  %v214_v2 = vld [vmem:[%s323_s1 + $0x4] ss:$12 sps:$4 sm:$0xff]   ;;  %v216_v3 = vld [vmem:[%s323_s1 + $0x8] ss:$12 sps:$4 sm:$0xff]   ;;  %v217_v4 = vld [vmem:[%s323_s1] ss:$12 sps:$4 sm:$0xff]  }
  0x14   :  { %127 = vmatprep.mubr.bf16.mxu0 %v250_v1  ;;  %95 = vmatprep.subr.bf16.mxu0 %v214_v2  ;;  %v218_v5 = vld [vmem:[%s323_s1 + $0x1c] ss:$12 sps:$4 sm:$0xff]   ;;  %v220_v6 = vld [vmem:[%s323_s1 + $0x20] ss:$12 sps:$4 sm:$0xff]   ;;  %v221_v7 = vld [vmem:[%s323_s1 + $0x18] ss:$12 sps:$4 sm:$0xff]  }
  0x15   :  { %203 = vmatpush3.bf16.msra.mxu1 %v216_v3  ;;  %96 = vmatpush1.bf16.msra.mxu0 %v217_v4  ;;  %vm91_vm1 = vcmask 261120   ;;  %v40_v10 = vshrl.u32 %v39_v9, 7  ;;  %v37_v12 = vld [vmem:[#allocation2] sm:$0x7] }
  0x16   :  { %204 = vmatprep.subr.bf16.mxu1 %v248_v0  ;;  %97 = vmatprep.subr.bf16.mxu0 %v218_v5 }
  0x17   :  { %v49_v11 = vsub.s32 2, %v40_v10  ;;  %v41_v13 = vsub.s32 0, %v40_v10  ;;  %v45_v14 = vsub.s32 1, %v40_v10 }
  0x19   :  { %205 = vmatpush3.bf16.msra.mxu1 %v220_v6  ;;  %98 = vmatpush1.bf16.msra.mxu0 %v221_v7  ;;  %v50_v15 = vrot.slane %v37_v12, %v49_v11  ;;  %v42_v16 = vrot.slane %v37_v12, %v41_v13  ;;  %v46_v17 = vrot.slane %v37_v12, %v45_v14 }
  0x1c   :  { %207 = vmatmul.mubr.msk.bf16.vlgmr.msra.gmra.mrb[0].mxu1 %vm91_vm1, %v222_v8  ;;  %197 = vmatmul.mubr.msk.bf16.vlgmr.msra.gmra.mrb[0].mxu0 %vm91_vm1, %v222_v8 }
  0xef   :  { %v172_v18 = vpop.f32.mrb[0].mxu1  ;;  %v129_v20 = vpop.f32.mrb[0].mxu0 }
  0xf0   :  { %v173_v19 = vadd.f32 %v172_v18, %v50_v15  ;;  %v208_v21 = vpop.f32.mrb[1].mxu1  ;;  %v130_v22 = vadd.f32 %v129_v20, %v42_v16  ;;  %v131_v23 = vpop.f32.mrb[1].mxu0 }
  0xf1   :  { %v175_v24 = vpop.f32.mrb[2].mxu1  ;;  %v132_v25 = vadd.f32 %v131_v23, %v46_v17  ;;  %v133_v27 = vpop.f32.mrb[2].mxu0 }
  0xf2   :  { %181 = vst [vmem:[%s325_s3 + $0x10] sm:$0xff] %v173_v19  ;;  %v176_v26 = vadd.f32 %v175_v24, %v50_v15  ;;  %v209_v28 = vpop.f32.mrb[3].mxu1  ;;  %179 = vst [vmem:[%s325_s3] sm:$0xff] %v130_v22  ;;  %v134_v29 = vadd.f32 %v133_v27, %v42_v16  ;;  %v135_v30 = vpop.f32.mrb[3].mxu0 }
  0xf3   :  { %180 = vst [vmem:[%s325_s3 + $0x8] sm:$0xff] %v132_v25  ;;  %v136_v31 = vadd.f32 %v135_v30, %v46_v17 }
  0xf4   :  { %184 = vst [vmem:[%s325_s3 + $0x28] sm:$0xff] %v176_v26  ;;  %182 = vst [vmem:[%s325_s3 + $0x18] sm:$0xff] %v134_v29 }
  0xf5   :  { %183 = vst [vmem:[%s325_s3 + $0x20] sm:$0xff] %v136_v31 }
  0xf6   :  { %189 = vsyncpa [#allocation3], 1 }

// kernel: coupled_vae_forward.32
= control target key start
LH: loop header
LB: loop body
LE: loop exit
PB: predicated region body
PF: predicated region fallthrough
CT: control target
= control target key end

     0   :  { %12 = vsyncpa [#allocation4], 0  ;;  %s1112_s0 = inlined_call_operand.vmem [shape: f32[8,2,384], index: 0, kind: input, shape index: {}]   ;;  %s1113_s1 = inlined_call_operand.vmem [shape: f32[2,128], index: 1, kind: input, shape index: {}]   ;;  %s1114_s2 = inlined_call_operand.vmem [shape: s32[2,1], index: 2, kind: input, shape index: {}]   ;;  %s1115_s3 = inlined_call_operand.vmem [shape: bf16[128,384], index: 3, kind: input, shape index: {}]   ;;  %s1116_s4 = inlined_call_operand.vmem [shape: f32[1,384], index: 4, kind: input, shape index: {}]   ;;  %s1117_s5 = inlined_call_operand.hbm [shape: f32[8,2,128], index: 5, kind: output, shape index: {0}]   ;;  %s1118_s6 = inlined_call_operand.vmem [shape: f32[2,128], index: 6, kind: output, shape index: {1}]  }
   0x1   :  { %14 = vsyncpa [#allocation4 + $0x1], 0  ;;  %s896_s21 = smov 0   ;;  %s898_s22 = smov 0  }
   0x2   :  { %s900_s23 = smov 0   ;;  %s902_s24 = smov 0  }
   0x3 LB: > { %s917_s25 = sadd.s32 4294967295, %s855_s24   ;;  %s642_s26 = sadd.s32 4294967294, %s855_s24   ;;  %s855_s24 = sphi %s902_s24, %s1124_s24   ;;  %s851_s23 = sphi %s900_s23, %s1123_s23   ;;  %s847_s22 = sphi %s898_s22, %s1122_s22   ;;  %s843_s21 = sphi %s896_s21, %s1121_s21  }
   0x4   : > { %s921_s27 = sadd.s32 1, %s855_s24   ;;  %s137_s28 = sadd.s32 1, %s851_s23 }
   0x5   : > { %s134_s29 = ssub.s32 %s855_s24, %s921_s27  ;;  %p147_p0 = scmp.ne.s32.totalorder %s851_s23, %s847_s22 }
   0x6   : > { %p135_p1 = scmp.eq.s32.totalorder %s134_s29, 0  ;;  %p148_p2 = scmp.eq.s32.totalorder %s917_s25, 7 }
   0x7   : > { %p153_p3 = scmp.ne.s32.totalorder %s847_s22, %s843_s21  ;;  %p154_p4 = scmp.eq.s32.totalorder %s642_s26, 7 }
   0x8   : > { %s932_s30 = scalar_select %p135_p1, %s851_s23, %s137_s28  }
   0x9   : > { %p934_p5 = por %p148_p2, %p147_p0  ;;  %p938_p6 = por %p154_p4, %p153_p3 }
   0xa   : > { %p645_p7 = scmp.ge.s32.totalorder %s855_s24, 1  ;;  %p213_p8 = scmp.lt.s32.totalorder %s855_s24, 9 }
   0xc   : > { %p214_p9 = pnand %p645_p7, %p213_p8 }
   0xd   : > { %s238_s9 = sand.u32 (!%p214_p9), 1, %s847_s22   ;;  %p243_p10 = scmp.lt.s32.totalorder (!%p214_p9), %s917_s25, 7 }
   0xe   : > { %217 = sbr.rel (%p214_p9) target bundleno = 346 (0x15a), region = 40  ;;  %s948_s10 = sshll.u32 (!%p214_p9), %s238_s9, 1 }
   0xf   : > { %s240_s16 = scalar_lea.vmem (!%p214_p9), [#allocation3], %s948_s10  ;;  %p648_p11 = scmp.ne.s32.totalorder (!%p214_p9), %s917_s25, 0 }
  0x15   : > { %s244_s11 = scalar_select %p243_p10, %s917_s25, 7 }
  0x16   : > { %252 = sbr.rel (%p648_p11) target bundleno = 29 (0x1d), region = 44  ;;  %v253_v0 = vld [vmem:[%s1113_s1] sm:$0x3] (!%p648_p11) }
  0x17   : > { %s707_s12 = smul.u32 6, %s244_s11  ;;  %254 = vst [vmem:[#allocation2] sm:$0x3] (!%p648_p11), %v253_v0 }
  0x19   : > { %s954_s15 = scalar_lea.vmem %s1112_s0, %s707_s12 }
  0x1d PF: > { %v751_v1 = vld [vmem:[%s1115_s3 + $0x4] ss:$12 sps:$4 sm:$0xff]   ;;  %v753_v2 = vld [vmem:[%s1115_s3] ss:$12 sps:$4 sm:$0xff]   ;;  %v857_v3 = vmov 0.0   ;;  %v858_v4 = vmov 0   ;;  %v541_v17 = vstv %s917_s25  ;;  %v292_v33 = vlaneseq }
  0x1e   : > { %687 = vmatprep.subr.bf16.mxu1 %v857_v3  ;;  %467 = vmatprep.mubr.bf16.mxu0 %v858_v4  ;;  %v754_v5 = vld [vmem:[%s1115_s3 + $0x1c] ss:$12 sps:$4 sm:$0xff]   ;;  %vm859_vm0 = vmmov 0   ;;  %v756_v6 = vld [vmem:[%s1115_s3 + $0x18] ss:$12 sps:$4 sm:$0xff]   ;;  %s577_s14 = sshll.u32 %s240_s16, 4  ;;  %s1068_s14 = int_to_ptr.vmem [resolvable:$true] %s577_s14 }
  0x1f   : > { %435 = vmatprep.subr.bf16.mxu0 %v751_v1  ;;  %703 = vmatprep.mubr.msk.bf16.mxu1 %vm859_vm0, %v857_v3  ;;  %v757_v7 = vld [vmem:[%s1115_s3 + $0x34] ss:$12 sps:$4 sm:$0xff]   ;;  %v759_v8 = vld [vmem:[%s1115_s3 + $0x30] ss:$12 sps:$4 sm:$0xff]   ;;  %v760_v9 = vld [vmem:[%s1115_s3 + $0x4c] ss:$12 sps:$4 sm:$0xff]  }
  0x20   : > { %436 = vmatpush1.bf16.msra.mxu0 %v753_v2  ;;  %750 = vset.pattern.permute.xlu0 %v858_v4  ;;  %v762_v10 = vld [vmem:[%s1115_s3 + $0x48] ss:$12 sps:$4 sm:$0xff]   ;;  %v763_v12 = vld [vmem:[%s1115_s3 + $0x64] ss:$12 sps:$4 sm:$0xff]   ;;  %v776_v13 = vld [vmem:[%s1115_s3 + $0x20] ss:$12 sps:$4 sm:$0xff]  }
  0x21   : > { %437 = vmatprep.subr.bf16.mxu0 %v754_v5  ;;  %v774_v11 = vld [vmem:[%s1115_s3 + $0x8] ss:$12 sps:$4 sm:$0xff]   ;;  %v765_v14 = vld [vmem:[%s1115_s3 + $0x60] ss:$12 sps:$4 sm:$0xff]   ;;  %v777_v16 = vld [vmem:[%s1115_s3 + $0x38] ss:$12 sps:$4 sm:$0xff]  }
  0x22   : > { %688 = vmatpush3.bf16.msra.mxu1 %v774_v11  ;;  %v766_v15 = vld [vmem:[%s1115_s3 + $0x7c] ss:$12 sps:$4 sm:$0xff]   ;;  %v768_v18 = vld [vmem:[%s1115_s3 + $0x78] ss:$12 sps:$4 sm:$0xff]   ;;  %v540_v19 = vld [vmem:[%s1114_s2] sm:$0x3] }
  0x23   : > { %689 = vmatprep.subr.bf16.mxu1 %v857_v3  ;;  %v769_v20 = vld [vmem:[%s1115_s3 + $0x94] ss:$12 sps:$4 sm:$0xff]   ;;  %vm542_vm1 = vcmp.gt.s32.totalorder %v540_v19, %v541_v17  ;;  %v778_v21 = vld [vmem:[%s1115_s3 + $0x50] ss:$12 sps:$4 sm:$0xff]   ;;  %v772_v25 = vld [vmem:[%s1115_s3 + $0xac] ss:$12 sps:$4 sm:$0xff]  }
  0x24   : > { %438 = vmatpush1.bf16.msra.mxu0 %v756_v6  ;;  %v673_v22 = vsel %vm542_vm1, 1.0, %v857_v3  ;;  %v771_v24 = vld [vmem:[%s1115_s3 + $0x90] ss:$12 sps:$4 sm:$0xff]   ;;  %v779_v26 = vld [vmem:[%s1115_s3 + $0x68] ss:$12 sps:$4 sm:$0xff]   ;;  %v293_v34 = vshrl.u32 %v292_v33, 7 }
  0x25   : > { %439 = vmatprep.subr.bf16.mxu0 %v757_v7  ;;  %v551_v23 = vsub.f32 1.0, %v673_v22  ;;  %547 = vperm.xlu0 %750, %v673_v22   ;;  %v775_v27 = vld [vmem:[%s1115_s3 + $0xa8] ss:$12 sps:$4 sm:$0xff]   ;;  %v1035_v28 = vld [vmem:[#allocation2] sm:$0x3]  ;;  %s793_s28 = scalar_lea.vmem %s1068_s14, 32 }
  0x26   : > { %690 = vmatpush3.bf16.msra.mxu1 %v776_v13  ;;  %v780_v29 = vld [vmem:[%s1115_s3 + $0x80] ss:$12 sps:$4 sm:$0xff]   ;;  %v257_v30 = vpack.c.bf16 %v1035_v28, %v1035_v28  ;;  %v781_v31 = vld [vmem:[%s1115_s3 + $0x98] ss:$12 sps:$4 sm:$0xff]   ;;  %v782_v32 = vld [vmem:[%s1115_s3 + $0xb0] ss:$12 sps:$4 sm:$0xff]   ;;  %p794_p12 = scmp.ne.s32.totalorder %s1068_s14, %s793_s28 }
  0x27   : > { %691 = vmatprep.subr.bf16.mxu1 %v857_v3  ;;  %v294_v35 = vsub.s32 0, %v293_v34  ;;  %v290_v36 = vld [vmem:[%s1116_s4] sm:$0x7]  ;;  %v298_v37 = vsub.s32 1, %v293_v34  ;;  %v302_v60 = vsub.s32 2, %v293_v34  ;;  %s860_s29 = smov [#allocation3]  }
  0x28   : > { %440 = vmatpush1.bf16.msra.mxu0 %v759_v8  ;;  %v255_v38 = vld [vmem:[%s954_s15] sm:$0x3f]  ;;  %s675_s15 = sshll.u32 %s917_s25, 5  ;;  %s564_s25 = scalar_lea.sflag [#allocation4], %s238_s9 }
  0x29   : > { %441 = vmatprep.subr.bf16.mxu0 %v760_v9  ;;  %554 = vperm.xlu0 %750, %v551_v23   ;;  %v295_v39 = vrot.slane %v290_v36, %v294_v35  ;;  %v299_v40 = vrot.slane %v290_v36, %v298_v37  ;;  %v523_v42 = vrot.slane %v255_v38, 2  ;;  %v303_v61 = vrot.slane %v290_v36, %v302_v60  ;;  %s1066_s26 = scalar_lea.hbm %s1117_s5, %s675_s15  ;;  %p795_p13 = pnand %p794_p12, %p934_p5 }
  0x2a   : > { %692 = vmatpush3.bf16.msra.mxu1 %v777_v16  ;;  %v532_v1 = vrot.slane %v255_v38, 4  ;;  %s797_s11 = sshll.u32 %s860_s29, 4  ;;  %s798_s11 = int_to_ptr.vmem [resolvable:$false] %s797_s11 }
  0x2b   : > { %693 = vmatprep.subr.bf16.mxu1 %v857_v3  ;;  %p796_p0 = pneg %p795_p13  ;;  %s799_s12 = scalar_lea.vmem %s798_s11, 64 }
  0x2c   : > { %442 = vmatpush1.bf16.msra.mxu0 %v762_v10  ;;  %p800_p1 = scmp.lt.s32.totalorder %s1068_s14, %s798_s11  ;;  %p801_p2 = scmp.lt.s32.totalorder %s799_s12, %s793_s28 }
  0x2d   : > { %443 = vmatprep.subr.bf16.mxu0 %v763_v12 }
  0x2e   : > { %694 = vmatpush3.bf16.msra.mxu1 %v778_v21  ;;  %p802_p3 = por %p801_p2, %p800_p1 }
  0x2f   : > { %695 = vmatprep.subr.bf16.mxu1 %v857_v3 }
  0x30   : > { %444 = vmatpush1.bf16.msra.mxu0 %v765_v14  ;;  %p803_p4 = pnand %p802_p3, %p796_p0 }
  0x31   : > { %445 = vmatprep.subr.bf16.mxu0 %v766_v15 }
  0x32   : > { %696 = vmatpush3.bf16.msra.mxu1 %v779_v26 }
  0x33   : > { %697 = vmatprep.subr.bf16.mxu1 %v857_v3 }
  0x34   : > { %446 = vmatpush1.bf16.msra.mxu0 %v768_v18 }
  0x35   : > { %447 = vmatprep.subr.bf16.mxu0 %v769_v20 }
  0x36   : > { %698 = vmatpush3.bf16.msra.mxu1 %v780_v29 }
  0x37   : > { %699 = vmatprep.subr.bf16.mxu1 %v857_v3 }
  0x38   : > { %448 = vmatpush1.bf16.msra.mxu0 %v771_v24 }
  0x39   : > { %449 = vmatprep.subr.bf16.mxu0 %v772_v25 }
  0x3a   : > { %700 = vmatpush3.bf16.msra.mxu1 %v781_v31 }
  0x3b   : > { %701 = vmatprep.subr.bf16.mxu1 %v857_v3 }
  0x3c   : > { %450 = vmatpush1.bf16.msra.mxu0 %v775_v27 }
  0x3e   : > { %702 = vmatpush3.bf16.msra.mxu1 %v782_v32 }
  0x3f   : > { %468 = vmatmul.mubr.bf16.vlgmr.msra.gmra.mrb[0].mxu0 %v257_v30 }
  0x41   : > { %704 = vmatmul.mubr.bf16.vlgmr.msra.gmra.mrb[0].mxu1 %v257_v30 }
  0xa4   : > { %v548_v6 = vpop.permute.xlu0 %547 }
  0xa8   : > { %v555_v11 = vpop.permute.xlu0 %554 }
  0xa9   : > { %v557_v14 = vmul.f32 %v555_v11, %v1035_v28 }
 0x112   : > { %v469_v41 = vpop.f32.mrb[0].mxu0 }
 0x113   : > { %v470_v43 = vadd.f32 %v469_v41, %v295_v39  ;;  %v471_v44 = vpop.f32.mrb[1].mxu0 }
 0x114   : > { %v472_v45 = vadd.f32 %v471_v44, %v299_v40  ;;  %v473_v46 = vpop.f32.mrb[2].mxu0  ;;  %v510_v53 = vpop.f32.mrb[0].mxu1 }
 0x115   : > { %v516_v47 = vadd.f32 %v470_v43, %v255_v38  ;;  %v474_v48 = vpop.f32.mrb[3].mxu0  ;;  %v705_v54 = vpop.f32.mrb[1].mxu1  ;;  %v511_v0 = vadd.f32 %v510_v53, %v303_v61 }
 0x116   : > { %v525_v49 = vadd.f32 %v523_v42, %v472_v45  ;;  %v513_v56 = vpop.f32.mrb[2].mxu1 }
 0x117   : > { %v517_v50 = vsub.f32 0.0, %v516_v47  ;;  %v706_v57 = vpop.f32.mrb[3].mxu1 }
 0x118   : > { %v526_v52 = vsub.f32 0.0, %v525_v49 }
 0x119   : > { %v518_v51 = vmul.f32 1.442695, %v517_v50 }
 0x11a   : > { %v527_v55 = vmul.f32 1.442695, %v526_v52 }
 0x11b   : > { %783 = vpow2.f32 %v518_v51 }
 0x11c   : > { %785 = vpow2.f32 %v527_v55 }
 0x125   : > { %v784_v58 = vpop.eup %783 }
 0x126   : > { %v520_v59 = vadd.f32 1.0, %v784_v58  ;;  %v786_v62 = vpop.eup %785 }
 0x127   : > { %v529_v63 = vadd.f32 1.0, %v786_v62 }
 0x128   : > { %787 = vrcp.f32 %v520_v59 }
 0x129   : > { %789 = vrcp.f32 %v529_v63 }
 0x132   : > { %v788_v2 = vpop.eup %787 }
 0x133   : > { %v531_v3 = vmul.f32 %v788_v2, %v511_v0  ;;  %v790_v5 = vpop.eup %789 }
 0x134   : > { %v536_v7 = vsub.f32 1.0, %v790_v5  ;;  %v538_v10 = vmul.f32 %v790_v5, %v1035_v28 }
 0x135   : > { %v534_v4 = vadd.f32 %v532_v1, %v531_v3 }
 0x137   : > { %791 = vtanh.f32 %v534_v4 }
 0x141   : > { %v792_v8 = vpop.eup %791 }
 0x142   : > { %v537_v9 = vmul.f32 %v792_v8, %v536_v7 }
 0x144   : > { %v539_v12 = vadd.f32 %v538_v10, %v537_v9 }
 0x146   : > { %v550_v13 = vmul.f32 %v548_v6, %v539_v12 }
 0x148   : > { %v558_v15 = vadd.f32 %v557_v14, %v550_v13 }
 0x14a   : > { %559 = vst [vmem:[#allocation2] sm:$0x3] %v558_v15  ;;  %562 = vst [vmem:[%s1118_s6] sm:$0x3] %v558_v15  ;;  %v560_v16 = vmul.f32 %v558_v15, %v548_v6 }
 0x14c   : > { %561 = vst [vmem:[%s240_s16] sm:$0x3] %v560_v16 }
 0x14d   : > { %806 = shalt.err (!%p803_p4)
}
 0x14e   : > { %s807_s9 = scalar_lea.hbm %s1066_s26, 32  ;;  %s811_s13 = scalar_lea.hbm %s1117_s5, 256 }
 0x14f   : > { %p808_p7 = scmp.ne.s32.totalorder %s1066_s26, %s807_s9  ;;  %p812_p10 = scmp.lt.u32.totalorder %s1066_s26, %s1117_s5 }
 0x150   : > { %p813_p11 = scmp.lt.u32.totalorder %s811_s13, %s807_s9  ;;  %p815_p13 = scmp.lt.u32.totalorder %s807_s9, %s1066_s26 }
 0x151   : > { %p809_p8 = pnand %p808_p7, %p934_p5 }
 0x152   : > { %p814_p12 = por %p813_p11, %p812_p10 }
 0x153   : > { %p810_p9 = pneg %p809_p8 }
 0x154   : > { %p816_p0 = por %p815_p13, %p814_p12 }
 0x156   : > { %p817_p1 = pnand %p816_p0, %p810_p9 }
 0x158   : > { %820 = shalt.err (!%p817_p1)
}
 0x159   : > { %708 = dma.vmem_to_hbm [thread:$0]  (%p934_p5), %s1068_s14, 32, %s1066_s26, %s564_s25  }
 0x15a PF: > { %p714_p2 = scmp.ge.s32.totalorder %s855_s24, 2  ;;  %s595_s18 = sand.u32 1, %s843_s21  }
 0x15b   : > { %s596_s19 = scalar_lea.sflag [#allocation4], %s595_s18 }
 0x15c   : > { %p711_p3 = pnand %p714_p2, %p938_p6 }
 0x15e   : > { %838 = dma.done.wait (!%p711_p3), %s596_s19, 32  }
 0x15f   : > { %840 = vsyncadd (!%p711_p3), %s596_s19, 4294967264  ;;  %p17_p4 = scmp.ge.s32.totalorder %s921_s27, 10   ;;  %s1121_s21 = smov %s847_s22 }
 0x160   : > { %s1122_s22 = smov %s851_s23  ;;  %s1123_s23 = smov %s932_s30 }
 0x161   : > { %s1124_s24 = smov %s921_s27  ;;  %19 = sbr.rel (!%p17_p4) target bundleno = 3 (0x3), region = 87 }
 0x168   :  { %601 = vsyncpa [#allocation4], 1 }
 0x169   :  { %603 = vsyncpa [#allocation4 + $0x1], 1 }

// kernel: coupled_vae_forward.33
= control target key start
LH: loop header
LB: loop body
LE: loop exit
PB: predicated region body
PF: predicated region fallthrough
CT: control target
= control target key end

     0   :  { %s629_s15 = smov 0   ;;  %s631_s16 = smov 0   ;;  %s703_s0 = inlined_call_operand.vmem [shape: bf16[16,2,32], index: 0, kind: input, shape index: {}]   ;;  %s704_s1 = inlined_call_operand.vmem [shape: bf16[16,32,64], index: 1, kind: input, shape index: {}]   ;;  %s705_s2 = inlined_call_operand.vmem [shape: f32[1,64], index: 2, kind: input, shape index: {}]   ;;  %s706_s3 = inlined_call_operand.vmem [shape: f32[1,64], index: 3, kind: input, shape index: {}]   ;;  %s707_s4 = inlined_call_operand.vmem [shape: f32[16,2,64], index: 4, kind: output, shape index: {}]  }
   0x1   :  { %s633_s17 = smov 0   ;;  %s635_s18 = smov 0  }
   0x2   :  { %s637_s19 = smov 0  }
   0x3 LB: > { %s29_s20 = sadd.s32 1, %s591_s17  ;;  %s33_s21 = sadd.s32 1, %s595_s18  ;;  %s599_s19 = sphi %s637_s19, %s14_s19   ;;  %s595_s18 = sphi %s635_s18, %s711_s18   ;;  %s591_s17 = sphi %s633_s17, %s710_s17   ;;  %s587_s16 = sphi %s631_s16, %s709_s16   ;;  %s583_s15 = sphi %s629_s15, %s708_s15  }
   0x4   : > { %p31_p0 = scmp.ge.s32.totalorder %s29_s20, 16  ;;  %p487_p1 = scmp.ge.s32.totalorder %s599_s19, 1 }
   0x5   : > { %p196_p2 = scmp.lt.s32.totalorder %s599_s19, 33 }
   0x6   : > { %s713_s20 = smov (%p31_p0, %s29_s20), 0  ;;  %s715_s21 = smov (!%p31_p0, %s33_s21), %s595_s18 }
   0x7   : > { %p197_p3 = pnand %p487_p1, %p196_p2  ;;  %p35_p4 = scmp.ge.s32.totalorder %s715_s21, 2 }
   0x8   : > { %p230_p5 = scmp.lt.s32.totalorder (!%p197_p3), %s583_s15, 15  ;;  %v601_v0 = vmov (!%p197_p3), 0.0   ;;  %vm602_vm0 = vmmov (!%p197_p3), 0   ;;  %vm270_vm1 = vcmask (!%p197_p3), 261120   ;;  %p249_p6 = scmp.eq.s32.totalorder (!%p197_p3), %s583_s15, 0 }
   0x9   : > { %s717_s21 = smov (%p35_p4, %s715_s21), 0  ;;  %200 = sbr.rel (%p197_p3) target bundleno = 298 (0x12a), region = 36 }
   0xa   : > { %506 = vmatprep.subr.bf16.mxu0 (!%p197_p3), %v601_v0  ;;  %510 = vmatprep.mubr.msk.bf16.mxu0 (!%p197_p3), %vm602_vm0, %v601_v0  ;;  %p314_p7 = scmp.eq.s32.totalorder (!%p197_p3), %s587_s16, 0 }
   0xc   : > { %p315_p8 = pnand (!%p197_p3), %p314_p7, %p249_p6 }
  0x10   : > { %s231_s22 = scalar_select %p230_p5, %s583_s15, 15 }
  0x11   : > { %vm319_vm2 = vcmask (!%p315_p8), 516096   ;;  %v603_v8 = vmov (!%p315_p8), 0.0  }
  0x12   : > { %s501_s23 = sshll.u32 %s231_s22, 4  ;;  %s490_s24 = sshll.u32 %s231_s22, 1  ;;  %320 = vst.msk [vmem:[#allocation2] sm:$0x1] (!%p315_p8), %vm319_vm2, %v603_v8  ;;  %321 = vst.msk [vmem:[#allocation3] sm:$0x1] (!%p315_p8), %vm319_vm2, %v603_v8 }
  0x13   : > { %s240_s27 = scalar_lea.vmem %s704_s1, %s501_s23  ;;  %s671_s30 = scalar_lea.vmem %s707_s4, %s490_s24 }
  0x14   : > { %v557_v1 = vld [vmem:[%s240_s27] sm:$0xff]   ;;  %v558_v2 = vld [vmem:[%s240_s27 + $0x8] sm:$0xff]   ;;  %s235_s7 = scalar_lea.vmem %s703_s0, %s231_s22 }
  0x15   : > { %507 = vmatpush3.bf16.msra.mxu0 %v557_v1  ;;  %v253_v3 = vld [vmem:[%s235_s7] sm:$0x1] }
  0x16   : > { %508 = vmatprep.subr.bf16.mxu0 %v601_v0 }
  0x19   : > { %509 = vmatpush3.bf16.msra.mxu0 %v558_v2 }
  0x1c   : > { %511 = vmatmul.mubr.msk.bf16.vlgmr.msra.gmra.mrb[0].mxu0 %vm270_vm1, %v253_v3 }
  0xec   : > { %318 = sbr.rel (%p315_p8) target bundleno = 243 (0xf3), region = 40 }
  0xef   : > { %v308_v4 = vpop.f32.mrb[0].mxu0 }
  0xf0   : > { %v512_v5 = vpop.f32.mrb[1].mxu0 }
  0xf1   : > { %v311_v6 = vpop.f32.mrb[2].mxu0 }
  0xf2   : > { %v513_v7 = vpop.f32.mrb[3].mxu0 }
  0xf3 PF: > { %p495_p9 = scmp.ne.s32.totalorder %s587_s16, 0 }
  0xf4   : > { %vm326_vm3 = vcmask (!%p495_p9), 517120   ;;  %v338_v9 = vmul.f32 (!%p495_p9), %v308_v4, %v308_v4  ;;  %v325_v21 = vld [vmem:[#allocation2] sm:$0x1] (!%p495_p9)  ;;  %v337_v24 = vld [vmem:[#allocation3] sm:$0x1] (!%p495_p9)  ;;  %vm335_vm4 = vcmask (!%p495_p9), 516096  }
  0xf5   : > { %324 = sbr.rel (%p495_p9) target bundleno = 262 (0x106), region = 44  ;;  %v327_v10 = vsel (!%p495_p9), %vm326_vm3, %v308_v4, 0.0  ;;  %348 = vst.msk [vmem:[%s671_s30] sm:$0x3] (!%p495_p9), %vm326_vm3, %v308_v4 }
  0xf6   : > { %v328_v11 = vrot.slane (!%p495_p9), %v327_v10, 4  ;;  %v339_v12 = vsel (!%p495_p9), %vm326_vm3, %v338_v9, 0.0 }
  0xf7   : > { %v340_v13 = vrot.slane (!%p495_p9), %v339_v12, 4 }
  0xf8   : > { %v329_v14 = vadd.f32 (!%p495_p9), %v328_v11, %v327_v10 }
  0xf9   : > { %v341_v15 = vadd.f32 (!%p495_p9), %v340_v13, %v339_v12 }
  0xfa   : > { %v330_v16 = vrot.slane (!%p495_p9), %v329_v14, 2 }
  0xfb   : > { %v342_v17 = vrot.slane (!%p495_p9), %v341_v15, 2 }
  0xfc   : > { %v331_v18 = vadd.f32 %v330_v16, %v329_v14 }
  0xfd   : > { %v343_v19 = vadd.f32 %v342_v17, %v341_v15 }
  0xfe   : > { %v332_v20 = vrot.slane %v331_v18, 1 }
  0xff   : > { %v344_v22 = vrot.slane %v343_v19, 1 }
 0x100   : > { %v333_v23 = vadd.f32 %v332_v20, %v331_v18 }
 0x101   : > { %v345_v25 = vadd.f32 %v344_v22, %v343_v19 }
 0x102   : > { %v334_v26 = vadd.f32 %v333_v23, %v325_v21 }
 0x103   : > { %v346_v27 = vadd.f32 %v345_v25, %v337_v24 }
 0x104   : > { %336 = vst.msk [vmem:[#allocation2] sm:$0x1] %vm335_vm4, %v334_v26 }
 0x105   : > { %347 = vst.msk [vmem:[#allocation3] sm:$0x1] %vm335_vm4, %v346_v27 }
 0x106 PF: > { %p496_p10 = scmp.ne.s32.totalorder %s587_s16, 1 }
 0x107   : > { %v360_v32 = vlaneseq (!%p496_p10)  ;;  %v497_v42 = vld [vmem:[%s705_s2] ss:$0 sm:$0xff] (!%p496_p10)  ;;  %vm392_vm5 = vcmask (!%p496_p10), 517120  }
 0x108   : > { %352 = sbr.rel (%p496_p10) target bundleno = 298 (0x12a), region = 48  ;;  %v498_v44 = vld [vmem:[%s706_s3] ss:$0 sm:$0xff] (!%p496_p10) }
 0x109   : > { %v361_v35 = vshrl.u32 (!%p496_p10), %v360_v32, 7 }
 0x10b   : > { %v353_v28 = vld [vmem:[#allocation2] sm:$0x1] (!%p496_p10)  ;;  %v362_v37 = vsub.s32 (!%p496_p10), 0, %v361_v35 }
 0x10c   : > { %v355_v29 = vld [vmem:[#allocation3] sm:$0x1] (!%p496_p10)  ;;  %v354_v30 = vmul.f32 (!%p496_p10), 0.03125, %v353_v28 }
 0x10d   : > { %v356_v31 = vmul.f32 (!%p496_p10), 0.03125, %v355_v29 }
 0x10e   : > { %v357_v33 = vmul.f32 (!%p496_p10), %v354_v30, %v354_v30  ;;  %v363_v38 = vrot.slane (!%p496_p10), %v354_v30, %v362_v37 }
 0x110   : > { %v358_v34 = vsub.f32 %v356_v31, %v357_v33  ;;  %v365_v39 = vsub.f32 %v308_v4, %v363_v38 }
 0x112   : > { %v366_v36 = vadd.f32 1e-05, %v358_v34 }
 0x114   : > { %559 = vrsqrt.f32 %v366_v36 }
 0x11e   : > { %v560_v40 = vpop.eup %559 }
 0x11f   : > { %v372_v41 = vrot.slane %v560_v40, %v362_v37 }
 0x121   : > { %v374_v43 = vmul.f32 %v372_v41, %v365_v39 }
 0x123   : > { %v382_v45 = vmul.f32 %v497_v42, %v374_v43 }
 0x125   : > { %v390_v46 = vadd.f32 %v498_v44, %v382_v45 }
 0x127   : > { %v391_v47 = vmax.f32 %v390_v46, 0.0 }
 0x129   : > { %393 = vst.msk [vmem:[%s671_s30] sm:$0x3] %vm392_vm5, %v391_v47 }
 0x12a PF: > { %s14_s19 = sadd.s32 1, %s599_s19   ;;  %s708_s15 = smov %s591_s17 }
 0x12b   : > { %p11_p11 = scmp.ge.s32.totalorder %s14_s19, 34   ;;  %s709_s16 = smov %s595_s18 }
 0x12c   : > { %s710_s17 = smov %s713_s20  ;;  %s711_s18 = smov %s717_s21 }
 0x12d   :  { %13 = sbr.rel (!%p11_p11) target bundleno = 3 (0x3), region = 81 }

// kernel: coupled_vae_forward.34
= control target key start
LH: loop header
LB: loop body
LE: loop exit
PB: predicated region body
PF: predicated region fallthrough
CT: control target
= control target key end

     0   :  { %s914_s15 = smov 0   ;;  %s916_s16 = smov 0   ;;  %s1056_s0 = inlined_call_operand.vmem [shape: bf16[4,32,256], index: 0, kind: input, shape index: {}]   ;;  %s1057_s1 = inlined_call_operand.vmem [shape: bf16[4,256,32], index: 1, kind: input, shape index: {}]   ;;  %s1058_s2 = inlined_call_operand.vmem [shape: f32[1,32], index: 2, kind: input, shape index: {}]   ;;  %s1059_s3 = inlined_call_operand.vmem [shape: f32[1,32], index: 3, kind: input, shape index: {}]   ;;  %s1060_s4 = inlined_call_operand.vmem [shape: f32[4,32,32], index: 4, kind: output, shape index: {}]  }
   0x1   :  { %s918_s17 = smov 0   ;;  %s920_s18 = smov 0  }
   0x2   :  { %s922_s19 = smov 0  }
   0x3 LB: > { %s29_s20 = sadd.s32 1, %s878_s17  ;;  %s33_s21 = sadd.s32 1, %s882_s18  ;;  %s886_s19 = sphi %s922_s19, %s14_s19   ;;  %s882_s18 = sphi %s920_s18, %s1064_s18   ;;  %s878_s17 = sphi %s918_s17, %s1063_s17   ;;  %s874_s16 = sphi %s916_s16, %s1062_s16   ;;  %s870_s15 = sphi %s914_s15, %s1061_s15  }
   0x4   : > { %p31_p0 = scmp.ge.s32.totalorder %s29_s20, 4  ;;  %p701_p1 = scmp.ge.s32.totalorder %s886_s19, 1 }
   0x5   : > { %p201_p2 = scmp.lt.s32.totalorder %s886_s19, 9 }
   0x6   : > { %s1066_s20 = smov (%p31_p0, %s29_s20), 0  ;;  %s1068_s21 = smov (!%p31_p0, %s33_s21), %s882_s18 }
   0x7   : > { %p202_p3 = pnand %p701_p1, %p201_p2  ;;  %p35_p4 = scmp.ge.s32.totalorder %s1068_s21, 2 }
   0x8   : > { %p242_p5 = scmp.lt.s32.totalorder (!%p202_p3), %s870_s15, 3  ;;  %p268_p6 = scmp.eq.s32.totalorder (!%p202_p3), %s870_s15, 0 }
   0x9   : > { %s1070_s21 = smov (%p35_p4, %s1068_s21), 0  ;;  %205 = sbr.rel (%p202_p3) target bundleno = 331 (0x14b), region = 36 }
   0xa   : > { %p473_p7 = scmp.eq.s32.totalorder (!%p202_p3), %s874_s16, 0 }
   0xc   : > { %p474_p8 = pnand (!%p202_p3), %p473_p7, %p268_p6 }
  0x10   : > { %s950_s22 = scalar_select %p242_p5, %s870_s15, 3 }
  0x11   : > { %vm478_vm0 = vcmask (!%p474_p8), 253952   ;;  %v888_v32 = vmov (!%p474_p8), 0.0  }
  0x12   : > { %s736_s23 = sshll.u32 %s950_s22, 7  ;;  %s735_s27 = sshll.u32 %s950_s22, 5  ;;  %479 = vst.msk [vmem:[#allocation2] sm:$0x1] (!%p474_p8), %vm478_vm0, %v888_v32  ;;  %480 = vst.msk [vmem:[#allocation3] sm:$0x1] (!%p474_p8), %vm478_vm0, %v888_v32 }
  0x13   : > { %s956_s26 = scalar_lea.vmem %s1057_s1, %s736_s23  ;;  %s963_s30 = scalar_lea.vmem %s1060_s4, %s735_s27 }
  0x14   : > { %v824_v0 = vld [vmem:[%s956_s26 + $0x40] sm:$0xff]   ;;  %v826_v2 = vld [vmem:[%s956_s26 + $0x48] sm:$0xff]   ;;  %v828_v4 = vld [vmem:[%s956_s26 + $0x50] sm:$0xff]   ;;  %s250_s7 = scalar_lea.vmem %s1056_s0, %s735_s27 }
  0x15   : > { %v825_v1 = vld [vmem:[%s956_s26] sm:$0xff]   ;;  %739 = vmatprep.subr.bf16.mxu0 %v824_v0  ;;  %767 = vmatprep.subr.bf16.mxu1 %v824_v0  ;;  %v827_v3 = vld [vmem:[%s956_s26 + $0x8] sm:$0xff]   ;;  %v829_v5 = vld [vmem:[%s956_s26 + $0x10] sm:$0xff]  }
  0x16   : > { %740 = vmatpush3.bf16.msra.mxu0 %v825_v1  ;;  %775 = vmatpush3.bf16.msra.mxu1 %v825_v1  ;;  %v830_v6 = vld [vmem:[%s956_s26 + $0x58] sm:$0xff]   ;;  %v832_v8 = vld [vmem:[%s956_s26 + $0x60] sm:$0xff]   ;;  %v834_v10 = vld [vmem:[%s956_s26 + $0x68] sm:$0xff]  }
  0x17   : > { %741 = vmatprep.subr.bf16.mxu0 %v826_v2  ;;  %768 = vmatprep.subr.bf16.mxu1 %v826_v2  ;;  %v831_v7 = vld [vmem:[%s956_s26 + $0x18] sm:$0xff]   ;;  %v833_v9 = vld [vmem:[%s956_s26 + $0x20] sm:$0xff]   ;;  %v835_v13 = vld [vmem:[%s956_s26 + $0x28] sm:$0xff]  }
  0x18   : > { %v842_v11 = vld [vmem:[%s250_s7 + $0x4] ss:$8 sps:$4 sm:$0xff]   ;;  %v845_v12 = vld [vmem:[%s250_s7 + $0x14] ss:$8 sps:$4 sm:$0xff]   ;;  %v840_v18 = vld [vmem:[%s250_s7] ss:$8 sps:$4 sm:$0xff]  }
  0x19   : > { %v836_v14 = vld [vmem:[%s956_s26 + $0x70] sm:$0xff]   ;;  %456 = vmatprep.mubr.bf16.mxu0 %v842_v11  ;;  %464 = vmatprep.mubr.bf16.mxu1 %v845_v12  ;;  %v838_v16 = vld [vmem:[%s956_s26 + $0x78] sm:$0xff]  }
  0x1a   : > { %742 = vmatpush3.bf16.msra.mxu0 %v827_v3  ;;  %776 = vmatpush3.bf16.msra.mxu1 %v827_v3  ;;  %v837_v15 = vld [vmem:[%s956_s26 + $0x30] sm:$0xff]   ;;  %v839_v17 = vld [vmem:[%s956_s26 + $0x38] sm:$0xff]  }
  0x1b   : > { %743 = vmatprep.subr.bf16.mxu0 %v828_v4  ;;  %769 = vmatprep.subr.bf16.mxu1 %v828_v4  ;;  %v843_v19 = vld [vmem:[%s250_s7 + $0x10] ss:$8 sps:$4 sm:$0xff]  }
  0x1e   : > { %744 = vmatpush3.bf16.msra.mxu0 %v829_v5  ;;  %777 = vmatpush3.bf16.msra.mxu1 %v829_v5 }
  0x1f   : > { %745 = vmatprep.subr.bf16.mxu0 %v830_v6  ;;  %770 = vmatprep.subr.bf16.mxu1 %v830_v6 }
  0x22   : > { %746 = vmatpush3.bf16.msra.mxu0 %v831_v7  ;;  %778 = vmatpush3.bf16.msra.mxu1 %v831_v7 }
  0x23   : > { %747 = vmatprep.subr.bf16.mxu0 %v832_v8  ;;  %771 = vmatprep.subr.bf16.mxu1 %v832_v8 }
  0x26   : > { %748 = vmatpush3.bf16.msra.mxu0 %v833_v9  ;;  %779 = vmatpush3.bf16.msra.mxu1 %v833_v9 }
  0x27   : > { %749 = vmatprep.subr.bf16.mxu0 %v834_v10  ;;  %772 = vmatprep.subr.bf16.mxu1 %v834_v10 }
  0x2a   : > { %750 = vmatpush3.bf16.msra.mxu0 %v835_v13  ;;  %780 = vmatpush3.bf16.msra.mxu1 %v835_v13 }
  0x2b   : > { %751 = vmatprep.subr.bf16.mxu0 %v836_v14  ;;  %773 = vmatprep.subr.bf16.mxu1 %v836_v14 }
  0x2e   : > { %752 = vmatpush3.bf16.msra.mxu0 %v837_v15  ;;  %781 = vmatpush3.bf16.msra.mxu1 %v837_v15 }
  0x2f   : > { %753 = vmatprep.subr.bf16.mxu0 %v838_v16  ;;  %774 = vmatprep.subr.bf16.mxu1 %v838_v16 }
  0x32   : > { %754 = vmatpush3.bf16.msra.mxu0 %v839_v17  ;;  %782 = vmatpush3.bf16.msra.mxu1 %v839_v17 }
  0x35   : > { %457 = vmatmul.mubr.bf16.vlgmr.msra.gmra.mrb[0].mxu0 %v840_v18  ;;  %465 = vmatmul.mubr.bf16.vlgmr.msra.gmra.mrb[0].mxu1 %v843_v19 }
 0x106   : > { %477 = sbr.rel (%p474_p8) target bundleno = 269 (0x10d), region = 40 }
 0x108   : > { %v755_v20 = vpop.f32.mrb[0].mxu0  ;;  %v761_v21 = vpop.f32.mrb[0].mxu1 }
 0x109   : > { %v756_v22 = vpop.f32.mrb[1].mxu0  ;;  %v762_v23 = vpop.f32.mrb[1].mxu1 }
 0x10a   : > { %v985_v24 = vadd.f32 %v756_v22, %v755_v20  ;;  %v987_v25 = vadd.f32 %v762_v23, %v761_v21  ;;  %v758_v26 = vpop.f32.mrb[2].mxu0  ;;  %v764_v27 = vpop.f32.mrb[2].mxu1 }
 0x10b   : > { %v759_v28 = vpop.f32.mrb[3].mxu0  ;;  %v765_v29 = vpop.f32.mrb[3].mxu1 }
 0x10c   : > { %v989_v30 = vadd.f32 %v759_v28, %v758_v26  ;;  %v991_v31 = vadd.f32 %v765_v29, %v764_v27 }
 0x10d PF: > { %p729_p9 = scmp.ne.s32.totalorder %s874_s16, 0 }
 0x10e   : > { %vm485_vm1 = vcmask (!%p729_p9), 261120   ;;  %v503_v33 = vmul.f32 (!%p729_p9), %v985_v24, %v985_v24  ;;  %v504_v34 = vmul.f32 (!%p729_p9), %v989_v30, %v989_v30  ;;  %v505_v39 = vmul.f32 (!%p729_p9), %v987_v25, %v987_v25  ;;  %v484_v60 = vld [vmem:[#allocation2] sm:$0x1] (!%p729_p9)  ;;  %v502_v63 = vld [vmem:[#allocation3] sm:$0x1] (!%p729_p9) }
 0x10f   : > { %483 = sbr.rel (%p729_p9) target bundleno = 294 (0x126), region = 44  ;;  %v486_v35 = vsel (!%p729_p9), %vm485_vm1, %v985_v24, 0.0  ;;  %v487_v36 = vsel (!%p729_p9), %vm485_vm1, %v989_v30, 0.0  ;;  %v489_v37 = vsel (!%p729_p9), %vm485_vm1, %v987_v25, 0.0  ;;  %522 = vst.msk [vmem:[%s963_s30] sm:$0xff] (!%p729_p9), %vm485_vm1, %v985_v24  ;;  %523 = vst.msk [vmem:[%s963_s30 + $0x8] sm:$0xff] (!%p729_p9), %vm485_vm1, %v989_v30  ;;  %v506_v40 = vmul.f32 (!%p729_p9), %v991_v31, %v991_v31 }
 0x110   : > { %524 = vst.msk [vmem:[%s963_s30 + $0x10] sm:$0xff] (!%p729_p9), %vm485_vm1, %v987_v25  ;;  %525 = vst.msk [vmem:[%s963_s30 + $0x18] sm:$0xff] (!%p729_p9), %vm485_vm1, %v991_v31  ;;  %v488_v38 = vadd.f32 (!%p729_p9), %v487_v36, %v486_v35  ;;  %v507_v41 = vsel (!%p729_p9), %vm485_vm1, %v503_v33, 0.0  ;;  %v491_v42 = vsel (!%p729_p9), %vm485_vm1, %v991_v31, 0.0  ;;  %v508_v43 = vsel (!%p729_p9), %vm485_vm1, %v504_v34, 0.0 }
 0x111   : > { %v509_v45 = vadd.f32 (!%p729_p9), %v508_v43, %v507_v41  ;;  %v510_v46 = vsel (!%p729_p9), %vm485_vm1, %v505_v39, 0.0  ;;  %v512_v47 = vsel (!%p729_p9), %vm485_vm1, %v506_v40, 0.0  ;;  %vm500_vm2 = vcmask (!%p729_p9), 253952  }
 0x112   : > { %v490_v44 = vadd.f32 (!%p729_p9), %v489_v37, %v488_v38 }
 0x113   : > { %v511_v49 = vadd.f32 (!%p729_p9), %v510_v46, %v509_v45 }
 0x114   : > { %v492_v48 = vadd.f32 (!%p729_p9), %v491_v42, %v490_v44 }
 0x115   : > { %v513_v51 = vadd.f32 (!%p729_p9), %v512_v47, %v511_v49 }
 0x116   : > { %v493_v50 = vrot.slane %v492_v48, 4 }
 0x117   : > { %v514_v53 = vrot.slane %v513_v51, 4 }
 0x118   : > { %v494_v52 = vadd.f32 %v493_v50, %v492_v48 }
 0x119   : > { %v515_v55 = vadd.f32 %v514_v53, %v513_v51 }
 0x11a   : > { %v495_v54 = vrot.slane %v494_v52, 2 }
 0x11b   : > { %v516_v57 = vrot.slane %v515_v55, 2 }
 0x11c   : > { %v496_v56 = vadd.f32 %v495_v54, %v494_v52 }
 0x11d   : > { %v517_v59 = vadd.f32 %v516_v57, %v515_v55 }
 0x11e   : > { %v497_v58 = vrot.slane %v496_v56, 1 }
 0x11f   : > { %v518_v62 = vrot.slane %v517_v59, 1 }
 0x120   : > { %v498_v61 = vadd.f32 %v497_v58, %v496_v56 }
 0x121   : > { %v519_v1 = vadd.f32 %v518_v62, %v517_v59 }
 0x122   : > { %v499_v0 = vadd.f32 %v498_v61, %v484_v60 }
 0x123   : > { %v520_v2 = vadd.f32 %v519_v1, %v502_v63 }
 0x124   : > { %501 = vst.msk [vmem:[#allocation2] sm:$0x1] %vm500_vm2, %v499_v0 }
 0x125   : > { %521 = vst.msk [vmem:[#allocation3] sm:$0x1] %vm500_vm2, %v520_v2 }
 0x126 PF: > { %p730_p10 = scmp.ne.s32.totalorder %s874_s16, 1 }
 0x127   : > { %v537_v7 = vlaneseq (!%p730_p10)  ;;  %v731_v20 = vld [vmem:[%s1058_s2] ss:$0 sm:$0xff] (!%p730_p10)  ;;  %vm584_vm3 = vcmask (!%p730_p10), 261120  }
 0x128   : > { %529 = sbr.rel (%p730_p10) target bundleno = 331 (0x14b), region = 48 }
 0x129   : > { %v538_v10 = vshrl.u32 (!%p730_p10), %v537_v7, 7 }
 0x12b   : > { %v530_v3 = vld [vmem:[#allocation2] sm:$0x1] (!%p730_p10)  ;;  %v539_v12 = vsub.s32 (!%p730_p10), 0, %v538_v10 }
 0x12c   : > { %v532_v4 = vld [vmem:[#allocation3] sm:$0x1] (!%p730_p10)  ;;  %v531_v5 = vmul.f32 (!%p730_p10), 0.0078125, %v530_v3 }
 0x12d   : > { %v533_v6 = vmul.f32 (!%p730_p10), 0.0078125, %v532_v4 }
 0x12e   : > { %v534_v8 = vmul.f32 (!%p730_p10), %v531_v5, %v531_v5  ;;  %v540_v13 = vrot.slane (!%p730_p10), %v531_v5, %v539_v12 }
 0x130   : > { %v535_v9 = vsub.f32 %v533_v6, %v534_v8  ;;  %v542_v14 = vsub.f32 %v985_v24, %v540_v13  ;;  %v543_v15 = vsub.f32 %v989_v30, %v540_v13  ;;  %v544_v16 = vsub.f32 %v987_v25, %v540_v13  ;;  %v732_v24 = vld [vmem:[%s1059_s3] ss:$0 sm:$0xff] }
 0x131   : > { %v545_v17 = vsub.f32 %v991_v31, %v540_v13 }
 0x132   : > { %v546_v11 = vadd.f32 1e-05, %v535_v9 }
 0x134   : > { %846 = vrsqrt.f32 %v546_v11 }
 0x13e   : > { %v847_v18 = vpop.eup %846 }
 0x13f   : > { %v552_v19 = vrot.slane %v847_v18, %v539_v12 }
 0x141   : > { %v554_v21 = vmul.f32 %v552_v19, %v542_v14  ;;  %v555_v22 = vmul.f32 %v552_v19, %v543_v15  ;;  %v556_v23 = vmul.f32 %v552_v19, %v544_v16  ;;  %v557_v26 = vmul.f32 %v552_v19, %v545_v17 }
 0x143   : > { %v565_v25 = vmul.f32 %v731_v20, %v554_v21  ;;  %v566_v27 = vmul.f32 %v731_v20, %v555_v22  ;;  %v567_v28 = vmul.f32 %v731_v20, %v556_v23  ;;  %v568_v29 = vmul.f32 %v731_v20, %v557_v26 }
 0x145   : > { %v576_v30 = vadd.f32 %v732_v24, %v565_v25  ;;  %v577_v31 = vadd.f32 %v732_v24, %v566_v27  ;;  %v578_v32 = vadd.f32 %v732_v24, %v567_v28  ;;  %v579_v33 = vadd.f32 %v732_v24, %v568_v29 }
 0x147   : > { %v580_v34 = vmax.f32 %v576_v30, 0.0  ;;  %v581_v35 = vmax.f32 %v577_v31, 0.0  ;;  %v582_v36 = vmax.f32 %v578_v32, 0.0  ;;  %v583_v37 = vmax.f32 %v579_v33, 0.0 }
 0x149   : > { %585 = vst.msk [vmem:[%s963_s30] sm:$0xff] %vm584_vm3, %v580_v34  ;;  %586 = vst.msk [vmem:[%s963_s30 + $0x8] sm:$0xff] %vm584_vm3, %v581_v35 }
 0x14a   : > { %587 = vst.msk [vmem:[%s963_s30 + $0x10] sm:$0xff] %vm584_vm3, %v582_v36  ;;  %588 = vst.msk [vmem:[%s963_s30 + $0x18] sm:$0xff] %vm584_vm3, %v583_v37 }
 0x14b PF: > { %s14_s19 = sadd.s32 1, %s886_s19   ;;  %s1061_s15 = smov %s878_s17 }
 0x14c   : > { %p11_p11 = scmp.ge.s32.totalorder %s14_s19, 10   ;;  %s1062_s16 = smov %s882_s18 }
 0x14d   : > { %s1063_s17 = smov %s1066_s20  ;;  %s1064_s18 = smov %s1070_s21 }
 0x14e   :  { %13 = sbr.rel (!%p11_p11) target bundleno = 3 (0x3), region = 81 }

// kernel: coupled_vae_forward.35
= control target key start
LH: loop header
LB: loop body
LE: loop exit
PB: predicated region body
PF: predicated region fallthrough
CT: control target
= control target key end

     0   :  { %s1086_s15 = smov 0   ;;  %s1088_s16 = smov 0   ;;  %s1410_s0 = inlined_call_operand.vmem [shape: bf16[4,128,128], index: 0, kind: input, shape index: {}]   ;;  %s1411_s1 = inlined_call_operand.vmem [shape: bf16[4,128,16], index: 1, kind: input, shape index: {}]   ;;  %s1412_s2 = inlined_call_operand.vmem [shape: f32[1,16], index: 2, kind: input, shape index: {}]   ;;  %s1413_s3 = inlined_call_operand.vmem [shape: f32[1,16], index: 3, kind: input, shape index: {}]   ;;  %s1414_s4 = inlined_call_operand.vmem [shape: f32[4,128,16], index: 4, kind: output, shape index: {}]  }
   0x1   :  { %s1090_s17 = smov 0   ;;  %s1092_s18 = smov 0  }
   0x2   :  { %s1094_s19 = smov 0  }
   0x3 LB: > { %s29_s20 = sadd.s32 1, %s1050_s17  ;;  %s33_s21 = sadd.s32 1, %s1054_s18  ;;  %s1058_s19 = sphi %s1094_s19, %s14_s19   ;;  %s1054_s18 = sphi %s1092_s18, %s1419_s18   ;;  %s1050_s17 = sphi %s1090_s17, %s1418_s17   ;;  %s1046_s16 = sphi %s1088_s16, %s1417_s16   ;;  %s1042_s15 = sphi %s1086_s15, %s1416_s15  }
   0x4   : > { %p31_p0 = scmp.ge.s32.totalorder %s29_s20, 4  ;;  %p863_p1 = scmp.ge.s32.totalorder %s1058_s19, 1 }
   0x5   : > { %p200_p2 = scmp.lt.s32.totalorder %s1058_s19, 9 }
   0x6   : > { %s1421_s20 = smov (%p31_p0, %s29_s20), 0  ;;  %s1423_s21 = smov (!%p31_p0, %s33_s21), %s1054_s18 }
   0x7   : > { %p201_p3 = pnand %p863_p1, %p200_p2  ;;  %p35_p4 = scmp.ge.s32.totalorder %s1423_s21, 2 }
   0x8   : > { %p240_p5 = scmp.lt.s32.totalorder (!%p201_p3), %s1042_s15, 3  ;;  %p265_p6 = scmp.eq.s32.totalorder (!%p201_p3), %s1042_s15, 0 }
   0x9   : > { %s1425_s21 = smov (%p35_p4, %s1423_s21), 0  ;;  %204 = sbr.rel (%p201_p3) target bundleno = 373 (0x175), region = 36 }
   0xa   : > { %p494_p7 = scmp.eq.s32.totalorder (!%p201_p3), %s1046_s16, 0 }
   0xc   : > { %p1155_p8 = pnand (!%p201_p3), %p494_p7, %p265_p6 }
  0x10   : > { %s241_s22 = scalar_select %p240_p5, %s1042_s15, 3 }
  0x11   : > { %vm499_vm0 = vcmask (!%p1155_p8), 122880   ;;  %v1060_v32 = vmov (!%p1155_p8), 0.0  }
  0x12   : > { %s893_s23 = sshll.u32 %s241_s22, 6  ;;  %s895_s24 = sshll.u32 %s241_s22, 7  ;;  %500 = vst.msk [vmem:[#allocation2] sm:$0x1] (!%p1155_p8), %vm499_vm0, %v1060_v32  ;;  %501 = vst.msk [vmem:[#allocation3] sm:$0x1] (!%p1155_p8), %vm499_vm0, %v1060_v32 }
  0x13   : > { %s1125_s27 = scalar_lea.vmem %s1411_s1, %s893_s23  ;;  %s1130_s30 = scalar_lea.vmem %s1414_s4, %s895_s24 }
  0x14   : > { %v1002_v0 = vld [vmem:[%s1125_s27] sm:$0xff]   ;;  %v1003_v1 = vld [vmem:[%s1125_s27 + $0x8] sm:$0xff]   ;;  %v1004_v2 = vld [vmem:[%s1125_s27 + $0x10] sm:$0xff]   ;;  %s1138_s7 = scalar_lea.vmem %s1410_s0, %s893_s23 }
  0x15   : > { %913 = vmatprep.subr.bf16.mxu0 %v1002_v0  ;;  %945 = vmatprep.subr.bf16.mxu1 %v1002_v0  ;;  %v1005_v3 = vld [vmem:[%s1125_s27 + $0x18] sm:$0xff]   ;;  %v1010_v4 = vld [vmem:[%s1138_s7] sm:$0xff]   ;;  %v1007_v7 = vld [vmem:[%s1125_s27 + $0x28] sm:$0xff]  }
  0x16   : > { %914 = vmatpush3.bf16.msra.mxu0 %v1002_v0  ;;  %953 = vmatpush3.bf16.msra.mxu1 %v1002_v0  ;;  %v1011_v5 = vld [vmem:[%s1138_s7 + $0x20] sm:$0xff]   ;;  %v1008_v8 = vld [vmem:[%s1125_s27 + $0x30] sm:$0xff]   ;;  %v1009_v9 = vld [vmem:[%s1125_s27 + $0x38] sm:$0xff]  }
  0x17   : > { %915 = vmatprep.subr.bf16.mxu0 %v1003_v1  ;;  %946 = vmatprep.subr.bf16.mxu1 %v1003_v1  ;;  %v1006_v6 = vld [vmem:[%s1125_s27 + $0x20] sm:$0xff]   ;;  %v1012_v10 = vld [vmem:[%s1138_s7 + $0x8] sm:$0xff]   ;;  %v1014_v12 = vld [vmem:[%s1138_s7 + $0x10] sm:$0xff]  }
  0x18   : > { %929 = vmatprep.mubr.bf16.mxu0 %v1010_v4  ;;  %937 = vmatprep.mubr.bf16.mxu1 %v1011_v5  ;;  %v1013_v11 = vld [vmem:[%s1138_s7 + $0x28] sm:$0xff]   ;;  %v1015_v13 = vld [vmem:[%s1138_s7 + $0x30] sm:$0xff]   ;;  %v1016_v14 = vld [vmem:[%s1138_s7 + $0x18] sm:$0xff]  }
  0x19   : > { %v1017_v15 = vld [vmem:[%s1138_s7 + $0x38] sm:$0xff]  }
  0x1a   : > { %916 = vmatpush3.bf16.msra.mxu0 %v1003_v1  ;;  %954 = vmatpush3.bf16.msra.mxu1 %v1003_v1 }
  0x1b   : > { %917 = vmatprep.subr.bf16.mxu0 %v1004_v2  ;;  %947 = vmatprep.subr.bf16.mxu1 %v1004_v2 }
  0x1e   : > { %918 = vmatpush3.bf16.msra.mxu0 %v1004_v2  ;;  %955 = vmatpush3.bf16.msra.mxu1 %v1004_v2 }
  0x1f   : > { %919 = vmatprep.subr.bf16.mxu0 %v1005_v3  ;;  %948 = vmatprep.subr.bf16.mxu1 %v1005_v3 }
  0x22   : > { %920 = vmatpush3.bf16.msra.mxu0 %v1005_v3  ;;  %956 = vmatpush3.bf16.msra.mxu1 %v1005_v3 }
  0x23   : > { %921 = vmatprep.subr.bf16.mxu0 %v1006_v6  ;;  %949 = vmatprep.subr.bf16.mxu1 %v1006_v6 }
  0x26   : > { %922 = vmatpush3.bf16.msra.mxu0 %v1006_v6  ;;  %957 = vmatpush3.bf16.msra.mxu1 %v1006_v6 }
  0x27   : > { %923 = vmatprep.subr.bf16.mxu0 %v1007_v7  ;;  %950 = vmatprep.subr.bf16.mxu1 %v1007_v7 }
  0x2a   : > { %924 = vmatpush3.bf16.msra.mxu0 %v1007_v7  ;;  %958 = vmatpush3.bf16.msra.mxu1 %v1007_v7 }
  0x2b   : > { %925 = vmatprep.subr.bf16.mxu0 %v1008_v8  ;;  %951 = vmatprep.subr.bf16.mxu1 %v1008_v8 }
  0x2e   : > { %926 = vmatpush3.bf16.msra.mxu0 %v1008_v8  ;;  %959 = vmatpush3.bf16.msra.mxu1 %v1008_v8 }
  0x2f   : > { %927 = vmatprep.subr.bf16.mxu0 %v1009_v9  ;;  %952 = vmatprep.subr.bf16.mxu1 %v1009_v9 }
  0x32   : > { %928 = vmatpush3.bf16.msra.mxu0 %v1009_v9  ;;  %960 = vmatpush3.bf16.msra.mxu1 %v1009_v9 }
  0x35   : > { %930 = vmatmul.mubr.bf16.vlgmr.msra.gmra.mrb[0].mxu0 %v1012_v10  ;;  %938 = vmatmul.mubr.bf16.vlgmr.msra.gmra.mrb[0].mxu1 %v1013_v11 }
  0x36   : > { %933 = vmatprep.mubr.bf16.mxu0 %v1014_v12  ;;  %941 = vmatprep.mubr.bf16.mxu1 %v1015_v13 }
  0x3d   : > { %934 = vmatmul.mubr.bf16.gmra.mrb[4].mxu0 %v1016_v14  ;;  %942 = vmatmul.mubr.bf16.gmra.mrb[4].mxu1 %v1017_v15 }
 0x108   : > { %v1159_v16 = vpop.f32.mrb[0].mxu0  ;;  %v1161_v17 = vpop.f32.mrb[0].mxu1 }
 0x109   : > { %v1163_v18 = vpop.f32.mrb[1].mxu0  ;;  %v1165_v19 = vpop.f32.mrb[1].mxu1 }
 0x10a   : > { %v1167_v20 = vpop.f32.mrb[2].mxu0  ;;  %v1169_v21 = vpop.f32.mrb[2].mxu1 }
 0x10b   : > { %v1171_v22 = vpop.f32.mrb[3].mxu0  ;;  %v1173_v23 = vpop.f32.mrb[3].mxu1 }
 0x10d   : > { %498 = sbr.rel (%p1155_p8) target bundleno = 276 (0x114), region = 40 }
 0x110   : > { %v1175_v24 = vpop.f32.mrb[4].mxu0  ;;  %v1177_v25 = vpop.f32.mrb[4].mxu1 }
 0x111   : > { %v1179_v26 = vpop.f32.mrb[5].mxu0  ;;  %v1181_v27 = vpop.f32.mrb[5].mxu1 }
 0x112   : > { %v1183_v28 = vpop.f32.mrb[6].mxu0  ;;  %v1185_v29 = vpop.f32.mrb[6].mxu1 }
 0x113   : > { %v1187_v30 = vpop.f32.mrb[7].mxu0  ;;  %v1189_v31 = vpop.f32.mrb[7].mxu1 }
 0x114 PF: > { %p887_p9 = scmp.ne.s32.totalorder %s1046_s16, 0 }
 0x115   : > { %vm506_vm1 = vcmask (!%p887_p9), 130048   ;;  %v548_v40 = vmul.f32 (!%p887_p9), %v1163_v18, %v1163_v18  ;;  %v549_v41 = vmul.f32 (!%p887_p9), %v1171_v22, %v1171_v22  ;;  %v550_v43 = vmul.f32 (!%p887_p9), %v1159_v16, %v1159_v16 }
 0x116   : > { %504 = sbr.rel (%p887_p9) target bundleno = 326 (0x146), region = 44  ;;  %v507_v33 = vsel (!%p887_p9), %vm506_vm1, %v1163_v18, 0.0  ;;  %v508_v34 = vsel (!%p887_p9), %vm506_vm1, %v1171_v22, 0.0  ;;  %v510_v35 = vsel (!%p887_p9), %vm506_vm1, %v1159_v16, 0.0  ;;  %603 = vst.msk [vmem:[%s1130_s30] sm:$0xff] (!%p887_p9), %vm506_vm1, %v1163_v18  ;;  %604 = vst.msk [vmem:[%s1130_s30 + $0x8] sm:$0xff] (!%p887_p9), %vm506_vm1, %v1171_v22  ;;  %v551_v45 = vmul.f32 (!%p887_p9), %v1167_v20, %v1167_v20 }
 0x117   : > { %605 = vst.msk [vmem:[%s1130_s30 + $0x10] sm:$0xff] (!%p887_p9), %vm506_vm1, %v1159_v16  ;;  %606 = vst.msk [vmem:[%s1130_s30 + $0x18] sm:$0xff] (!%p887_p9), %vm506_vm1, %v1167_v20  ;;  %v509_v36 = vadd.f32 (!%p887_p9), %v508_v34, %v507_v33  ;;  %v512_v37 = vsel (!%p887_p9), %vm506_vm1, %v1167_v20, 0.0  ;;  %v514_v39 = vsel (!%p887_p9), %vm506_vm1, %v1179_v26, 0.0  ;;  %v516_v44 = vsel (!%p887_p9), %vm506_vm1, %v1187_v30, 0.0 }
 0x118   : > { %607 = vst.msk [vmem:[%s1130_s30 + $0x20] sm:$0xff] (!%p887_p9), %vm506_vm1, %v1179_v26  ;;  %608 = vst.msk [vmem:[%s1130_s30 + $0x28] sm:$0xff] (!%p887_p9), %vm506_vm1, %v1187_v30  ;;  %v518_v47 = vsel (!%p887_p9), %vm506_vm1, %v1175_v24, 0.0  ;;  %v552_v48 = vmul.f32 (!%p887_p9), %v1179_v26, %v1179_v26  ;;  %v564_v49 = vsel (!%p887_p9), %vm506_vm1, %v548_v40, 0.0  ;;  %v565_v50 = vsel (!%p887_p9), %vm506_vm1, %v549_v41, 0.0 }
 0x119   : > { %609 = vst.msk [vmem:[%s1130_s30 + $0x30] sm:$0xff] (!%p887_p9), %vm506_vm1, %v1175_v24  ;;  %610 = vst.msk [vmem:[%s1130_s30 + $0x38] sm:$0xff] (!%p887_p9), %vm506_vm1, %v1183_v28  ;;  %v511_v38 = vadd.f32 (!%p887_p9), %v510_v35, %v509_v36  ;;  %v566_v52 = vadd.f32 (!%p887_p9), %v565_v50, %v564_v49  ;;  %v567_v53 = vsel (!%p887_p9), %vm506_vm1, %v550_v43, 0.0  ;;  %v520_v54 = vsel (!%p887_p9), %vm506_vm1, %v1183_v28, 0.0 }
 0x11a   : > { %611 = vst.msk [vmem:[%s1130_s30 + $0x40] sm:$0xff] (!%p887_p9), %vm506_vm1, %v1165_v19  ;;  %612 = vst.msk [vmem:[%s1130_s30 + $0x48] sm:$0xff] (!%p887_p9), %vm506_vm1, %v1173_v23  ;;  %v553_v55 = vmul.f32 (!%p887_p9), %v1187_v30, %v1187_v30  ;;  %v569_v56 = vsel (!%p887_p9), %vm506_vm1, %v551_v45, 0.0  ;;  %v522_v59 = vsel (!%p887_p9), %vm506_vm1, %v1165_v19, 0.0  ;;  %v554_v60 = vmul.f32 (!%p887_p9), %v1175_v24, %v1175_v24 }
 0x11b   : > { %613 = vst.msk [vmem:[%s1130_s30 + $0x50] sm:$0xff] (!%p887_p9), %vm506_vm1, %v1161_v17  ;;  %614 = vst.msk [vmem:[%s1130_s30 + $0x58] sm:$0xff] (!%p887_p9), %vm506_vm1, %v1169_v21  ;;  %v513_v42 = vadd.f32 (!%p887_p9), %v512_v37, %v511_v38  ;;  %v568_v58 = vadd.f32 (!%p887_p9), %v567_v53, %v566_v52  ;;  %v571_v61 = vsel (!%p887_p9), %vm506_vm1, %v552_v48, 0.0  ;;  %v524_v0 = vsel (!%p887_p9), %vm506_vm1, %v1173_v23, 0.0 }
 0x11c   : > { %615 = vst.msk [vmem:[%s1130_s30 + $0x60] sm:$0xff] (!%p887_p9), %vm506_vm1, %v1181_v27  ;;  %616 = vst.msk [vmem:[%s1130_s30 + $0x68] sm:$0xff] (!%p887_p9), %vm506_vm1, %v1189_v31  ;;  %v555_v1 = vmul.f32 (!%p887_p9), %v1183_v28, %v1183_v28  ;;  %v573_v2 = vsel (!%p887_p9), %vm506_vm1, %v553_v55, 0.0  ;;  %v526_v5 = vsel (!%p887_p9), %vm506_vm1, %v1161_v17, 0.0  ;;  %v556_v6 = vmul.f32 (!%p887_p9), %v1165_v19, %v1165_v19 }
 0x11d   : > { %617 = vst.msk [vmem:[%s1130_s30 + $0x70] sm:$0xff] %vm506_vm1, %v1177_v25  ;;  %618 = vst.msk [vmem:[%s1130_s30 + $0x78] sm:$0xff] %vm506_vm1, %v1185_v29  ;;  %v515_v46 = vadd.f32 %v514_v39, %v513_v42  ;;  %v570_v63 = vadd.f32 %v569_v56, %v568_v58  ;;  %v575_v7 = vsel %vm506_vm1, %v554_v60, 0.0  ;;  %v528_v10 = vsel %vm506_vm1, %v1169_v21, 0.0 }
 0x11e   : > { %v557_v11 = vmul.f32 %v1173_v23, %v1173_v23  ;;  %v577_v12 = vsel %vm506_vm1, %v555_v1, 0.0  ;;  %v530_v15 = vsel %vm506_vm1, %v1181_v27, 0.0  ;;  %v558_v32 = vmul.f32 %v1161_v17, %v1161_v17 }
 0x11f   : > { %v517_v51 = vadd.f32 %v516_v44, %v515_v46  ;;  %v572_v4 = vadd.f32 %v571_v61, %v570_v63  ;;  %v579_v33 = vsel %vm506_vm1, %v556_v6, 0.0  ;;  %v532_v36 = vsel %vm506_vm1, %v1189_v31, 0.0 }
 0x120   : > { %v559_v37 = vmul.f32 %v1169_v21, %v1169_v21  ;;  %v581_v38 = vsel %vm506_vm1, %v557_v11, 0.0  ;;  %v534_v41 = vsel %vm506_vm1, %v1177_v25, 0.0  ;;  %v560_v42 = vmul.f32 %v1181_v27, %v1181_v27 }
 0x121   : > { %v519_v57 = vadd.f32 %v518_v47, %v517_v51  ;;  %v574_v9 = vadd.f32 %v573_v2, %v572_v4  ;;  %v583_v43 = vsel %vm506_vm1, %v558_v32, 0.0  ;;  %v536_v46 = vsel %vm506_vm1, %v1185_v29, 0.0 }
 0x122   : > { %v561_v47 = vmul.f32 %v1189_v31, %v1189_v31  ;;  %v585_v48 = vsel %vm506_vm1, %v559_v37, 0.0  ;;  %v562_v51 = vmul.f32 %v1177_v25, %v1177_v25  ;;  %v587_v52 = vsel %vm506_vm1, %v560_v42, 0.0 }
 0x123   : > { %v521_v62 = vadd.f32 %v520_v54, %v519_v57  ;;  %v576_v14 = vadd.f32 %v575_v7, %v574_v9  ;;  %v563_v55 = vmul.f32 %v1185_v29, %v1185_v29  ;;  %vm545_vm2 = vcmask 122880  }
 0x124   : > { %v589_v56 = vsel %vm506_vm1, %v561_v47, 0.0 }
 0x125   : > { %v523_v3 = vadd.f32 %v522_v59, %v521_v62  ;;  %v578_v35 = vadd.f32 %v577_v12, %v576_v14  ;;  %v591_v59 = vsel %vm506_vm1, %v562_v51, 0.0  ;;  %v593_v62 = vsel %vm506_vm1, %v563_v55, 0.0  ;;  %v547_v12 = vld [vmem:[#allocation3] sm:$0x1] }
 0x127   : > { %v525_v8 = vadd.f32 %v524_v0, %v523_v3  ;;  %v580_v40 = vadd.f32 %v579_v33, %v578_v35 }
 0x129   : > { %v527_v13 = vadd.f32 %v526_v5, %v525_v8  ;;  %v582_v45 = vadd.f32 %v581_v38, %v580_v40  ;;  %v505_v5 = vld [vmem:[#allocation2] sm:$0x1] }
 0x12b   : > { %v529_v34 = vadd.f32 %v528_v10, %v527_v13  ;;  %v584_v50 = vadd.f32 %v583_v43, %v582_v45 }
 0x12d   : > { %v531_v39 = vadd.f32 %v530_v15, %v529_v34  ;;  %v586_v54 = vadd.f32 %v585_v48, %v584_v50 }
 0x12f   : > { %v533_v44 = vadd.f32 %v532_v36, %v531_v39  ;;  %v588_v58 = vadd.f32 %v587_v52, %v586_v54 }
 0x131   : > { %v535_v49 = vadd.f32 %v534_v41, %v533_v44  ;;  %v590_v61 = vadd.f32 %v589_v56, %v588_v58 }
 0x133   : > { %v537_v53 = vadd.f32 %v536_v46, %v535_v49  ;;  %v592_v0 = vadd.f32 %v591_v59, %v590_v61 }
 0x135   : > { %v538_v57 = vrot.slane %v537_v53, 4  ;;  %v594_v2 = vadd.f32 %v593_v62, %v592_v0 }
 0x137   : > { %v539_v60 = vadd.f32 %v538_v57, %v537_v53  ;;  %v595_v4 = vrot.slane %v594_v2, 4 }
 0x139   : > { %v540_v63 = vrot.slane %v539_v60, 2  ;;  %v596_v7 = vadd.f32 %v595_v4, %v594_v2 }
 0x13b   : > { %v541_v1 = vadd.f32 %v540_v63, %v539_v60  ;;  %v597_v9 = vrot.slane %v596_v7, 2 }
 0x13d   : > { %v542_v3 = vrot.slane %v541_v1, 1  ;;  %v598_v10 = vadd.f32 %v597_v9, %v596_v7 }
 0x13f   : > { %v543_v6 = vadd.f32 %v542_v3, %v541_v1  ;;  %v599_v11 = vrot.slane %v598_v10, 1 }
 0x141   : > { %v544_v8 = vadd.f32 %v543_v6, %v505_v5  ;;  %v600_v13 = vadd.f32 %v599_v11, %v598_v10 }
 0x143   : > { %546 = vst.msk [vmem:[#allocation2] sm:$0x1] %vm545_vm2, %v544_v8  ;;  %v601_v14 = vadd.f32 %v600_v13, %v547_v12 }
 0x145   : > { %602 = vst.msk [vmem:[#allocation3] sm:$0x1] %vm545_vm2, %v601_v14 }
 0x146 PF: > { %p888_p10 = scmp.ne.s32.totalorder %s1046_s16, 1 }
 0x147   : > { %v630_v35 = vlaneseq (!%p888_p10)  ;;  %vm737_vm3 = vcmask (!%p888_p10), 130048   ;;  %v890_v53 = vld [vmem:[%s1413_s3] ss:$0 sm:$0xff] (!%p888_p10) }
 0x148   : > { %622 = sbr.rel (%p888_p10) target bundleno = 373 (0x175), region = 48 }
 0x149   : > { %v631_v38 = vshrl.u32 (!%p888_p10), %v630_v35, 7 }
 0x14a   : > { %v623_v15 = vld [vmem:[#allocation2] sm:$0x1] (!%p888_p10) }
 0x14b   : > { %v624_v33 = vmul.f32 (!%p888_p10), 0.001953125, %v623_v15  ;;  %v632_v40 = vsub.s32 (!%p888_p10), 0, %v631_v38 }
 0x14c   : > { %v625_v32 = vld [vmem:[#allocation3] sm:$0x1] (!%p888_p10) }
 0x14d   : > { %v626_v34 = vmul.f32 (!%p888_p10), 0.001953125, %v625_v32  ;;  %v627_v36 = vmul.f32 (!%p888_p10), %v624_v33, %v624_v33  ;;  %v1323_v41 = vrot.slane (!%p888_p10), %v624_v33, %v632_v40 }
 0x14f   : > { %v628_v37 = vsub.f32 %v626_v34, %v627_v36  ;;  %v635_v42 = vsub.f32 %v1163_v18, %v1323_v41  ;;  %v636_v43 = vsub.f32 %v1171_v22, %v1323_v41  ;;  %v637_v44 = vsub.f32 %v1159_v16, %v1323_v41 }
 0x150   : > { %v638_v45 = vsub.f32 %v1167_v20, %v1323_v41  ;;  %v639_v46 = vsub.f32 %v1179_v26, %v1323_v41  ;;  %v640_v48 = vsub.f32 %v1187_v30, %v1323_v41  ;;  %v641_v18 = vsub.f32 %v1175_v24, %v1323_v41  ;;  %v889_v24 = vld [vmem:[%s1412_s2] ss:$0 sm:$0xff] }
 0x151   : > { %v651_v39 = vadd.f32 1e-05, %v628_v37  ;;  %v642_v22 = vsub.f32 %v1183_v28, %v1323_v41  ;;  %v643_v16 = vsub.f32 %v1165_v19, %v1323_v41  ;;  %v644_v20 = vsub.f32 %v1173_v23, %v1323_v41 }
 0x152   : > { %v645_v26 = vsub.f32 %v1161_v17, %v1323_v41  ;;  %v646_v50 = vsub.f32 %v1169_v21, %v1323_v41  ;;  %v647_v28 = vsub.f32 %v1181_v27, %v1323_v41  ;;  %v648_v19 = vsub.f32 %v1189_v31, %v1323_v41 }
 0x153   : > { %1018 = vrsqrt.f32 %v651_v39  ;;  %v649_v30 = vsub.f32 %v1177_v25, %v1323_v41  ;;  %v650_v23 = vsub.f32 %v1185_v29, %v1323_v41 }
 0x15d   : > { %v1019_v47 = vpop.eup %1018 }
 0x15e   : > { %v657_v49 = vrot.slane %v1019_v47, %v632_v40 }
 0x160   : > { %v659_v17 = vmul.f32 %v657_v49, %v635_v42  ;;  %v660_v51 = vmul.f32 %v657_v49, %v636_v43  ;;  %v661_v52 = vmul.f32 %v657_v49, %v637_v44  ;;  %v662_v21 = vmul.f32 %v657_v49, %v638_v45 }
 0x161   : > { %v663_v54 = vmul.f32 %v657_v49, %v639_v46  ;;  %v664_v55 = vmul.f32 %v657_v49, %v640_v48  ;;  %v665_v27 = vmul.f32 %v657_v49, %v641_v18  ;;  %v666_v56 = vmul.f32 %v657_v49, %v642_v22 }
 0x162   : > { %v682_v57 = vmul.f32 %v889_v24, %v659_v17  ;;  %v683_v31 = vmul.f32 %v889_v24, %v660_v51  ;;  %v684_v58 = vmul.f32 %v889_v24, %v661_v52  ;;  %v685_v59 = vmul.f32 %v889_v24, %v662_v21 }
 0x163   : > { %v686_v25 = vmul.f32 %v889_v24, %v663_v54  ;;  %v687_v60 = vmul.f32 %v889_v24, %v664_v55  ;;  %v688_v61 = vmul.f32 %v889_v24, %v665_v27  ;;  %v689_v29 = vmul.f32 %v889_v24, %v666_v56 }
 0x164   : > { %v705_v62 = vadd.f32 %v890_v53, %v682_v57  ;;  %v706_v63 = vadd.f32 %v890_v53, %v683_v31  ;;  %v707_v0 = vadd.f32 %v890_v53, %v684_v58  ;;  %v708_v1 = vadd.f32 %v890_v53, %v685_v59 }
 0x165   : > { %v709_v2 = vadd.f32 %v890_v53, %v686_v25  ;;  %v710_v3 = vadd.f32 %v890_v53, %v687_v60  ;;  %v711_v4 = vadd.f32 %v890_v53, %v688_v61  ;;  %v712_v5 = vadd.f32 %v890_v53, %v689_v29 }
 0x166   : > { %v721_v6 = vmax.f32 %v705_v62, 0.0  ;;  %v722_v7 = vmax.f32 %v706_v63, 0.0  ;;  %v723_v8 = vmax.f32 %v707_v0, 0.0  ;;  %v724_v9 = vmax.f32 %v708_v1, 0.0 }
 0x167   : > { %v725_v10 = vmax.f32 %v709_v2, 0.0  ;;  %v726_v11 = vmax.f32 %v710_v3, 0.0  ;;  %v727_v12 = vmax.f32 %v711_v4, 0.0  ;;  %v728_v13 = vmax.f32 %v712_v5, 0.0 }
 0x168   : > { %738 = vst.msk [vmem:[%s1130_s30] sm:$0xff] %vm737_vm3, %v721_v6  ;;  %739 = vst.msk [vmem:[%s1130_s30 + $0x8] sm:$0xff] %vm737_vm3, %v722_v7  ;;  %v667_v14 = vmul.f32 %v657_v49, %v643_v16  ;;  %v668_v15 = vmul.f32 %v657_v49, %v644_v20  ;;  %v669_v32 = vmul.f32 %v657_v49, %v645_v26 }
 0x169   : > { %740 = vst.msk [vmem:[%s1130_s30 + $0x10] sm:$0xff] %vm737_vm3, %v723_v8  ;;  %741 = vst.msk [vmem:[%s1130_s30 + $0x18] sm:$0xff] %vm737_vm3, %v724_v9  ;;  %v670_v33 = vmul.f32 %v657_v49, %v646_v50  ;;  %v671_v34 = vmul.f32 %v657_v49, %v647_v28  ;;  %v672_v35 = vmul.f32 %v657_v49, %v648_v19 }
 0x16a   : > { %742 = vst.msk [vmem:[%s1130_s30 + $0x20] sm:$0xff] %vm737_vm3, %v725_v10  ;;  %743 = vst.msk [vmem:[%s1130_s30 + $0x28] sm:$0xff] %vm737_vm3, %v726_v11  ;;  %v673_v36 = vmul.f32 %v657_v49, %v649_v30  ;;  %v674_v37 = vmul.f32 %v657_v49, %v650_v23  ;;  %v690_v38 = vmul.f32 %v889_v24, %v667_v14 }
 0x16b   : > { %744 = vst.msk [vmem:[%s1130_s30 + $0x30] sm:$0xff] %vm737_vm3, %v727_v12  ;;  %745 = vst.msk [vmem:[%s1130_s30 + $0x38] sm:$0xff] %vm737_vm3, %v728_v13  ;;  %v691_v39 = vmul.f32 %v889_v24, %v668_v15  ;;  %v692_v40 = vmul.f32 %v889_v24, %v669_v32  ;;  %v693_v41 = vmul.f32 %v889_v24, %v670_v33 }
 0x16c   : > { %v694_v42 = vmul.f32 %v889_v24, %v671_v34  ;;  %v695_v43 = vmul.f32 %v889_v24, %v672_v35  ;;  %v696_v44 = vmul.f32 %v889_v24, %v673_v36  ;;  %v697_v45 = vmul.f32 %v889_v24, %v674_v37 }
 0x16d   : > { %v713_v46 = vadd.f32 %v890_v53, %v690_v38  ;;  %v714_v47 = vadd.f32 %v890_v53, %v691_v39  ;;  %v715_v48 = vadd.f32 %v890_v53, %v692_v40  ;;  %v716_v18 = vadd.f32 %v890_v53, %v693_v41 }
 0x16e   : > { %v717_v22 = vadd.f32 %v890_v53, %v694_v42  ;;  %v718_v16 = vadd.f32 %v890_v53, %v695_v43  ;;  %v719_v49 = vadd.f32 %v890_v53, %v696_v44  ;;  %v720_v20 = vadd.f32 %v890_v53, %v697_v45 }
 0x16f   : > { %v729_v26 = vmax.f32 %v713_v46, 0.0  ;;  %v730_v50 = vmax.f32 %v714_v47, 0.0  ;;  %v731_v28 = vmax.f32 %v715_v48, 0.0  ;;  %v732_v24 = vmax.f32 %v716_v18, 0.0 }
 0x170   : > { %v733_v19 = vmax.f32 %v717_v22, 0.0  ;;  %v734_v30 = vmax.f32 %v718_v16, 0.0  ;;  %v735_v23 = vmax.f32 %v719_v49, 0.0  ;;  %v736_v17 = vmax.f32 %v720_v20, 0.0 }
 0x171   : > { %746 = vst.msk [vmem:[%s1130_s30 + $0x40] sm:$0xff] %vm737_vm3, %v729_v26  ;;  %747 = vst.msk [vmem:[%s1130_s30 + $0x48] sm:$0xff] %vm737_vm3, %v730_v50 }
 0x172   : > { %748 = vst.msk [vmem:[%s1130_s30 + $0x50] sm:$0xff] %vm737_vm3, %v731_v28  ;;  %749 = vst.msk [vmem:[%s1130_s30 + $0x58] sm:$0xff] %vm737_vm3, %v732_v24 }
 0x173   : > { %750 = vst.msk [vmem:[%s1130_s30 + $0x60] sm:$0xff] %vm737_vm3, %v733_v19  ;;  %751 = vst.msk [vmem:[%s1130_s30 + $0x68] sm:$0xff] %vm737_vm3, %v734_v30 }
 0x174   : > { %752 = vst.msk [vmem:[%s1130_s30 + $0x70] sm:$0xff] %vm737_vm3, %v735_v23  ;;  %753 = vst.msk [vmem:[%s1130_s30 + $0x78] sm:$0xff] %vm737_vm3, %v736_v17 }
 0x175 PF: > { %s14_s19 = sadd.s32 1, %s1058_s19   ;;  %s1416_s15 = smov %s1050_s17 }
 0x176   : > { %p11_p11 = scmp.ge.s32.totalorder %s14_s19, 10   ;;  %s1417_s16 = smov %s1054_s18 }
 0x177   : > { %s1418_s17 = smov %s1421_s20  ;;  %s1419_s18 = smov %s1425_s21 }
 0x178   :  { %13 = sbr.rel (!%p11_p11) target bundleno = 3 (0x3), region = 81 }

// kernel: coupled_vae_forward.21
= control target key start
LH: loop header
LB: loop body
LE: loop exit
PB: predicated region body
PF: predicated region fallthrough
CT: control target
= control target key end

     0   :  { %s1485_s9 = smov 0   ;;  %s1487_s10 = smov 0   ;;  %s1727_s0 = inlined_call_operand.vmem [shape: bf16[1,2048,48], index: 0, kind: input, shape index: {}]   ;;  %s1728_s1 = inlined_call_operand.vmem [shape: bf16[1,48,8], index: 1, kind: input, shape index: {}]   ;;  %s1729_s2 = inlined_call_operand.vmem [shape: f32[1,2048,8], index: 2, kind: output, shape index: {}]  }
   0x1   :  { %s1489_s11 = smov 0  }
   0x2 LB: > { %s21_s12 = sadd.s32 1, %s1464_s10  ;;  %p1202_p0 = scmp.ge.s32.totalorder %s1468_s11, 1  ;;  %s1468_s11 = sphi %s1489_s11, %s12_s11   ;;  %s1464_s10 = sphi %s1487_s10, %s1731_s10   ;;  %s1460_s9 = sphi %s1485_s9, %s1730_s9  }
   0x3   : > { %p22_p1 = scmp.ge.s32.totalorder %s21_s12, 4  ;;  %p143_p2 = scmp.lt.s32.totalorder %s1468_s11, 5 }
   0x5   : > { %s1733_s12 = smov (%p22_p1, %s21_s12), 0  ;;  %p144_p3 = pnand %p1202_p0, %p143_p2 }
   0x6   : > { %v1411_v0 = vld [vmem:[%s1728_s1] sm:$0xff] (!%p144_p3)   ;;  %s1203_s15 = sshll.u32 (!%p144_p3), %s1460_s9, 6  ;;  %v1412_v1 = vld [vmem:[%s1728_s1 + $0x8] sm:$0xff] (!%p144_p3)   ;;  %v1413_v2 = vld [vmem:[%s1728_s1 + $0x10] sm:$0xff] (!%p144_p3)   ;;  %vm452_vm0 = vcmask (!%p144_p3), 392192   ;;  %vm1030_vm1 = vcmask (!%p144_p3), 64512  }
   0x7   : > { %147 = sbr.rel (%p144_p3) target bundleno = 297 (0x129), region = 28  ;;  %p181_p4 = scmp.lt.s32.totalorder (!%p144_p3), %s1203_s15, 255  ;;  %1311 = vmatprep.subr.bf16.mxu0 (!%p144_p3), %v1411_v0  ;;  %1381 = vmatprep.subr.bf16.mxu1 (!%p144_p3), %v1411_v0 }
   0x8   : > { %1312 = vmatpush3.bf16.msra.mxu0 (!%p144_p3), %v1411_v0  ;;  %1384 = vmatpush3.bf16.msra.mxu1 (!%p144_p3), %v1411_v0 }
   0x9   : > { %1313 = vmatprep.subr.bf16.mxu0 (!%p144_p3), %v1412_v1  ;;  %1382 = vmatprep.subr.bf16.mxu1 (!%p144_p3), %v1412_v1 }
   0xc   : > { %1314 = vmatpush3.bf16.msra.mxu0 (!%p144_p3), %v1412_v1  ;;  %1385 = vmatpush3.bf16.msra.mxu1 (!%p144_p3), %v1412_v1 }
   0xd   : > { %1315 = vmatprep.subr.bf16.mxu0 (!%p144_p3), %v1413_v2  ;;  %1383 = vmatprep.subr.bf16.mxu1 (!%p144_p3), %v1413_v2 }
   0xe   : > { %s1735_s15 = smov (!%p181_p4, %s1203_s15), 255 }
   0xf   : > { %s1204_s20 = sshll.u32 %s1735_s15, 2  ;;  %s1206_s24 = sshll.u32 %s1735_s15, 3 }
  0x10   : > { %s1518_s23 = scalar_lea.vmem %s1727_s0, %s1204_s20  ;;  %1316 = vmatpush3.bf16.msra.mxu0 %v1413_v2  ;;  %1386 = vmatpush3.bf16.msra.mxu1 %v1413_v2  ;;  %s1588_s27 = scalar_lea.vmem %s1729_s2, %s1206_s24 }
  0x11   : > { %v1414_v3 = vld [vmem:[%s1518_s23] sm:$0xff]   ;;  %v1416_v5 = vld [vmem:[%s1518_s23 + $0x8] sm:$0xff]   ;;  %v1418_v7 = vld [vmem:[%s1518_s23 + $0x10] sm:$0xff]  }
  0x12   : > { %v1415_v4 = vld [vmem:[%s1518_s23 + $0x80] sm:$0xff]   ;;  %1317 = vmatprep.mubr.msk.bf16.mxu0 %vm452_vm0, %v1414_v3  ;;  %v1417_v6 = vld [vmem:[%s1518_s23 + $0x88] sm:$0xff]   ;;  %v1419_v8 = vld [vmem:[%s1518_s23 + $0x90] sm:$0xff]  }
  0x13   : > { %1349 = vmatprep.mubr.msk.bf16.mxu1 %vm452_vm0, %v1415_v4  ;;  %1318 = vmatmul.mubr.msk.bf16.vlgmr.msra.gmra.mrb[0].mxu0 %vm452_vm0, %v1416_v5  ;;  %v1420_v9 = vld [vmem:[%s1518_s23 + $0x18] sm:$0xff]   ;;  %v1422_v11 = vld [vmem:[%s1518_s23 + $0x20] sm:$0xff]   ;;  %v1424_v13 = vld [vmem:[%s1518_s23 + $0x28] sm:$0xff]  }
  0x14   : > { %1350 = vmatmul.mubr.msk.bf16.vlgmr.msra.gmra.mrb[0].mxu1 %vm452_vm0, %v1417_v6  ;;  %1321 = vmatprep.mubr.msk.bf16.mxu0 %vm452_vm0, %v1418_v7  ;;  %v1421_v10 = vld [vmem:[%s1518_s23 + $0x98] sm:$0xff]   ;;  %v1423_v12 = vld [vmem:[%s1518_s23 + $0xa0] sm:$0xff]   ;;  %v1425_v14 = vld [vmem:[%s1518_s23 + $0xa8] sm:$0xff]  }
  0x15   : > { %1353 = vmatprep.mubr.msk.bf16.mxu1 %vm452_vm0, %v1419_v8  ;;  %v1426_v15 = vld [vmem:[%s1518_s23 + $0x30] sm:$0xff]   ;;  %v1428_v17 = vld [vmem:[%s1518_s23 + $0x38] sm:$0xff]   ;;  %v1430_v19 = vld [vmem:[%s1518_s23 + $0x40] sm:$0xff]  }
  0x16   : > { %v1427_v16 = vld [vmem:[%s1518_s23 + $0xb0] sm:$0xff]   ;;  %v1429_v18 = vld [vmem:[%s1518_s23 + $0xb8] sm:$0xff]   ;;  %v1431_v20 = vld [vmem:[%s1518_s23 + $0xc0] sm:$0xff]  }
  0x17   : > { %v1432_v21 = vld [vmem:[%s1518_s23 + $0x48] sm:$0xff]   ;;  %v1434_v23 = vld [vmem:[%s1518_s23 + $0x50] sm:$0xff]   ;;  %v1436_v25 = vld [vmem:[%s1518_s23 + $0x58] sm:$0xff]  }
  0x18   : > { %v1433_v22 = vld [vmem:[%s1518_s23 + $0xc8] sm:$0xff]   ;;  %v1435_v24 = vld [vmem:[%s1518_s23 + $0xd0] sm:$0xff]   ;;  %v1437_v26 = vld [vmem:[%s1518_s23 + $0xd8] sm:$0xff]  }
  0x19   : > { %v1438_v27 = vld [vmem:[%s1518_s23 + $0x60] sm:$0xff]   ;;  %v1440_v29 = vld [vmem:[%s1518_s23 + $0x68] sm:$0xff]   ;;  %v1442_v31 = vld [vmem:[%s1518_s23 + $0x70] sm:$0xff]  }
  0x1a   : > { %v1439_v28 = vld [vmem:[%s1518_s23 + $0xe0] sm:$0xff]   ;;  %v1441_v30 = vld [vmem:[%s1518_s23 + $0xe8] sm:$0xff]   ;;  %v1443_v32 = vld [vmem:[%s1518_s23 + $0xf0] sm:$0xff]  }
  0x1b   : > { %1322 = vmatmul.mubr.msk.bf16.gmra.mrb[4].mxu0 %vm452_vm0, %v1420_v9  ;;  %v1444_v33 = vld [vmem:[%s1518_s23 + $0x78] sm:$0xff]  }
  0x1c   : > { %1354 = vmatmul.mubr.msk.bf16.gmra.mrb[4].mxu1 %vm452_vm0, %v1421_v10  ;;  %1325 = vmatprep.mubr.msk.bf16.mxu0 %vm452_vm0, %v1422_v11  ;;  %v1445_v34 = vld [vmem:[%s1518_s23 + $0xf8] sm:$0xff]  }
  0x1d   : > { %1357 = vmatprep.mubr.msk.bf16.mxu1 %vm452_vm0, %v1423_v12 }
  0x23   : > { %1326 = vmatmul.mubr.msk.bf16.gmra.mrb[8].mxu0 %vm452_vm0, %v1424_v13 }
  0x24   : > { %1358 = vmatmul.mubr.msk.bf16.gmra.mrb[8].mxu1 %vm452_vm0, %v1425_v14  ;;  %1329 = vmatprep.mubr.msk.bf16.mxu0 %vm452_vm0, %v1426_v15 }
  0x25   : > { %1361 = vmatprep.mubr.msk.bf16.mxu1 %vm452_vm0, %v1427_v16 }
  0x2b   : > { %1330 = vmatmul.mubr.msk.bf16.gmra.mrb[12].mxu0 %vm452_vm0, %v1428_v17 }
  0x2c   : > { %1362 = vmatmul.mubr.msk.bf16.gmra.mrb[12].mxu1 %vm452_vm0, %v1429_v18  ;;  %1333 = vmatprep.mubr.msk.bf16.mxu0 %vm452_vm0, %v1430_v19 }
  0x2d   : > { %1365 = vmatprep.mubr.msk.bf16.mxu1 %vm452_vm0, %v1431_v20 }
  0x33   : > { %1334 = vmatmul.mubr.msk.bf16.gmra.mrb[16].mxu0 %vm452_vm0, %v1432_v21 }
  0x34   : > { %1366 = vmatmul.mubr.msk.bf16.gmra.mrb[16].mxu1 %vm452_vm0, %v1433_v22  ;;  %1337 = vmatprep.mubr.msk.bf16.mxu0 %vm452_vm0, %v1434_v23 }
  0x35   : > { %1369 = vmatprep.mubr.msk.bf16.mxu1 %vm452_vm0, %v1435_v24 }
  0x3b   : > { %1338 = vmatmul.mubr.msk.bf16.gmra.mrb[20].mxu0 %vm452_vm0, %v1436_v25 }
  0x3c   : > { %1370 = vmatmul.mubr.msk.bf16.gmra.mrb[20].mxu1 %vm452_vm0, %v1437_v26  ;;  %1341 = vmatprep.mubr.msk.bf16.mxu0 %vm452_vm0, %v1438_v27 }
  0x3d   : > { %1373 = vmatprep.mubr.msk.bf16.mxu1 %vm452_vm0, %v1439_v28 }
  0x43   : > { %1342 = vmatmul.mubr.msk.bf16.gmra.mrb[24].mxu0 %vm452_vm0, %v1440_v29 }
  0x44   : > { %1374 = vmatmul.mubr.msk.bf16.gmra.mrb[24].mxu1 %vm452_vm0, %v1441_v30  ;;  %1345 = vmatprep.mubr.msk.bf16.mxu0 %vm452_vm0, %v1442_v31 }
  0x45   : > { %1377 = vmatprep.mubr.msk.bf16.mxu1 %vm452_vm0, %v1443_v32 }
  0x4b   : > { %1346 = vmatmul.mubr.msk.bf16.gmra.mrb[28].mxu0 %vm452_vm0, %v1444_v33 }
  0x4c   : > { %1378 = vmatmul.mubr.msk.bf16.gmra.mrb[28].mxu1 %vm452_vm0, %v1445_v34 }
  0xe6   : > { %v1319_v35 = vpop.f32.mrb[0].mxu0 }
  0xe7   : > { %v1351_v36 = vpop.f32.mrb[0].mxu1  ;;  %vm840_vm2 = vcmp.gt.f32.partialorder %v1319_v35, 0.0  ;;  %v904_v37 = vmul.f32 0.2, %v1319_v35  ;;  %v583_v39 = vpop.f32.mrb[1].mxu0 }
  0xe8   : > { %vm872_vm3 = vcmp.gt.f32.partialorder %v1351_v36, 0.0  ;;  %v936_v38 = vmul.f32 0.2, %v1351_v36  ;;  %v711_v40 = vpop.f32.mrb[1].mxu1  ;;  %vm838_vm4 = vcmp.gt.f32.partialorder %v583_v39, 0.0  ;;  %v1320_v44 = vpop.f32.mrb[2].mxu0 }
  0xe9   : > { %v968_v41 = vsel %vm840_vm2, %v1319_v35, %v904_v37  ;;  %v902_v43 = vmul.f32 0.2, %v583_v39  ;;  %v1352_v45 = vpop.f32.mrb[2].mxu1  ;;  %vm870_vm5 = vcmp.gt.f32.partialorder %v711_v40, 0.0  ;;  %v934_v46 = vmul.f32 0.2, %v711_v40 }
  0xea   : > { %v1000_v42 = vsel %vm872_vm3, %v1351_v36, %v936_v38  ;;  %1033 = vst.msk [vmem:[%s1588_s27 + $0x10] sm:$0xff] %vm1030_vm1, %v968_v41  ;;  %vm841_vm6 = vcmp.gt.f32.partialorder %v1320_v44, 0.0  ;;  %v905_v47 = vmul.f32 0.2, %v1320_v44  ;;  %vm873_vm7 = vcmp.gt.f32.partialorder %v1352_v45, 0.0  ;;  %v586_v50 = vpop.f32.mrb[3].mxu0 }
  0xeb   : > { %1065 = vst.msk [vmem:[%s1588_s27 + $0x110] sm:$0xff] %vm1030_vm1, %v1000_v42  ;;  %v966_v48 = vsel %vm838_vm4, %v583_v39, %v902_v43  ;;  %v937_v49 = vmul.f32 0.2, %v1352_v45  ;;  %v714_v51 = vpop.f32.mrb[3].mxu1  ;;  %v998_v52 = vsel %vm870_vm5, %v711_v40, %v934_v46  ;;  %vm839_vm8 = vcmp.gt.f32.partialorder %v586_v50, 0.0 }
  0xec   : > { %1031 = vst.msk [vmem:[%s1588_s27] sm:$0xff] %vm1030_vm1, %v966_v48  ;;  %v969_v53 = vsel %vm841_vm6, %v1320_v44, %v905_v47  ;;  %v903_v54 = vmul.f32 0.2, %v586_v50  ;;  %1063 = vst.msk [vmem:[%s1588_s27 + $0x100] sm:$0xff] %vm1030_vm1, %v998_v52  ;;  %vm871_vm9 = vcmp.gt.f32.partialorder %v714_v51, 0.0 }
  0xed   : > { %1034 = vst.msk [vmem:[%s1588_s27 + $0x18] sm:$0xff] %vm1030_vm1, %v969_v53  ;;  %v1001_v55 = vsel %vm873_vm7, %v1352_v45, %v937_v49  ;;  %v935_v56 = vmul.f32 0.2, %v714_v51 }
  0xee   : > { %1066 = vst.msk [vmem:[%s1588_s27 + $0x118] sm:$0xff] %vm1030_vm1, %v1001_v55  ;;  %v967_v57 = vsel %vm839_vm8, %v586_v50, %v903_v54  ;;  %v1323_v58 = vpop.f32.mrb[4].mxu0 }
  0xef   : > { %v1355_v59 = vpop.f32.mrb[4].mxu1  ;;  %1032 = vst.msk [vmem:[%s1588_s27 + $0x8] sm:$0xff] %vm1030_vm1, %v967_v57  ;;  %v999_v60 = vsel %vm871_vm9, %v714_v51, %v935_v56  ;;  %vm844_vm10 = vcmp.gt.f32.partialorder %v1323_v58, 0.0  ;;  %v908_v61 = vmul.f32 0.2, %v1323_v58  ;;  %v599_v62 = vpop.f32.mrb[5].mxu0 }
  0xf0   : > { %vm876_vm11 = vcmp.gt.f32.partialorder %v1355_v59, 0.0  ;;  %v727_v63 = vpop.f32.mrb[5].mxu1  ;;  %1064 = vst.msk [vmem:[%s1588_s27 + $0x108] sm:$0xff] %vm1030_vm1, %v999_v60  ;;  %v940_v0 = vmul.f32 0.2, %v1355_v59  ;;  %vm842_vm12 = vcmp.gt.f32.partialorder %v599_v62, 0.0 }
  0xf1   : > { %v906_v1 = vmul.f32 0.2, %v599_v62  ;;  %vm874_vm13 = vcmp.gt.f32.partialorder %v727_v63, 0.0  ;;  %v972_v2 = vsel %vm844_vm10, %v1323_v58, %v908_v61  ;;  %v938_v3 = vmul.f32 0.2, %v727_v63  ;;  %v1324_v4 = vpop.f32.mrb[6].mxu0 }
  0xf2   : > { %v1356_v5 = vpop.f32.mrb[6].mxu1  ;;  %1037 = vst.msk [vmem:[%s1588_s27 + $0x30] sm:$0xff] %vm1030_vm1, %v972_v2  ;;  %v1004_v6 = vsel %vm876_vm11, %v1355_v59, %v940_v0  ;;  %vm845_vm14 = vcmp.gt.f32.partialorder %v1324_v4, 0.0  ;;  %v909_v8 = vmul.f32 0.2, %v1324_v4  ;;  %v602_v9 = vpop.f32.mrb[7].mxu0 }
  0xf3   : > { %v970_v7 = vsel %vm842_vm12, %v599_v62, %v906_v1  ;;  %v730_v10 = vpop.f32.mrb[7].mxu1  ;;  %1069 = vst.msk [vmem:[%s1588_s27 + $0x130] sm:$0xff] %vm1030_vm1, %v1004_v6  ;;  %v1002_v11 = vsel %vm874_vm13, %v727_v63, %v938_v3  ;;  %vm877_vm15 = vcmp.gt.f32.partialorder %v1356_v5, 0.0  ;;  %v941_v12 = vmul.f32 0.2, %v1356_v5 }
  0xf4   : > { %1035 = vst.msk [vmem:[%s1588_s27 + $0x20] sm:$0xff] %vm1030_vm1, %v970_v7  ;;  %vm843_vm0 = vcmp.gt.f32.partialorder %v602_v9, 0.0  ;;  %1067 = vst.msk [vmem:[%s1588_s27 + $0x120] sm:$0xff] %vm1030_vm1, %v1002_v11  ;;  %v973_v13 = vsel %vm845_vm14, %v1324_v4, %v909_v8  ;;  %v907_v14 = vmul.f32 0.2, %v602_v9  ;;  %vm875_vm2 = vcmp.gt.f32.partialorder %v730_v10, 0.0 }
  0xf5   : > { %v939_v15 = vmul.f32 0.2, %v730_v10  ;;  %1038 = vst.msk [vmem:[%s1588_s27 + $0x38] sm:$0xff] %vm1030_vm1, %v973_v13  ;;  %v1005_v16 = vsel %vm877_vm15, %v1356_v5, %v941_v12 }
  0xf6   : > { %1070 = vst.msk [vmem:[%s1588_s27 + $0x138] sm:$0xff] %vm1030_vm1, %v1005_v16  ;;  %v971_v17 = vsel %vm843_vm0, %v602_v9, %v907_v14  ;;  %v1327_v19 = vpop.f32.mrb[8].mxu0 }
  0xf7   : > { %v1003_v18 = vsel %vm875_vm2, %v730_v10, %v939_v15  ;;  %v1359_v20 = vpop.f32.mrb[8].mxu1  ;;  %1036 = vst.msk [vmem:[%s1588_s27 + $0x28] sm:$0xff] %vm1030_vm1, %v971_v17  ;;  %vm848_vm3 = vcmp.gt.f32.partialorder %v1327_v19, 0.0  ;;  %v912_v21 = vmul.f32 0.2, %v1327_v19  ;;  %v615_v23 = vpop.f32.mrb[9].mxu0 }
  0xf8   : > { %1068 = vst.msk [vmem:[%s1588_s27 + $0x128] sm:$0xff] %vm1030_vm1, %v1003_v18  ;;  %vm880_vm4 = vcmp.gt.f32.partialorder %v1359_v20, 0.0  ;;  %v944_v22 = vmul.f32 0.2, %v1359_v20  ;;  %v743_v24 = vpop.f32.mrb[9].mxu1  ;;  %vm846_vm5 = vcmp.gt.f32.partialorder %v615_v23, 0.0 }
  0xf9   : > { %v976_v25 = vsel %vm848_vm3, %v1327_v19, %v912_v21  ;;  %v910_v27 = vmul.f32 0.2, %v615_v23  ;;  %v1328_v28 = vpop.f32.mrb[10].mxu0  ;;  %v1360_v29 = vpop.f32.mrb[10].mxu1  ;;  %vm878_vm6 = vcmp.gt.f32.partialorder %v743_v24, 0.0 }
  0xfa   : > { %v1008_v26 = vsel %vm880_vm4, %v1359_v20, %v944_v22  ;;  %1041 = vst.msk [vmem:[%s1588_s27 + $0x50] sm:$0xff] %vm1030_vm1, %v976_v25  ;;  %v942_v30 = vmul.f32 0.2, %v743_v24  ;;  %vm849_vm7 = vcmp.gt.f32.partialorder %v1328_v28, 0.0  ;;  %v913_v31 = vmul.f32 0.2, %v1328_v28 }
  0xfb   : > { %1073 = vst.msk [vmem:[%s1588_s27 + $0x150] sm:$0xff] %vm1030_vm1, %v1008_v26  ;;  %v974_v32 = vsel %vm846_vm5, %v615_v23, %v910_v27  ;;  %vm881_vm8 = vcmp.gt.f32.partialorder %v1360_v29, 0.0  ;;  %v945_v33 = vmul.f32 0.2, %v1360_v29  ;;  %v618_v34 = vpop.f32.mrb[11].mxu0  ;;  %v746_v35 = vpop.f32.mrb[11].mxu1 }
  0xfc   : > { %1039 = vst.msk [vmem:[%s1588_s27 + $0x40] sm:$0xff] %vm1030_vm1, %v974_v32  ;;  %v1006_v36 = vsel %vm878_vm6, %v743_v24, %v942_v30  ;;  %v977_v37 = vsel %vm849_vm7, %v1328_v28, %v913_v31  ;;  %vm847_vm9 = vcmp.gt.f32.partialorder %v618_v34, 0.0  ;;  %v911_v38 = vmul.f32 0.2, %v618_v34 }
  0xfd   : > { %1071 = vst.msk [vmem:[%s1588_s27 + $0x140] sm:$0xff] %vm1030_vm1, %v1006_v36  ;;  %1042 = vst.msk [vmem:[%s1588_s27 + $0x58] sm:$0xff] %vm1030_vm1, %v977_v37  ;;  %v1009_v39 = vsel %vm881_vm8, %v1360_v29, %v945_v33  ;;  %vm879_vm10 = vcmp.gt.f32.partialorder %v746_v35, 0.0  ;;  %v943_v40 = vmul.f32 0.2, %v746_v35 }
  0xfe   : > { %1074 = vst.msk [vmem:[%s1588_s27 + $0x158] sm:$0xff] %vm1030_vm1, %v1009_v39  ;;  %v975_v41 = vsel %vm847_vm9, %v618_v34, %v911_v38  ;;  %v1331_v42 = vpop.f32.mrb[12].mxu0 }
  0xff   : > { %v1363_v43 = vpop.f32.mrb[12].mxu1  ;;  %1040 = vst.msk [vmem:[%s1588_s27 + $0x48] sm:$0xff] %vm1030_vm1, %v975_v41  ;;  %v1007_v44 = vsel %vm879_vm10, %v746_v35, %v943_v40  ;;  %vm852_vm11 = vcmp.gt.f32.partialorder %v1331_v42, 0.0  ;;  %v916_v45 = vmul.f32 0.2, %v1331_v42  ;;  %v631_v46 = vpop.f32.mrb[13].mxu0 }
 0x100   : > { %vm884_vm12 = vcmp.gt.f32.partialorder %v1363_v43, 0.0  ;;  %v759_v47 = vpop.f32.mrb[13].mxu1  ;;  %1072 = vst.msk [vmem:[%s1588_s27 + $0x148] sm:$0xff] %vm1030_vm1, %v1007_v44  ;;  %v948_v48 = vmul.f32 0.2, %v1363_v43  ;;  %vm850_vm13 = vcmp.gt.f32.partialorder %v631_v46, 0.0 }
 0x101   : > { %v914_v49 = vmul.f32 0.2, %v631_v46  ;;  %vm882_vm14 = vcmp.gt.f32.partialorder %v759_v47, 0.0  ;;  %v980_v50 = vsel %vm852_vm11, %v1331_v42, %v916_v45  ;;  %v946_v51 = vmul.f32 0.2, %v759_v47  ;;  %v1332_v52 = vpop.f32.mrb[14].mxu0 }
 0x102   : > { %v1364_v53 = vpop.f32.mrb[14].mxu1  ;;  %1045 = vst.msk [vmem:[%s1588_s27 + $0x70] sm:$0xff] %vm1030_vm1, %v980_v50  ;;  %v1012_v54 = vsel %vm884_vm12, %v1363_v43, %v948_v48  ;;  %vm853_vm15 = vcmp.gt.f32.partialorder %v1332_v52, 0.0  ;;  %v917_v56 = vmul.f32 0.2, %v1332_v52  ;;  %v634_v57 = vpop.f32.mrb[15].mxu0 }
 0x103   : > { %v978_v55 = vsel %vm850_vm13, %v631_v46, %v914_v49  ;;  %v762_v58 = vpop.f32.mrb[15].mxu1  ;;  %1077 = vst.msk [vmem:[%s1588_s27 + $0x170] sm:$0xff] %vm1030_vm1, %v1012_v54  ;;  %v1010_v59 = vsel %vm882_vm14, %v759_v47, %v946_v51  ;;  %vm885_vm0 = vcmp.gt.f32.partialorder %v1364_v53, 0.0  ;;  %v949_v60 = vmul.f32 0.2, %v1364_v53 }
 0x104   : > { %1043 = vst.msk [vmem:[%s1588_s27 + $0x60] sm:$0xff] %vm1030_vm1, %v978_v55  ;;  %vm851_vm2 = vcmp.gt.f32.partialorder %v634_v57, 0.0  ;;  %1075 = vst.msk [vmem:[%s1588_s27 + $0x160] sm:$0xff] %vm1030_vm1, %v1010_v59  ;;  %v981_v61 = vsel %vm853_vm15, %v1332_v52, %v917_v56  ;;  %v915_v62 = vmul.f32 0.2, %v634_v57  ;;  %vm883_vm3 = vcmp.gt.f32.partialorder %v762_v58, 0.0 }
 0x105   : > { %v947_v63 = vmul.f32 0.2, %v762_v58  ;;  %1046 = vst.msk [vmem:[%s1588_s27 + $0x78] sm:$0xff] %vm1030_vm1, %v981_v61  ;;  %v1013_v0 = vsel %vm885_vm0, %v1364_v53, %v949_v60 }
 0x106   : > { %1078 = vst.msk [vmem:[%s1588_s27 + $0x178] sm:$0xff] %vm1030_vm1, %v1013_v0  ;;  %v979_v1 = vsel %vm851_vm2, %v634_v57, %v915_v62  ;;  %v1335_v3 = vpop.f32.mrb[16].mxu0 }
 0x107   : > { %v1011_v2 = vsel %vm883_vm3, %v762_v58, %v947_v63  ;;  %v1367_v4 = vpop.f32.mrb[16].mxu1  ;;  %1044 = vst.msk [vmem:[%s1588_s27 + $0x68] sm:$0xff] %vm1030_vm1, %v979_v1  ;;  %vm856_vm4 = vcmp.gt.f32.partialorder %v1335_v3, 0.0  ;;  %v920_v5 = vmul.f32 0.2, %v1335_v3  ;;  %v647_v7 = vpop.f32.mrb[17].mxu0 }
 0x108   : > { %1076 = vst.msk [vmem:[%s1588_s27 + $0x168] sm:$0xff] %vm1030_vm1, %v1011_v2  ;;  %vm888_vm5 = vcmp.gt.f32.partialorder %v1367_v4, 0.0  ;;  %v952_v6 = vmul.f32 0.2, %v1367_v4  ;;  %v775_v8 = vpop.f32.mrb[17].mxu1  ;;  %vm854_vm6 = vcmp.gt.f32.partialorder %v647_v7, 0.0 }
 0x109   : > { %v984_v9 = vsel %vm856_vm4, %v1335_v3, %v920_v5  ;;  %v918_v11 = vmul.f32 0.2, %v647_v7  ;;  %v1336_v12 = vpop.f32.mrb[18].mxu0  ;;  %v1368_v13 = vpop.f32.mrb[18].mxu1  ;;  %vm886_vm7 = vcmp.gt.f32.partialorder %v775_v8, 0.0 }
 0x10a   : > { %v1016_v10 = vsel %vm888_vm5, %v1367_v4, %v952_v6  ;;  %1049 = vst.msk [vmem:[%s1588_s27 + $0x90] sm:$0xff] %vm1030_vm1, %v984_v9  ;;  %v950_v14 = vmul.f32 0.2, %v775_v8  ;;  %vm857_vm8 = vcmp.gt.f32.partialorder %v1336_v12, 0.0  ;;  %v921_v15 = vmul.f32 0.2, %v1336_v12 }
 0x10b   : > { %1081 = vst.msk [vmem:[%s1588_s27 + $0x190] sm:$0xff] %vm1030_vm1, %v1016_v10  ;;  %v982_v16 = vsel %vm854_vm6, %v647_v7, %v918_v11  ;;  %vm889_vm9 = vcmp.gt.f32.partialorder %v1368_v13, 0.0  ;;  %v953_v17 = vmul.f32 0.2, %v1368_v13  ;;  %v650_v18 = vpop.f32.mrb[19].mxu0  ;;  %v778_v19 = vpop.f32.mrb[19].mxu1 }
 0x10c   : > { %1047 = vst.msk [vmem:[%s1588_s27 + $0x80] sm:$0xff] %vm1030_vm1, %v982_v16  ;;  %v1014_v20 = vsel %vm886_vm7, %v775_v8, %v950_v14  ;;  %v985_v21 = vsel %vm857_vm8, %v1336_v12, %v921_v15  ;;  %vm855_vm10 = vcmp.gt.f32.partialorder %v650_v18, 0.0  ;;  %v919_v22 = vmul.f32 0.2, %v650_v18 }
 0x10d   : > { %1079 = vst.msk [vmem:[%s1588_s27 + $0x180] sm:$0xff] %vm1030_vm1, %v1014_v20  ;;  %1050 = vst.msk [vmem:[%s1588_s27 + $0x98] sm:$0xff] %vm1030_vm1, %v985_v21  ;;  %v1017_v23 = vsel %vm889_vm9, %v1368_v13, %v953_v17  ;;  %vm887_vm11 = vcmp.gt.f32.partialorder %v778_v19, 0.0  ;;  %v951_v24 = vmul.f32 0.2, %v778_v19 }
 0x10e   : > { %1082 = vst.msk [vmem:[%s1588_s27 + $0x198] sm:$0xff] %vm1030_vm1, %v1017_v23  ;;  %v983_v25 = vsel %vm855_vm10, %v650_v18, %v919_v22  ;;  %v1339_v26 = vpop.f32.mrb[20].mxu0 }
 0x10f   : > { %v1371_v27 = vpop.f32.mrb[20].mxu1  ;;  %1048 = vst.msk [vmem:[%s1588_s27 + $0x88] sm:$0xff] %vm1030_vm1, %v983_v25  ;;  %v1015_v28 = vsel %vm887_vm11, %v778_v19, %v951_v24  ;;  %vm860_vm12 = vcmp.gt.f32.partialorder %v1339_v26, 0.0  ;;  %v924_v29 = vmul.f32 0.2, %v1339_v26  ;;  %v663_v30 = vpop.f32.mrb[21].mxu0 }
 0x110   : > { %vm892_vm13 = vcmp.gt.f32.partialorder %v1371_v27, 0.0  ;;  %v791_v31 = vpop.f32.mrb[21].mxu1  ;;  %1080 = vst.msk [vmem:[%s1588_s27 + $0x188] sm:$0xff] %vm1030_vm1, %v1015_v28  ;;  %v956_v32 = vmul.f32 0.2, %v1371_v27  ;;  %vm858_vm14 = vcmp.gt.f32.partialorder %v663_v30, 0.0 }
 0x111   : > { %v922_v33 = vmul.f32 0.2, %v663_v30  ;;  %vm890_vm15 = vcmp.gt.f32.partialorder %v791_v31, 0.0  ;;  %v988_v34 = vsel %vm860_vm12, %v1339_v26, %v924_v29  ;;  %v954_v35 = vmul.f32 0.2, %v791_v31  ;;  %v1340_v36 = vpop.f32.mrb[22].mxu0 }
 0x112   : > { %v1372_v37 = vpop.f32.mrb[22].mxu1  ;;  %1053 = vst.msk [vmem:[%s1588_s27 + $0xb0] sm:$0xff] %vm1030_vm1, %v988_v34  ;;  %v1020_v38 = vsel %vm892_vm13, %v1371_v27, %v956_v32  ;;  %vm861_vm0 = vcmp.gt.f32.partialorder %v1340_v36, 0.0  ;;  %v925_v40 = vmul.f32 0.2, %v1340_v36  ;;  %v666_v41 = vpop.f32.mrb[23].mxu0 }
 0x113   : > { %v986_v39 = vsel %vm858_vm14, %v663_v30, %v922_v33  ;;  %v794_v42 = vpop.f32.mrb[23].mxu1  ;;  %1085 = vst.msk [vmem:[%s1588_s27 + $0x1b0] sm:$0xff] %vm1030_vm1, %v1020_v38  ;;  %v1018_v43 = vsel %vm890_vm15, %v791_v31, %v954_v35  ;;  %vm893_vm2 = vcmp.gt.f32.partialorder %v1372_v37, 0.0  ;;  %v957_v44 = vmul.f32 0.2, %v1372_v37 }
 0x114   : > { %1051 = vst.msk [vmem:[%s1588_s27 + $0xa0] sm:$0xff] %vm1030_vm1, %v986_v39  ;;  %vm859_vm3 = vcmp.gt.f32.partialorder %v666_v41, 0.0  ;;  %1083 = vst.msk [vmem:[%s1588_s27 + $0x1a0] sm:$0xff] %vm1030_vm1, %v1018_v43  ;;  %v989_v45 = vsel %vm861_vm0, %v1340_v36, %v925_v40  ;;  %v923_v46 = vmul.f32 0.2, %v666_v41  ;;  %vm891_vm4 = vcmp.gt.f32.partialorder %v794_v42, 0.0 }
 0x115   : > { %v955_v47 = vmul.f32 0.2, %v794_v42  ;;  %1054 = vst.msk [vmem:[%s1588_s27 + $0xb8] sm:$0xff] %vm1030_vm1, %v989_v45  ;;  %v1021_v48 = vsel %vm893_vm2, %v1372_v37, %v957_v44 }
 0x116   : > { %1086 = vst.msk [vmem:[%s1588_s27 + $0x1b8] sm:$0xff] %vm1030_vm1, %v1021_v48  ;;  %v987_v49 = vsel %vm859_vm3, %v666_v41, %v923_v46  ;;  %v1343_v51 = vpop.f32.mrb[24].mxu0 }
 0x117   : > { %v1019_v50 = vsel %vm891_vm4, %v794_v42, %v955_v47  ;;  %v1375_v52 = vpop.f32.mrb[24].mxu1  ;;  %1052 = vst.msk [vmem:[%s1588_s27 + $0xa8] sm:$0xff] %vm1030_vm1, %v987_v49  ;;  %vm864_vm5 = vcmp.gt.f32.partialorder %v1343_v51, 0.0  ;;  %v928_v53 = vmul.f32 0.2, %v1343_v51  ;;  %v679_v55 = vpop.f32.mrb[25].mxu0 }
 0x118   : > { %1084 = vst.msk [vmem:[%s1588_s27 + $0x1a8] sm:$0xff] %vm1030_vm1, %v1019_v50  ;;  %vm896_vm6 = vcmp.gt.f32.partialorder %v1375_v52, 0.0  ;;  %v960_v54 = vmul.f32 0.2, %v1375_v52  ;;  %v807_v56 = vpop.f32.mrb[25].mxu1  ;;  %vm862_vm7 = vcmp.gt.f32.partialorder %v679_v55, 0.0 }
 0x119   : > { %v992_v57 = vsel %vm864_vm5, %v1343_v51, %v928_v53  ;;  %v926_v59 = vmul.f32 0.2, %v679_v55  ;;  %v1344_v60 = vpop.f32.mrb[26].mxu0  ;;  %v1376_v61 = vpop.f32.mrb[26].mxu1  ;;  %vm894_vm8 = vcmp.gt.f32.partialorder %v807_v56, 0.0 }
 0x11a   : > { %v1024_v58 = vsel %vm896_vm6, %v1375_v52, %v960_v54  ;;  %1057 = vst.msk [vmem:[%s1588_s27 + $0xd0] sm:$0xff] %vm1030_vm1, %v992_v57  ;;  %v958_v62 = vmul.f32 0.2, %v807_v56  ;;  %vm865_vm9 = vcmp.gt.f32.partialorder %v1344_v60, 0.0  ;;  %v929_v63 = vmul.f32 0.2, %v1344_v60 }
 0x11b   : > { %1089 = vst.msk [vmem:[%s1588_s27 + $0x1d0] sm:$0xff] %vm1030_vm1, %v1024_v58  ;;  %v990_v0 = vsel %vm862_vm7, %v679_v55, %v926_v59  ;;  %vm897_vm10 = vcmp.gt.f32.partialorder %v1376_v61, 0.0  ;;  %v961_v1 = vmul.f32 0.2, %v1376_v61  ;;  %v682_v2 = vpop.f32.mrb[27].mxu0  ;;  %v810_v3 = vpop.f32.mrb[27].mxu1 }
 0x11c   : > { %1055 = vst.msk [vmem:[%s1588_s27 + $0xc0] sm:$0xff] %vm1030_vm1, %v990_v0  ;;  %v1022_v4 = vsel %vm894_vm8, %v807_v56, %v958_v62  ;;  %v993_v5 = vsel %vm865_vm9, %v1344_v60, %v929_v63  ;;  %vm863_vm11 = vcmp.gt.f32.partialorder %v682_v2, 0.0  ;;  %v927_v6 = vmul.f32 0.2, %v682_v2 }
 0x11d   : > { %1087 = vst.msk [vmem:[%s1588_s27 + $0x1c0] sm:$0xff] %vm1030_vm1, %v1022_v4  ;;  %1058 = vst.msk [vmem:[%s1588_s27 + $0xd8] sm:$0xff] %vm1030_vm1, %v993_v5  ;;  %v1025_v7 = vsel %vm897_vm10, %v1376_v61, %v961_v1  ;;  %vm895_vm12 = vcmp.gt.f32.partialorder %v810_v3, 0.0  ;;  %v959_v8 = vmul.f32 0.2, %v810_v3 }
 0x11e   : > { %1090 = vst.msk [vmem:[%s1588_s27 + $0x1d8] sm:$0xff] %vm1030_vm1, %v1025_v7  ;;  %v991_v9 = vsel %vm863_vm11, %v682_v2, %v927_v6  ;;  %v1347_v10 = vpop.f32.mrb[28].mxu0 }
 0x11f   : > { %v1379_v11 = vpop.f32.mrb[28].mxu1  ;;  %1056 = vst.msk [vmem:[%s1588_s27 + $0xc8] sm:$0xff] %vm1030_vm1, %v991_v9  ;;  %v1023_v12 = vsel %vm895_vm12, %v810_v3, %v959_v8  ;;  %vm868_vm13 = vcmp.gt.f32.partialorder %v1347_v10, 0.0  ;;  %v932_v13 = vmul.f32 0.2, %v1347_v10  ;;  %v695_v14 = vpop.f32.mrb[29].mxu0 }
 0x120   : > { %vm900_vm14 = vcmp.gt.f32.partialorder %v1379_v11, 0.0  ;;  %v823_v15 = vpop.f32.mrb[29].mxu1  ;;  %1088 = vst.msk [vmem:[%s1588_s27 + $0x1c8] sm:$0xff] %vm1030_vm1, %v1023_v12  ;;  %v964_v16 = vmul.f32 0.2, %v1379_v11  ;;  %vm866_vm15 = vcmp.gt.f32.partialorder %v695_v14, 0.0 }
 0x121   : > { %v930_v17 = vmul.f32 0.2, %v695_v14  ;;  %vm898_vm0 = vcmp.gt.f32.partialorder %v823_v15, 0.0  ;;  %v996_v18 = vsel %vm868_vm13, %v1347_v10, %v932_v13  ;;  %v962_v19 = vmul.f32 0.2, %v823_v15  ;;  %v1348_v20 = vpop.f32.mrb[30].mxu0 }
 0x122   : > { %v1380_v21 = vpop.f32.mrb[30].mxu1  ;;  %1061 = vst.msk [vmem:[%s1588_s27 + $0xf0] sm:$0xff] %vm1030_vm1, %v996_v18  ;;  %v1028_v22 = vsel %vm900_vm14, %v1379_v11, %v964_v16  ;;  %vm869_vm2 = vcmp.gt.f32.partialorder %v1348_v20, 0.0  ;;  %v933_v24 = vmul.f32 0.2, %v1348_v20  ;;  %v698_v25 = vpop.f32.mrb[31].mxu0 }
 0x123   : > { %v994_v23 = vsel %vm866_vm15, %v695_v14, %v930_v17  ;;  %v826_v26 = vpop.f32.mrb[31].mxu1  ;;  %1093 = vst.msk [vmem:[%s1588_s27 + $0x1f0] sm:$0xff] %vm1030_vm1, %v1028_v22  ;;  %v1026_v27 = vsel %vm898_vm0, %v823_v15, %v962_v19  ;;  %vm901_vm3 = vcmp.gt.f32.partialorder %v1380_v21, 0.0  ;;  %v965_v28 = vmul.f32 0.2, %v1380_v21 }
 0x124   : > { %1059 = vst.msk [vmem:[%s1588_s27 + $0xe0] sm:$0xff] %vm1030_vm1, %v994_v23  ;;  %vm867_vm4 = vcmp.gt.f32.partialorder %v698_v25, 0.0  ;;  %1091 = vst.msk [vmem:[%s1588_s27 + $0x1e0] sm:$0xff] %vm1030_vm1, %v1026_v27  ;;  %v997_v29 = vsel %vm869_vm2, %v1348_v20, %v933_v24  ;;  %v931_v30 = vmul.f32 0.2, %v698_v25  ;;  %vm899_vm5 = vcmp.gt.f32.partialorder %v826_v26, 0.0 }
 0x125   : > { %v963_v31 = vmul.f32 0.2, %v826_v26  ;;  %1062 = vst.msk [vmem:[%s1588_s27 + $0xf8] sm:$0xff] %vm1030_vm1, %v997_v29  ;;  %v1029_v32 = vsel %vm901_vm3, %v1380_v21, %v965_v28 }
 0x126   : > { %1094 = vst.msk [vmem:[%s1588_s27 + $0x1f8] sm:$0xff] %vm1030_vm1, %v1029_v32  ;;  %v995_v33 = vsel %vm867_vm4, %v698_v25, %v931_v30 }
 0x127   : > { %v1027_v34 = vsel %vm899_vm5, %v826_v26, %v963_v31  ;;  %1060 = vst.msk [vmem:[%s1588_s27 + $0xe8] sm:$0xff] %vm1030_vm1, %v995_v33 }
 0x128   : > { %1092 = vst.msk [vmem:[%s1588_s27 + $0x1e8] sm:$0xff] %vm1030_vm1, %v1027_v34 }
 0x129 PF: > { %s12_s11 = sadd.s32 1, %s1468_s11   ;;  %s1730_s9 = smov %s1464_s10 }
 0x12a   : > { %p9_p5 = scmp.ge.s32.totalorder %s12_s11, 6   ;;  %s1731_s10 = smov %s1733_s12 }
 0x12c   :  { %11 = sbr.rel (!%p9_p5) target bundleno = 2 (0x2), region = 61 }

// kernel: coupled_vae_forward.22
= control target key start
LH: loop header
LB: loop body
LE: loop exit
PB: predicated region body
PF: predicated region fallthrough
CT: control target
= control target key end

     0   :  { %s2255_s15 = smov 0   ;;  %s2257_s16 = smov 0   ;;  %s3916_s0 = inlined_call_operand.vmem [shape: bf16[1,512,128], index: 0, kind: input, shape index: {}]   ;;  %s3917_s1 = inlined_call_operand.vmem [shape: bf16[1,128,16], index: 1, kind: input, shape index: {}]   ;;  %s3918_s2 = inlined_call_operand.vmem [shape: f32[1,16], index: 2, kind: input, shape index: {}]   ;;  %s3919_s3 = inlined_call_operand.vmem [shape: f32[1,16], index: 3, kind: input, shape index: {}]   ;;  %s3920_s4 = inlined_call_operand.vmem [shape: f32[1,512,16], index: 4, kind: output, shape index: {}]  }
   0x1   :  { %s2259_s17 = smov 0  }
   0x2 LB: > { %s33_s18 = sadd.s32 1, %s2223_s16  ;;  %p1951_p0 = scmp.ge.s32.totalorder %s2227_s17, 1  ;;  %s2227_s17 = sphi %s2259_s17, %s14_s17   ;;  %s2223_s16 = sphi %s2257_s16, %s4124_s16   ;;  %s2219_s15 = sphi %s2255_s15, %s4123_s15  }
   0x3   : > { %p35_p1 = scmp.ge.s32.totalorder %s33_s18, 2  ;;  %p200_p2 = scmp.lt.s32.totalorder %s2227_s17, 3 }
   0x5   : > { %s4126_s18 = smov (%p35_p1, %s33_s18), 0  ;;  %p201_p3 = pnand %p1951_p0, %p200_p2 }
   0x7   : > { %204 = sbr.rel (%p201_p3) target bundleno = 665 (0x299), region = 36 }
   0xe   : > { %v2163_v0 = vld [vmem:[%s3917_s1] sm:$0xff]   ;;  %v2164_v1 = vld [vmem:[%s3917_s1 + $0x8] sm:$0xff]   ;;  %v2165_v2 = vld [vmem:[%s3917_s1 + $0x10] sm:$0xff]   ;;  %p878_p4 = scmp.eq.s32.totalorder %s2219_s15, 0 }
   0xf   : > { %2042 = vmatprep.subr.bf16.mxu0 %v2163_v0  ;;  %2122 = vmatprep.subr.bf16.mxu1 %v2163_v0  ;;  %v2166_v3 = vld [vmem:[%s3917_s1 + $0x18] sm:$0xff]   ;;  %v2171_v4 = vld [vmem:[%s3916_s0] sm:$0xff]   ;;  %v2168_v7 = vld [vmem:[%s3917_s1 + $0x28] sm:$0xff]   ;;  %vm883_vm0 = vcmask (%p878_p4), 122880  }
  0x10   : > { %2043 = vmatpush3.bf16.msra.mxu0 %v2163_v0  ;;  %2130 = vmatpush3.bf16.msra.mxu1 %v2163_v0  ;;  %v2172_v5 = vld [vmem:[%s3916_s0 + $0x80] sm:$0xff]   ;;  %v2169_v8 = vld [vmem:[%s3917_s1 + $0x30] sm:$0xff]   ;;  %v2170_v9 = vld [vmem:[%s3917_s1 + $0x38] sm:$0xff]  }
  0x11   : > { %2044 = vmatprep.subr.bf16.mxu0 %v2164_v1  ;;  %2123 = vmatprep.subr.bf16.mxu1 %v2164_v1  ;;  %v2167_v6 = vld [vmem:[%s3917_s1 + $0x20] sm:$0xff]   ;;  %v2173_v10 = vld [vmem:[%s3916_s0 + $0x8] sm:$0xff]   ;;  %v2175_v12 = vld [vmem:[%s3916_s0 + $0x10] sm:$0xff]  }
  0x12   : > { %2058 = vmatprep.mubr.bf16.mxu0 %v2171_v4  ;;  %2090 = vmatprep.mubr.bf16.mxu1 %v2172_v5  ;;  %v2174_v11 = vld [vmem:[%s3916_s0 + $0x88] sm:$0xff]   ;;  %v2176_v13 = vld [vmem:[%s3916_s0 + $0x90] sm:$0xff]   ;;  %v2177_v14 = vld [vmem:[%s3916_s0 + $0x18] sm:$0xff]  }
  0x13   : > { %v2178_v15 = vld [vmem:[%s3916_s0 + $0x98] sm:$0xff]   ;;  %v2179_v16 = vld [vmem:[%s3916_s0 + $0x20] sm:$0xff]   ;;  %v2181_v18 = vld [vmem:[%s3916_s0 + $0x28] sm:$0xff]  }
  0x14   : > { %2045 = vmatpush3.bf16.msra.mxu0 %v2164_v1  ;;  %2131 = vmatpush3.bf16.msra.mxu1 %v2164_v1  ;;  %v2180_v17 = vld [vmem:[%s3916_s0 + $0xa0] sm:$0xff]   ;;  %v2182_v19 = vld [vmem:[%s3916_s0 + $0xa8] sm:$0xff]   ;;  %v2183_v20 = vld [vmem:[%s3916_s0 + $0x30] sm:$0xff]  }
  0x15   : > { %2046 = vmatprep.subr.bf16.mxu0 %v2165_v2  ;;  %2124 = vmatprep.subr.bf16.mxu1 %v2165_v2  ;;  %v2184_v21 = vld [vmem:[%s3916_s0 + $0xb0] sm:$0xff]   ;;  %v2185_v22 = vld [vmem:[%s3916_s0 + $0x38] sm:$0xff]   ;;  %v2187_v24 = vld [vmem:[%s3916_s0 + $0x40] sm:$0xff]  }
  0x16   : > { %v2186_v23 = vld [vmem:[%s3916_s0 + $0xb8] sm:$0xff]   ;;  %v2188_v25 = vld [vmem:[%s3916_s0 + $0xc0] sm:$0xff]   ;;  %v2189_v26 = vld [vmem:[%s3916_s0 + $0x48] sm:$0xff]  }
  0x17   : > { %v2190_v27 = vld [vmem:[%s3916_s0 + $0xc8] sm:$0xff]   ;;  %v2191_v28 = vld [vmem:[%s3916_s0 + $0x50] sm:$0xff]   ;;  %v2193_v30 = vld [vmem:[%s3916_s0 + $0x58] sm:$0xff]  }
  0x18   : > { %2047 = vmatpush3.bf16.msra.mxu0 %v2165_v2  ;;  %2132 = vmatpush3.bf16.msra.mxu1 %v2165_v2  ;;  %v2192_v29 = vld [vmem:[%s3916_s0 + $0xd0] sm:$0xff]   ;;  %v2194_v31 = vld [vmem:[%s3916_s0 + $0xd8] sm:$0xff]   ;;  %v2195_v32 = vld [vmem:[%s3916_s0 + $0x60] sm:$0xff]  }
  0x19   : > { %2048 = vmatprep.subr.bf16.mxu0 %v2166_v3  ;;  %2125 = vmatprep.subr.bf16.mxu1 %v2166_v3  ;;  %v2196_v33 = vld [vmem:[%s3916_s0 + $0xe0] sm:$0xff]   ;;  %v2197_v34 = vld [vmem:[%s3916_s0 + $0x68] sm:$0xff]   ;;  %v2199_v36 = vld [vmem:[%s3916_s0 + $0x70] sm:$0xff]  }
  0x1a   : > { %v2198_v35 = vld [vmem:[%s3916_s0 + $0xe8] sm:$0xff]   ;;  %v2200_v37 = vld [vmem:[%s3916_s0 + $0xf0] sm:$0xff]   ;;  %v2201_v38 = vld [vmem:[%s3916_s0 + $0x78] sm:$0xff]  }
  0x1b   : > { %v2202_v39 = vld [vmem:[%s3916_s0 + $0xf8] sm:$0xff]  }
  0x1c   : > { %2049 = vmatpush3.bf16.msra.mxu0 %v2166_v3  ;;  %2133 = vmatpush3.bf16.msra.mxu1 %v2166_v3 }
  0x1d   : > { %2050 = vmatprep.subr.bf16.mxu0 %v2167_v6  ;;  %2126 = vmatprep.subr.bf16.mxu1 %v2167_v6 }
  0x20   : > { %2051 = vmatpush3.bf16.msra.mxu0 %v2167_v6  ;;  %2134 = vmatpush3.bf16.msra.mxu1 %v2167_v6 }
  0x21   : > { %2052 = vmatprep.subr.bf16.mxu0 %v2168_v7  ;;  %2127 = vmatprep.subr.bf16.mxu1 %v2168_v7 }
  0x24   : > { %2053 = vmatpush3.bf16.msra.mxu0 %v2168_v7  ;;  %2135 = vmatpush3.bf16.msra.mxu1 %v2168_v7 }
  0x25   : > { %2054 = vmatprep.subr.bf16.mxu0 %v2169_v8  ;;  %2128 = vmatprep.subr.bf16.mxu1 %v2169_v8 }
  0x28   : > { %2055 = vmatpush3.bf16.msra.mxu0 %v2169_v8  ;;  %2136 = vmatpush3.bf16.msra.mxu1 %v2169_v8 }
  0x29   : > { %2056 = vmatprep.subr.bf16.mxu0 %v2170_v9  ;;  %2129 = vmatprep.subr.bf16.mxu1 %v2170_v9 }
  0x2c   : > { %2057 = vmatpush3.bf16.msra.mxu0 %v2170_v9  ;;  %2137 = vmatpush3.bf16.msra.mxu1 %v2170_v9 }
  0x2f   : > { %2059 = vmatmul.mubr.bf16.vlgmr.msra.gmra.mrb[0].mxu0 %v2173_v10  ;;  %2091 = vmatmul.mubr.bf16.vlgmr.msra.gmra.mrb[0].mxu1 %v2174_v11 }
  0x30   : > { %2062 = vmatprep.mubr.bf16.mxu0 %v2175_v12  ;;  %2094 = vmatprep.mubr.bf16.mxu1 %v2176_v13 }
  0x37   : > { %2063 = vmatmul.mubr.bf16.gmra.mrb[4].mxu0 %v2177_v14  ;;  %2095 = vmatmul.mubr.bf16.gmra.mrb[4].mxu1 %v2178_v15 }
  0x38   : > { %2066 = vmatprep.mubr.bf16.mxu0 %v2179_v16  ;;  %2098 = vmatprep.mubr.bf16.mxu1 %v2180_v17 }
  0x3f   : > { %2067 = vmatmul.mubr.bf16.gmra.mrb[8].mxu0 %v2181_v18  ;;  %2099 = vmatmul.mubr.bf16.gmra.mrb[8].mxu1 %v2182_v19 }
  0x40   : > { %2070 = vmatprep.mubr.bf16.mxu0 %v2183_v20  ;;  %2102 = vmatprep.mubr.bf16.mxu1 %v2184_v21 }
  0x47   : > { %2071 = vmatmul.mubr.bf16.gmra.mrb[12].mxu0 %v2185_v22  ;;  %2103 = vmatmul.mubr.bf16.gmra.mrb[12].mxu1 %v2186_v23 }
  0x48   : > { %2074 = vmatprep.mubr.bf16.mxu0 %v2187_v24  ;;  %2106 = vmatprep.mubr.bf16.mxu1 %v2188_v25 }
  0x4f   : > { %2075 = vmatmul.mubr.bf16.gmra.mrb[16].mxu0 %v2189_v26  ;;  %2107 = vmatmul.mubr.bf16.gmra.mrb[16].mxu1 %v2190_v27 }
  0x50   : > { %2078 = vmatprep.mubr.bf16.mxu0 %v2191_v28  ;;  %2110 = vmatprep.mubr.bf16.mxu1 %v2192_v29 }
  0x57   : > { %2079 = vmatmul.mubr.bf16.gmra.mrb[20].mxu0 %v2193_v30  ;;  %2111 = vmatmul.mubr.bf16.gmra.mrb[20].mxu1 %v2194_v31 }
  0x58   : > { %2082 = vmatprep.mubr.bf16.mxu0 %v2195_v32  ;;  %2114 = vmatprep.mubr.bf16.mxu1 %v2196_v33 }
  0x5f   : > { %2083 = vmatmul.mubr.bf16.gmra.mrb[24].mxu0 %v2197_v34  ;;  %2115 = vmatmul.mubr.bf16.gmra.mrb[24].mxu1 %v2198_v35 }
  0x60   : > { %2086 = vmatprep.mubr.bf16.mxu0 %v2199_v36  ;;  %2118 = vmatprep.mubr.bf16.mxu1 %v2200_v37 }
  0x67   : > { %2087 = vmatmul.mubr.bf16.gmra.mrb[28].mxu0 %v2201_v38  ;;  %2119 = vmatmul.mubr.bf16.gmra.mrb[28].mxu1 %v2202_v39 }
 0x102   : > { %v2396_v40 = vpop.f32.mrb[0].mxu0  ;;  %v2398_v41 = vpop.f32.mrb[0].mxu1 }
 0x103   : > { %3985 = vst [vmem:[#allocation4_spill] sm:$0xff] %v2396_v40  ;;  %3986 = vst [vmem:[#allocation5_spill] sm:$0xff] %v2398_v41  ;;  %v2400_v42 = vpop.f32.mrb[1].mxu0  ;;  %v2402_v43 = vpop.f32.mrb[1].mxu1 }
 0x104   : > { %3987 = vst [vmem:[#allocation6_spill] sm:$0xff] %v2400_v42  ;;  %3988 = vst [vmem:[#allocation7_spill] sm:$0xff] %v2402_v43  ;;  %v2404_v44 = vpop.f32.mrb[2].mxu0  ;;  %v2406_v45 = vpop.f32.mrb[2].mxu1 }
 0x105   : > { %3989 = vst [vmem:[#allocation8_spill] sm:$0xff] %v2404_v44  ;;  %3990 = vst [vmem:[#allocation9_spill] sm:$0xff] %v2406_v45  ;;  %v2408_v46 = vpop.f32.mrb[3].mxu0  ;;  %v2410_v47 = vpop.f32.mrb[3].mxu1 }
 0x106   : > { %3991 = vst [vmem:[#allocation10_spill] sm:$0xff] %v2408_v46  ;;  %3992 = vst [vmem:[#allocation11_spill] sm:$0xff] %v2410_v47 }
 0x10a   : > { %v2412_v48 = vpop.f32.mrb[4].mxu0  ;;  %v2414_v49 = vpop.f32.mrb[4].mxu1 }
 0x10b   : > { %3993 = vst [vmem:[#allocation12_spill] sm:$0xff] %v2414_v49  ;;  %v2416_v50 = vpop.f32.mrb[5].mxu0  ;;  %v2418_v51 = vpop.f32.mrb[5].mxu1 }
 0x10c   : > { %3994 = vst [vmem:[#allocation13_spill] sm:$0xff] %v2416_v50  ;;  %3995 = vst [vmem:[#allocation14_spill] sm:$0xff] %v2418_v51  ;;  %v2420_v52 = vpop.f32.mrb[6].mxu0  ;;  %v2422_v53 = vpop.f32.mrb[6].mxu1 }
 0x10d   : > { %3996 = vst [vmem:[#allocation15_spill] sm:$0xff] %v2422_v53  ;;  %v2424_v54 = vpop.f32.mrb[7].mxu0  ;;  %v2426_v55 = vpop.f32.mrb[7].mxu1 }
 0x10e   : > { %3997 = vst [vmem:[#allocation16_spill] sm:$0xff] %v2426_v55 }
 0x112   : > { %v2428_v56 = vpop.f32.mrb[8].mxu0  ;;  %v2430_v57 = vpop.f32.mrb[8].mxu1 }
 0x113   : > { %3998 = vst [vmem:[#allocation17_spill] sm:$0xff] %v2430_v57  ;;  %v2432_v58 = vpop.f32.mrb[9].mxu0  ;;  %v2434_v59 = vpop.f32.mrb[9].mxu1 }
 0x114   : > { %3999 = vst [vmem:[#allocation18_spill] sm:$0xff] %v2434_v59  ;;  %v2436_v60 = vpop.f32.mrb[10].mxu0  ;;  %v2438_v61 = vpop.f32.mrb[10].mxu1 }
 0x115   : > { %4000 = vst [vmem:[#allocation19_spill] sm:$0xff] %v2438_v61  ;;  %v2440_v62 = vpop.f32.mrb[11].mxu0  ;;  %v2442_v63 = vpop.f32.mrb[11].mxu1 }
 0x116   : > { %4001 = vst [vmem:[#allocation20_spill] sm:$0xff] %v2442_v63 }
 0x11a   : > { %v2444_v0 = vpop.f32.mrb[12].mxu0  ;;  %v2446_v1 = vpop.f32.mrb[12].mxu1 }
 0x11b   : > { %4002 = vst [vmem:[#allocation21_spill] sm:$0xff] %v2446_v1  ;;  %v2448_v2 = vpop.f32.mrb[13].mxu0  ;;  %v2450_v3 = vpop.f32.mrb[13].mxu1 }
 0x11c   : > { %4003 = vst [vmem:[#allocation22_spill] sm:$0xff] %v2450_v3  ;;  %v2452_v4 = vpop.f32.mrb[14].mxu0  ;;  %v2454_v5 = vpop.f32.mrb[14].mxu1 }
 0x11d   : > { %v2456_v6 = vpop.f32.mrb[15].mxu0  ;;  %v2458_v7 = vpop.f32.mrb[15].mxu1 }
 0x11e   : > { %4004 = vst [vmem:[#allocation23_spill] sm:$0xff] %v2458_v7 }
 0x122   : > { %v2460_v8 = vpop.f32.mrb[16].mxu0  ;;  %v2462_v9 = vpop.f32.mrb[16].mxu1 }
 0x123   : > { %4005 = vst [vmem:[#allocation24_spill] sm:$0xff] %v2462_v9  ;;  %v2464_v10 = vpop.f32.mrb[17].mxu0  ;;  %v2466_v11 = vpop.f32.mrb[17].mxu1 }
 0x124   : > { %v2468_v12 = vpop.f32.mrb[18].mxu0  ;;  %v2470_v13 = vpop.f32.mrb[18].mxu1 }
 0x125   : > { %4006 = vst [vmem:[#allocation25_spill] sm:$0xff] %v2470_v13  ;;  %v2472_v14 = vpop.f32.mrb[19].mxu0  ;;  %v2474_v15 = vpop.f32.mrb[19].mxu1 }
 0x126   : > { %4007 = vst [vmem:[#allocation26_spill] sm:$0xff] %v2474_v15 }
 0x12a   : > { %v2476_v16 = vpop.f32.mrb[20].mxu0  ;;  %v2478_v17 = vpop.f32.mrb[20].mxu1 }
 0x12b   : > { %4008 = vst [vmem:[#allocation27_spill] sm:$0xff] %v2478_v17  ;;  %v2480_v18 = vpop.f32.mrb[21].mxu0  ;;  %v2482_v19 = vpop.f32.mrb[21].mxu1 }
 0x12c   : > { %4009 = vst [vmem:[#allocation28_spill] sm:$0xff] %v2482_v19  ;;  %v2484_v20 = vpop.f32.mrb[22].mxu0  ;;  %v2486_v21 = vpop.f32.mrb[22].mxu1 }
 0x12d   : > { %4010 = vst [vmem:[#allocation29_spill] sm:$0xff] %v2486_v21  ;;  %v2488_v22 = vpop.f32.mrb[23].mxu0  ;;  %v2490_v23 = vpop.f32.mrb[23].mxu1 }
 0x12e   : > { %4011 = vst [vmem:[#allocation30_spill] sm:$0xff] %v2490_v23 }
 0x132   : > { %v2492_v24 = vpop.f32.mrb[24].mxu0  ;;  %v2494_v25 = vpop.f32.mrb[24].mxu1 }
 0x133   : > { %4012 = vst [vmem:[#allocation31_spill] sm:$0xff] %v2494_v25  ;;  %v2496_v26 = vpop.f32.mrb[25].mxu0  ;;  %v2498_v27 = vpop.f32.mrb[25].mxu1 }
 0x134   : > { %4013 = vst [vmem:[#allocation32_spill] sm:$0xff] %v2498_v27  ;;  %v2500_v28 = vpop.f32.mrb[26].mxu0  ;;  %v2502_v29 = vpop.f32.mrb[26].mxu1 }
 0x135   : > { %4014 = vst [vmem:[#allocation33_spill] sm:$0xff] %v2502_v29  ;;  %v2504_v30 = vpop.f32.mrb[27].mxu0  ;;  %v2506_v31 = vpop.f32.mrb[27].mxu1  ;;  %v2229_v29 = vmov (%p878_p4), 0.0  }
 0x136   : > { %4015 = vst [vmem:[#allocation34_spill] sm:$0xff] %v2506_v31  ;;  %884 = vst.msk [vmem:[#allocation2] sm:$0x1] (%p878_p4), %vm883_vm0, %v2229_v29 }
 0x137   : > { %885 = vst.msk [vmem:[#allocation3] sm:$0x1] (%p878_p4), %vm883_vm0, %v2229_v29 }
 0x138   : > { %882 = sbr.rel (!%p878_p4) target bundleno = 319 (0x13f), region = 40 }
 0x13a   : > { %v2508_v32 = vpop.f32.mrb[28].mxu0  ;;  %v2510_v33 = vpop.f32.mrb[28].mxu1 }
 0x13b   : > { %4016 = vst [vmem:[#allocation35_spill] sm:$0xff] %v2510_v33  ;;  %v2512_v34 = vpop.f32.mrb[29].mxu0  ;;  %v2514_v35 = vpop.f32.mrb[29].mxu1 }
 0x13c   : > { %4017 = vst [vmem:[#allocation36_spill] sm:$0xff] %v2514_v35  ;;  %v2516_v36 = vpop.f32.mrb[30].mxu0  ;;  %v2518_v37 = vpop.f32.mrb[30].mxu1 }
 0x13d   : > { %4018 = vst [vmem:[#allocation37_spill] sm:$0xff] %v2518_v37  ;;  %v2520_v38 = vpop.f32.mrb[31].mxu0  ;;  %v2522_v39 = vpop.f32.mrb[31].mxu1 }
 0x13e   : > { %4019 = vst [vmem:[#allocation38_spill] sm:$0xff] %v2522_v39 }
 0x13f PF: > { %p1993_p5 = scmp.ne.s32.totalorder %s2219_s15, 0 }
 0x140   : > { %vm890_vm1 = vcmask (!%p1993_p5), 130048   ;;  %v4020_v29 = vld [vmem:[#allocation33_spill] sm:$0xff] (!%p1993_p5)  ;;  %vm1025_vm2 = vcmask (!%p1993_p5), 122880  }
 0x141   : > { %888 = sbr.rel (%p1993_p5) target bundleno = 524 (0x20c), region = 44  ;;  %v2529_v33 = vsel (!%p1993_p5), %vm890_vm1, %v2400_v42, 0.0  ;;  %v2533_v37 = vsel (!%p1993_p5), %vm890_vm1, %v2408_v46, 0.0  ;;  %v2537_v39 = vsel (!%p1993_p5), %vm890_vm1, %v2396_v40, 0.0  ;;  %1227 = vst.msk [vmem:[%s3920_s4] sm:$0xff] (!%p1993_p5), %vm890_vm1, %v2400_v42  ;;  %1228 = vst.msk [vmem:[%s3920_s4 + $0x8] sm:$0xff] (!%p1993_p5), %vm890_vm1, %v2408_v46 }
 0x142   : > { %1229 = vst.msk [vmem:[%s3920_s4 + $0x10] sm:$0xff] (!%p1993_p5), %vm890_vm1, %v2396_v40  ;;  %1230 = vst.msk [vmem:[%s3920_s4 + $0x18] sm:$0xff] (!%p1993_p5), %vm890_vm1, %v2404_v44 }
 0x143   : > { %1231 = vst.msk [vmem:[%s3920_s4 + $0x20] sm:$0xff] (!%p1993_p5), %vm890_vm1, %v2416_v50  ;;  %1232 = vst.msk [vmem:[%s3920_s4 + $0x28] sm:$0xff] (!%p1993_p5), %vm890_vm1, %v2424_v54 }
 0x144   : > { %1233 = vst.msk [vmem:[%s3920_s4 + $0x30] sm:$0xff] (!%p1993_p5), %vm890_vm1, %v2412_v48  ;;  %1234 = vst.msk [vmem:[%s3920_s4 + $0x38] sm:$0xff] (!%p1993_p5), %vm890_vm1, %v2420_v52 }
 0x145   : > { %1235 = vst.msk [vmem:[%s3920_s4 + $0x40] sm:$0xff] (!%p1993_p5), %vm890_vm1, %v2432_v58  ;;  %1236 = vst.msk [vmem:[%s3920_s4 + $0x48] sm:$0xff] (!%p1993_p5), %vm890_vm1, %v2440_v62 }
 0x146   : > { %1237 = vst.msk [vmem:[%s3920_s4 + $0x50] sm:$0xff] (!%p1993_p5), %vm890_vm1, %v2428_v56  ;;  %1238 = vst.msk [vmem:[%s3920_s4 + $0x58] sm:$0xff] (!%p1993_p5), %vm890_vm1, %v2436_v60 }
 0x147   : > { %1239 = vst.msk [vmem:[%s3920_s4 + $0x60] sm:$0xff] (!%p1993_p5), %vm890_vm1, %v2448_v2  ;;  %1240 = vst.msk [vmem:[%s3920_s4 + $0x68] sm:$0xff] (!%p1993_p5), %vm890_vm1, %v2456_v6 }
 0x148   : > { %1241 = vst.msk [vmem:[%s3920_s4 + $0x70] sm:$0xff] %vm890_vm1, %v2444_v0  ;;  %1242 = vst.msk [vmem:[%s3920_s4 + $0x78] sm:$0xff] %vm890_vm1, %v2452_v4 }
 0x149   : > { %1243 = vst.msk [vmem:[%s3920_s4 + $0x80] sm:$0xff] %vm890_vm1, %v2464_v10  ;;  %1244 = vst.msk [vmem:[%s3920_s4 + $0x88] sm:$0xff] %vm890_vm1, %v2472_v14 }
 0x14a   : > { %1245 = vst.msk [vmem:[%s3920_s4 + $0x90] sm:$0xff] %vm890_vm1, %v2460_v8  ;;  %1246 = vst.msk [vmem:[%s3920_s4 + $0x98] sm:$0xff] %vm890_vm1, %v2468_v12 }
 0x14b   : > { %1247 = vst.msk [vmem:[%s3920_s4 + $0xa0] sm:$0xff] %vm890_vm1, %v2480_v18  ;;  %1248 = vst.msk [vmem:[%s3920_s4 + $0xa8] sm:$0xff] %vm890_vm1, %v2488_v22 }
 0x14c   : > { %1249 = vst.msk [vmem:[%s3920_s4 + $0xb0] sm:$0xff] %vm890_vm1, %v2476_v16  ;;  %1250 = vst.msk [vmem:[%s3920_s4 + $0xb8] sm:$0xff] %vm890_vm1, %v2484_v20 }
 0x14d   : > { %1251 = vst.msk [vmem:[%s3920_s4 + $0xc0] sm:$0xff] %vm890_vm1, %v2496_v26  ;;  %1252 = vst.msk [vmem:[%s3920_s4 + $0xc8] sm:$0xff] %vm890_vm1, %v2504_v30 }
 0x14e   : > { %1253 = vst.msk [vmem:[%s3920_s4 + $0xd0] sm:$0xff] %vm890_vm1, %v2492_v24  ;;  %1254 = vst.msk [vmem:[%s3920_s4 + $0xd8] sm:$0xff] %vm890_vm1, %v2500_v28 }
 0x14f   : > { %1255 = vst.msk [vmem:[%s3920_s4 + $0xe0] sm:$0xff] %vm890_vm1, %v2512_v34  ;;  %1256 = vst.msk [vmem:[%s3920_s4 + $0xe8] sm:$0xff] %vm890_vm1, %v2520_v38 }
 0x150   : > { %1257 = vst.msk [vmem:[%s3920_s4 + $0xf0] sm:$0xff] %vm890_vm1, %v2508_v32  ;;  %1258 = vst.msk [vmem:[%s3920_s4 + $0xf8] sm:$0xff] %vm890_vm1, %v2516_v36 }
 0x151   : > { %1259 = vst.msk [vmem:[%s3920_s4 + $0x100] sm:$0xff] %vm890_vm1, %v2402_v43  ;;  %1260 = vst.msk [vmem:[%s3920_s4 + $0x108] sm:$0xff] %vm890_vm1, %v2410_v47 }
 0x152   : > { %1261 = vst.msk [vmem:[%s3920_s4 + $0x110] sm:$0xff] %vm890_vm1, %v2398_v41  ;;  %1262 = vst.msk [vmem:[%s3920_s4 + $0x118] sm:$0xff] %vm890_vm1, %v2406_v45 }
 0x153   : > { %1263 = vst.msk [vmem:[%s3920_s4 + $0x120] sm:$0xff] %vm890_vm1, %v2418_v51  ;;  %1264 = vst.msk [vmem:[%s3920_s4 + $0x128] sm:$0xff] %vm890_vm1, %v2426_v55 }
 0x154   : > { %1265 = vst.msk [vmem:[%s3920_s4 + $0x130] sm:$0xff] %vm890_vm1, %v2414_v49  ;;  %1266 = vst.msk [vmem:[%s3920_s4 + $0x138] sm:$0xff] %vm890_vm1, %v2422_v53 }
 0x155   : > { %1267 = vst.msk [vmem:[%s3920_s4 + $0x140] sm:$0xff] %vm890_vm1, %v2434_v59  ;;  %1268 = vst.msk [vmem:[%s3920_s4 + $0x148] sm:$0xff] %vm890_vm1, %v2442_v63 }
 0x156   : > { %1269 = vst.msk [vmem:[%s3920_s4 + $0x150] sm:$0xff] %vm890_vm1, %v2430_v57  ;;  %1270 = vst.msk [vmem:[%s3920_s4 + $0x158] sm:$0xff] %vm890_vm1, %v2438_v61 }
 0x157   : > { %1271 = vst.msk [vmem:[%s3920_s4 + $0x160] sm:$0xff] %vm890_vm1, %v2450_v3  ;;  %1272 = vst.msk [vmem:[%s3920_s4 + $0x168] sm:$0xff] %vm890_vm1, %v2458_v7 }
 0x158   : > { %1273 = vst.msk [vmem:[%s3920_s4 + $0x170] sm:$0xff] %vm890_vm1, %v2446_v1  ;;  %1274 = vst.msk [vmem:[%s3920_s4 + $0x178] sm:$0xff] %vm890_vm1, %v2454_v5 }
 0x159   : > { %1275 = vst.msk [vmem:[%s3920_s4 + $0x180] sm:$0xff] %vm890_vm1, %v2466_v11  ;;  %1276 = vst.msk [vmem:[%s3920_s4 + $0x188] sm:$0xff] %vm890_vm1, %v2474_v15 }
 0x15a   : > { %1277 = vst.msk [vmem:[%s3920_s4 + $0x190] sm:$0xff] %vm890_vm1, %v2462_v9  ;;  %1278 = vst.msk [vmem:[%s3920_s4 + $0x198] sm:$0xff] %vm890_vm1, %v2470_v13  ;;  %v906_v13 = vsel %vm890_vm1, %v2432_v58, 0.0 }
 0x15b   : > { %1279 = vst.msk [vmem:[%s3920_s4 + $0x1a0] sm:$0xff] %vm890_vm1, %v2482_v19  ;;  %1280 = vst.msk [vmem:[%s3920_s4 + $0x1a8] sm:$0xff] %vm890_vm1, %v2490_v23  ;;  %v902_v19 = vsel %vm890_vm1, %v2412_v48, 0.0 }
 0x15c   : > { %1281 = vst.msk [vmem:[%s3920_s4 + $0x1b0] sm:$0xff] %vm890_vm1, %v2478_v17  ;;  %1282 = vst.msk [vmem:[%s3920_s4 + $0x1b8] sm:$0xff] %vm890_vm1, %v2486_v21  ;;  %v898_v21 = vsel %vm890_vm1, %v2416_v50, 0.0 }
 0x15d   : > { %1283 = vst.msk [vmem:[%s3920_s4 + $0x1c0] sm:$0xff] %vm890_vm1, %v2498_v27  ;;  %1284 = vst.msk [vmem:[%s3920_s4 + $0x1c8] sm:$0xff] %vm890_vm1, %v2506_v31  ;;  %v4021_v27 = vld [vmem:[#allocation38_spill] sm:$0xff]  ;;  %v4022_v31 = vld [vmem:[#allocation35_spill] sm:$0xff] }
 0x15e   : > { %1285 = vst.msk [vmem:[%s3920_s4 + $0x1d0] sm:$0xff] %vm890_vm1, %v2494_v25  ;;  %1286 = vst.msk [vmem:[%s3920_s4 + $0x1d8] sm:$0xff] %vm890_vm1, %v4020_v29  ;;  %v4023_v25 = vld [vmem:[#allocation37_spill] sm:$0xff]  ;;  %v896_v29 = vsel %vm890_vm1, %v2404_v44, 0.0 }
 0x15f   : > { %1287 = vst.msk [vmem:[%s3920_s4 + $0x1e0] sm:$0xff] %vm890_vm1, %v2514_v35  ;;  %1288 = vst.msk [vmem:[%s3920_s4 + $0x1e8] sm:$0xff] %vm890_vm1, %v4021_v27  ;;  %v893_v35 = vadd.f32 %v2533_v37, %v2529_v33  ;;  %v904_v33 = vsel %vm890_vm1, %v2420_v52, 0.0 }
 0x160   : > { %1289 = vst.msk [vmem:[%s3920_s4 + $0x1f0] sm:$0xff] %vm890_vm1, %v4022_v31  ;;  %1290 = vst.msk [vmem:[%s3920_s4 + $0x1f8] sm:$0xff] %vm890_vm1, %v4023_v25  ;;  %v900_v31 = vsel %vm890_vm1, %v2424_v54, 0.0 }
 0x161   : > { %v895_v27 = vadd.f32 %v2537_v39, %v893_v35  ;;  %v908_v39 = vsel %vm890_vm1, %v2440_v62, 0.0 }
 0x163   : > { %v897_v17 = vadd.f32 %v896_v29, %v895_v27  ;;  %v910_v29 = vsel %vm890_vm1, %v2428_v56, 0.0 }
 0x165   : > { %v899_v23 = vadd.f32 %v898_v21, %v897_v17  ;;  %v912_v21 = vsel %vm890_vm1, %v2436_v60, 0.0 }
 0x167   : > { %v901_v25 = vadd.f32 %v900_v31, %v899_v23  ;;  %v914_v31 = vsel %vm890_vm1, %v2448_v2, 0.0 }
 0x169   : > { %v903_v37 = vadd.f32 %v902_v19, %v901_v25  ;;  %v916_v25 = vsel %vm890_vm1, %v2456_v6, 0.0 }
 0x16b   : > { %v905_v35 = vadd.f32 %v904_v33, %v903_v37  ;;  %v918_v37 = vsel %vm890_vm1, %v2444_v0, 0.0 }
 0x16d   : > { %v907_v27 = vadd.f32 %v906_v13, %v905_v35  ;;  %v920_v35 = vsel %vm890_vm1, %v2452_v4, 0.0 }
 0x16f   : > { %v909_v17 = vadd.f32 %v908_v39, %v907_v27  ;;  %v922_v27 = vsel %vm890_vm1, %v2464_v10, 0.0 }
 0x171   : > { %v911_v23 = vadd.f32 %v910_v29, %v909_v17  ;;  %v924_v17 = vsel %vm890_vm1, %v2472_v14, 0.0 }
 0x173   : > { %v913_v19 = vadd.f32 %v912_v21, %v911_v23  ;;  %v926_v23 = vsel %vm890_vm1, %v2460_v8, 0.0 }
 0x175   : > { %v915_v33 = vadd.f32 %v914_v31, %v913_v19  ;;  %v1028_v31 = vmul.f32 %v2400_v42, %v2400_v42  ;;  %v1029_v19 = vmul.f32 %v2408_v46, %v2408_v46  ;;  %v932_v42 = vsel %vm890_vm1, %v2488_v22, 0.0 }
 0x177   : > { %v917_v13 = vadd.f32 %v916_v25, %v915_v33  ;;  %v1030_v25 = vmul.f32 %v2396_v40, %v2396_v40  ;;  %v1093_v46 = vsel %vm890_vm1, %v1029_v19, 0.0 }
 0x179   : > { %v919_v39 = vadd.f32 %v918_v37, %v917_v13  ;;  %v928_v37 = vsel %vm890_vm1, %v2468_v12, 0.0  ;;  %v1031_v13 = vmul.f32 %v2404_v44, %v2404_v44  ;;  %v1095_v40 = vsel %vm890_vm1, %v1030_v25, 0.0 }
 0x17b   : > { %v921_v29 = vadd.f32 %v920_v35, %v919_v39  ;;  %v930_v39 = vsel %vm890_vm1, %v2480_v18, 0.0 }
 0x17d   : > { %v923_v21 = vadd.f32 %v922_v27, %v921_v29  ;;  %v1032_v27 = vmul.f32 %v2416_v50, %v2416_v50  ;;  %v1092_v29 = vsel %vm890_vm1, %v1028_v31, 0.0  ;;  %v934_v50 = vsel %vm890_vm1, %v2476_v16, 0.0 }
 0x17e   : > { %v1034_v31 = vmul.f32 %v2412_v48, %v2412_v48 }
 0x17f   : > { %v925_v33 = vadd.f32 %v924_v17, %v923_v21  ;;  %v1094_v21 = vadd.f32 %v1093_v46, %v1092_v29  ;;  %v1099_v19 = vsel %vm890_vm1, %v1032_v27, 0.0  ;;  %v938_v29 = vsel %vm890_vm1, %v2496_v26, 0.0 }
 0x180   : > { %v1103_v27 = vsel %vm890_vm1, %v1034_v31, 0.0 }
 0x181   : > { %v927_v35 = vadd.f32 %v926_v23, %v925_v33  ;;  %v1033_v23 = vmul.f32 %v2424_v54, %v2424_v54  ;;  %v1097_v33 = vsel %vm890_vm1, %v1031_v13, 0.0  ;;  %v1096_v9 = vadd.f32 %v1095_v40, %v1094_v21 }
 0x182   : > { %v1037_v21 = vmul.f32 %v2440_v62, %v2440_v62 }
 0x183   : > { %v929_v17 = vadd.f32 %v928_v37, %v927_v35  ;;  %v1098_v46 = vadd.f32 %v1097_v33, %v1096_v9  ;;  %v936_v37 = vsel %vm890_vm1, %v2484_v20, 0.0  ;;  %v1035_v35 = vmul.f32 %v2420_v52, %v2420_v52 }
 0x184   : > { %v1101_v13 = vsel %vm890_vm1, %v1033_v23, 0.0  ;;  %v940_v9 = vsel %vm890_vm1, %v2504_v30, 0.0 }
 0x185   : > { %v931_v44 = vadd.f32 %v930_v39, %v929_v17  ;;  %v1100_v40 = vadd.f32 %v1099_v19, %v1098_v46  ;;  %v1036_v17 = vmul.f32 %v2432_v58, %v2432_v58  ;;  %v1105_v23 = vsel %vm890_vm1, %v1035_v35, 0.0 }
 0x186   : > { %v942_v19 = vsel %vm890_vm1, %v2492_v24, 0.0  ;;  %v1109_v35 = vsel %vm890_vm1, %v1037_v21, 0.0 }
 0x187   : > { %v933_v25 = vadd.f32 %v932_v42, %v931_v44  ;;  %v1102_v44 = vadd.f32 %v1101_v13, %v1100_v40  ;;  %v1107_v31 = vsel %vm890_vm1, %v1036_v17, 0.0  ;;  %v944_v13 = vsel %vm890_vm1, %v2500_v28, 0.0 }
 0x189   : > { %v935_v39 = vadd.f32 %v934_v50, %v933_v25  ;;  %v1104_v33 = vadd.f32 %v1103_v27, %v1102_v44  ;;  %v1038_v25 = vmul.f32 %v2428_v56, %v2428_v56  ;;  %v946_v27 = vsel %vm890_vm1, %v2512_v34, 0.0 }
 0x18b   : > { %v937_v42 = vadd.f32 %v936_v37, %v935_v39  ;;  %v1106_v37 = vadd.f32 %v1105_v23, %v1104_v33  ;;  %v1039_v39 = vmul.f32 %v2436_v60, %v2436_v60  ;;  %v1111_v17 = vsel %vm890_vm1, %v1038_v25, 0.0 }
 0x18c   : > { %v948_v23 = vsel %vm890_vm1, %v2520_v38, 0.0 }
 0x18d   : > { %v939_v50 = vadd.f32 %v938_v29, %v937_v42  ;;  %v1108_v29 = vadd.f32 %v1107_v31, %v1106_v37  ;;  %v1040_v42 = vmul.f32 %v2448_v2, %v2448_v2  ;;  %v1113_v21 = vsel %vm890_vm1, %v1039_v39, 0.0 }
 0x18e   : > { %v950_v31 = vsel %vm890_vm1, %v2508_v32, 0.0 }
 0x18f   : > { %v941_v46 = vadd.f32 %v940_v9, %v939_v50  ;;  %v1110_v9 = vadd.f32 %v1109_v35, %v1108_v29  ;;  %v1041_v50 = vmul.f32 %v2456_v6, %v2456_v6  ;;  %v1115_v25 = vsel %vm890_vm1, %v1040_v42, 0.0 }
 0x190   : > { %v952_v35 = vsel %vm890_vm1, %v2516_v36, 0.0 }
 0x191   : > { %v943_v40 = vadd.f32 %v942_v19, %v941_v46  ;;  %v1112_v19 = vadd.f32 %v1111_v17, %v1110_v9  ;;  %v1042_v46 = vmul.f32 %v2444_v0, %v2444_v0  ;;  %v1117_v39 = vsel %vm890_vm1, %v1041_v50, 0.0 }
 0x192   : > { %v954_v17 = vsel %vm890_vm1, %v2402_v43, 0.0 }
 0x193   : > { %v945_v44 = vadd.f32 %v944_v13, %v943_v40  ;;  %v1114_v13 = vadd.f32 %v1113_v21, %v1112_v19  ;;  %v1043_v40 = vmul.f32 %v2452_v4, %v2452_v4  ;;  %v1119_v42 = vsel %vm890_vm1, %v1042_v46, 0.0 }
 0x194   : > { %v956_v21 = vsel %vm890_vm1, %v2410_v47, 0.0 }
 0x195   : > { %v947_v33 = vadd.f32 %v946_v27, %v945_v44  ;;  %v1116_v27 = vadd.f32 %v1115_v25, %v1114_v13  ;;  %v1044_v44 = vmul.f32 %v2464_v10, %v2464_v10  ;;  %v1121_v50 = vsel %vm890_vm1, %v1043_v40, 0.0 }
 0x196   : > { %v958_v25 = vsel %vm890_vm1, %v2398_v41, 0.0 }
 0x197   : > { %v949_v37 = vadd.f32 %v948_v23, %v947_v33  ;;  %v1118_v23 = vadd.f32 %v1117_v39, %v1116_v27  ;;  %v1045_v33 = vmul.f32 %v2472_v14, %v2472_v14  ;;  %v1123_v46 = vsel %vm890_vm1, %v1044_v44, 0.0 }
 0x198   : > { %v960_v39 = vsel %vm890_vm1, %v2406_v45, 0.0 }
 0x199   : > { %v951_v29 = vadd.f32 %v950_v31, %v949_v37  ;;  %v1120_v31 = vadd.f32 %v1119_v42, %v1118_v23  ;;  %v1046_v37 = vmul.f32 %v2460_v8, %v2460_v8  ;;  %v1125_v40 = vsel %vm890_vm1, %v1045_v33, 0.0 }
 0x19a   : > { %v962_v42 = vsel %vm890_vm1, %v2418_v51, 0.0 }
 0x19b   : > { %v953_v9 = vadd.f32 %v952_v35, %v951_v29  ;;  %v1122_v35 = vadd.f32 %v1121_v50, %v1120_v31  ;;  %v1047_v29 = vmul.f32 %v2468_v12, %v2468_v12  ;;  %v1127_v44 = vsel %vm890_vm1, %v1046_v37, 0.0 }
 0x19c   : > { %v964_v50 = vsel %vm890_vm1, %v2426_v55, 0.0 }
 0x19d   : > { %v955_v19 = vadd.f32 %v954_v17, %v953_v9  ;;  %v1124_v17 = vadd.f32 %v1123_v46, %v1122_v35  ;;  %v1048_v9 = vmul.f32 %v2480_v18, %v2480_v18  ;;  %v1129_v33 = vsel %vm890_vm1, %v1047_v29, 0.0 }
 0x19e   : > { %v966_v46 = vsel %vm890_vm1, %v2414_v49, 0.0 }
 0x19f   : > { %v957_v13 = vadd.f32 %v956_v21, %v955_v19  ;;  %v1126_v21 = vadd.f32 %v1125_v40, %v1124_v17  ;;  %v1049_v19 = vmul.f32 %v2488_v22, %v2488_v22  ;;  %v1131_v37 = vsel %vm890_vm1, %v1048_v9, 0.0 }
 0x1a0   : > { %v968_v40 = vsel %vm890_vm1, %v2422_v53, 0.0 }
 0x1a1   : > { %v959_v27 = vadd.f32 %v958_v25, %v957_v13  ;;  %v1128_v25 = vadd.f32 %v1127_v44, %v1126_v21  ;;  %v1050_v13 = vmul.f32 %v2476_v16, %v2476_v16  ;;  %v1133_v29 = vsel %vm890_vm1, %v1049_v19, 0.0 }
 0x1a2   : > { %v970_v44 = vsel %vm890_vm1, %v2434_v59, 0.0 }
 0x1a3   : > { %v961_v23 = vadd.f32 %v960_v39, %v959_v27  ;;  %v1130_v39 = vadd.f32 %v1129_v33, %v1128_v25  ;;  %v1051_v27 = vmul.f32 %v2484_v20, %v2484_v20  ;;  %v1135_v9 = vsel %vm890_vm1, %v1050_v13, 0.0 }
 0x1a4   : > { %v972_v33 = vsel %vm890_vm1, %v2442_v63, 0.0 }
 0x1a5   : > { %v963_v31 = vadd.f32 %v962_v42, %v961_v23  ;;  %v1132_v42 = vadd.f32 %v1131_v37, %v1130_v39  ;;  %v1052_v23 = vmul.f32 %v2496_v26, %v2496_v26  ;;  %v1137_v19 = vsel %vm890_vm1, %v1051_v27, 0.0 }
 0x1a6   : > { %v974_v37 = vsel %vm890_vm1, %v2430_v57, 0.0 }
 0x1a7   : > { %v965_v35 = vadd.f32 %v964_v50, %v963_v31  ;;  %v1134_v50 = vadd.f32 %v1133_v29, %v1132_v42  ;;  %v1053_v31 = vmul.f32 %v2504_v30, %v2504_v30  ;;  %v1139_v13 = vsel %vm890_vm1, %v1052_v23, 0.0 }
 0x1a8   : > { %v976_v29 = vsel %vm890_vm1, %v2438_v61, 0.0 }
 0x1a9   : > { %v967_v17 = vadd.f32 %v966_v46, %v965_v35  ;;  %v1136_v46 = vadd.f32 %v1135_v9, %v1134_v50  ;;  %v1054_v35 = vmul.f32 %v2492_v24, %v2492_v24  ;;  %v1141_v27 = vsel %vm890_vm1, %v1053_v31, 0.0 }
 0x1aa   : > { %v978_v9 = vsel %vm890_vm1, %v2450_v3, 0.0 }
 0x1ab   : > { %v969_v21 = vadd.f32 %v968_v40, %v967_v17  ;;  %v1138_v40 = vadd.f32 %v1137_v19, %v1136_v46  ;;  %v1055_v17 = vmul.f32 %v2500_v28, %v2500_v28  ;;  %v1143_v23 = vsel %vm890_vm1, %v1054_v35, 0.0 }
 0x1ac   : > { %v980_v19 = vsel %vm890_vm1, %v2458_v7, 0.0 }
 0x1ad   : > { %v971_v25 = vadd.f32 %v970_v44, %v969_v21  ;;  %v1140_v44 = vadd.f32 %v1139_v13, %v1138_v40  ;;  %v1056_v21 = vmul.f32 %v2512_v34, %v2512_v34  ;;  %v1145_v31 = vsel %vm890_vm1, %v1055_v17, 0.0 }
 0x1ae   : > { %v982_v13 = vsel %vm890_vm1, %v2446_v1, 0.0 }
 0x1af   : > { %v973_v39 = vadd.f32 %v972_v33, %v971_v25  ;;  %v1142_v33 = vadd.f32 %v1141_v27, %v1140_v44  ;;  %v1057_v25 = vmul.f32 %v2520_v38, %v2520_v38  ;;  %v1147_v35 = vsel %vm890_vm1, %v1056_v21, 0.0 }
 0x1b0   : > { %v984_v27 = vsel %vm890_vm1, %v2454_v5, 0.0 }
 0x1b1   : > { %v975_v42 = vadd.f32 %v974_v37, %v973_v39  ;;  %v1144_v37 = vadd.f32 %v1143_v23, %v1142_v33  ;;  %v1058_v39 = vmul.f32 %v2508_v32, %v2508_v32  ;;  %v1149_v17 = vsel %vm890_vm1, %v1057_v25, 0.0 }
 0x1b2   : > { %v986_v23 = vsel %vm890_vm1, %v2466_v11, 0.0 }
 0x1b3   : > { %v977_v50 = vadd.f32 %v976_v29, %v975_v42  ;;  %v1146_v29 = vadd.f32 %v1145_v31, %v1144_v37  ;;  %v1059_v42 = vmul.f32 %v2516_v36, %v2516_v36  ;;  %v1151_v21 = vsel %vm890_vm1, %v1058_v39, 0.0 }
 0x1b4   : > { %v988_v31 = vsel %vm890_vm1, %v2474_v15, 0.0 }
 0x1b5   : > { %v979_v46 = vadd.f32 %v978_v9, %v977_v50  ;;  %v1148_v9 = vadd.f32 %v1147_v35, %v1146_v29  ;;  %v1060_v50 = vmul.f32 %v2402_v43, %v2402_v43  ;;  %v1153_v25 = vsel %vm890_vm1, %v1059_v42, 0.0  ;;  %v4024_v35 = vld [vmem:[#allocation24_spill] sm:$0xff] }
 0x1b6   : > { %v1062_v29 = vmul.f32 %v2398_v41, %v2398_v41  ;;  %v1064_v41 = vmul.f32 %v2418_v51, %v2418_v51  ;;  %v1066_v51 = vmul.f32 %v2414_v49, %v2414_v49  ;;  %v1068_v49 = vmul.f32 %v2434_v59, %v2434_v59 }
 0x1b7   : > { %v981_v40 = vadd.f32 %v980_v19, %v979_v46  ;;  %v1150_v19 = vadd.f32 %v1149_v17, %v1148_v9  ;;  %v1061_v46 = vmul.f32 %v2410_v47, %v2410_v47  ;;  %v1155_v39 = vsel %vm890_vm1, %v1060_v50, 0.0 }
 0x1b8   : > { %v1063_v47 = vmul.f32 %v2406_v45, %v2406_v45  ;;  %v1159_v50 = vsel %vm890_vm1, %v1062_v29, 0.0  ;;  %v1065_v45 = vmul.f32 %v2426_v55, %v2426_v55  ;;  %v1163_v29 = vsel %vm890_vm1, %v1064_v41, 0.0 }
 0x1b9   : > { %v983_v44 = vadd.f32 %v982_v13, %v981_v40  ;;  %v1152_v13 = vadd.f32 %v1151_v21, %v1150_v19  ;;  %v990_v40 = vsel %vm890_vm1, %v4024_v35, 0.0  ;;  %v1157_v42 = vsel %vm890_vm1, %v1061_v46, 0.0 }
 0x1ba   : > { %v1161_v46 = vsel %vm890_vm1, %v1063_v47, 0.0  ;;  %v1067_v55 = vmul.f32 %v2422_v53, %v2422_v53  ;;  %v1165_v47 = vsel %vm890_vm1, %v1065_v45, 0.0  ;;  %v1167_v41 = vsel %vm890_vm1, %v1066_v51, 0.0 }
 0x1bb   : > { %v985_v33 = vadd.f32 %v984_v27, %v983_v44  ;;  %v1154_v17 = vadd.f32 %v1153_v25, %v1152_v13  ;;  %v4025_v44 = vld [vmem:[#allocation25_spill] sm:$0xff]  ;;  %v1069_v53 = vmul.f32 %v2442_v63, %v2442_v63  ;;  %v1070_v59 = vmul.f32 %v2430_v57, %v2430_v57 }
 0x1bc   : > { %v992_v9 = vsel %vm890_vm1, %v4025_v44, 0.0  ;;  %v1169_v45 = vsel %vm890_vm1, %v1067_v55, 0.0  ;;  %v1171_v51 = vsel %vm890_vm1, %v1068_v49, 0.0  ;;  %v1071_v63 = vmul.f32 %v2438_v61, %v2438_v61 }
 0x1bd   : > { %v987_v37 = vadd.f32 %v986_v23, %v985_v33  ;;  %v1156_v21 = vadd.f32 %v1155_v39, %v1154_v17  ;;  %v4026_v33 = vld [vmem:[#allocation28_spill] sm:$0xff]  ;;  %v1173_v55 = vsel %vm890_vm1, %v1069_v53, 0.0  ;;  %v1072_v57 = vmul.f32 %v2450_v3, %v2450_v3 }
 0x1be   : > { %v994_v19 = vsel %vm890_vm1, %v4026_v33, 0.0  ;;  %v1175_v49 = vsel %vm890_vm1, %v1070_v59, 0.0  ;;  %v1073_v61 = vmul.f32 %v2458_v7, %v2458_v7  ;;  %v1177_v53 = vsel %vm890_vm1, %v1071_v63, 0.0 }
 0x1bf   : > { %v989_v27 = vadd.f32 %v988_v31, %v987_v37  ;;  %v1158_v25 = vadd.f32 %v1157_v42, %v1156_v21  ;;  %v4027_v37 = vld [vmem:[#allocation30_spill] sm:$0xff]  ;;  %v1074_v3 = vmul.f32 %v2446_v1, %v2446_v1  ;;  %v1179_v59 = vsel %vm890_vm1, %v1072_v57, 0.0 }
 0x1c0   : > { %v996_v13 = vsel %vm890_vm1, %v4027_v37, 0.0  ;;  %v1075_v7 = vmul.f32 %v2454_v5, %v2454_v5  ;;  %v1181_v63 = vsel %vm890_vm1, %v1073_v61, 0.0  ;;  %v1077_v57 = vmul.f32 %v2474_v15, %v2474_v15 }
 0x1c1   : > { %v991_v23 = vadd.f32 %v990_v40, %v989_v27  ;;  %v1160_v39 = vadd.f32 %v1159_v50, %v1158_v25  ;;  %v4028_v27 = vld [vmem:[#allocation27_spill] sm:$0xff] }
 0x1c2   : > { %v998_v17 = vsel %vm890_vm1, %v4028_v27, 0.0 }
 0x1c3   : > { %v993_v31 = vadd.f32 %v992_v9, %v991_v23  ;;  %v1162_v42 = vadd.f32 %v1161_v46, %v1160_v39  ;;  %v4029_v23 = vld [vmem:[#allocation29_spill] sm:$0xff] }
 0x1c4   : > { %v1000_v21 = vsel %vm890_vm1, %v4029_v23, 0.0 }
 0x1c5   : > { %v995_v40 = vadd.f32 %v994_v19, %v993_v31  ;;  %v1164_v50 = vadd.f32 %v1163_v29, %v1162_v42  ;;  %v4030_v31 = vld [vmem:[#allocation32_spill] sm:$0xff] }
 0x1c6   : > { %v1002_v25 = vsel %vm890_vm1, %v4030_v31, 0.0 }
 0x1c7   : > { %v997_v9 = vadd.f32 %v996_v13, %v995_v40  ;;  %v1166_v46 = vadd.f32 %v1165_v47, %v1164_v50  ;;  %v4031_v40 = vld [vmem:[#allocation34_spill] sm:$0xff] }
 0x1c8   : > { %v1004_v39 = vsel %vm890_vm1, %v4031_v40, 0.0 }
 0x1c9   : > { %v999_v19 = vadd.f32 %v998_v17, %v997_v9  ;;  %v1168_v29 = vadd.f32 %v1167_v41, %v1166_v46  ;;  %v4032_v9 = vld [vmem:[#allocation31_spill] sm:$0xff] }
 0x1ca   : > { %v1006_v42 = vsel %vm890_vm1, %v4032_v9, 0.0 }
 0x1cb   : > { %v1001_v13 = vadd.f32 %v1000_v21, %v999_v19  ;;  %v1170_v47 = vadd.f32 %v1169_v45, %v1168_v29  ;;  %v4033_v19 = vld [vmem:[#allocation33_spill] sm:$0xff] }
 0x1cc   : > { %v1008_v50 = vsel %vm890_vm1, %v4033_v19, 0.0 }
 0x1cd   : > { %v1003_v17 = vadd.f32 %v1002_v25, %v1001_v13  ;;  %v1172_v41 = vadd.f32 %v1171_v51, %v1170_v47  ;;  %v4034_v13 = vld [vmem:[#allocation36_spill] sm:$0xff] }
 0x1ce   : > { %v1010_v46 = vsel %vm890_vm1, %v4034_v13, 0.0 }
 0x1cf   : > { %v1005_v21 = vadd.f32 %v1004_v39, %v1003_v17  ;;  %v1174_v45 = vadd.f32 %v1173_v55, %v1172_v41  ;;  %v4035_v17 = vld [vmem:[#allocation38_spill] sm:$0xff] }
 0x1d0   : > { %v1012_v29 = vsel %vm890_vm1, %v4035_v17, 0.0 }
 0x1d1   : > { %v1007_v25 = vadd.f32 %v1006_v42, %v1005_v21  ;;  %v1176_v51 = vadd.f32 %v1175_v49, %v1174_v45  ;;  %v4036_v21 = vld [vmem:[#allocation35_spill] sm:$0xff]  ;;  %v1183_v45 = vsel %vm890_vm1, %v1074_v3, 0.0  ;;  %v1189_v3 = vsel %vm890_vm1, %v1077_v57, 0.0 }
 0x1d2   : > { %v1014_v47 = vsel %vm890_vm1, %v4036_v21, 0.0 }
 0x1d3   : > { %v1009_v39 = vadd.f32 %v1008_v50, %v1007_v25  ;;  %v1178_v55 = vadd.f32 %v1177_v53, %v1176_v51  ;;  %v4037_v25 = vld [vmem:[#allocation37_spill] sm:$0xff]  ;;  %v1078_v51 = vmul.f32 %v4024_v35, %v4024_v35  ;;  %v1081_v35 = vmul.f32 %v4027_v37, %v4027_v37 }
 0x1d4   : > { %v1016_v41 = vsel %vm890_vm1, %v4037_v25, 0.0 }
 0x1d5   : > { %v1011_v42 = vadd.f32 %v1010_v46, %v1009_v39  ;;  %v1180_v49 = vadd.f32 %v1179_v59, %v1178_v55  ;;  %v1076_v39 = vmul.f32 %v2466_v11, %v2466_v11 }
 0x1d7   : > { %v1013_v50 = vadd.f32 %v1012_v29, %v1011_v42  ;;  %v1182_v43 = vadd.f32 %v1181_v63, %v1180_v49  ;;  %v1185_v29 = vsel %vm890_vm1, %v1075_v7, 0.0  ;;  %v1187_v61 = vsel %vm890_vm1, %v1076_v39, 0.0 }
 0x1d8   : > { %v1080_v63 = vmul.f32 %v4026_v33, %v4026_v33  ;;  %v1191_v7 = vsel %vm890_vm1, %v1078_v51, 0.0  ;;  %v1083_v33 = vmul.f32 %v4029_v23, %v4029_v23  ;;  %v1086_v23 = vmul.f32 %v4032_v9, %v4032_v9 }
 0x1d9   : > { %v1015_v46 = vadd.f32 %v1014_v47, %v1013_v50  ;;  %v1184_v42 = vadd.f32 %v1183_v45, %v1182_v43  ;;  %v1079_v50 = vmul.f32 %v4025_v44, %v4025_v44  ;;  %v889_v45 = vld [vmem:[#allocation2] sm:$0x1]  ;;  %v1082_v44 = vmul.f32 %v4028_v27, %v4028_v27 }
 0x1da   : > { %v1195_v57 = vsel %vm890_vm1, %v1080_v63, 0.0 }
 0x1db   : > { %v1017_v1 = vadd.f32 %v1016_v41, %v1015_v46  ;;  %v1186_v59 = vadd.f32 %v1185_v29, %v1184_v42  ;;  %v1197_v42 = vsel %vm890_vm1, %v1081_v35, 0.0  ;;  %v1089_v35 = vmul.f32 %v4035_v17, %v4035_v17 }
 0x1dd   : > { %v1018_v53 = vrot.slane %v1017_v1, 4  ;;  %v1188_v41 = vadd.f32 %v1187_v61, %v1186_v59  ;;  %v1084_v61 = vmul.f32 %v4030_v31, %v4030_v31  ;;  %v1085_v59 = vmul.f32 %v4031_v40, %v4031_v40 }
 0x1de   : > { %v1087_v31 = vmul.f32 %v4033_v19, %v4033_v19  ;;  %v1207_v40 = vsel %vm890_vm1, %v1086_v23, 0.0 }
 0x1df   : > { %v1019_v47 = vadd.f32 %v1018_v53, %v1017_v1  ;;  %v1190_v46 = vadd.f32 %v1189_v3, %v1188_v41  ;;  %v1193_v1 = vsel %vm890_vm1, %v1079_v50, 0.0  ;;  %v1201_v50 = vsel %vm890_vm1, %v1083_v33, 0.0 }
 0x1e0   : > { %v1205_v63 = vsel %vm890_vm1, %v1085_v59, 0.0  ;;  %v1209_v9 = vsel %vm890_vm1, %v1087_v31, 0.0 }
 0x1e1   : > { %v1020_v55 = vrot.slane %v1019_v47, 2  ;;  %v1192_v39 = vadd.f32 %v1191_v7, %v1190_v46 }
 0x1e3   : > { %v1021_v43 = vadd.f32 %v1020_v55, %v1019_v47  ;;  %v1194_v53 = vadd.f32 %v1193_v1, %v1192_v39  ;;  %v1199_v47 = vsel %vm890_vm1, %v1082_v44, 0.0  ;;  %v1203_v55 = vsel %vm890_vm1, %v1084_v61, 0.0 }
 0x1e5   : > { %v1022_v49 = vrot.slane %v1021_v43, 1  ;;  %v1196_v37 = vadd.f32 %v1195_v57, %v1194_v53 }
 0x1e7   : > { %v1023_v29 = vadd.f32 %v1022_v49, %v1021_v43  ;;  %v1198_v27 = vadd.f32 %v1197_v42, %v1196_v37  ;;  %v1088_v43 = vmul.f32 %v4034_v13, %v4034_v13  ;;  %v1090_v49 = vmul.f32 %v4036_v21, %v4036_v21 }
 0x1e8   : > { %v1213_v13 = vsel %vm890_vm1, %v1089_v35, 0.0 }
 0x1e9   : > { %v1024_v51 = vadd.f32 %v1023_v29, %v889_v45  ;;  %v1200_v3 = vadd.f32 %v1199_v47, %v1198_v27  ;;  %v1211_v19 = vsel %vm890_vm1, %v1088_v43, 0.0  ;;  %v1091_v45 = vmul.f32 %v4037_v25, %v4037_v25  ;;  %v1027_v47 = vld [vmem:[#allocation3] sm:$0x1] }
 0x1ea   : > { %v1215_v57 = vsel %vm890_vm1, %v1090_v49, 0.0 }
 0x1eb   : > { %1026 = vst.msk [vmem:[#allocation2] sm:$0x1] %vm1025_vm2, %v1024_v51  ;;  %v1202_v41 = vadd.f32 %v1201_v50, %v1200_v3  ;;  %v1217_v17 = vsel %vm890_vm1, %v1091_v45, 0.0 }
 0x1ed   : > { %v1204_v7 = vadd.f32 %v1203_v55, %v1202_v41 }
 0x1ef   : > { %v1206_v46 = vadd.f32 %v1205_v63, %v1204_v7 }
 0x1f1   : > { %v1208_v1 = vadd.f32 %v1207_v40, %v1206_v46 }
 0x1f3   : > { %v1210_v39 = vadd.f32 %v1209_v9, %v1208_v1 }
 0x1f5   : > { %v1212_v44 = vadd.f32 %v1211_v19, %v1210_v39 }
 0x1f7   : > { %v1214_v29 = vadd.f32 %v1213_v13, %v1212_v44 }
 0x1f9   : > { %v1216_v53 = vadd.f32 %v1215_v57, %v1214_v29 }
 0x1fb   : > { %v1218_v33 = vadd.f32 %v1217_v17, %v1216_v53 }
 0x1fd   : > { %v1219_v42 = vrot.slane %v1218_v33, 4 }
 0x1ff   : > { %v1220_v51 = vadd.f32 %v1219_v42, %v1218_v33 }
 0x201   : > { %v1221_v37 = vrot.slane %v1220_v51, 2 }
 0x203   : > { %v1222_v21 = vadd.f32 %v1221_v37, %v1220_v51 }
 0x205   : > { %v1223_v61 = vrot.slane %v1222_v21, 1 }
 0x207   : > { %v1224_v27 = vadd.f32 %v1223_v61, %v1222_v21 }
 0x209   : > { %v1225_v59 = vadd.f32 %v1224_v27, %v1027_v47 }
 0x20b   : > { %1226 = vst.msk [vmem:[#allocation3] sm:$0x1] %vm1025_vm2, %v1225_v59 }
 0x20c PF: > { %p1994_p6 = scmp.ne.s32.totalorder %s2219_s15, 1 }
 0x20d   : > { %v1295_v25 = vld [vmem:[#allocation2] sm:$0x1] (!%p1994_p6)  ;;  %v1302_v3 = vlaneseq (!%p1994_p6)  ;;  %v4038_v46 = vld [vmem:[#allocation6_spill] sm:$0xff] (!%p1994_p6)  ;;  %v4040_v49 = vld [vmem:[#allocation4_spill] sm:$0xff] (!%p1994_p6)  ;;  %vm1777_vm3 = vcmask (!%p1994_p6), 130048  }
 0x20e   : > { %1294 = sbr.rel (%p1994_p6) target bundleno = 665 (0x299), region = 48  ;;  %v1296_v23 = vmul.f32 (!%p1994_p6), 0.001953125, %v1295_v25  ;;  %v4039_v9 = vld [vmem:[#allocation10_spill] sm:$0xff] (!%p1994_p6)  ;;  %v4041_v39 = vld [vmem:[#allocation8_spill] sm:$0xff] (!%p1994_p6)  ;;  %v4042_v13 = vld [vmem:[#allocation13_spill] sm:$0xff] (!%p1994_p6) }
 0x20f   : > { %v1303_v41 = vshrl.u32 (!%p1994_p6), %v1302_v3, 7  ;;  %v4054_v3 = vld [vmem:[#allocation19_spill] sm:$0xff] (!%p1994_p6)  ;;  %v4057_v59 = vld [vmem:[#allocation21_spill] sm:$0xff] (!%p1994_p6) }
 0x210   : > { %v1299_v31 = vmul.f32 (!%p1994_p6), %v1296_v23, %v1296_v23  ;;  %v4056_v25 = vld [vmem:[#allocation23_spill] sm:$0xff] (!%p1994_p6) }
 0x211   : > { %v1304_v63 = vsub.s32 (!%p1994_p6), 0, %v1303_v41  ;;  %v4051_v41 = vld [vmem:[#allocation18_spill] sm:$0xff] (!%p1994_p6) }
 0x212   : > { %v1297_v50 = vld [vmem:[#allocation3] sm:$0x1] (!%p1994_p6) }
 0x213   : > { %v1298_v55 = vmul.f32 (!%p1994_p6), 0.001953125, %v1297_v50  ;;  %v3179_v43 = vrot.slane (!%p1994_p6), %v1296_v23, %v1304_v63  ;;  %v4053_v23 = vld [vmem:[#allocation17_spill] sm:$0xff] (!%p1994_p6)  ;;  %v4055_v50 = vld [vmem:[#allocation22_spill] sm:$0xff] (!%p1994_p6) }
 0x215   : > { %v1300_v7 = vsub.f32 %v1298_v55, %v1299_v31  ;;  %v1307_v35 = vsub.f32 %v4038_v46, %v3179_v43  ;;  %v1308_v1 = vsub.f32 %v4039_v9, %v3179_v43  ;;  %v1309_v19 = vsub.f32 %v4040_v49, %v3179_v43  ;;  %v4043_v49 = vld [vmem:[#allocation7_spill] sm:$0xff]  ;;  %v4045_v31 = vld [vmem:[#allocation5_spill] sm:$0xff]  ;;  %v4048_v46 = vld [vmem:[#allocation16_spill] sm:$0xff] }
 0x216   : > { %v1310_v45 = vsub.f32 %v4041_v39, %v3179_v43  ;;  %v1311_v44 = vsub.f32 %v4042_v13, %v3179_v43  ;;  %v1312_v57 = vsub.f32 %v2424_v54, %v3179_v43  ;;  %v1313_v29 = vsub.f32 %v2412_v48, %v3179_v43  ;;  %v4044_v13 = vld [vmem:[#allocation11_spill] sm:$0xff]  ;;  %v4049_v9 = vld [vmem:[#allocation12_spill] sm:$0xff] }
 0x217   : > { %v1371_v40 = vadd.f32 1e-05, %v1300_v7  ;;  %v1314_v17 = vsub.f32 %v2420_v52, %v3179_v43  ;;  %v4046_v7 = vld [vmem:[#allocation9_spill] sm:$0xff]  ;;  %v4050_v39 = vld [vmem:[#allocation15_spill] sm:$0xff]  ;;  %v4052_v55 = vld [vmem:[#allocation20_spill] sm:$0xff] }
 0x218   : > { %v3286_v52 = vld [vmem:[%s3918_s2] ss:$0 sm:$0xff] }
 0x219   : > { %2203 = vrsqrt.f32 %v1371_v40  ;;  %v4047_v40 = vld [vmem:[#allocation14_spill] sm:$0xff]  ;;  %v3303_v54 = vld [vmem:[%s3919_s3] ss:$0 sm:$0xff] }
 0x223   : > { %v2204_v21 = vpop.eup %2203 }
 0x224   : > { %v3275_v27 = vrot.slane %v2204_v21, %v1304_v63 }
 0x226   : > { %v1379_v33 = vmul.f32 %v3275_v27, %v1307_v35  ;;  %v1380_v37 = vmul.f32 %v3275_v27, %v1308_v1  ;;  %v1381_v53 = vmul.f32 %v3275_v27, %v1309_v19  ;;  %v1382_v15 = vmul.f32 %v3275_v27, %v1310_v45 }
 0x227   : > { %v1383_v21 = vmul.f32 %v3275_v27, %v1311_v44  ;;  %v1384_v47 = vmul.f32 %v3275_v27, %v1312_v57  ;;  %v1385_v51 = vmul.f32 %v3275_v27, %v1313_v29  ;;  %v1386_v61 = vmul.f32 %v3275_v27, %v1314_v17 }
 0x228   : > { %v1450_v35 = vmul.f32 %v3286_v52, %v1379_v33  ;;  %v1451_v1 = vmul.f32 %v3286_v52, %v1380_v37  ;;  %v1452_v19 = vmul.f32 %v3286_v52, %v1381_v53  ;;  %v1453_v45 = vmul.f32 %v3286_v52, %v1382_v15 }
 0x229   : > { %v1454_v42 = vmul.f32 %v3286_v52, %v1383_v21  ;;  %v1455_v63 = vmul.f32 %v3286_v52, %v1384_v47  ;;  %v1456_v44 = vmul.f32 %v3286_v52, %v1385_v51  ;;  %v1457_v57 = vmul.f32 %v3286_v52, %v1386_v61 }
 0x22a   : > { %v1521_v29 = vadd.f32 %v3303_v54, %v1450_v35  ;;  %v1522_v17 = vadd.f32 %v3303_v54, %v1451_v1  ;;  %v1523_v33 = vadd.f32 %v3303_v54, %v1452_v19  ;;  %v1524_v37 = vadd.f32 %v3303_v54, %v1453_v45 }
 0x22b   : > { %v1525_v53 = vadd.f32 %v3303_v54, %v1454_v42  ;;  %v1526_v15 = vadd.f32 %v3303_v54, %v1455_v63  ;;  %v1527_v21 = vadd.f32 %v3303_v54, %v1456_v44  ;;  %v1528_v47 = vadd.f32 %v3303_v54, %v1457_v57 }
 0x22c   : > { %vm1585_vm4 = vcmp.gt.f32.partialorder %v1521_v29, 0.0  ;;  %v1649_v51 = vmul.f32 0.2, %v1521_v29  ;;  %vm1586_vm5 = vcmp.gt.f32.partialorder %v1522_v17, 0.0  ;;  %v1650_v61 = vmul.f32 0.2, %v1522_v17 }
 0x22d   : > { %vm1587_vm6 = vcmp.gt.f32.partialorder %v1523_v33, 0.0  ;;  %v1651_v35 = vmul.f32 0.2, %v1523_v33  ;;  %vm1588_vm7 = vcmp.gt.f32.partialorder %v1524_v37, 0.0  ;;  %v1652_v1 = vmul.f32 0.2, %v1524_v37 }
 0x22e   : > { %v1713_v48 = vsel %vm1585_vm4, %v1521_v29, %v1649_v51  ;;  %v1714_v19 = vsel %vm1586_vm5, %v1522_v17, %v1650_v61  ;;  %vm1589_vm8 = vcmp.gt.f32.partialorder %v1525_v53, 0.0  ;;  %v1653_v45 = vmul.f32 0.2, %v1525_v53 }
 0x22f   : > { %1778 = vst.msk [vmem:[%s3920_s4] sm:$0xff] %vm1777_vm3, %v1713_v48  ;;  %1779 = vst.msk [vmem:[%s3920_s4 + $0x8] sm:$0xff] %vm1777_vm3, %v1714_v19  ;;  %v1715_v42 = vsel %vm1587_vm6, %v1523_v33, %v1651_v35  ;;  %v1716_v63 = vsel %vm1588_vm7, %v1524_v37, %v1652_v1  ;;  %vm1590_vm9 = vcmp.gt.f32.partialorder %v1526_v15, 0.0  ;;  %v1654_v44 = vmul.f32 0.2, %v1526_v15 }
 0x230   : > { %1780 = vst.msk [vmem:[%s3920_s4 + $0x10] sm:$0xff] %vm1777_vm3, %v1715_v42  ;;  %1781 = vst.msk [vmem:[%s3920_s4 + $0x18] sm:$0xff] %vm1777_vm3, %v1716_v63  ;;  %v1717_v48 = vsel %vm1589_vm8, %v1525_v53, %v1653_v45  ;;  %vm1591_vm10 = vcmp.gt.f32.partialorder %v1527_v21, 0.0  ;;  %v1655_v57 = vmul.f32 0.2, %v1527_v21  ;;  %vm1592_vm11 = vcmp.gt.f32.partialorder %v1528_v47, 0.0 }
 0x231   : > { %1782 = vst.msk [vmem:[%s3920_s4 + $0x20] sm:$0xff] %vm1777_vm3, %v1717_v48  ;;  %v1718_v29 = vsel %vm1590_vm9, %v1526_v15, %v1654_v44  ;;  %v1656_v17 = vmul.f32 0.2, %v1528_v47  ;;  %v4062_v33 = vsub.f32 %v2432_v58, %v3179_v43  ;;  %v4063_v51 = vsub.f32 %v2440_v62, %v3179_v43 }
 0x232   : > { %1783 = vst.msk [vmem:[%s3920_s4 + $0x28] sm:$0xff] %vm1777_vm3, %v1718_v29  ;;  %v1719_v61 = vsel %vm1591_vm10, %v1527_v21, %v1655_v57  ;;  %v4064_v15 = vsub.f32 %v2428_v56, %v3179_v43  ;;  %v4065_v58 = vsub.f32 %v2436_v60, %v3179_v43  ;;  %v4066_v62 = vsub.f32 %v2448_v2, %v3179_v43 }
 0x233   : > { %v1387_v37 = vmul.f32 %v3275_v27, %v4062_v33  ;;  %v1388_v53 = vmul.f32 %v3275_v27, %v4063_v51  ;;  %1784 = vst.msk [vmem:[%s3920_s4 + $0x30] sm:$0xff] %vm1777_vm3, %v1719_v61  ;;  %v1720_v21 = vsel %vm1592_vm11, %v1528_v47, %v1656_v17  ;;  %v4067_v60 = vsub.f32 %v2456_v6, %v3179_v43 }
 0x234   : > { %v1389_v35 = vmul.f32 %v3275_v27, %v4064_v15  ;;  %v1390_v1 = vmul.f32 %v3275_v27, %v4065_v58  ;;  %v1391_v19 = vmul.f32 %v3275_v27, %v4066_v62  ;;  %1785 = vst.msk [vmem:[%s3920_s4 + $0x38] sm:$0xff] %vm1777_vm3, %v1720_v21  ;;  %v4068_v44 = vsub.f32 %v2444_v0, %v3179_v43 }
 0x235   : > { %v1458_v56 = vmul.f32 %v3286_v52, %v1387_v37  ;;  %v1459_v45 = vmul.f32 %v3286_v52, %v1388_v53  ;;  %v1392_v42 = vmul.f32 %v3275_v27, %v4067_v60  ;;  %v4069_v17 = vsub.f32 %v2452_v4, %v3179_v43 }
 0x236   : > { %v1460_v2 = vmul.f32 %v3286_v52, %v1389_v35  ;;  %v1461_v63 = vmul.f32 %v3286_v52, %v1390_v1  ;;  %v1462_v47 = vmul.f32 %v3286_v52, %v1391_v19  ;;  %v1393_v48 = vmul.f32 %v3275_v27, %v4068_v44 }
 0x237   : > { %v1529_v6 = vadd.f32 %v3303_v54, %v1458_v56  ;;  %v1530_v57 = vadd.f32 %v3303_v54, %v1459_v45  ;;  %v1463_v29 = vmul.f32 %v3286_v52, %v1392_v42  ;;  %v1394_v33 = vmul.f32 %v3275_v27, %v4069_v17 }
 0x238   : > { %v1531_v37 = vadd.f32 %v3303_v54, %v1460_v2  ;;  %v1532_v51 = vadd.f32 %v3303_v54, %v1461_v63  ;;  %v1533_v53 = vadd.f32 %v3303_v54, %v1462_v47  ;;  %v1464_v0 = vmul.f32 %v3286_v52, %v1393_v48 }
 0x239   : > { %vm1593_vm12 = vcmp.gt.f32.partialorder %v1529_v6, 0.0  ;;  %v1657_v61 = vmul.f32 0.2, %v1529_v6  ;;  %vm1594_vm13 = vcmp.gt.f32.partialorder %v1530_v57, 0.0  ;;  %v1658_v15 = vmul.f32 0.2, %v1530_v57 }
 0x23a   : > { %vm1595_vm14 = vcmp.gt.f32.partialorder %v1531_v37, 0.0  ;;  %v1659_v35 = vmul.f32 0.2, %v1531_v37  ;;  %vm1596_vm15 = vcmp.gt.f32.partialorder %v1532_v51, 0.0  ;;  %v1660_v58 = vmul.f32 0.2, %v1532_v51 }
 0x23b   : > { %v1721_v1 = vsel %vm1593_vm12, %v1529_v6, %v1657_v61  ;;  %v1722_v4 = vsel %vm1594_vm13, %v1530_v57, %v1658_v15  ;;  %vm1597_vm0 = vcmp.gt.f32.partialorder %v1533_v53, 0.0  ;;  %v1661_v62 = vmul.f32 0.2, %v1533_v53 }
 0x23c   : > { %1786 = vst.msk [vmem:[%s3920_s4 + $0x40] sm:$0xff] %vm1777_vm3, %v1721_v1  ;;  %1787 = vst.msk [vmem:[%s3920_s4 + $0x48] sm:$0xff] %vm1777_vm3, %v1722_v4  ;;  %v1723_v19 = vsel %vm1595_vm14, %v1531_v37, %v1659_v35  ;;  %v1724_v21 = vsel %vm1596_vm15, %v1532_v51, %v1660_v58  ;;  %v1534_v56 = vadd.f32 %v3303_v54, %v1463_v29 }
 0x23d   : > { %v1535_v45 = vadd.f32 %v3303_v54, %v1464_v0  ;;  %1788 = vst.msk [vmem:[%s3920_s4 + $0x50] sm:$0xff] %vm1777_vm3, %v1723_v19  ;;  %1789 = vst.msk [vmem:[%s3920_s4 + $0x58] sm:$0xff] %vm1777_vm3, %v1724_v21  ;;  %v1725_v60 = vsel %vm1597_vm0, %v1533_v53, %v1661_v62  ;;  %v1465_v42 = vmul.f32 %v3286_v52, %v1394_v33 }
 0x23e   : > { %v4070_v2 = vsub.f32 %v2464_v10, %v3179_v43  ;;  %v4071_v47 = vsub.f32 %v2472_v14, %v3179_v43  ;;  %1790 = vst.msk [vmem:[%s3920_s4 + $0x60] sm:$0xff] %vm1777_vm3, %v1725_v60  ;;  %vm1598_vm1 = vcmp.gt.f32.partialorder %v1534_v56, 0.0  ;;  %v1662_v48 = vmul.f32 0.2, %v1534_v56 }
 0x23f   : > { %vm1599_vm2 = vcmp.gt.f32.partialorder %v1535_v45, 0.0  ;;  %v1663_v6 = vmul.f32 0.2, %v1535_v45  ;;  %v1536_v57 = vadd.f32 %v3303_v54, %v1465_v42  ;;  %v4072_v14 = vsub.f32 %v2460_v8, %v3179_v43 }
 0x240   : > { %v1395_v63 = vmul.f32 %v3275_v27, %v4070_v2  ;;  %v1396_v44 = vmul.f32 %v3275_v27, %v4071_v47  ;;  %v1726_v33 = vsel %vm1598_vm1, %v1534_v56, %v1662_v48  ;;  %v4073_v51 = vsub.f32 %v2468_v12, %v3179_v43 }
 0x241   : > { %v1397_v17 = vmul.f32 %v3275_v27, %v4072_v14  ;;  %v1727_v37 = vsel %vm1599_vm2, %v1535_v45, %v1663_v6  ;;  %v4074_v0 = vsub.f32 %v2480_v18, %v3179_v43  ;;  %1791 = vst.msk [vmem:[%s3920_s4 + $0x68] sm:$0xff] %vm1777_vm3, %v1726_v33  ;;  %vm1600_vm4 = vcmp.gt.f32.partialorder %v1536_v57, 0.0 }
 0x242   : > { %v1466_v10 = vmul.f32 %v3286_v52, %v1395_v63  ;;  %v1467_v29 = vmul.f32 %v3286_v52, %v1396_v44  ;;  %v1398_v53 = vmul.f32 %v3275_v27, %v4073_v51  ;;  %1792 = vst.msk [vmem:[%s3920_s4 + $0x70] sm:$0xff] %vm1777_vm3, %v1727_v37  ;;  %v1664_v8 = vmul.f32 0.2, %v1536_v57 }
 0x243   : > { %v1399_v61 = vmul.f32 %v3275_v27, %v4074_v0  ;;  %v1468_v18 = vmul.f32 %v3286_v52, %v1397_v17  ;;  %v4075_v1 = vsub.f32 %v2488_v22, %v3179_v43  ;;  %v4076_v2 = vsub.f32 %v2476_v16, %v3179_v43 }
 0x244   : > { %v1537_v12 = vadd.f32 %v3303_v54, %v1466_v10  ;;  %v1538_v15 = vadd.f32 %v3303_v54, %v1467_v29  ;;  %v1469_v35 = vmul.f32 %v3286_v52, %v1398_v53  ;;  %v1728_v62 = vsel %vm1600_vm4, %v1536_v57, %v1664_v8 }
 0x245   : > { %v1470_v58 = vmul.f32 %v3286_v52, %v1399_v61  ;;  %v1400_v4 = vmul.f32 %v3275_v27, %v4075_v1  ;;  %1793 = vst.msk [vmem:[%s3920_s4 + $0x78] sm:$0xff] %vm1777_vm3, %v1728_v62  ;;  %v1539_v56 = vadd.f32 %v3303_v54, %v1468_v18  ;;  %v1401_v63 = vmul.f32 %v3275_v27, %v4076_v2 }
 0x246   : > { %vm1601_vm5 = vcmp.gt.f32.partialorder %v1537_v12, 0.0  ;;  %v1665_v19 = vmul.f32 0.2, %v1537_v12  ;;  %vm1602_vm6 = vcmp.gt.f32.partialorder %v1538_v15, 0.0  ;;  %v1666_v21 = vmul.f32 0.2, %v1538_v15 }
 0x247   : > { %v1540_v45 = vadd.f32 %v3303_v54, %v1469_v35  ;;  %v1541_v60 = vadd.f32 %v3303_v54, %v1470_v58  ;;  %v1471_v22 = vmul.f32 %v3286_v52, %v1400_v4  ;;  %v4077_v47 = vsub.f32 %v2484_v20, %v3179_v43 }
 0x248   : > { %v1729_v42 = vsel %vm1601_vm5, %v1537_v12, %v1665_v19  ;;  %v1730_v48 = vsel %vm1602_vm6, %v1538_v15, %v1666_v21  ;;  %vm1603_vm7 = vcmp.gt.f32.partialorder %v1539_v56, 0.0  ;;  %v1667_v6 = vmul.f32 0.2, %v1539_v56 }
 0x249   : > { %v1402_v44 = vmul.f32 %v3275_v27, %v4077_v47  ;;  %1794 = vst.msk [vmem:[%s3920_s4 + $0x80] sm:$0xff] %vm1777_vm3, %v1729_v42  ;;  %vm1604_vm8 = vcmp.gt.f32.partialorder %v1540_v45, 0.0  ;;  %1795 = vst.msk [vmem:[%s3920_s4 + $0x88] sm:$0xff] %vm1777_vm3, %v1730_v48  ;;  %v1668_v16 = vmul.f32 0.2, %v1540_v45  ;;  %vm1605_vm9 = vcmp.gt.f32.partialorder %v1541_v60, 0.0 }
 0x24a   : > { %v1669_v57 = vmul.f32 0.2, %v1541_v60  ;;  %v1542_v20 = vadd.f32 %v3303_v54, %v1471_v22  ;;  %v1731_v10 = vsel %vm1603_vm7, %v1539_v56, %v1667_v6  ;;  %v1472_v29 = vmul.f32 %v3286_v52, %v1401_v63 }
 0x24b   : > { %v1473_v14 = vmul.f32 %v3286_v52, %v1402_v44  ;;  %v4078_v17 = vsub.f32 %v2496_v26, %v3179_v43  ;;  %1796 = vst.msk [vmem:[%s3920_s4 + $0x90] sm:$0xff] %vm1777_vm3, %v1731_v10  ;;  %v1732_v37 = vsel %vm1604_vm8, %v1540_v45, %v1668_v16  ;;  %v4079_v8 = vsub.f32 %v2504_v30, %v3179_v43 }
 0x24c   : > { %v1733_v51 = vsel %vm1605_vm9, %v1541_v60, %v1669_v57  ;;  %vm1606_vm10 = vcmp.gt.f32.partialorder %v1542_v20, 0.0  ;;  %v1670_v53 = vmul.f32 0.2, %v1542_v20  ;;  %1797 = vst.msk [vmem:[%s3920_s4 + $0x98] sm:$0xff] %vm1777_vm3, %v1732_v37  ;;  %v1543_v26 = vadd.f32 %v3303_v54, %v1472_v29 }
 0x24d   : > { %v1403_v33 = vmul.f32 %v3275_v27, %v4078_v17  ;;  %1798 = vst.msk [vmem:[%s3920_s4 + $0xa0] sm:$0xff] %vm1777_vm3, %v1733_v51  ;;  %v1544_v0 = vadd.f32 %v3303_v54, %v1473_v14  ;;  %v1404_v12 = vmul.f32 %v3275_v27, %v4079_v8  ;;  %v4080_v18 = vsub.f32 %v2492_v24, %v3179_v43 }
 0x24e   : > { %v1734_v15 = vsel %vm1606_vm10, %v1542_v20, %v1670_v53  ;;  %v4081_v58 = vsub.f32 %v2500_v28, %v3179_v43  ;;  %v4082_v4 = vsub.f32 %v2512_v34, %v3179_v43  ;;  %vm1607_vm11 = vcmp.gt.f32.partialorder %v1543_v26, 0.0 }
 0x24f   : > { %v1474_v61 = vmul.f32 %v3286_v52, %v1403_v33  ;;  %v1405_v35 = vmul.f32 %v3275_v27, %v4080_v18  ;;  %1799 = vst.msk [vmem:[%s3920_s4 + $0xa8] sm:$0xff] %vm1777_vm3, %v1734_v15  ;;  %v1671_v30 = vmul.f32 0.2, %v1543_v26  ;;  %vm1608_vm12 = vcmp.gt.f32.partialorder %v1544_v0, 0.0 }
 0x250   : > { %v1406_v1 = vmul.f32 %v3275_v27, %v4081_v58  ;;  %v1407_v62 = vmul.f32 %v3275_v27, %v4082_v4  ;;  %v1672_v24 = vmul.f32 0.2, %v1544_v0  ;;  %v1475_v28 = vmul.f32 %v3286_v52, %v1404_v12 }
 0x251   : > { %v1545_v19 = vadd.f32 %v3303_v54, %v1474_v61  ;;  %v1476_v21 = vmul.f32 %v3286_v52, %v1405_v35  ;;  %v1735_v34 = vsel %vm1607_vm11, %v1543_v26, %v1671_v30  ;;  %v4083_v42 = vsub.f32 %v2520_v38, %v3179_v43 }
 0x252   : > { %v1477_v56 = vmul.f32 %v3286_v52, %v1406_v1  ;;  %v1736_v45 = vsel %vm1608_vm12, %v1544_v0, %v1672_v24  ;;  %v1478_v60 = vmul.f32 %v3286_v52, %v1407_v62  ;;  %1800 = vst.msk [vmem:[%s3920_s4 + $0xb0] sm:$0xff] %vm1777_vm3, %v1735_v34  ;;  %v1546_v63 = vadd.f32 %v3303_v54, %v1475_v28 }
 0x253   : > { %v1408_v22 = vmul.f32 %v3275_v27, %v4083_v42  ;;  %1801 = vst.msk [vmem:[%s3920_s4 + $0xb8] sm:$0xff] %vm1777_vm3, %v1736_v45  ;;  %vm1609_vm13 = vcmp.gt.f32.partialorder %v1545_v19, 0.0  ;;  %v1673_v2 = vmul.f32 0.2, %v1545_v19  ;;  %v1547_v47 = vadd.f32 %v3303_v54, %v1476_v21 }
 0x254   : > { %v1548_v38 = vadd.f32 %v3303_v54, %v1477_v56  ;;  %v1549_v44 = vadd.f32 %v3303_v54, %v1478_v60  ;;  %v4084_v6 = vsub.f32 %v2508_v32, %v3179_v43  ;;  %vm1610_vm14 = vcmp.gt.f32.partialorder %v1546_v63, 0.0 }
 0x255   : > { %v1479_v48 = vmul.f32 %v3286_v52, %v1408_v22  ;;  %v1737_v57 = vsel %vm1609_vm13, %v1545_v19, %v1673_v2  ;;  %v1674_v20 = vmul.f32 0.2, %v1546_v63  ;;  %vm1611_vm15 = vcmp.gt.f32.partialorder %v1547_v47, 0.0 }
 0x256   : > { %v1409_v16 = vmul.f32 %v3275_v27, %v4084_v6  ;;  %1802 = vst.msk [vmem:[%s3920_s4 + $0xc0] sm:$0xff] %vm1777_vm3, %v1737_v57  ;;  %v1675_v10 = vmul.f32 0.2, %v1547_v47  ;;  %vm1612_vm0 = vcmp.gt.f32.partialorder %v1548_v38, 0.0  ;;  %v1676_v29 = vmul.f32 0.2, %v1548_v38 }
 0x257   : > { %vm1613_vm1 = vcmp.gt.f32.partialorder %v1549_v44, 0.0  ;;  %v1738_v14 = vsel %vm1610_vm14, %v1546_v63, %v1674_v20  ;;  %v1677_v17 = vmul.f32 0.2, %v1549_v44  ;;  %v1550_v33 = vadd.f32 %v3303_v54, %v1479_v48 }
 0x258   : > { %v1480_v32 = vmul.f32 %v3286_v52, %v1409_v16  ;;  %1803 = vst.msk [vmem:[%s3920_s4 + $0xc8] sm:$0xff] %vm1777_vm3, %v1738_v14  ;;  %v1739_v37 = vsel %vm1611_vm15, %v1547_v47, %v1675_v10  ;;  %v1740_v51 = vsel %vm1612_vm0, %v1548_v38, %v1676_v29  ;;  %v4085_v53 = vsub.f32 %v2516_v36, %v3179_v43 }
 0x259   : > { %v4086_v0 = vsub.f32 %v4043_v49, %v3179_v43  ;;  %1804 = vst.msk [vmem:[%s3920_s4 + $0xd0] sm:$0xff] %vm1777_vm3, %v1739_v37  ;;  %1805 = vst.msk [vmem:[%s3920_s4 + $0xd8] sm:$0xff] %vm1777_vm3, %v1740_v51  ;;  %v1741_v8 = vsel %vm1613_vm1, %v1549_v44, %v1677_v17  ;;  %vm1614_vm2 = vcmp.gt.f32.partialorder %v1550_v33, 0.0  ;;  %v1678_v36 = vmul.f32 0.2, %v1550_v33 }
 0x25a   : > { %v1410_v26 = vmul.f32 %v3275_v27, %v4085_v53  ;;  %v1551_v12 = vadd.f32 %v3303_v54, %v1480_v32  ;;  %1806 = vst.msk [vmem:[%s3920_s4 + $0xe0] sm:$0xff] %vm1777_vm3, %v1741_v8  ;;  %v4087_v18 = vsub.f32 %v4044_v13, %v3179_v43  ;;  %v4088_v58 = vsub.f32 %v4045_v31, %v3179_v43 }
 0x25b   : > { %v1411_v61 = vmul.f32 %v3275_v27, %v4086_v0  ;;  %v1742_v4 = vsel %vm1614_vm2, %v1550_v33, %v1678_v36  ;;  %v4089_v30 = vsub.f32 %v4046_v7, %v3179_v43  ;;  %v4090_v7 = vsub.f32 %v4047_v40, %v3179_v43 }
 0x25c   : > { %v1481_v49 = vmul.f32 %v3286_v52, %v1410_v26  ;;  %v1412_v35 = vmul.f32 %v3275_v27, %v4087_v18  ;;  %v1413_v1 = vmul.f32 %v3275_v27, %v4088_v58  ;;  %vm1615_vm4 = vcmp.gt.f32.partialorder %v1551_v12, 0.0  ;;  %1807 = vst.msk [vmem:[%s3920_s4 + $0xe8] sm:$0xff] %vm1777_vm3, %v1742_v4 }
 0x25d   : > { %v1482_v15 = vmul.f32 %v3286_v52, %v1411_v61  ;;  %v1679_v62 = vmul.f32 0.2, %v1551_v12  ;;  %v1414_v24 = vmul.f32 %v3275_v27, %v4089_v30  ;;  %v1415_v34 = vmul.f32 %v3275_v27, %v4090_v7 }
 0x25e   : > { %v1552_v13 = vadd.f32 %v3303_v54, %v1481_v49  ;;  %v1483_v31 = vmul.f32 %v3286_v52, %v1412_v35  ;;  %v1484_v28 = vmul.f32 %v3286_v52, %v1413_v1  ;;  %v4091_v45 = vsub.f32 %v4048_v46, %v3179_v43 }
 0x25f   : > { %v1553_v19 = vadd.f32 %v3303_v54, %v1482_v15  ;;  %v1743_v21 = vsel %vm1615_vm4, %v1551_v12, %v1679_v62  ;;  %v1485_v56 = vmul.f32 %v3286_v52, %v1414_v24  ;;  %v1486_v47 = vmul.f32 %v3286_v52, %v1415_v34 }
 0x260   : > { %v1416_v60 = vmul.f32 %v3275_v27, %v4091_v45  ;;  %1808 = vst.msk [vmem:[%s3920_s4 + $0xf0] sm:$0xff] %vm1777_vm3, %v1743_v21  ;;  %vm1616_vm5 = vcmp.gt.f32.partialorder %v1552_v13, 0.0  ;;  %v1680_v42 = vmul.f32 0.2, %v1552_v13  ;;  %v1554_v2 = vadd.f32 %v3303_v54, %v1483_v31 }
 0x261   : > { %vm1617_vm6 = vcmp.gt.f32.partialorder %v1553_v19, 0.0  ;;  %v1681_v22 = vmul.f32 0.2, %v1553_v19  ;;  %v1555_v40 = vadd.f32 %v3303_v54, %v1484_v28  ;;  %v1556_v63 = vadd.f32 %v3303_v54, %v1485_v56 }
 0x262   : > { %v1744_v46 = vsel %vm1616_vm5, %v1552_v13, %v1680_v42  ;;  %v1487_v44 = vmul.f32 %v3286_v52, %v1416_v60  ;;  %v4092_v48 = vsub.f32 %v4049_v9, %v3179_v43  ;;  %vm1618_vm7 = vcmp.gt.f32.partialorder %v1554_v2, 0.0 }
 0x263   : > { %v1745_v38 = vsel %vm1617_vm6, %v1553_v19, %v1681_v22  ;;  %1809 = vst.msk [vmem:[%s3920_s4 + $0xf8] sm:$0xff] %vm1777_vm3, %v1744_v46  ;;  %v1682_v16 = vmul.f32 0.2, %v1554_v2  ;;  %vm1619_vm8 = vcmp.gt.f32.partialorder %v1555_v40, 0.0  ;;  %v1683_v57 = vmul.f32 0.2, %v1555_v40 }
 0x264   : > { %v1417_v6 = vmul.f32 %v3275_v27, %v4092_v48  ;;  %1810 = vst.msk [vmem:[%s3920_s4 + $0x100] sm:$0xff] %vm1777_vm3, %v1745_v38  ;;  %vm1620_vm9 = vcmp.gt.f32.partialorder %v1556_v63, 0.0  ;;  %v1684_v20 = vmul.f32 0.2, %v1556_v63  ;;  %v1557_v9 = vadd.f32 %v3303_v54, %v1486_v47 }
 0x265   : > { %v1558_v10 = vadd.f32 %v3303_v54, %v1487_v44  ;;  %v1746_v29 = vsel %vm1618_vm7, %v1554_v2, %v1682_v16  ;;  %v1747_v14 = vsel %vm1619_vm8, %v1555_v40, %v1683_v57  ;;  %v4093_v33 = vsub.f32 %v4050_v39, %v3179_v43 }
 0x266   : > { %v1488_v17 = vmul.f32 %v3286_v52, %v1417_v6  ;;  %1811 = vst.msk [vmem:[%s3920_s4 + $0x108] sm:$0xff] %vm1777_vm3, %v1746_v29  ;;  %1812 = vst.msk [vmem:[%s3920_s4 + $0x110] sm:$0xff] %vm1777_vm3, %v1747_v14  ;;  %v1748_v37 = vsel %vm1620_vm9, %v1556_v63, %v1684_v20  ;;  %vm1621_vm10 = vcmp.gt.f32.partialorder %v1557_v9, 0.0  ;;  %v1685_v51 = vmul.f32 0.2, %v1557_v9  ;;  %v4103_v29 = vld [vmem:[#allocation26_spill] sm:$0xff] }
 0x267   : > { %v1418_v32 = vmul.f32 %v3275_v27, %v4093_v33  ;;  %vm1622_vm11 = vcmp.gt.f32.partialorder %v1558_v10, 0.0  ;;  %1813 = vst.msk [vmem:[%s3920_s4 + $0x118] sm:$0xff] %vm1777_vm3, %v1748_v37  ;;  %v1686_v39 = vmul.f32 0.2, %v1558_v10  ;;  %v4094_v0 = vsub.f32 %v4051_v41, %v3179_v43  ;;  %v4105_v33 = vld [vmem:[#allocation24_spill] sm:$0xff] }
 0x268   : > { %v1559_v53 = vadd.f32 %v3303_v54, %v1488_v17  ;;  %v1749_v8 = vsel %vm1621_vm10, %v1557_v9, %v1685_v51  ;;  %v4095_v36 = vsub.f32 %v4052_v55, %v3179_v43  ;;  %v4096_v49 = vsub.f32 %v4053_v23, %v3179_v43 }
 0x269   : > { %v1489_v26 = vmul.f32 %v3286_v52, %v1418_v32  ;;  %v1419_v61 = vmul.f32 %v3275_v27, %v4094_v0  ;;  %v4097_v18 = vsub.f32 %v4054_v3, %v3179_v43  ;;  %1814 = vst.msk [vmem:[%s3920_s4 + $0x120] sm:$0xff] %vm1777_vm3, %v1749_v8  ;;  %v1750_v41 = vsel %vm1622_vm11, %v1558_v10, %v1686_v39 }
 0x26a   : > { %v1420_v12 = vmul.f32 %v3275_v27, %v4095_v36  ;;  %v1421_v15 = vmul.f32 %v3275_v27, %v4096_v49  ;;  %vm1623_vm12 = vcmp.gt.f32.partialorder %v1559_v53, 0.0  ;;  %v1687_v55 = vmul.f32 0.2, %v1559_v53  ;;  %1815 = vst.msk [vmem:[%s3920_s4 + $0x128] sm:$0xff] %vm1777_vm3, %v1750_v41 }
 0x26b   : > { %v1422_v35 = vmul.f32 %v3275_v27, %v4097_v18  ;;  %v1560_v58 = vadd.f32 %v3303_v54, %v1489_v26  ;;  %v1490_v23 = vmul.f32 %v3286_v52, %v1419_v61  ;;  %v4098_v24 = vsub.f32 %v4055_v50, %v3179_v43 }
 0x26c   : > { %v1491_v3 = vmul.f32 %v3286_v52, %v1420_v12  ;;  %v1492_v1 = vmul.f32 %v3286_v52, %v1421_v15  ;;  %v1751_v62 = vsel %vm1623_vm12, %v1559_v53, %v1687_v55  ;;  %v4099_v50 = vsub.f32 %v4056_v25, %v3179_v43  ;;  %v4107_v12 = vld [vmem:[#allocation25_spill] sm:$0xff] }
 0x26d   : > { %v1493_v4 = vmul.f32 %v3286_v52, %v1422_v35  ;;  %vm1624_vm13 = vcmp.gt.f32.partialorder %v1560_v58, 0.0  ;;  %v1688_v30 = vmul.f32 0.2, %v1560_v58  ;;  %v1423_v13 = vmul.f32 %v3275_v27, %v4098_v24  ;;  %1816 = vst.msk [vmem:[%s3920_s4 + $0x130] sm:$0xff] %vm1777_vm3, %v1751_v62 }
 0x26e   : > { %v1561_v19 = vadd.f32 %v3303_v54, %v1490_v23  ;;  %v1562_v31 = vadd.f32 %v3303_v54, %v1491_v3  ;;  %v1563_v28 = vadd.f32 %v3303_v54, %v1492_v1  ;;  %v1424_v34 = vmul.f32 %v3275_v27, %v4099_v50  ;;  %v4113_v50 = vld [vmem:[#allocation27_spill] sm:$0xff] }
 0x26f   : > { %v1564_v21 = vadd.f32 %v3303_v54, %v1493_v4  ;;  %v1752_v56 = vsel %vm1624_vm13, %v1560_v58, %v1688_v30  ;;  %v1494_v7 = vmul.f32 %v3286_v52, %v1423_v13  ;;  %v4100_v45 = vsub.f32 %v4057_v59, %v3179_v43  ;;  %v4109_v4 = vld [vmem:[#allocation28_spill] sm:$0xff] }
 0x270   : > { %1817 = vst.msk [vmem:[%s3920_s4 + $0x138] sm:$0xff] %vm1777_vm3, %v1752_v56  ;;  %vm1625_vm14 = vcmp.gt.f32.partialorder %v1561_v19, 0.0  ;;  %v1689_v42 = vmul.f32 0.2, %v1561_v19  ;;  %vm1626_vm15 = vcmp.gt.f32.partialorder %v1562_v31, 0.0  ;;  %vm1627_vm0 = vcmp.gt.f32.partialorder %v1563_v28, 0.0 }
 0x271   : > { %v1425_v60 = vmul.f32 %v3275_v27, %v4100_v45  ;;  %v1690_v22 = vmul.f32 0.2, %v1562_v31  ;;  %v1691_v2 = vmul.f32 0.2, %v1563_v28  ;;  %vm1628_vm1 = vcmp.gt.f32.partialorder %v1564_v21, 0.0 }
 0x272   : > { %v1692_v25 = vmul.f32 0.2, %v1564_v21  ;;  %v1753_v40 = vsel %vm1625_vm14, %v1561_v19, %v1689_v42  ;;  %v1565_v47 = vadd.f32 %v3303_v54, %v1494_v7  ;;  %v1495_v59 = vmul.f32 %v3286_v52, %v1424_v34  ;;  %v4114_v42 = vld [vmem:[#allocation29_spill] sm:$0xff] }
 0x273   : > { %v1754_v63 = vsel %vm1626_vm15, %v1562_v31, %v1690_v22  ;;  %1818 = vst.msk [vmem:[%s3920_s4 + $0x140] sm:$0xff] %vm1777_vm3, %v1753_v40  ;;  %v1755_v46 = vsel %vm1627_vm0, %v1563_v28, %v1691_v2  ;;  %v1496_v44 = vmul.f32 %v3286_v52, %v1425_v60  ;;  %v4101_v48 = vsub.f32 %v2454_v5, %v3179_v43 }
 0x274   : > { %1819 = vst.msk [vmem:[%s3920_s4 + $0x148] sm:$0xff] %vm1777_vm3, %v1754_v63  ;;  %v1756_v38 = vsel %vm1628_vm1, %v1564_v21, %v1692_v25  ;;  %1820 = vst.msk [vmem:[%s3920_s4 + $0x150] sm:$0xff] %vm1777_vm3, %v1755_v46  ;;  %vm1629_vm2 = vcmp.gt.f32.partialorder %v1565_v47, 0.0  ;;  %v1693_v16 = vmul.f32 0.2, %v1565_v47  ;;  %v1566_v57 = vadd.f32 %v3303_v54, %v1495_v59  ;;  %v4111_v21 = vld [vmem:[#allocation30_spill] sm:$0xff] }
 0x275   : > { %v1426_v6 = vmul.f32 %v3275_v27, %v4101_v48  ;;  %1821 = vst.msk [vmem:[%s3920_s4 + $0x158] sm:$0xff] %vm1777_vm3, %v1756_v38  ;;  %v4102_v20 = vsub.f32 %v2466_v11, %v3179_v43  ;;  %v1567_v9 = vadd.f32 %v3303_v54, %v1496_v44  ;;  %v4104_v14 = vsub.f32 %v4103_v29, %v3179_v43  ;;  %v4115_v63 = vld [vmem:[#allocation32_spill] sm:$0xff]  ;;  %v4116_v38 = vld [vmem:[#allocation34_spill] sm:$0xff]  ;;  %v4117_v48 = vld [vmem:[#allocation31_spill] sm:$0xff] }
 0x276   : > { %v4106_v32 = vsub.f32 %v4105_v33, %v3179_v43  ;;  %v1757_v51 = vsel %vm1629_vm2, %v1565_v47, %v1693_v16  ;;  %vm1630_vm4 = vcmp.gt.f32.partialorder %v1566_v57, 0.0  ;;  %v1694_v39 = vmul.f32 0.2, %v1566_v57 }
 0x277   : > { %v1427_v5 = vmul.f32 %v3275_v27, %v4102_v20  ;;  %v1497_v10 = vmul.f32 %v3286_v52, %v1426_v6  ;;  %v1428_v17 = vmul.f32 %v3275_v27, %v4104_v14  ;;  %1822 = vst.msk [vmem:[%s3920_s4 + $0x160] sm:$0xff] %vm1777_vm3, %v1757_v51  ;;  %vm1631_vm5 = vcmp.gt.f32.partialorder %v1567_v9, 0.0 }
 0x278   : > { %v1429_v37 = vmul.f32 %v3275_v27, %v4106_v32  ;;  %v1695_v53 = vmul.f32 0.2, %v1567_v9  ;;  %v1758_v61 = vsel %vm1630_vm4, %v1566_v57, %v1694_v39  ;;  %v4108_v49 = vsub.f32 %v4107_v12, %v3179_v43 }
 0x279   : > { %v1498_v11 = vmul.f32 %v3286_v52, %v1427_v5  ;;  %v1568_v26 = vadd.f32 %v3303_v54, %v1497_v10  ;;  %v1499_v0 = vmul.f32 %v3286_v52, %v1428_v17  ;;  %1823 = vst.msk [vmem:[%s3920_s4 + $0x168] sm:$0xff] %vm1777_vm3, %v1758_v61  ;;  %v4110_v62 = vsub.f32 %v4109_v4, %v3179_v43 }
 0x27a   : > { %v1500_v36 = vmul.f32 %v3286_v52, %v1429_v37  ;;  %v1430_v15 = vmul.f32 %v3275_v27, %v4108_v49  ;;  %v1759_v18 = vsel %vm1631_vm5, %v1567_v9, %v1695_v53  ;;  %v4112_v56 = vsub.f32 %v4111_v21, %v3179_v43  ;;  %v4122_v21 = vld [vmem:[#allocation37_spill] sm:$0xff] }
 0x27b   : > { %v1569_v8 = vadd.f32 %v3303_v54, %v1498_v11  ;;  %vm1632_vm6 = vcmp.gt.f32.partialorder %v1568_v26, 0.0  ;;  %v1696_v35 = vmul.f32 0.2, %v1568_v26  ;;  %v1570_v41 = vadd.f32 %v3303_v54, %v1499_v0  ;;  %1824 = vst.msk [vmem:[%s3920_s4 + $0x170] sm:$0xff] %vm1777_vm3, %v1759_v18  ;;  %v4119_v18 = vld [vmem:[#allocation36_spill] sm:$0xff] }
 0x27c   : > { %v1571_v58 = vadd.f32 %v3303_v54, %v1500_v36  ;;  %v1501_v23 = vmul.f32 %v3286_v52, %v1430_v15  ;;  %v1431_v30 = vmul.f32 %v3275_v27, %v4110_v62  ;;  %v1432_v7 = vmul.f32 %v3275_v27, %v4112_v56  ;;  %v4120_v62 = vld [vmem:[#allocation38_spill] sm:$0xff] }
 0x27d   : > { %vm1633_vm7 = vcmp.gt.f32.partialorder %v1569_v8, 0.0  ;;  %v1697_v55 = vmul.f32 0.2, %v1569_v8  ;;  %v1760_v3 = vsel %vm1632_vm6, %v1568_v26, %v1696_v35  ;;  %vm1634_vm8 = vcmp.gt.f32.partialorder %v1570_v41, 0.0  ;;  %v4118_v26 = vld [vmem:[#allocation33_spill] sm:$0xff] }
 0x27e   : > { %v1698_v1 = vmul.f32 0.2, %v1570_v41  ;;  %1825 = vst.msk [vmem:[%s3920_s4 + $0x178] sm:$0xff] %vm1777_vm3, %v1760_v3  ;;  %vm1635_vm9 = vcmp.gt.f32.partialorder %v1571_v58, 0.0  ;;  %v1699_v13 = vmul.f32 0.2, %v1571_v58  ;;  %v1572_v19 = vadd.f32 %v3303_v54, %v1501_v23 }
 0x27f   : > { %v1761_v24 = vsel %vm1633_vm7, %v1569_v8, %v1697_v55  ;;  %v1502_v28 = vmul.f32 %v3286_v52, %v1431_v30  ;;  %v1361_v34 = vsub.f32 %v4113_v50, %v3179_v43  ;;  %v1362_v22 = vsub.f32 %v4114_v42, %v3179_v43 }
 0x280   : > { %1826 = vst.msk [vmem:[%s3920_s4 + $0x180] sm:$0xff] %vm1777_vm3, %v1761_v24  ;;  %v1762_v31 = vsel %vm1634_vm8, %v1570_v41, %v1698_v1  ;;  %v1763_v45 = vsel %vm1635_vm9, %v1571_v58, %v1699_v13  ;;  %vm1636_vm10 = vcmp.gt.f32.partialorder %v1572_v19, 0.0  ;;  %v1700_v60 = vmul.f32 0.2, %v1572_v19  ;;  %v4121_v24 = vld [vmem:[#allocation35_spill] sm:$0xff] }
 0x281   : > { %1827 = vst.msk [vmem:[%s3920_s4 + $0x188] sm:$0xff] %vm1777_vm3, %v1762_v31  ;;  %1828 = vst.msk [vmem:[%s3920_s4 + $0x190] sm:$0xff] %vm1777_vm3, %v1763_v45  ;;  %v1573_v2 = vadd.f32 %v3303_v54, %v1502_v28  ;;  %v1503_v25 = vmul.f32 %v3286_v52, %v1432_v7  ;;  %v1433_v40 = vmul.f32 %v3275_v27, %v1361_v34 }
 0x282   : > { %v1363_v47 = vsub.f32 %v4115_v63, %v3179_v43  ;;  %v1764_v59 = vsel %vm1636_vm10, %v1572_v19, %v1700_v60  ;;  %v1434_v46 = vmul.f32 %v3275_v27, %v1362_v22  ;;  %v1364_v44 = vsub.f32 %v4116_v38, %v3179_v43 }
 0x283   : > { %v1365_v6 = vsub.f32 %v4117_v48, %v3179_v43  ;;  %1829 = vst.msk [vmem:[%s3920_s4 + $0x198] sm:$0xff] %vm1777_vm3, %v1764_v59  ;;  %vm1637_vm11 = vcmp.gt.f32.partialorder %v1573_v2, 0.0  ;;  %v1701_v16 = vmul.f32 0.2, %v1573_v2  ;;  %v1574_v57 = vadd.f32 %v3303_v54, %v1503_v25 }
 0x284   : > { %v1504_v20 = vmul.f32 %v3286_v52, %v1433_v40  ;;  %v1505_v5 = vmul.f32 %v3286_v52, %v1434_v46  ;;  %v1435_v9 = vmul.f32 %v3275_v27, %v1363_v47  ;;  %v1436_v10 = vmul.f32 %v3275_v27, %v1364_v44 }
 0x285   : > { %v1437_v29 = vmul.f32 %v3275_v27, %v1365_v6  ;;  %v1765_v14 = vsel %vm1637_vm11, %v1573_v2, %v1701_v16  ;;  %vm1638_vm12 = vcmp.gt.f32.partialorder %v1574_v57, 0.0  ;;  %v1702_v17 = vmul.f32 0.2, %v1574_v57 }
 0x286   : > { %v1575_v33 = vadd.f32 %v3303_v54, %v1504_v20  ;;  %1830 = vst.msk [vmem:[%s3920_s4 + $0x1a0] sm:$0xff] %vm1777_vm3, %v1765_v14  ;;  %v1576_v32 = vadd.f32 %v3303_v54, %v1505_v5  ;;  %v1506_v37 = vmul.f32 %v3286_v52, %v1435_v9  ;;  %v1507_v51 = vmul.f32 %v3286_v52, %v1436_v10 }
 0x287   : > { %v1508_v39 = vmul.f32 %v3286_v52, %v1437_v29  ;;  %v1766_v11 = vsel %vm1638_vm12, %v1574_v57, %v1702_v17  ;;  %v1366_v0 = vsub.f32 %v4118_v26, %v3179_v43  ;;  %v1367_v35 = vsub.f32 %v4119_v18, %v3179_v43 }
 0x288   : > { %vm1639_vm13 = vcmp.gt.f32.partialorder %v1575_v33, 0.0  ;;  %v1703_v53 = vmul.f32 0.2, %v1575_v33  ;;  %1831 = vst.msk [vmem:[%s3920_s4 + $0x1a8] sm:$0xff] %vm1777_vm3, %v1766_v11  ;;  %vm1640_vm14 = vcmp.gt.f32.partialorder %v1576_v32, 0.0  ;;  %v1577_v8 = vadd.f32 %v3303_v54, %v1506_v37 }
 0x289   : > { %v1704_v61 = vmul.f32 0.2, %v1576_v32  ;;  %v1578_v36 = vadd.f32 %v3303_v54, %v1507_v51  ;;  %v1579_v49 = vadd.f32 %v3303_v54, %v1508_v39  ;;  %v1438_v15 = vmul.f32 %v3275_v27, %v1366_v0 }
 0x28a   : > { %v1767_v12 = vsel %vm1639_vm13, %v1575_v33, %v1703_v53  ;;  %vm1641_vm15 = vcmp.gt.f32.partialorder %v1577_v8, 0.0  ;;  %v1705_v55 = vmul.f32 0.2, %v1577_v8  ;;  %v1439_v4 = vmul.f32 %v3275_v27, %v1367_v35 }
 0x28b   : > { %1832 = vst.msk [vmem:[%s3920_s4 + $0x1b0] sm:$0xff] %vm1777_vm3, %v1767_v12  ;;  %v1768_v41 = vsel %vm1640_vm14, %v1576_v32, %v1704_v61  ;;  %vm1642_vm0 = vcmp.gt.f32.partialorder %v1578_v36, 0.0  ;;  %v1706_v58 = vmul.f32 0.2, %v1578_v36  ;;  %vm1643_vm1 = vcmp.gt.f32.partialorder %v1579_v49, 0.0 }
 0x28c   : > { %1833 = vst.msk [vmem:[%s3920_s4 + $0x1b8] sm:$0xff] %vm1777_vm3, %v1768_v41  ;;  %v1707_v23 = vmul.f32 0.2, %v1579_v49  ;;  %v1509_v3 = vmul.f32 %v3286_v52, %v1438_v15  ;;  %v1769_v1 = vsel %vm1641_vm15, %v1577_v8, %v1705_v55  ;;  %v1368_v30 = vsub.f32 %v4120_v62, %v3179_v43 }
 0x28d   : > { %v1369_v13 = vsub.f32 %v4121_v24, %v3179_v43  ;;  %1834 = vst.msk [vmem:[%s3920_s4 + $0x1c0] sm:$0xff] %vm1777_vm3, %v1769_v1  ;;  %v1770_v19 = vsel %vm1642_vm0, %v1578_v36, %v1706_v58  ;;  %v1370_v56 = vsub.f32 %v4122_v21, %v3179_v43  ;;  %v1510_v7 = vmul.f32 %v3286_v52, %v1439_v4 }
 0x28e   : > { %v1771_v31 = vsel %vm1643_vm1, %v1579_v49, %v1707_v23  ;;  %v1580_v28 = vadd.f32 %v3303_v54, %v1509_v3  ;;  %1835 = vst.msk [vmem:[%s3920_s4 + $0x1c8] sm:$0xff] %vm1777_vm3, %v1770_v19  ;;  %v1440_v50 = vmul.f32 %v3275_v27, %v1368_v30 }
 0x28f   : > { %1836 = vst.msk [vmem:[%s3920_s4 + $0x1d0] sm:$0xff] %vm1777_vm3, %v1771_v31  ;;  %v1441_v34 = vmul.f32 %v3275_v27, %v1369_v13  ;;  %v1442_v43 = vmul.f32 %v3275_v27, %v1370_v56  ;;  %v1581_v60 = vadd.f32 %v3303_v54, %v1510_v7 }
 0x290   : > { %vm1644_vm2 = vcmp.gt.f32.partialorder %v1580_v28, 0.0  ;;  %v1708_v45 = vmul.f32 0.2, %v1580_v28  ;;  %v1511_v42 = vmul.f32 %v3286_v52, %v1440_v50 }
 0x291   : > { %v1512_v22 = vmul.f32 %v3286_v52, %v1441_v34  ;;  %v1513_v25 = vmul.f32 %v3286_v52, %v1442_v43  ;;  %vm1645_vm4 = vcmp.gt.f32.partialorder %v1581_v60, 0.0  ;;  %v1709_v40 = vmul.f32 0.2, %v1581_v60 }
 0x292   : > { %v1772_v2 = vsel %vm1644_vm2, %v1580_v28, %v1708_v45  ;;  %v1582_v63 = vadd.f32 %v3303_v54, %v1511_v42 }
 0x293   : > { %1837 = vst.msk [vmem:[%s3920_s4 + $0x1d8] sm:$0xff] %vm1777_vm3, %v1772_v2  ;;  %v1583_v27 = vadd.f32 %v3303_v54, %v1512_v22  ;;  %v1584_v47 = vadd.f32 %v3303_v54, %v1513_v25  ;;  %v1773_v59 = vsel %vm1645_vm4, %v1581_v60, %v1709_v40 }
 0x294   : > { %vm1646_vm5 = vcmp.gt.f32.partialorder %v1582_v63, 0.0  ;;  %v1710_v46 = vmul.f32 0.2, %v1582_v63  ;;  %1838 = vst.msk [vmem:[%s3920_s4 + $0x1e0] sm:$0xff] %vm1777_vm3, %v1773_v59 }
 0x295   : > { %vm1647_vm6 = vcmp.gt.f32.partialorder %v1583_v27, 0.0  ;;  %v1711_v52 = vmul.f32 0.2, %v1583_v27  ;;  %vm1648_vm7 = vcmp.gt.f32.partialorder %v1584_v47, 0.0  ;;  %v1712_v38 = vmul.f32 0.2, %v1584_v47 }
 0x296   : > { %v1774_v44 = vsel %vm1646_vm5, %v1582_v63, %v1710_v46 }
 0x297   : > { %1839 = vst.msk [vmem:[%s3920_s4 + $0x1e8] sm:$0xff] %vm1777_vm3, %v1774_v44  ;;  %v1775_v48 = vsel %vm1647_vm6, %v1583_v27, %v1711_v52  ;;  %v1776_v54 = vsel %vm1648_vm7, %v1584_v47, %v1712_v38 }
 0x298   : > { %1840 = vst.msk [vmem:[%s3920_s4 + $0x1f0] sm:$0xff] %vm1777_vm3, %v1775_v48  ;;  %1841 = vst.msk [vmem:[%s3920_s4 + $0x1f8] sm:$0xff] %vm1777_vm3, %v1776_v54 }
 0x299 PF: > { %s14_s17 = sadd.s32 1, %s2227_s17   ;;  %s4123_s15 = smov %s2223_s16 }
 0x29a   : > { %p11_p7 = scmp.ge.s32.totalorder %s14_s17, 4   ;;  %s4124_s16 = smov %s4126_s18 }
 0x29c   :  { %13 = sbr.rel (!%p11_p7) target bundleno = 2 (0x2), region = 81 }

// kernel: coupled_vae_forward.23
= control target key start
LH: loop header
LB: loop body
LE: loop exit
PB: predicated region body
PF: predicated region fallthrough
CT: control target
= control target key end

     0   :  { %s1237_s15 = smov 0   ;;  %s1239_s16 = smov 0   ;;  %s1735_s0 = inlined_call_operand.vmem [shape: bf16[1,128,256], index: 0, kind: input, shape index: {}]   ;;  %s1736_s1 = inlined_call_operand.vmem [shape: bf16[1,256,32], index: 1, kind: input, shape index: {}]   ;;  %s1737_s2 = inlined_call_operand.vmem [shape: f32[1,32], index: 2, kind: input, shape index: {}]   ;;  %s1738_s3 = inlined_call_operand.vmem [shape: f32[1,32], index: 3, kind: input, shape index: {}]   ;;  %s1739_s4 = inlined_call_operand.vmem [shape: f32[1,128,32], index: 4, kind: output, shape index: {}]  }
   0x1   :  { %s1241_s17 = smov 0  }
   0x2 LB: > { %s33_s18 = sadd.s32 1, %s1205_s16  ;;  %p997_p0 = scmp.ge.s32.totalorder %s1209_s17, 1  ;;  %s1209_s17 = sphi %s1241_s17, %s14_s17   ;;  %s1205_s16 = sphi %s1239_s16, %s1741_s16   ;;  %s1201_s15 = sphi %s1237_s15, %s1740_s15  }
   0x3   : > { %p35_p1 = scmp.ge.s32.totalorder %s33_s18, 2  ;;  %p201_p2 = scmp.lt.s32.totalorder %s1209_s17, 3 }
   0x5   : > { %s1743_s18 = smov (%p35_p1, %s33_s18), 0  ;;  %p202_p3 = pnand %p997_p0, %p201_p2 }
   0x6   : > { %v1145_v0 = vld [vmem:[%s1736_s1 + $0x40] sm:$0xff] (!%p202_p3)   ;;  %v1147_v2 = vld [vmem:[%s1736_s1 + $0x48] sm:$0xff] (!%p202_p3)   ;;  %v1149_v4 = vld [vmem:[%s1736_s1 + $0x50] sm:$0xff] (!%p202_p3)   ;;  %p593_p4 = scmp.eq.s32.totalorder (!%p202_p3), %s1201_s15, 0 }
   0x7   : > { %205 = sbr.rel (%p202_p3) target bundleno = 384 (0x180), region = 36  ;;  %v1146_v1 = vld [vmem:[%s1736_s1] sm:$0xff] (!%p202_p3)   ;;  %1040 = vmatprep.subr.bf16.mxu0 (!%p202_p3), %v1145_v0  ;;  %1104 = vmatprep.subr.bf16.mxu1 (!%p202_p3), %v1145_v0  ;;  %v1148_v3 = vld [vmem:[%s1736_s1 + $0x8] sm:$0xff] (!%p202_p3)   ;;  %v1150_v5 = vld [vmem:[%s1736_s1 + $0x10] sm:$0xff] (!%p202_p3)  }
   0x8   : > { %1041 = vmatpush3.bf16.msra.mxu0 (!%p202_p3), %v1146_v1  ;;  %1112 = vmatpush3.bf16.msra.mxu1 (!%p202_p3), %v1146_v1  ;;  %v1151_v6 = vld [vmem:[%s1736_s1 + $0x58] sm:$0xff] (!%p202_p3)   ;;  %v1153_v8 = vld [vmem:[%s1736_s1 + $0x60] sm:$0xff] (!%p202_p3)   ;;  %v1155_v10 = vld [vmem:[%s1736_s1 + $0x68] sm:$0xff] (!%p202_p3)  }
   0x9   : > { %1042 = vmatprep.subr.bf16.mxu0 (!%p202_p3), %v1147_v2  ;;  %1105 = vmatprep.subr.bf16.mxu1 (!%p202_p3), %v1147_v2  ;;  %v1152_v7 = vld [vmem:[%s1736_s1 + $0x18] sm:$0xff] (!%p202_p3)   ;;  %v1154_v9 = vld [vmem:[%s1736_s1 + $0x20] sm:$0xff] (!%p202_p3)   ;;  %v1156_v13 = vld [vmem:[%s1736_s1 + $0x28] sm:$0xff] (!%p202_p3)  }
   0xa   : > { %v1163_v11 = vld [vmem:[%s1735_s0 + $0x4] ss:$8 sps:$4 sm:$0xff] (!%p202_p3)   ;;  %v1157_v14 = vld [vmem:[%s1736_s1 + $0x70] sm:$0xff] (!%p202_p3)   ;;  %v1159_v16 = vld [vmem:[%s1736_s1 + $0x78] sm:$0xff] (!%p202_p3)  }
   0xb   : > { %v1166_v12 = vld [vmem:[%s1735_s0 + $0x44] ss:$8 sps:$4 sm:$0xff] (!%p202_p3)   ;;  %528 = vmatprep.mubr.bf16.mxu0 (!%p202_p3), %v1163_v11  ;;  %v1158_v15 = vld [vmem:[%s1736_s1 + $0x30] sm:$0xff] (!%p202_p3)   ;;  %v1160_v17 = vld [vmem:[%s1736_s1 + $0x38] sm:$0xff] (!%p202_p3)  }
   0xc   : > { %1043 = vmatpush3.bf16.msra.mxu0 (!%p202_p3), %v1148_v3  ;;  %1113 = vmatpush3.bf16.msra.mxu1 (!%p202_p3), %v1148_v3  ;;  %v1161_v18 = vld [vmem:[%s1735_s0] ss:$8 sps:$4 sm:$0xff] (!%p202_p3)   ;;  %v1167_v20 = vld [vmem:[%s1735_s0 + $0x14] ss:$8 sps:$4 sm:$0xff] (!%p202_p3)   ;;  %v1171_v22 = vld [vmem:[%s1735_s0 + $0x10] ss:$8 sps:$4 sm:$0xff] (!%p202_p3)  }
   0xd   : > { %1044 = vmatprep.subr.bf16.mxu0 (!%p202_p3), %v1149_v4  ;;  %1106 = vmatprep.subr.bf16.mxu1 (!%p202_p3), %v1149_v4  ;;  %v1164_v19 = vld [vmem:[%s1735_s0 + $0x40] ss:$8 sps:$4 sm:$0xff] (!%p202_p3)   ;;  %v1169_v21 = vld [vmem:[%s1735_s0 + $0x54] ss:$8 sps:$4 sm:$0xff] (!%p202_p3)   ;;  %v1172_v23 = vld [vmem:[%s1735_s0 + $0x50] ss:$8 sps:$4 sm:$0xff] (!%p202_p3)  }
   0xe   : > { %560 = vmatprep.mubr.bf16.mxu1 %v1166_v12  ;;  %v1173_v24 = vld [vmem:[%s1735_s0 + $0x24] ss:$8 sps:$4 sm:$0xff]   ;;  %v1177_v26 = vld [vmem:[%s1735_s0 + $0x20] ss:$8 sps:$4 sm:$0xff]   ;;  %v1179_v28 = vld [vmem:[%s1735_s0 + $0x34] ss:$8 sps:$4 sm:$0xff]  }
   0xf   : > { %v1175_v25 = vld [vmem:[%s1735_s0 + $0x64] ss:$8 sps:$4 sm:$0xff]   ;;  %v1178_v27 = vld [vmem:[%s1735_s0 + $0x60] ss:$8 sps:$4 sm:$0xff]   ;;  %v1181_v29 = vld [vmem:[%s1735_s0 + $0x74] ss:$8 sps:$4 sm:$0xff]  }
  0x10   : > { %1045 = vmatpush3.bf16.msra.mxu0 %v1150_v5  ;;  %1114 = vmatpush3.bf16.msra.mxu1 %v1150_v5  ;;  %v1183_v30 = vld [vmem:[%s1735_s0 + $0x30] ss:$8 sps:$4 sm:$0xff]   ;;  %vm598_vm0 = vcmask (%p593_p4), 253952  }
  0x11   : > { %1046 = vmatprep.subr.bf16.mxu0 %v1151_v6  ;;  %1107 = vmatprep.subr.bf16.mxu1 %v1151_v6  ;;  %v1184_v31 = vld [vmem:[%s1735_s0 + $0x70] ss:$8 sps:$4 sm:$0xff]  }
  0x14   : > { %1047 = vmatpush3.bf16.msra.mxu0 %v1152_v7  ;;  %1115 = vmatpush3.bf16.msra.mxu1 %v1152_v7 }
  0x15   : > { %1048 = vmatprep.subr.bf16.mxu0 %v1153_v8  ;;  %1108 = vmatprep.subr.bf16.mxu1 %v1153_v8 }
  0x18   : > { %1049 = vmatpush3.bf16.msra.mxu0 %v1154_v9  ;;  %1116 = vmatpush3.bf16.msra.mxu1 %v1154_v9 }
  0x19   : > { %1050 = vmatprep.subr.bf16.mxu0 %v1155_v10  ;;  %1109 = vmatprep.subr.bf16.mxu1 %v1155_v10 }
  0x1c   : > { %1051 = vmatpush3.bf16.msra.mxu0 %v1156_v13  ;;  %1117 = vmatpush3.bf16.msra.mxu1 %v1156_v13 }
  0x1d   : > { %1052 = vmatprep.subr.bf16.mxu0 %v1157_v14  ;;  %1110 = vmatprep.subr.bf16.mxu1 %v1157_v14 }
  0x20   : > { %1053 = vmatpush3.bf16.msra.mxu0 %v1158_v15  ;;  %1118 = vmatpush3.bf16.msra.mxu1 %v1158_v15 }
  0x21   : > { %1054 = vmatprep.subr.bf16.mxu0 %v1159_v16  ;;  %1111 = vmatprep.subr.bf16.mxu1 %v1159_v16  ;;  %v1211_v16 = vmov (%p593_p4), 0.0  }
  0x22   : > { %599 = vst.msk [vmem:[#allocation2] sm:$0x1] (%p593_p4), %vm598_vm0, %v1211_v16  ;;  %600 = vst.msk [vmem:[#allocation3] sm:$0x1] (%p593_p4), %vm598_vm0, %v1211_v16 }
  0x24   : > { %1055 = vmatpush3.bf16.msra.mxu0 %v1160_v17  ;;  %1119 = vmatpush3.bf16.msra.mxu1 %v1160_v17 }
  0x27   : > { %529 = vmatmul.mubr.bf16.vlgmr.msra.gmra.mrb[0].mxu0 %v1161_v18  ;;  %561 = vmatmul.mubr.bf16.vlgmr.msra.gmra.mrb[0].mxu1 %v1164_v19 }
  0x28   : > { %536 = vmatprep.mubr.bf16.mxu0 %v1167_v20  ;;  %568 = vmatprep.mubr.bf16.mxu1 %v1169_v21 }
  0x2f   : > { %537 = vmatmul.mubr.bf16.gmra.mrb[4].mxu0 %v1171_v22  ;;  %569 = vmatmul.mubr.bf16.gmra.mrb[4].mxu1 %v1172_v23 }
  0x30   : > { %544 = vmatprep.mubr.bf16.mxu0 %v1173_v24  ;;  %576 = vmatprep.mubr.bf16.mxu1 %v1175_v25 }
  0x37   : > { %545 = vmatmul.mubr.bf16.gmra.mrb[8].mxu0 %v1177_v26  ;;  %577 = vmatmul.mubr.bf16.gmra.mrb[8].mxu1 %v1178_v27 }
  0x38   : > { %552 = vmatprep.mubr.bf16.mxu0 %v1179_v28  ;;  %584 = vmatprep.mubr.bf16.mxu1 %v1181_v29 }
  0x3f   : > { %553 = vmatmul.mubr.bf16.gmra.mrb[12].mxu0 %v1183_v30  ;;  %585 = vmatmul.mubr.bf16.gmra.mrb[12].mxu1 %v1184_v31 }
  0xfa   : > { %v1056_v32 = vpop.f32.mrb[0].mxu0  ;;  %v1080_v33 = vpop.f32.mrb[0].mxu1 }
  0xfb   : > { %v1057_v34 = vpop.f32.mrb[1].mxu0  ;;  %v1081_v35 = vpop.f32.mrb[1].mxu1 }
  0xfc   : > { %v1354_v36 = vadd.f32 %v1057_v34, %v1056_v32  ;;  %v1356_v37 = vadd.f32 %v1081_v35, %v1080_v33  ;;  %v1059_v38 = vpop.f32.mrb[2].mxu0  ;;  %v1083_v39 = vpop.f32.mrb[2].mxu1 }
  0xfd   : > { %v1060_v40 = vpop.f32.mrb[3].mxu0  ;;  %v1084_v41 = vpop.f32.mrb[3].mxu1 }
  0xfe   : > { %v1358_v42 = vadd.f32 %v1060_v40, %v1059_v38  ;;  %v1360_v43 = vadd.f32 %v1084_v41, %v1083_v39 }
 0x102   : > { %v1062_v44 = vpop.f32.mrb[4].mxu0  ;;  %v1086_v45 = vpop.f32.mrb[4].mxu1 }
 0x103   : > { %v1063_v46 = vpop.f32.mrb[5].mxu0  ;;  %v1087_v47 = vpop.f32.mrb[5].mxu1 }
 0x104   : > { %v1362_v48 = vadd.f32 %v1063_v46, %v1062_v44  ;;  %v1364_v49 = vadd.f32 %v1087_v47, %v1086_v45  ;;  %v1065_v50 = vpop.f32.mrb[6].mxu0  ;;  %v1089_v51 = vpop.f32.mrb[6].mxu1 }
 0x105   : > { %v1066_v52 = vpop.f32.mrb[7].mxu0  ;;  %v1090_v53 = vpop.f32.mrb[7].mxu1 }
 0x106   : > { %v1366_v54 = vadd.f32 %v1066_v52, %v1065_v50  ;;  %v1368_v55 = vadd.f32 %v1090_v53, %v1089_v51 }
 0x10a   : > { %v1068_v56 = vpop.f32.mrb[8].mxu0  ;;  %v1092_v57 = vpop.f32.mrb[8].mxu1 }
 0x10b   : > { %v1069_v58 = vpop.f32.mrb[9].mxu0  ;;  %v1093_v59 = vpop.f32.mrb[9].mxu1 }
 0x10c   : > { %v1370_v60 = vadd.f32 %v1069_v58, %v1068_v56  ;;  %v1372_v61 = vadd.f32 %v1093_v59, %v1092_v57  ;;  %v1071_v62 = vpop.f32.mrb[10].mxu0  ;;  %v1095_v63 = vpop.f32.mrb[10].mxu1 }
 0x10d   : > { %v1072_v0 = vpop.f32.mrb[11].mxu0  ;;  %v1096_v1 = vpop.f32.mrb[11].mxu1 }
 0x10e   : > { %v1374_v2 = vadd.f32 %v1072_v0, %v1071_v62  ;;  %v1376_v3 = vadd.f32 %v1096_v1, %v1095_v63 }
 0x110   : > { %597 = sbr.rel (!%p593_p4) target bundleno = 279 (0x117), region = 40 }
 0x112   : > { %v1074_v4 = vpop.f32.mrb[12].mxu0  ;;  %v1098_v5 = vpop.f32.mrb[12].mxu1 }
 0x113   : > { %v1075_v6 = vpop.f32.mrb[13].mxu0  ;;  %v1099_v7 = vpop.f32.mrb[13].mxu1 }
 0x114   : > { %v1378_v8 = vadd.f32 %v1075_v6, %v1074_v4  ;;  %v1380_v9 = vadd.f32 %v1099_v7, %v1098_v5  ;;  %v1077_v10 = vpop.f32.mrb[14].mxu0  ;;  %v1101_v11 = vpop.f32.mrb[14].mxu1 }
 0x115   : > { %v1078_v12 = vpop.f32.mrb[15].mxu0  ;;  %v1102_v13 = vpop.f32.mrb[15].mxu1 }
 0x116   : > { %v1382_v14 = vadd.f32 %v1078_v12, %v1077_v10  ;;  %v1384_v15 = vadd.f32 %v1102_v13, %v1101_v11 }
 0x117 PF: > { %p1031_p5 = scmp.ne.s32.totalorder %s1201_s15, 0 }
 0x118   : > { %vm605_vm1 = vcmask (!%p1031_p5), 261120   ;;  %v647_v24 = vmul.f32 (!%p1031_p5), %v1354_v36, %v1354_v36  ;;  %v648_v25 = vmul.f32 (!%p1031_p5), %v1358_v42, %v1358_v42  ;;  %v649_v27 = vmul.f32 (!%p1031_p5), %v1362_v48, %v1362_v48 }
 0x119   : > { %603 = sbr.rel (%p1031_p5) target bundleno = 329 (0x149), region = 44  ;;  %v606_v17 = vsel (!%p1031_p5), %vm605_vm1, %v1354_v36, 0.0  ;;  %v607_v18 = vsel (!%p1031_p5), %vm605_vm1, %v1358_v42, 0.0  ;;  %v609_v19 = vsel (!%p1031_p5), %vm605_vm1, %v1362_v48, 0.0  ;;  %702 = vst.msk [vmem:[%s1739_s4] sm:$0xff] (!%p1031_p5), %vm605_vm1, %v1354_v36  ;;  %703 = vst.msk [vmem:[%s1739_s4 + $0x8] sm:$0xff] (!%p1031_p5), %vm605_vm1, %v1358_v42  ;;  %v650_v29 = vmul.f32 (!%p1031_p5), %v1366_v54, %v1366_v54 }
 0x11a   : > { %704 = vst.msk [vmem:[%s1739_s4 + $0x10] sm:$0xff] (!%p1031_p5), %vm605_vm1, %v1362_v48  ;;  %705 = vst.msk [vmem:[%s1739_s4 + $0x18] sm:$0xff] (!%p1031_p5), %vm605_vm1, %v1366_v54  ;;  %v608_v20 = vadd.f32 (!%p1031_p5), %v607_v18, %v606_v17  ;;  %v611_v21 = vsel (!%p1031_p5), %vm605_vm1, %v1366_v54, 0.0  ;;  %v613_v23 = vsel (!%p1031_p5), %vm605_vm1, %v1370_v60, 0.0  ;;  %v615_v28 = vsel (!%p1031_p5), %vm605_vm1, %v1374_v2, 0.0 }
 0x11b   : > { %706 = vst.msk [vmem:[%s1739_s4 + $0x20] sm:$0xff] (!%p1031_p5), %vm605_vm1, %v1370_v60  ;;  %707 = vst.msk [vmem:[%s1739_s4 + $0x28] sm:$0xff] (!%p1031_p5), %vm605_vm1, %v1374_v2  ;;  %v617_v31 = vsel (!%p1031_p5), %vm605_vm1, %v1378_v8, 0.0  ;;  %v651_v32 = vmul.f32 (!%p1031_p5), %v1370_v60, %v1370_v60  ;;  %v663_v33 = vsel (!%p1031_p5), %vm605_vm1, %v647_v24, 0.0  ;;  %v664_v34 = vsel (!%p1031_p5), %vm605_vm1, %v648_v25, 0.0 }
 0x11c   : > { %708 = vst.msk [vmem:[%s1739_s4 + $0x30] sm:$0xff] (!%p1031_p5), %vm605_vm1, %v1378_v8  ;;  %709 = vst.msk [vmem:[%s1739_s4 + $0x38] sm:$0xff] (!%p1031_p5), %vm605_vm1, %v1382_v14  ;;  %v610_v22 = vadd.f32 (!%p1031_p5), %v609_v19, %v608_v20  ;;  %v665_v38 = vadd.f32 (!%p1031_p5), %v664_v34, %v663_v33  ;;  %v666_v39 = vsel (!%p1031_p5), %vm605_vm1, %v649_v27, 0.0  ;;  %v619_v40 = vsel (!%p1031_p5), %vm605_vm1, %v1382_v14, 0.0 }
 0x11d   : > { %710 = vst.msk [vmem:[%s1739_s4 + $0x40] sm:$0xff] (!%p1031_p5), %vm605_vm1, %v1356_v37  ;;  %711 = vst.msk [vmem:[%s1739_s4 + $0x48] sm:$0xff] (!%p1031_p5), %vm605_vm1, %v1360_v43  ;;  %v652_v41 = vmul.f32 (!%p1031_p5), %v1374_v2, %v1374_v2  ;;  %v668_v44 = vsel (!%p1031_p5), %vm605_vm1, %v650_v29, 0.0  ;;  %v621_v47 = vsel (!%p1031_p5), %vm605_vm1, %v1356_v37, 0.0  ;;  %v653_v50 = vmul.f32 (!%p1031_p5), %v1378_v8, %v1378_v8 }
 0x11e   : > { %712 = vst.msk [vmem:[%s1739_s4 + $0x50] sm:$0xff] (!%p1031_p5), %vm605_vm1, %v1364_v49  ;;  %713 = vst.msk [vmem:[%s1739_s4 + $0x58] sm:$0xff] (!%p1031_p5), %vm605_vm1, %v1368_v55  ;;  %v612_v26 = vadd.f32 (!%p1031_p5), %v611_v21, %v610_v22  ;;  %v667_v46 = vadd.f32 (!%p1031_p5), %v666_v39, %v665_v38  ;;  %v670_v51 = vsel (!%p1031_p5), %vm605_vm1, %v651_v32, 0.0  ;;  %v623_v56 = vsel (!%p1031_p5), %vm605_vm1, %v1360_v43, 0.0 }
 0x11f   : > { %714 = vst.msk [vmem:[%s1739_s4 + $0x60] sm:$0xff] (!%p1031_p5), %vm605_vm1, %v1372_v61  ;;  %715 = vst.msk [vmem:[%s1739_s4 + $0x68] sm:$0xff] (!%p1031_p5), %vm605_vm1, %v1376_v3  ;;  %v654_v57 = vmul.f32 (!%p1031_p5), %v1382_v14, %v1382_v14  ;;  %v672_v58 = vsel (!%p1031_p5), %vm605_vm1, %v652_v41, 0.0  ;;  %v625_v63 = vsel (!%p1031_p5), %vm605_vm1, %v1364_v49, 0.0  ;;  %v655_v0 = vmul.f32 (!%p1031_p5), %v1356_v37, %v1356_v37 }
 0x120   : > { %716 = vst.msk [vmem:[%s1739_s4 + $0x70] sm:$0xff] %vm605_vm1, %v1380_v9  ;;  %717 = vst.msk [vmem:[%s1739_s4 + $0x78] sm:$0xff] %vm605_vm1, %v1384_v15  ;;  %v614_v30 = vadd.f32 %v613_v23, %v612_v26  ;;  %v669_v53 = vadd.f32 %v668_v44, %v667_v46  ;;  %v674_v1 = vsel %vm605_vm1, %v653_v50, 0.0  ;;  %v627_v6 = vsel %vm605_vm1, %v1368_v55, 0.0 }
 0x121   : > { %v656_v7 = vmul.f32 %v1360_v43, %v1360_v43  ;;  %v676_v10 = vsel %vm605_vm1, %v654_v57, 0.0  ;;  %v629_v13 = vsel %vm605_vm1, %v1372_v61, 0.0  ;;  %v657_v16 = vmul.f32 %v1364_v49, %v1364_v49 }
 0x122   : > { %v616_v35 = vadd.f32 %v615_v28, %v614_v30  ;;  %v671_v62 = vadd.f32 %v670_v51, %v669_v53  ;;  %v678_v17 = vsel %vm605_vm1, %v655_v0, 0.0  ;;  %v631_v20 = vsel %vm605_vm1, %v1376_v3, 0.0 }
 0x123   : > { %v658_v21 = vmul.f32 %v1368_v55, %v1368_v55  ;;  %v680_v22 = vsel %vm605_vm1, %v656_v7, 0.0  ;;  %v633_v25 = vsel %vm605_vm1, %v1380_v9, 0.0  ;;  %v659_v26 = vmul.f32 %v1372_v61, %v1372_v61 }
 0x124   : > { %v618_v45 = vadd.f32 %v617_v31, %v616_v35  ;;  %v673_v5 = vadd.f32 %v672_v58, %v671_v62  ;;  %v682_v27 = vsel %vm605_vm1, %v657_v16, 0.0  ;;  %v635_v30 = vsel %vm605_vm1, %v1384_v15, 0.0 }
 0x125   : > { %v660_v31 = vmul.f32 %v1376_v3, %v1376_v3  ;;  %v684_v32 = vsel %vm605_vm1, %v658_v21, 0.0  ;;  %v661_v35 = vmul.f32 %v1380_v9, %v1380_v9  ;;  %v686_v38 = vsel %vm605_vm1, %v659_v26, 0.0 }
 0x126   : > { %v620_v52 = vadd.f32 %v619_v40, %v618_v45  ;;  %v675_v12 = vadd.f32 %v674_v1, %v673_v5  ;;  %v662_v41 = vmul.f32 %v1384_v15, %v1384_v15  ;;  %vm644_vm2 = vcmask 253952  }
 0x127   : > { %v688_v44 = vsel %vm605_vm1, %v660_v31, 0.0 }
 0x128   : > { %v622_v59 = vadd.f32 %v621_v47, %v620_v52  ;;  %v677_v19 = vadd.f32 %v676_v10, %v675_v12  ;;  %v690_v47 = vsel %vm605_vm1, %v661_v35, 0.0  ;;  %v692_v52 = vsel %vm605_vm1, %v662_v41, 0.0  ;;  %v646_v10 = vld [vmem:[#allocation3] sm:$0x1] }
 0x12a   : > { %v624_v4 = vadd.f32 %v623_v56, %v622_v59  ;;  %v679_v24 = vadd.f32 %v678_v17, %v677_v19 }
 0x12c   : > { %v626_v11 = vadd.f32 %v625_v63, %v624_v4  ;;  %v681_v29 = vadd.f32 %v680_v22, %v679_v24  ;;  %v604_v63 = vld [vmem:[#allocation2] sm:$0x1] }
 0x12e   : > { %v628_v18 = vadd.f32 %v627_v6, %v626_v11  ;;  %v683_v34 = vadd.f32 %v682_v27, %v681_v29 }
 0x130   : > { %v630_v23 = vadd.f32 %v629_v13, %v628_v18  ;;  %v685_v40 = vadd.f32 %v684_v32, %v683_v34 }
 0x132   : > { %v632_v28 = vadd.f32 %v631_v20, %v630_v23  ;;  %v687_v46 = vadd.f32 %v686_v38, %v685_v40 }
 0x134   : > { %v634_v33 = vadd.f32 %v633_v25, %v632_v28  ;;  %v689_v51 = vadd.f32 %v688_v44, %v687_v46 }
 0x136   : > { %v636_v39 = vadd.f32 %v635_v30, %v634_v33  ;;  %v691_v56 = vadd.f32 %v690_v47, %v689_v51 }
 0x138   : > { %v637_v45 = vrot.slane %v636_v39, 4  ;;  %v693_v58 = vadd.f32 %v692_v52, %v691_v56 }
 0x13a   : > { %v638_v50 = vadd.f32 %v637_v45, %v636_v39  ;;  %v694_v62 = vrot.slane %v693_v58, 4 }
 0x13c   : > { %v639_v53 = vrot.slane %v638_v50, 2  ;;  %v695_v1 = vadd.f32 %v694_v62, %v693_v58 }
 0x13e   : > { %v640_v57 = vadd.f32 %v639_v53, %v638_v50  ;;  %v696_v5 = vrot.slane %v695_v1, 2 }
 0x140   : > { %v641_v59 = vrot.slane %v640_v57, 1  ;;  %v697_v6 = vadd.f32 %v696_v5, %v695_v1 }
 0x142   : > { %v642_v0 = vadd.f32 %v641_v59, %v640_v57  ;;  %v698_v7 = vrot.slane %v697_v6, 1 }
 0x144   : > { %v643_v4 = vadd.f32 %v642_v0, %v604_v63  ;;  %v699_v11 = vadd.f32 %v698_v7, %v697_v6 }
 0x146   : > { %645 = vst.msk [vmem:[#allocation2] sm:$0x1] %vm644_vm2, %v643_v4  ;;  %v700_v12 = vadd.f32 %v699_v11, %v646_v10 }
 0x148   : > { %701 = vst.msk [vmem:[#allocation3] sm:$0x1] %vm644_vm2, %v700_v12 }
 0x149 PF: > { %p1032_p6 = scmp.ne.s32.totalorder %s1201_s15, 1 }
 0x14a   : > { %v729_v19 = vlaneseq (!%p1032_p6)  ;;  %vm868_vm3 = vcmask (!%p1032_p6), 261120  }
 0x14b   : > { %721 = sbr.rel (%p1032_p6) target bundleno = 384 (0x180), region = 48 }
 0x14c   : > { %v730_v22 = vshrl.u32 (!%p1032_p6), %v729_v19, 7 }
 0x14d   : > { %v722_v13 = vld [vmem:[#allocation2] sm:$0x1] (!%p1032_p6) }
 0x14e   : > { %v723_v17 = vmul.f32 (!%p1032_p6), 0.0078125, %v722_v13  ;;  %v731_v24 = vsub.s32 (!%p1032_p6), 0, %v730_v22 }
 0x14f   : > { %v724_v16 = vld [vmem:[#allocation3] sm:$0x1] (!%p1032_p6) }
 0x150   : > { %v725_v18 = vmul.f32 (!%p1032_p6), 0.0078125, %v724_v16  ;;  %v726_v20 = vmul.f32 (!%p1032_p6), %v723_v17, %v723_v17  ;;  %v1550_v25 = vrot.slane (!%p1032_p6), %v723_v17, %v731_v24 }
 0x152   : > { %v727_v21 = vsub.f32 %v725_v18, %v726_v20  ;;  %v734_v26 = vsub.f32 %v1354_v36, %v1550_v25  ;;  %v735_v27 = vsub.f32 %v1358_v42, %v1550_v25  ;;  %v736_v28 = vsub.f32 %v1362_v48, %v1550_v25 }
 0x153   : > { %v737_v29 = vsub.f32 %v1366_v54, %v1550_v25  ;;  %v738_v30 = vsub.f32 %v1370_v60, %v1550_v25  ;;  %v739_v32 = vsub.f32 %v1374_v2, %v1550_v25  ;;  %v740_v33 = vsub.f32 %v1378_v8, %v1550_v25  ;;  %v1581_v8 = vld [vmem:[%s1737_s2] ss:$0 sm:$0xff] }
 0x154   : > { %v750_v23 = vadd.f32 1e-05, %v727_v21  ;;  %v741_v36 = vsub.f32 %v1382_v14, %v1550_v25  ;;  %v742_v42 = vsub.f32 %v1356_v37, %v1550_v25  ;;  %v743_v54 = vsub.f32 %v1360_v43, %v1550_v25 }
 0x155   : > { %v744_v60 = vsub.f32 %v1364_v49, %v1550_v25  ;;  %v745_v2 = vsub.f32 %v1368_v55, %v1550_v25  ;;  %v746_v14 = vsub.f32 %v1372_v61, %v1550_v25  ;;  %v747_v34 = vsub.f32 %v1376_v3, %v1550_v25  ;;  %v1598_v61 = vld [vmem:[%s1738_s3] ss:$0 sm:$0xff] }
 0x156   : > { %1185 = vrsqrt.f32 %v750_v23  ;;  %v748_v43 = vsub.f32 %v1380_v9, %v1550_v25  ;;  %v749_v35 = vsub.f32 %v1384_v15, %v1550_v25 }
 0x160   : > { %v1186_v31 = vpop.eup %1185 }
 0x161   : > { %v1570_v48 = vrot.slane %v1186_v31, %v731_v24 }
 0x163   : > { %v758_v38 = vmul.f32 %v1570_v48, %v734_v26  ;;  %v759_v39 = vmul.f32 %v1570_v48, %v735_v27  ;;  %v760_v40 = vmul.f32 %v1570_v48, %v736_v28  ;;  %v761_v41 = vmul.f32 %v1570_v48, %v737_v29 }
 0x164   : > { %v762_v44 = vmul.f32 %v1570_v48, %v738_v30  ;;  %v763_v45 = vmul.f32 %v1570_v48, %v739_v32  ;;  %v764_v46 = vmul.f32 %v1570_v48, %v740_v33  ;;  %v765_v47 = vmul.f32 %v1570_v48, %v741_v36 }
 0x165   : > { %v781_v50 = vmul.f32 %v1581_v8, %v758_v38  ;;  %v782_v51 = vmul.f32 %v1581_v8, %v759_v39  ;;  %v783_v52 = vmul.f32 %v1581_v8, %v760_v40  ;;  %v784_v53 = vmul.f32 %v1581_v8, %v761_v41 }
 0x166   : > { %v785_v56 = vmul.f32 %v1581_v8, %v762_v44  ;;  %v786_v57 = vmul.f32 %v1581_v8, %v763_v45  ;;  %v787_v58 = vmul.f32 %v1581_v8, %v764_v46  ;;  %v788_v59 = vmul.f32 %v1581_v8, %v765_v47 }
 0x167   : > { %v804_v62 = vadd.f32 %v1598_v61, %v781_v50  ;;  %v805_v63 = vadd.f32 %v1598_v61, %v782_v51  ;;  %v806_v0 = vadd.f32 %v1598_v61, %v783_v52  ;;  %v807_v1 = vadd.f32 %v1598_v61, %v784_v53 }
 0x168   : > { %v808_v4 = vadd.f32 %v1598_v61, %v785_v56  ;;  %v809_v5 = vadd.f32 %v1598_v61, %v786_v57  ;;  %v810_v6 = vadd.f32 %v1598_v61, %v787_v58  ;;  %v811_v7 = vadd.f32 %v1598_v61, %v788_v59 }
 0x169   : > { %vm820_vm4 = vcmp.gt.f32.partialorder %v804_v62, 0.0  ;;  %v836_v10 = vmul.f32 0.2, %v804_v62  ;;  %vm821_vm5 = vcmp.gt.f32.partialorder %v805_v63, 0.0  ;;  %v837_v11 = vmul.f32 0.2, %v805_v63 }
 0x16a   : > { %vm822_vm6 = vcmp.gt.f32.partialorder %v806_v0, 0.0  ;;  %v838_v12 = vmul.f32 0.2, %v806_v0  ;;  %vm823_vm7 = vcmp.gt.f32.partialorder %v807_v1, 0.0  ;;  %v839_v13 = vmul.f32 0.2, %v807_v1 }
 0x16b   : > { %v852_v16 = vsel %vm820_vm4, %v804_v62, %v836_v10  ;;  %v853_v17 = vsel %vm821_vm5, %v805_v63, %v837_v11  ;;  %vm824_vm8 = vcmp.gt.f32.partialorder %v808_v4, 0.0  ;;  %v840_v18 = vmul.f32 0.2, %v808_v4 }
 0x16c   : > { %869 = vst.msk [vmem:[%s1739_s4] sm:$0xff] %vm868_vm3, %v852_v16  ;;  %870 = vst.msk [vmem:[%s1739_s4 + $0x8] sm:$0xff] %vm868_vm3, %v853_v17  ;;  %v854_v19 = vsel %vm822_vm6, %v806_v0, %v838_v12  ;;  %v855_v20 = vsel %vm823_vm7, %v807_v1, %v839_v13  ;;  %vm825_vm9 = vcmp.gt.f32.partialorder %v809_v5, 0.0  ;;  %v841_v21 = vmul.f32 0.2, %v809_v5 }
 0x16d   : > { %871 = vst.msk [vmem:[%s1739_s4 + $0x10] sm:$0xff] %vm868_vm3, %v854_v19  ;;  %872 = vst.msk [vmem:[%s1739_s4 + $0x18] sm:$0xff] %vm868_vm3, %v855_v20  ;;  %v856_v22 = vsel %vm824_vm8, %v808_v4, %v840_v18  ;;  %vm826_vm10 = vcmp.gt.f32.partialorder %v810_v6, 0.0  ;;  %v842_v23 = vmul.f32 0.2, %v810_v6  ;;  %vm827_vm11 = vcmp.gt.f32.partialorder %v811_v7, 0.0 }
 0x16e   : > { %873 = vst.msk [vmem:[%s1739_s4 + $0x20] sm:$0xff] %vm868_vm3, %v856_v22  ;;  %v857_v24 = vsel %vm825_vm9, %v809_v5, %v841_v21  ;;  %v843_v26 = vmul.f32 0.2, %v811_v7  ;;  %v766_v27 = vmul.f32 %v1570_v48, %v742_v42  ;;  %v767_v28 = vmul.f32 %v1570_v48, %v743_v54 }
 0x16f   : > { %874 = vst.msk [vmem:[%s1739_s4 + $0x28] sm:$0xff] %vm868_vm3, %v857_v24  ;;  %v858_v29 = vsel %vm826_vm10, %v810_v6, %v842_v23  ;;  %v768_v30 = vmul.f32 %v1570_v48, %v744_v60  ;;  %v769_v37 = vmul.f32 %v1570_v48, %v745_v2  ;;  %v770_v31 = vmul.f32 %v1570_v48, %v746_v14 }
 0x170   : > { %875 = vst.msk [vmem:[%s1739_s4 + $0x30] sm:$0xff] %vm868_vm3, %v858_v29  ;;  %v859_v32 = vsel %vm827_vm11, %v811_v7, %v843_v26  ;;  %v789_v33 = vmul.f32 %v1581_v8, %v766_v27  ;;  %v790_v36 = vmul.f32 %v1581_v8, %v767_v28  ;;  %v771_v49 = vmul.f32 %v1570_v48, %v747_v34 }
 0x171   : > { %876 = vst.msk [vmem:[%s1739_s4 + $0x38] sm:$0xff] %vm868_vm3, %v859_v32  ;;  %v791_v55 = vmul.f32 %v1581_v8, %v768_v30  ;;  %v792_v42 = vmul.f32 %v1581_v8, %v769_v37  ;;  %v793_v54 = vmul.f32 %v1581_v8, %v770_v31  ;;  %v772_v60 = vmul.f32 %v1570_v48, %v748_v43 }
 0x172   : > { %v812_v3 = vadd.f32 %v1598_v61, %v789_v33  ;;  %v813_v2 = vadd.f32 %v1598_v61, %v790_v36  ;;  %v794_v14 = vmul.f32 %v1581_v8, %v771_v49  ;;  %v773_v34 = vmul.f32 %v1570_v48, %v749_v35 }
 0x173   : > { %v814_v38 = vadd.f32 %v1598_v61, %v791_v55  ;;  %v815_v39 = vadd.f32 %v1598_v61, %v792_v42  ;;  %v816_v40 = vadd.f32 %v1598_v61, %v793_v54  ;;  %v795_v9 = vmul.f32 %v1581_v8, %v772_v60 }
 0x174   : > { %vm828_vm12 = vcmp.gt.f32.partialorder %v812_v3, 0.0  ;;  %v844_v43 = vmul.f32 0.2, %v812_v3  ;;  %vm829_vm13 = vcmp.gt.f32.partialorder %v813_v2, 0.0  ;;  %v845_v41 = vmul.f32 0.2, %v813_v2 }
 0x175   : > { %vm830_vm14 = vcmp.gt.f32.partialorder %v814_v38, 0.0  ;;  %v846_v44 = vmul.f32 0.2, %v814_v38  ;;  %vm831_vm15 = vcmp.gt.f32.partialorder %v815_v39, 0.0  ;;  %v847_v45 = vmul.f32 0.2, %v815_v39 }
 0x176   : > { %v860_v46 = vsel %vm828_vm12, %v812_v3, %v844_v43  ;;  %v861_v15 = vsel %vm829_vm13, %v813_v2, %v845_v41  ;;  %vm832_vm0 = vcmp.gt.f32.partialorder %v816_v40, 0.0  ;;  %v848_v25 = vmul.f32 0.2, %v816_v40 }
 0x177   : > { %877 = vst.msk [vmem:[%s1739_s4 + $0x40] sm:$0xff] %vm868_vm3, %v860_v46  ;;  %878 = vst.msk [vmem:[%s1739_s4 + $0x48] sm:$0xff] %vm868_vm3, %v861_v15  ;;  %v862_v48 = vsel %vm830_vm14, %v814_v38, %v846_v44  ;;  %v863_v35 = vsel %vm831_vm15, %v815_v39, %v847_v45  ;;  %v817_v47 = vadd.f32 %v1598_v61, %v794_v14 }
 0x178   : > { %v818_v50 = vadd.f32 %v1598_v61, %v795_v9  ;;  %879 = vst.msk [vmem:[%s1739_s4 + $0x50] sm:$0xff] %vm868_vm3, %v862_v48  ;;  %880 = vst.msk [vmem:[%s1739_s4 + $0x58] sm:$0xff] %vm868_vm3, %v863_v35  ;;  %v864_v51 = vsel %vm832_vm0, %v816_v40, %v848_v25  ;;  %v796_v52 = vmul.f32 %v1581_v8, %v773_v34 }
 0x179   : > { %881 = vst.msk [vmem:[%s1739_s4 + $0x60] sm:$0xff] %vm868_vm3, %v864_v51  ;;  %vm833_vm1 = vcmp.gt.f32.partialorder %v817_v47, 0.0  ;;  %v849_v53 = vmul.f32 0.2, %v817_v47 }
 0x17a   : > { %vm834_vm2 = vcmp.gt.f32.partialorder %v818_v50, 0.0  ;;  %v850_v56 = vmul.f32 0.2, %v818_v50  ;;  %v819_v57 = vadd.f32 %v1598_v61, %v796_v52 }
 0x17b   : > { %v865_v58 = vsel %vm833_vm1, %v817_v47, %v849_v53 }
 0x17c   : > { %v866_v59 = vsel %vm834_vm2, %v818_v50, %v850_v56  ;;  %882 = vst.msk [vmem:[%s1739_s4 + $0x68] sm:$0xff] %vm868_vm3, %v865_v58  ;;  %vm835_vm4 = vcmp.gt.f32.partialorder %v819_v57, 0.0  ;;  %v851_v8 = vmul.f32 0.2, %v819_v57 }
 0x17d   : > { %883 = vst.msk [vmem:[%s1739_s4 + $0x70] sm:$0xff] %vm868_vm3, %v866_v59 }
 0x17e   : > { %v867_v62 = vsel %vm835_vm4, %v819_v57, %v851_v8 }
 0x17f   : > { %884 = vst.msk [vmem:[%s1739_s4 + $0x78] sm:$0xff] %vm868_vm3, %v867_v62 }
 0x180 PF: > { %s14_s17 = sadd.s32 1, %s1209_s17   ;;  %s1740_s15 = smov %s1205_s16 }
 0x181   : > { %p11_p7 = scmp.ge.s32.totalorder %s14_s17, 4   ;;  %s1741_s16 = smov %s1743_s18 }
 0x183   :  { %13 = sbr.rel (!%p11_p7) target bundleno = 2 (0x2), region = 81 }

// kernel: coupled_vae_forward.24
= control target key start
LH: loop header
LB: loop body
LE: loop exit
PB: predicated region body
PF: predicated region fallthrough
CT: control target
= control target key end

     0   :  { %s1138_s15 = smov 0   ;;  %s1140_s16 = smov 0   ;;  %s1366_s0 = inlined_call_operand.vmem [shape: bf16[1,32,512], index: 0, kind: input, shape index: {}]   ;;  %s1367_s1 = inlined_call_operand.vmem [shape: bf16[1,512,64], index: 1, kind: input, shape index: {}]   ;;  %s1368_s2 = inlined_call_operand.vmem [shape: f32[1,64], index: 2, kind: input, shape index: {}]   ;;  %s1369_s3 = inlined_call_operand.vmem [shape: f32[1,64], index: 3, kind: input, shape index: {}]   ;;  %s1370_s4 = inlined_call_operand.vmem [shape: f32[1,32,64], index: 4, kind: output, shape index: {}]  }
   0x1   :  { %s1142_s17 = smov 0  }
   0x2 LB: > { %s33_s18 = sadd.s32 1, %s1106_s16  ;;  %p910_p0 = scmp.ge.s32.totalorder %s1110_s17, 1  ;;  %s1110_s17 = sphi %s1142_s17, %s14_s17   ;;  %s1106_s16 = sphi %s1140_s16, %s1372_s16   ;;  %s1102_s15 = sphi %s1138_s15, %s1371_s15  }
   0x3   : > { %p35_p1 = scmp.ge.s32.totalorder %s33_s18, 2  ;;  %p201_p2 = scmp.lt.s32.totalorder %s1110_s17, 3 }
   0x5   : > { %s1374_s18 = smov (%p35_p1, %s33_s18), 0  ;;  %p202_p3 = pnand %p910_p0, %p201_p2 }
   0x6   : > { %v1042_v0 = vld [vmem:[%s1367_s1 + $0x40] sm:$0xff] (!%p202_p3)   ;;  %v1046_v4 = vld [vmem:[%s1367_s1 + $0x48] sm:$0xff] (!%p202_p3)   ;;  %v1050_v8 = vld [vmem:[%s1367_s1 + $0x50] sm:$0xff] (!%p202_p3)   ;;  %p674_p4 = scmp.eq.s32.totalorder (!%p202_p3), %s1102_s15, 0 }
   0x7   : > { %205 = sbr.rel (%p202_p3) target bundleno = 330 (0x14a), region = 36  ;;  %v1043_v1 = vld [vmem:[%s1367_s1 + $0xc0] sm:$0xff] (!%p202_p3)   ;;  %961 = vmatprep.subr.bf16.mxu0 (!%p202_p3), %v1042_v0  ;;  %v1047_v5 = vld [vmem:[%s1367_s1 + $0xc8] sm:$0xff] (!%p202_p3)   ;;  %v1051_v9 = vld [vmem:[%s1367_s1 + $0xd0] sm:$0xff] (!%p202_p3)  }
   0x8   : > { %v1044_v2 = vld [vmem:[%s1367_s1] sm:$0xff] (!%p202_p3)   ;;  %989 = vmatprep.subr.bf16.mxu1 (!%p202_p3), %v1043_v1  ;;  %v1048_v6 = vld [vmem:[%s1367_s1 + $0x8] sm:$0xff] (!%p202_p3)   ;;  %v1052_v10 = vld [vmem:[%s1367_s1 + $0x10] sm:$0xff] (!%p202_p3)  }
   0x9   : > { %v1045_v3 = vld [vmem:[%s1367_s1 + $0x80] sm:$0xff] (!%p202_p3)   ;;  %962 = vmatpush3.bf16.msra.mxu0 (!%p202_p3), %v1044_v2  ;;  %v1049_v7 = vld [vmem:[%s1367_s1 + $0x88] sm:$0xff] (!%p202_p3)   ;;  %v1053_v11 = vld [vmem:[%s1367_s1 + $0x90] sm:$0xff] (!%p202_p3)  }
   0xa   : > { %990 = vmatpush3.bf16.msra.mxu1 (!%p202_p3), %v1045_v3  ;;  %963 = vmatprep.subr.bf16.mxu0 (!%p202_p3), %v1046_v4  ;;  %v1054_v12 = vld [vmem:[%s1367_s1 + $0x58] sm:$0xff] (!%p202_p3)   ;;  %v1058_v16 = vld [vmem:[%s1367_s1 + $0x60] sm:$0xff] (!%p202_p3)   ;;  %v1062_v20 = vld [vmem:[%s1367_s1 + $0x68] sm:$0xff] (!%p202_p3)  }
   0xb   : > { %991 = vmatprep.subr.bf16.mxu1 (!%p202_p3), %v1047_v5  ;;  %v1055_v13 = vld [vmem:[%s1367_s1 + $0xd8] sm:$0xff] (!%p202_p3)   ;;  %v1059_v17 = vld [vmem:[%s1367_s1 + $0xe0] sm:$0xff] (!%p202_p3)   ;;  %v1063_v21 = vld [vmem:[%s1367_s1 + $0xe8] sm:$0xff] (!%p202_p3)  }
   0xc   : > { %v1056_v14 = vld [vmem:[%s1367_s1 + $0x18] sm:$0xff] (!%p202_p3)   ;;  %v1060_v18 = vld [vmem:[%s1367_s1 + $0x20] sm:$0xff] (!%p202_p3)   ;;  %v1064_v22 = vld [vmem:[%s1367_s1 + $0x28] sm:$0xff] (!%p202_p3)  }
   0xd   : > { %964 = vmatpush3.bf16.msra.mxu0 (!%p202_p3), %v1048_v6  ;;  %v1057_v15 = vld [vmem:[%s1367_s1 + $0x98] sm:$0xff] (!%p202_p3)   ;;  %v1061_v19 = vld [vmem:[%s1367_s1 + $0xa0] sm:$0xff] (!%p202_p3)   ;;  %v1065_v23 = vld [vmem:[%s1367_s1 + $0xa8] sm:$0xff] (!%p202_p3)  }
   0xe   : > { %992 = vmatpush3.bf16.msra.mxu1 %v1049_v7  ;;  %965 = vmatprep.subr.bf16.mxu0 %v1050_v8  ;;  %v1066_v24 = vld [vmem:[%s1367_s1 + $0x70] sm:$0xff]   ;;  %v1070_v28 = vld [vmem:[%s1367_s1 + $0x78] sm:$0xff]   ;;  %vm679_vm0 = vcmask (%p674_p4), 516096   ;;  %v1112_v4 = vmov (%p674_p4), 0.0  }
   0xf   : > { %993 = vmatprep.subr.bf16.mxu1 %v1051_v9  ;;  %v1067_v25 = vld [vmem:[%s1367_s1 + $0xf0] sm:$0xff]   ;;  %v1071_v29 = vld [vmem:[%s1367_s1 + $0xf8] sm:$0xff]   ;;  %680 = vst.msk [vmem:[#allocation2] sm:$0x1] (%p674_p4), %vm679_vm0, %v1112_v4  ;;  %681 = vst.msk [vmem:[#allocation3] sm:$0x1] (%p674_p4), %vm679_vm0, %v1112_v4 }
  0x10   : > { %v1068_v26 = vld [vmem:[%s1367_s1 + $0x30] sm:$0xff]   ;;  %v1072_v30 = vld [vmem:[%s1367_s1 + $0x38] sm:$0xff]  }
  0x11   : > { %966 = vmatpush3.bf16.msra.mxu0 %v1052_v10  ;;  %v1069_v27 = vld [vmem:[%s1367_s1 + $0xb0] sm:$0xff]   ;;  %v1073_v31 = vld [vmem:[%s1367_s1 + $0xb8] sm:$0xff]  }
  0x12   : > { %994 = vmatpush3.bf16.msra.mxu1 %v1053_v11  ;;  %967 = vmatprep.subr.bf16.mxu0 %v1054_v12  ;;  %v1074_v32 = vld [vmem:[%s1366_s0] ss:$16 sps:$4 sm:$0xff]   ;;  %v1076_v33 = vld [vmem:[%s1366_s0 + $0x4] ss:$16 sps:$4 sm:$0xff]   ;;  %v1077_v34 = vld [vmem:[%s1366_s0 + $0x8] ss:$16 sps:$4 sm:$0xff]  }
  0x13   : > { %995 = vmatprep.subr.bf16.mxu1 %v1055_v13  ;;  %v1079_v35 = vld [vmem:[%s1366_s0 + $0xc] ss:$16 sps:$4 sm:$0xff]   ;;  %608 = vmatprep.mubr.bf16.mxu0 %v1076_v33  ;;  %v1080_v36 = vld [vmem:[%s1366_s0 + $0x24] ss:$16 sps:$4 sm:$0xff]   ;;  %v1084_v38 = vld [vmem:[%s1366_s0 + $0x20] ss:$16 sps:$4 sm:$0xff]  }
  0x14   : > { %657 = vmatprep.mubr.bf16.mxu1 %v1079_v35  ;;  %v1082_v37 = vld [vmem:[%s1366_s0 + $0x2c] ss:$16 sps:$4 sm:$0xff]   ;;  %v1085_v39 = vld [vmem:[%s1366_s0 + $0x28] ss:$16 sps:$4 sm:$0xff]  }
  0x15   : > { %968 = vmatpush3.bf16.msra.mxu0 %v1056_v14 }
  0x16   : > { %996 = vmatpush3.bf16.msra.mxu1 %v1057_v15  ;;  %969 = vmatprep.subr.bf16.mxu0 %v1058_v16 }
  0x17   : > { %997 = vmatprep.subr.bf16.mxu1 %v1059_v17 }
  0x19   : > { %970 = vmatpush3.bf16.msra.mxu0 %v1060_v18 }
  0x1a   : > { %998 = vmatpush3.bf16.msra.mxu1 %v1061_v19  ;;  %971 = vmatprep.subr.bf16.mxu0 %v1062_v20 }
  0x1b   : > { %999 = vmatprep.subr.bf16.mxu1 %v1063_v21 }
  0x1d   : > { %972 = vmatpush3.bf16.msra.mxu0 %v1064_v22 }
  0x1e   : > { %1000 = vmatpush3.bf16.msra.mxu1 %v1065_v23  ;;  %973 = vmatprep.subr.bf16.mxu0 %v1066_v24 }
  0x1f   : > { %1001 = vmatprep.subr.bf16.mxu1 %v1067_v25 }
  0x21   : > { %974 = vmatpush3.bf16.msra.mxu0 %v1068_v26 }
  0x22   : > { %1002 = vmatpush3.bf16.msra.mxu1 %v1069_v27  ;;  %975 = vmatprep.subr.bf16.mxu0 %v1070_v28 }
  0x23   : > { %1003 = vmatprep.subr.bf16.mxu1 %v1071_v29 }
  0x25   : > { %976 = vmatpush3.bf16.msra.mxu0 %v1072_v30 }
  0x26   : > { %1004 = vmatpush3.bf16.msra.mxu1 %v1073_v31 }
  0x28   : > { %609 = vmatmul.mubr.bf16.vlgmr.msra.gmra.mrb[0].mxu0 %v1074_v32 }
  0x29   : > { %658 = vmatmul.mubr.bf16.vlgmr.msra.gmra.mrb[0].mxu1 %v1077_v34  ;;  %616 = vmatprep.mubr.bf16.mxu0 %v1080_v36 }
  0x2a   : > { %665 = vmatprep.mubr.bf16.mxu1 %v1082_v37 }
  0x30   : > { %617 = vmatmul.mubr.bf16.gmra.mrb[4].mxu0 %v1084_v38 }
  0x31   : > { %666 = vmatmul.mubr.bf16.gmra.mrb[4].mxu1 %v1085_v39 }
  0xfb   : > { %v977_v40 = vpop.f32.mrb[0].mxu0 }
  0xfc   : > { %v1005_v41 = vpop.f32.mrb[0].mxu1  ;;  %v978_v42 = vpop.f32.mrb[1].mxu0 }
  0xfd   : > { %v979_v43 = vadd.f32 %v978_v42, %v977_v40  ;;  %v1006_v44 = vpop.f32.mrb[1].mxu1  ;;  %v980_v45 = vpop.f32.mrb[2].mxu0 }
  0xfe   : > { %v1007_v46 = vadd.f32 %v1006_v44, %v1005_v41  ;;  %v1008_v47 = vpop.f32.mrb[2].mxu1  ;;  %v981_v48 = vpop.f32.mrb[3].mxu0 }
  0xff   : > { %v982_v49 = vadd.f32 %v981_v48, %v980_v45  ;;  %v1009_v50 = vpop.f32.mrb[3].mxu1 }
 0x100   : > { %v1279_v51 = vadd.f32 %v1007_v46, %v979_v43  ;;  %v1010_v52 = vadd.f32 %v1009_v50, %v1008_v47 }
 0x102   : > { %v1281_v53 = vadd.f32 %v1010_v52, %v982_v49 }
 0x103   : > { %v983_v54 = vpop.f32.mrb[4].mxu0 }
 0x104   : > { %v1011_v55 = vpop.f32.mrb[4].mxu1  ;;  %v984_v56 = vpop.f32.mrb[5].mxu0  ;;  %678 = sbr.rel (!%p674_p4) target bundleno = 267 (0x10b), region = 40 }
 0x105   : > { %v985_v57 = vadd.f32 %v984_v56, %v983_v54  ;;  %v1012_v58 = vpop.f32.mrb[5].mxu1  ;;  %v986_v59 = vpop.f32.mrb[6].mxu0 }
 0x106   : > { %v1013_v60 = vadd.f32 %v1012_v58, %v1011_v55  ;;  %v1014_v61 = vpop.f32.mrb[6].mxu1  ;;  %v987_v62 = vpop.f32.mrb[7].mxu0 }
 0x107   : > { %v988_v63 = vadd.f32 %v987_v62, %v986_v59  ;;  %v1015_v0 = vpop.f32.mrb[7].mxu1 }
 0x108   : > { %v1283_v1 = vadd.f32 %v1013_v60, %v985_v57  ;;  %v1016_v2 = vadd.f32 %v1015_v0, %v1014_v61 }
 0x10a   : > { %v1285_v3 = vadd.f32 %v1016_v2, %v988_v63 }
 0x10b PF: > { %p952_p5 = scmp.ne.s32.totalorder %s1102_s15, 0 }
 0x10c   : > { %vm686_vm1 = vcmask (!%p952_p5), 523264   ;;  %v704_v5 = vmul.f32 (!%p952_p5), %v1279_v51, %v1279_v51  ;;  %v705_v6 = vmul.f32 (!%p952_p5), %v1281_v53, %v1281_v53  ;;  %v706_v11 = vmul.f32 (!%p952_p5), %v1283_v1, %v1283_v1  ;;  %v685_v32 = vld [vmem:[#allocation2] sm:$0x1] (!%p952_p5)  ;;  %v703_v35 = vld [vmem:[#allocation3] sm:$0x1] (!%p952_p5) }
 0x10d   : > { %684 = sbr.rel (%p952_p5) target bundleno = 292 (0x124), region = 44  ;;  %v687_v7 = vsel (!%p952_p5), %vm686_vm1, %v1279_v51, 0.0  ;;  %v688_v8 = vsel (!%p952_p5), %vm686_vm1, %v1281_v53, 0.0  ;;  %v690_v9 = vsel (!%p952_p5), %vm686_vm1, %v1283_v1, 0.0  ;;  %723 = vst.msk [vmem:[%s1370_s4] sm:$0xff] (!%p952_p5), %vm686_vm1, %v1279_v51  ;;  %724 = vst.msk [vmem:[%s1370_s4 + $0x8] sm:$0xff] (!%p952_p5), %vm686_vm1, %v1281_v53  ;;  %v707_v12 = vmul.f32 (!%p952_p5), %v1285_v3, %v1285_v3 }
 0x10e   : > { %725 = vst.msk [vmem:[%s1370_s4 + $0x10] sm:$0xff] (!%p952_p5), %vm686_vm1, %v1283_v1  ;;  %726 = vst.msk [vmem:[%s1370_s4 + $0x18] sm:$0xff] (!%p952_p5), %vm686_vm1, %v1285_v3  ;;  %v689_v10 = vadd.f32 (!%p952_p5), %v688_v8, %v687_v7  ;;  %v708_v13 = vsel (!%p952_p5), %vm686_vm1, %v704_v5, 0.0  ;;  %v692_v14 = vsel (!%p952_p5), %vm686_vm1, %v1285_v3, 0.0  ;;  %v709_v15 = vsel (!%p952_p5), %vm686_vm1, %v705_v6, 0.0 }
 0x10f   : > { %v710_v17 = vadd.f32 (!%p952_p5), %v709_v15, %v708_v13  ;;  %v711_v18 = vsel (!%p952_p5), %vm686_vm1, %v706_v11, 0.0  ;;  %v713_v19 = vsel (!%p952_p5), %vm686_vm1, %v707_v12, 0.0  ;;  %vm701_vm2 = vcmask (!%p952_p5), 516096  }
 0x110   : > { %v691_v16 = vadd.f32 (!%p952_p5), %v690_v9, %v689_v10 }
 0x111   : > { %v712_v21 = vadd.f32 (!%p952_p5), %v711_v18, %v710_v17 }
 0x112   : > { %v693_v20 = vadd.f32 (!%p952_p5), %v692_v14, %v691_v16 }
 0x113   : > { %v714_v23 = vadd.f32 (!%p952_p5), %v713_v19, %v712_v21 }
 0x114   : > { %v694_v22 = vrot.slane %v693_v20, 4 }
 0x115   : > { %v715_v25 = vrot.slane %v714_v23, 4 }
 0x116   : > { %v695_v24 = vadd.f32 %v694_v22, %v693_v20 }
 0x117   : > { %v716_v27 = vadd.f32 %v715_v25, %v714_v23 }
 0x118   : > { %v696_v26 = vrot.slane %v695_v24, 2 }
 0x119   : > { %v717_v29 = vrot.slane %v716_v27, 2 }
 0x11a   : > { %v697_v28 = vadd.f32 %v696_v26, %v695_v24 }
 0x11b   : > { %v718_v31 = vadd.f32 %v717_v29, %v716_v27 }
 0x11c   : > { %v698_v30 = vrot.slane %v697_v28, 1 }
 0x11d   : > { %v719_v34 = vrot.slane %v718_v31, 1 }
 0x11e   : > { %v699_v33 = vadd.f32 %v698_v30, %v697_v28 }
 0x11f   : > { %v720_v37 = vadd.f32 %v719_v34, %v718_v31 }
 0x120   : > { %v700_v36 = vadd.f32 %v699_v33, %v685_v32 }
 0x121   : > { %v721_v38 = vadd.f32 %v720_v37, %v703_v35 }
 0x122   : > { %702 = vst.msk [vmem:[#allocation2] sm:$0x1] %vm701_vm2, %v700_v36 }
 0x123   : > { %722 = vst.msk [vmem:[#allocation3] sm:$0x1] %vm701_vm2, %v721_v38 }
 0x124 PF: > { %p953_p6 = scmp.ne.s32.totalorder %s1102_s15, 1 }
 0x125   : > { %v738_v43 = vlaneseq (!%p953_p6)  ;;  %v954_v58 = vld [vmem:[%s1368_s2] ss:$0 sm:$0xff] (!%p953_p6)  ;;  %vm793_vm3 = vcmask (!%p953_p6), 523264  }
 0x126   : > { %730 = sbr.rel (%p953_p6) target bundleno = 330 (0x14a), region = 48 }
 0x127   : > { %v739_v46 = vshrl.u32 (!%p953_p6), %v738_v43, 7 }
 0x129   : > { %v731_v39 = vld [vmem:[#allocation2] sm:$0x1] (!%p953_p6)  ;;  %v740_v48 = vsub.s32 (!%p953_p6), 0, %v739_v46 }
 0x12a   : > { %v733_v40 = vld [vmem:[#allocation3] sm:$0x1] (!%p953_p6)  ;;  %v732_v41 = vmul.f32 (!%p953_p6), 0.03125, %v731_v39 }
 0x12b   : > { %v734_v42 = vmul.f32 (!%p953_p6), 0.03125, %v733_v40 }
 0x12c   : > { %v735_v44 = vmul.f32 (!%p953_p6), %v732_v41, %v732_v41  ;;  %v741_v49 = vrot.slane (!%p953_p6), %v732_v41, %v740_v48 }
 0x12e   : > { %v736_v45 = vsub.f32 %v734_v42, %v735_v44  ;;  %v743_v50 = vsub.f32 %v1279_v51, %v741_v49  ;;  %v744_v52 = vsub.f32 %v1281_v53, %v741_v49  ;;  %v745_v54 = vsub.f32 %v1283_v1, %v741_v49  ;;  %v955_v51 = vld [vmem:[%s1369_s3] ss:$0 sm:$0xff] }
 0x12f   : > { %v746_v55 = vsub.f32 %v1285_v3, %v741_v49 }
 0x130   : > { %v747_v47 = vadd.f32 1e-05, %v736_v45 }
 0x132   : > { %1086 = vrsqrt.f32 %v747_v47 }
 0x13c   : > { %v1087_v56 = vpop.eup %1086 }
 0x13d   : > { %v753_v57 = vrot.slane %v1087_v56, %v740_v48 }
 0x13f   : > { %v755_v59 = vmul.f32 %v753_v57, %v743_v50  ;;  %v756_v60 = vmul.f32 %v753_v57, %v744_v52  ;;  %v757_v61 = vmul.f32 %v753_v57, %v745_v54  ;;  %v758_v62 = vmul.f32 %v753_v57, %v746_v55 }
 0x141   : > { %v766_v63 = vmul.f32 %v954_v58, %v755_v59  ;;  %v767_v53 = vmul.f32 %v954_v58, %v756_v60  ;;  %v768_v0 = vmul.f32 %v954_v58, %v757_v61  ;;  %v769_v1 = vmul.f32 %v954_v58, %v758_v62 }
 0x143   : > { %v777_v2 = vadd.f32 %v955_v51, %v766_v63  ;;  %v778_v3 = vadd.f32 %v955_v51, %v767_v53  ;;  %v779_v4 = vadd.f32 %v955_v51, %v768_v0  ;;  %v780_v5 = vadd.f32 %v955_v51, %v769_v1 }
 0x145   : > { %vm781_vm4 = vcmp.gt.f32.partialorder %v777_v2, 0.0  ;;  %v785_v6 = vmul.f32 0.2, %v777_v2  ;;  %vm782_vm5 = vcmp.gt.f32.partialorder %v778_v3, 0.0  ;;  %v786_v7 = vmul.f32 0.2, %v778_v3 }
 0x146   : > { %vm783_vm6 = vcmp.gt.f32.partialorder %v779_v4, 0.0  ;;  %v787_v8 = vmul.f32 0.2, %v779_v4  ;;  %vm784_vm7 = vcmp.gt.f32.partialorder %v780_v5, 0.0  ;;  %v788_v9 = vmul.f32 0.2, %v780_v5 }
 0x147   : > { %v789_v10 = vsel %vm781_vm4, %v777_v2, %v785_v6  ;;  %v790_v11 = vsel %vm782_vm5, %v778_v3, %v786_v7 }
 0x148   : > { %794 = vst.msk [vmem:[%s1370_s4] sm:$0xff] %vm793_vm3, %v789_v10  ;;  %795 = vst.msk [vmem:[%s1370_s4 + $0x8] sm:$0xff] %vm793_vm3, %v790_v11  ;;  %v791_v12 = vsel %vm783_vm6, %v779_v4, %v787_v8  ;;  %v792_v13 = vsel %vm784_vm7, %v780_v5, %v788_v9 }
 0x149   : > { %796 = vst.msk [vmem:[%s1370_s4 + $0x10] sm:$0xff] %vm793_vm3, %v791_v12  ;;  %797 = vst.msk [vmem:[%s1370_s4 + $0x18] sm:$0xff] %vm793_vm3, %v792_v13 }
 0x14a PF: > { %s14_s17 = sadd.s32 1, %s1110_s17   ;;  %s1371_s15 = smov %s1106_s16 }
 0x14b   : > { %p11_p7 = scmp.ge.s32.totalorder %s14_s17, 4   ;;  %s1372_s16 = smov %s1374_s18 }
 0x14d   :  { %13 = sbr.rel (!%p11_p7) target bundleno = 2 (0x2), region = 81 }

// kernel: coupled_vae_forward.38
= control target key start
LH: loop header
LB: loop body
LE: loop exit
PB: predicated region body
PF: predicated region fallthrough
CT: control target
= control target key end

     0   :  { %v198_v1 = vmov 0.0   ;;  %v199_v2 = vmov 0   ;;  %vm200_vm0 = vmmov 0   ;;  %vm73_vm1 = vcmask 261120   ;;  %s251_s1 = inlined_call_operand.vmem [shape: bf16[32,384], index: 1, kind: input, shape index: {}]   ;;  %s252_s0 = inlined_call_operand.vmem [shape: bf16[4,32], index: 0, kind: input, shape index: {}]   ;;  %s253_s2 = inlined_call_operand.vmem [shape: f32[1,384], index: 2, kind: input, shape index: {}]   ;;  %s254_s3 = inlined_call_operand.vmem [shape: f32[4,384], index: 3, kind: output, shape index: {}]  }
   0x1   :  { %v190_v0 = vld [vmem:[%s251_s1 + $0x4] ss:$12 sps:$4 sm:$0xff]   ;;  %179 = vmatprep.subr.bf16.mxu1 %v198_v1  ;;  %109 = vmatprep.mubr.bf16.mxu0 %v199_v2  ;;  %v192_v3 = vld [vmem:[%s251_s1] ss:$12 sps:$4 sm:$0xff]   ;;  %v193_v4 = vld [vmem:[%s251_s1 + $0x8] ss:$12 sps:$4 sm:$0xff]   ;;  %v26_v9 = vlaneseq }
   0x2   :  { %183 = vmatprep.mubr.msk.bf16.mxu1 %vm200_vm0, %v198_v1  ;;  %77 = vmatprep.subr.bf16.mxu0 %v190_v0  ;;  %v194_v5 = vld [vmem:[%s251_s1 + $0x1c] ss:$12 sps:$4 sm:$0xff]   ;;  %v196_v6 = vld [vmem:[%s251_s1 + $0x18] ss:$12 sps:$4 sm:$0xff]   ;;  %v197_v7 = vld [vmem:[%s251_s1 + $0x20] ss:$12 sps:$4 sm:$0xff]  }
   0x3   :  { %78 = vmatpush1.bf16.msra.mxu0 %v192_v3  ;;  %180 = vmatpush3.bf16.msra.mxu1 %v193_v4  ;;  %v15_v8 = vld [vmem:[%s252_s0] sm:$0x3]  ;;  %v27_v10 = vshrl.u32 %v26_v9, 7 }
   0x4   :  { %79 = vmatprep.subr.bf16.mxu0 %v194_v5  ;;  %181 = vmatprep.subr.bf16.mxu1 %v198_v1  ;;  %v24_v12 = vld [vmem:[%s253_s2] sm:$0x7] }
   0x5   :  { %v28_v11 = vsub.s32 0, %v27_v10  ;;  %v36_v13 = vsub.s32 2, %v27_v10  ;;  %v32_v14 = vsub.s32 1, %v27_v10 }
   0x7   :  { %80 = vmatpush1.bf16.msra.mxu0 %v196_v6  ;;  %182 = vmatpush3.bf16.msra.mxu1 %v197_v7  ;;  %v29_v15 = vrot.slane %v24_v12, %v28_v11  ;;  %v37_v16 = vrot.slane %v24_v12, %v36_v13  ;;  %v33_v17 = vrot.slane %v24_v12, %v32_v14 }
   0xa   :  { %174 = vmatmul.mubr.msk.bf16.vlgmr.msra.gmra.mrb[0].mxu0 %vm73_vm1, %v15_v8  ;;  %184 = vmatmul.mubr.msk.bf16.vlgmr.msra.gmra.mrb[0].mxu1 %vm73_vm1, %v15_v8 }
  0xdd   :  { %v111_v18 = vpop.f32.mrb[0].mxu0  ;;  %v152_v20 = vpop.f32.mrb[0].mxu1 }
  0xde   :  { %v112_v19 = vadd.f32 %v111_v18, %v29_v15  ;;  %v113_v21 = vpop.f32.mrb[1].mxu0  ;;  %v153_v22 = vadd.f32 %v152_v20, %v37_v16  ;;  %v185_v24 = vpop.f32.mrb[1].mxu1 }
  0xdf   :  { %v114_v23 = vadd.f32 %v113_v21, %v33_v17  ;;  %v115_v25 = vpop.f32.mrb[2].mxu0  ;;  %v155_v26 = vpop.f32.mrb[2].mxu1 }
  0xe0   :  { %v116_v27 = vpop.f32.mrb[3].mxu0  ;;  %163 = vst [vmem:[%s254_s3 + $0x8] sm:$0xf] %v153_v22  ;;  %v186_v29 = vpop.f32.mrb[3].mxu1 }
  0xe1   :  { %v160_v28 = vcombine.low %v112_v19, %v114_v23 }
  0xe3   :  { %162 = vst [vmem:[%s254_s3] sm:$0xff] %v160_v28 }

// kernel: coupled_vae_forward.25
= control target key start
LH: loop header
LB: loop body
LE: loop exit
PB: predicated region body
PF: predicated region fallthrough
CT: control target
= control target key end

     0   :  { %s1478_s15 = smov 0   ;;  %s1480_s16 = smov 0   ;;  %s1736_s0 = inlined_call_operand.vmem [shape: bf16[1,2,1024], index: 0, kind: input, shape index: {}]   ;;  %s1737_s1 = inlined_call_operand.vmem [shape: bf16[1,1024,32], index: 1, kind: input, shape index: {}]   ;;  %s1738_s2 = inlined_call_operand.vmem [shape: f32[1,32], index: 2, kind: input, shape index: {}]   ;;  %s1739_s3 = inlined_call_operand.vmem [shape: f32[1,32], index: 3, kind: input, shape index: {}]   ;;  %s1740_s4 = inlined_call_operand.vmem [shape: f32[1,2,32], index: 4, kind: output, shape index: {}]  }
   0x1   :  { %s1482_s17 = smov 0  }
   0x2 LB: > { %s33_s18 = sadd.s32 1, %s1445_s16  ;;  %p1172_p0 = scmp.ge.s32.totalorder %s1449_s17, 1  ;;  %s1449_s17 = sphi %s1482_s17, %s14_s17   ;;  %s1445_s16 = sphi %s1480_s16, %s1742_s16   ;;  %s1441_s15 = sphi %s1478_s15, %s1741_s15  }
   0x3   : > { %p35_p1 = scmp.ge.s32.totalorder %s33_s18, 2  ;;  %p198_p2 = scmp.lt.s32.totalorder %s1449_s17, 3 }
   0x5   : > { %s1744_s18 = smov (%p35_p1, %s33_s18), 0  ;;  %p199_p3 = pnand %p1172_p0, %p198_p2 }
   0x6   : > { %v1360_v0 = vld [vmem:[%s1737_s1 + $0x40] sm:$0xff] (!%p199_p3)   ;;  %v1364_v4 = vld [vmem:[%s1737_s1 + $0x48] sm:$0xff] (!%p199_p3)   ;;  %v1368_v8 = vld [vmem:[%s1737_s1 + $0x50] sm:$0xff] (!%p199_p3)   ;;  %v393_v28 = vlaneseq (!%p199_p3)  ;;  %v1451_v36 = vmov (!%p199_p3), 1966171168   ;;  %p990_p4 = scmp.eq.s32.totalorder (!%p199_p3), %s1441_s15, 0 }
   0x7   : > { %202 = sbr.rel (%p199_p3) target bundleno = 346 (0x15a), region = 36  ;;  %v1361_v1 = vld [vmem:[%s1737_s1 + $0xc0] sm:$0xff] (!%p199_p3)   ;;  %1246 = vmatprep.subr.bf16.mxu0 (!%p199_p3), %v1360_v0  ;;  %v1365_v5 = vld [vmem:[%s1737_s1 + $0xc8] sm:$0xff] (!%p199_p3)   ;;  %v1369_v9 = vld [vmem:[%s1737_s1 + $0xd0] sm:$0xff] (!%p199_p3)   ;;  %v391_v37 = vunpack.c.l.s4 (!%p199_p3), %v1451_v36 }
   0x8   : > { %v1362_v2 = vld [vmem:[%s1737_s1] sm:$0xff] (!%p199_p3)   ;;  %1268 = vmatprep.subr.bf16.mxu1 (!%p199_p3), %v1361_v1  ;;  %v1366_v6 = vld [vmem:[%s1737_s1 + $0x8] sm:$0xff] (!%p199_p3)   ;;  %v1370_v10 = vld [vmem:[%s1737_s1 + $0x10] sm:$0xff] (!%p199_p3)   ;;  %v1594_v33 = vshrl.u32 (!%p199_p3), %v393_v28, 7 }
   0x9   : > { %v1363_v3 = vld [vmem:[%s1737_s1 + $0x80] sm:$0xff] (!%p199_p3)   ;;  %1247 = vmatpush3.bf16.msra.mxu0 (!%p199_p3), %v1362_v2  ;;  %v1367_v7 = vld [vmem:[%s1737_s1 + $0x88] sm:$0xff] (!%p199_p3)   ;;  %v1371_v11 = vld [vmem:[%s1737_s1 + $0x90] sm:$0xff] (!%p199_p3)   ;;  %v392_v40 = vunpack.c.0.s8 (!%p199_p3), %v391_v37 }
   0xa   : > { %1269 = vmatpush3.bf16.msra.mxu1 (!%p199_p3), %v1363_v3  ;;  %1248 = vmatprep.subr.bf16.mxu0 (!%p199_p3), %v1364_v4  ;;  %v1372_v12 = vld [vmem:[%s1737_s1 + $0x58] sm:$0xff] (!%p199_p3)   ;;  %v1376_v16 = vld [vmem:[%s1737_s1 + $0x60] sm:$0xff] (!%p199_p3)   ;;  %v1380_v20 = vld [vmem:[%s1737_s1 + $0x68] sm:$0xff] (!%p199_p3)  }
   0xb   : > { %1270 = vmatprep.subr.bf16.mxu1 (!%p199_p3), %v1365_v5  ;;  %v1373_v13 = vld [vmem:[%s1737_s1 + $0xd8] sm:$0xff] (!%p199_p3)   ;;  %v1377_v17 = vld [vmem:[%s1737_s1 + $0xe0] sm:$0xff] (!%p199_p3)   ;;  %v1381_v21 = vld [vmem:[%s1737_s1 + $0xe8] sm:$0xff] (!%p199_p3)   ;;  %v1606_v41 = vsub.s32 (!%p199_p3), %v392_v40, %v1594_v33 }
   0xc   : > { %v1374_v14 = vld [vmem:[%s1737_s1 + $0x18] sm:$0xff] (!%p199_p3)   ;;  %v1378_v18 = vld [vmem:[%s1737_s1 + $0x20] sm:$0xff] (!%p199_p3)   ;;  %v1382_v22 = vld [vmem:[%s1737_s1 + $0x28] sm:$0xff] (!%p199_p3)  }
   0xd   : > { %1249 = vmatpush3.bf16.msra.mxu0 (!%p199_p3), %v1366_v6  ;;  %v1375_v15 = vld [vmem:[%s1737_s1 + $0x98] sm:$0xff] (!%p199_p3)   ;;  %v1379_v19 = vld [vmem:[%s1737_s1 + $0xa0] sm:$0xff] (!%p199_p3)   ;;  %v1383_v23 = vld [vmem:[%s1737_s1 + $0xa8] sm:$0xff] (!%p199_p3)  }
   0xe   : > { %1271 = vmatpush3.bf16.msra.mxu1 %v1367_v7  ;;  %1250 = vmatprep.subr.bf16.mxu0 %v1368_v8  ;;  %v1384_v24 = vld [vmem:[%s1737_s1 + $0x70] sm:$0xff]   ;;  %v1388_v29 = vld [vmem:[%s1737_s1 + $0x78] sm:$0xff]   ;;  %v259_v34 = vld [vmem:[%s1736_s0] sm:$0xff]  ;;  %vm995_vm0 = vcmask (%p990_p4), 253952  }
   0xf   : > { %1272 = vmatprep.subr.bf16.mxu1 %v1369_v9  ;;  %v1385_v25 = vld [vmem:[%s1737_s1 + $0xf0] sm:$0xff]   ;;  %v1389_v30 = vld [vmem:[%s1737_s1 + $0xf8] sm:$0xff]   ;;  %v1393_v35 = vld [vmem:[%s1737_s1 + $0x140] sm:$0xff]   ;;  %v389_v39 = vcombine.high %v259_v34, %v259_v34  ;;  %v396_v42 = vrot.slane %v259_v34, %v1606_v41 }
  0x10   : > { %v1386_v26 = vld [vmem:[%s1737_s1 + $0x30] sm:$0xff]   ;;  %v1390_v31 = vld [vmem:[%s1737_s1 + $0x38] sm:$0xff]   ;;  %v1394_v38 = vld [vmem:[%s1737_s1 + $0x1c0] sm:$0xff]  }
  0x11   : > { %1251 = vmatpush3.bf16.msra.mxu0 %v1370_v10  ;;  %v1387_v27 = vld [vmem:[%s1737_s1 + $0xb0] sm:$0xff]   ;;  %v1391_v32 = vld [vmem:[%s1737_s1 + $0xb8] sm:$0xff]   ;;  %v1610_v43 = vrot.slane %v389_v39, %v1606_v41  ;;  %v404_v44 = vcombine.high %v396_v42, %v396_v42  ;;  %v412_v45 = vrot.slane %v396_v42, %v1606_v41  ;;  %v1395_v48 = vld [vmem:[%s1737_s1 + $0x100] sm:$0xff]  }
  0x12   : > { %1273 = vmatpush3.bf16.msra.mxu1 %v1371_v11  ;;  %1252 = vmatprep.subr.bf16.mxu0 %v1372_v12  ;;  %v1397_v51 = vld [vmem:[%s1737_s1 + $0x148] sm:$0xff]   ;;  %v1396_v53 = vld [vmem:[%s1737_s1 + $0x180] sm:$0xff]   ;;  %v1401_v57 = vld [vmem:[%s1737_s1 + $0x150] sm:$0xff]  }
  0x13   : > { %1274 = vmatprep.subr.bf16.mxu1 %v1373_v13  ;;  %v405_v46 = vcombine.high %v1610_v43, %v1610_v43  ;;  %v426_v47 = vrot.slane %v404_v44, %v1606_v41  ;;  %v434_v50 = vcombine.high %v412_v45, %v412_v45  ;;  %v1398_v54 = vld [vmem:[%s1737_s1 + $0x1c8] sm:$0xff]   ;;  %v1402_v59 = vld [vmem:[%s1737_s1 + $0x1d0] sm:$0xff]   ;;  %v1405_v61 = vld [vmem:[%s1737_s1 + $0x158] sm:$0xff]   ;;  %v1452_v44 = vmov (%p990_p4), 0.0  }
  0x14   : > { %v1399_v56 = vld [vmem:[%s1737_s1 + $0x108] sm:$0xff]   ;;  %v1403_v60 = vld [vmem:[%s1737_s1 + $0x110] sm:$0xff]   ;;  %v1406_v63 = vld [vmem:[%s1737_s1 + $0x1d8] sm:$0xff]   ;;  %996 = vst.msk [vmem:[#allocation2] sm:$0x1] (%p990_p4), %vm995_vm0, %v1452_v44 }
  0x15   : > { %1253 = vmatpush3.bf16.msra.mxu0 %v1374_v14  ;;  %v433_v49 = vrot.slane %v405_v46, %v1606_v41  ;;  %862 = vmatprep.mubr.bf16.mxu0 %v426_v47  ;;  %v436_v52 = vcombine.high %v426_v47, %v426_v47  ;;  %v1400_v58 = vld [vmem:[%s1737_s1 + $0x188] sm:$0xff]   ;;  %v1404_v62 = vld [vmem:[%s1737_s1 + $0x190] sm:$0xff]   ;;  %v1407_v0 = vld [vmem:[%s1737_s1 + $0x118] sm:$0xff]   ;;  %997 = vst.msk [vmem:[#allocation3] sm:$0x1] (%p990_p4), %vm995_vm0, %v1452_v44 }
  0x16   : > { %1275 = vmatpush3.bf16.msra.mxu1 %v1375_v15  ;;  %1254 = vmatprep.subr.bf16.mxu0 %v1376_v16  ;;  %v1409_v1 = vld [vmem:[%s1737_s1 + $0x160] sm:$0xff]   ;;  %v1408_v2 = vld [vmem:[%s1737_s1 + $0x198] sm:$0xff]   ;;  %v1413_v5 = vld [vmem:[%s1737_s1 + $0x168] sm:$0xff]  }
  0x17   : > { %1276 = vmatprep.subr.bf16.mxu1 %v1377_v17  ;;  %v437_v55 = vcombine.high %v433_v49, %v433_v49  ;;  %902 = vmatprep.mubr.bf16.mxu1 %v436_v52  ;;  %v1410_v3 = vld [vmem:[%s1737_s1 + $0x1e0] sm:$0xff]   ;;  %v1414_v7 = vld [vmem:[%s1737_s1 + $0x1e8] sm:$0xff]   ;;  %v1417_v9 = vld [vmem:[%s1737_s1 + $0x170] sm:$0xff]   ;;  %v419_v17 = vrot.slane %v1610_v43, %v1606_v41 }
  0x18   : > { %v1411_v4 = vld [vmem:[%s1737_s1 + $0x120] sm:$0xff]   ;;  %v1415_v8 = vld [vmem:[%s1737_s1 + $0x128] sm:$0xff]   ;;  %v1418_v11 = vld [vmem:[%s1737_s1 + $0x1f0] sm:$0xff]  }
  0x19   : > { %1255 = vmatpush3.bf16.msra.mxu0 %v1378_v18  ;;  %v1412_v6 = vld [vmem:[%s1737_s1 + $0x1a0] sm:$0xff]   ;;  %v1416_v10 = vld [vmem:[%s1737_s1 + $0x1a8] sm:$0xff]   ;;  %v1419_v12 = vld [vmem:[%s1737_s1 + $0x130] sm:$0xff]  }
  0x1a   : > { %1277 = vmatpush3.bf16.msra.mxu1 %v1379_v19  ;;  %1256 = vmatprep.subr.bf16.mxu0 %v1380_v20  ;;  %v1421_v13 = vld [vmem:[%s1737_s1 + $0x178] sm:$0xff]   ;;  %v1420_v14 = vld [vmem:[%s1737_s1 + $0x1b0] sm:$0xff]   ;;  %v435_v19 = vcombine.high %v419_v17, %v419_v17 }
  0x1b   : > { %1278 = vmatprep.subr.bf16.mxu1 %v1381_v21  ;;  %v1422_v15 = vld [vmem:[%s1737_s1 + $0x1f8] sm:$0xff]  }
  0x1c   : > { %v1423_v16 = vld [vmem:[%s1737_s1 + $0x138] sm:$0xff]  }
  0x1d   : > { %1257 = vmatpush3.bf16.msra.mxu0 %v1382_v22  ;;  %v1424_v18 = vld [vmem:[%s1737_s1 + $0x1b8] sm:$0xff]  }
  0x1e   : > { %1279 = vmatpush3.bf16.msra.mxu1 %v1383_v23  ;;  %1258 = vmatprep.subr.bf16.mxu0 %v1384_v24 }
  0x1f   : > { %1280 = vmatprep.subr.bf16.mxu1 %v1385_v25 }
  0x21   : > { %1259 = vmatpush3.bf16.msra.mxu0 %v1386_v26 }
  0x22   : > { %1281 = vmatpush3.bf16.msra.mxu1 %v1387_v27  ;;  %1260 = vmatprep.subr.bf16.mxu0 %v1388_v29 }
  0x23   : > { %1282 = vmatprep.subr.bf16.mxu1 %v1389_v30 }
  0x25   : > { %1261 = vmatpush3.bf16.msra.mxu0 %v1390_v31 }
  0x26   : > { %1283 = vmatpush3.bf16.msra.mxu1 %v1391_v32  ;;  %1290 = vmatprep.subr.bf16.mxu0 %v1393_v35 }
  0x27   : > { %1312 = vmatprep.subr.bf16.mxu1 %v1394_v38 }
  0x28   : > { %863 = vmatmul.mubr.bf16.vlgmr.msra.gmra.mrb[0].mxu0 %v412_v45 }
  0x29   : > { %1291 = vmatpush3.bf16.msra.mxu0 %v1395_v48  ;;  %903 = vmatmul.mubr.bf16.vlgmr.msra.gmra.mrb[0].mxu1 %v434_v50 }
  0x2a   : > { %1292 = vmatprep.subr.bf16.mxu0 %v1397_v51  ;;  %1313 = vmatpush3.bf16.msra.mxu1 %v1396_v53 }
  0x2b   : > { %942 = vmatprep.mubr.bf16.mxu0 %v433_v49  ;;  %1314 = vmatprep.subr.bf16.mxu1 %v1398_v54 }
  0x2c   : > { %982 = vmatprep.mubr.bf16.mxu1 %v437_v55 }
  0x2d   : > { %1293 = vmatpush3.bf16.msra.mxu0 %v1399_v56 }
  0x2e   : > { %1294 = vmatprep.subr.bf16.mxu0 %v1401_v57  ;;  %1315 = vmatpush3.bf16.msra.mxu1 %v1400_v58 }
  0x2f   : > { %1316 = vmatprep.subr.bf16.mxu1 %v1402_v59 }
  0x31   : > { %1295 = vmatpush3.bf16.msra.mxu0 %v1403_v60 }
  0x32   : > { %1296 = vmatprep.subr.bf16.mxu0 %v1405_v61  ;;  %1317 = vmatpush3.bf16.msra.mxu1 %v1404_v62 }
  0x33   : > { %1318 = vmatprep.subr.bf16.mxu1 %v1406_v63 }
  0x35   : > { %1297 = vmatpush3.bf16.msra.mxu0 %v1407_v0 }
  0x36   : > { %1298 = vmatprep.subr.bf16.mxu0 %v1409_v1  ;;  %1319 = vmatpush3.bf16.msra.mxu1 %v1408_v2 }
  0x37   : > { %1320 = vmatprep.subr.bf16.mxu1 %v1410_v3 }
  0x39   : > { %1299 = vmatpush3.bf16.msra.mxu0 %v1411_v4 }
  0x3a   : > { %1300 = vmatprep.subr.bf16.mxu0 %v1413_v5  ;;  %1321 = vmatpush3.bf16.msra.mxu1 %v1412_v6 }
  0x3b   : > { %1322 = vmatprep.subr.bf16.mxu1 %v1414_v7 }
  0x3d   : > { %1301 = vmatpush3.bf16.msra.mxu0 %v1415_v8 }
  0x3e   : > { %1302 = vmatprep.subr.bf16.mxu0 %v1417_v9  ;;  %1323 = vmatpush3.bf16.msra.mxu1 %v1416_v10 }
  0x3f   : > { %1324 = vmatprep.subr.bf16.mxu1 %v1418_v11 }
  0x41   : > { %1303 = vmatpush3.bf16.msra.mxu0 %v1419_v12 }
  0x42   : > { %1304 = vmatprep.subr.bf16.mxu0 %v1421_v13  ;;  %1325 = vmatpush3.bf16.msra.mxu1 %v1420_v14 }
  0x43   : > { %1326 = vmatprep.subr.bf16.mxu1 %v1422_v15 }
  0x45   : > { %1305 = vmatpush3.bf16.msra.mxu0 %v1423_v16 }
  0x46   : > { %1327 = vmatpush3.bf16.msra.mxu1 %v1424_v18 }
  0x48   : > { %943 = vmatmul.mubr.bf16.vlgmr.msra.gmra.mrb[4].mxu0 %v419_v17 }
  0x49   : > { %983 = vmatmul.mubr.bf16.vlgmr.msra.gmra.mrb[4].mxu1 %v435_v19 }
  0xfb   : > { %v1262_v20 = vpop.f32.mrb[0].mxu0 }
  0xfc   : > { %v1263_v21 = vpop.f32.mrb[1].mxu0  ;;  %v1284_v22 = vpop.f32.mrb[0].mxu1 }
  0xfd   : > { %v1264_v23 = vadd.f32 %v1263_v21, %v1262_v20  ;;  %v1265_v24 = vpop.f32.mrb[2].mxu0  ;;  %v1285_v25 = vpop.f32.mrb[1].mxu1 }
  0xfe   : > { %v1266_v26 = vpop.f32.mrb[3].mxu0  ;;  %v1286_v27 = vadd.f32 %v1285_v25, %v1284_v22  ;;  %v1287_v28 = vpop.f32.mrb[2].mxu1 }
  0xff   : > { %v1288_v29 = vpop.f32.mrb[3].mxu1 }
 0x100   : > { %v905_v30 = vadd.f32 %v1286_v27, %v1264_v23 }
 0x11b   : > { %v1306_v31 = vpop.f32.mrb[4].mxu0  ;;  %994 = sbr.rel (!%p990_p4) target bundleno = 290 (0x122), region = 40 }
 0x11c   : > { %v1307_v32 = vpop.f32.mrb[5].mxu0  ;;  %v1328_v34 = vpop.f32.mrb[4].mxu1 }
 0x11d   : > { %v1308_v35 = vadd.f32 %v1307_v32, %v1306_v31  ;;  %v1309_v36 = vpop.f32.mrb[6].mxu0  ;;  %v1329_v37 = vpop.f32.mrb[5].mxu1 }
 0x11e   : > { %v1310_v38 = vpop.f32.mrb[7].mxu0  ;;  %v1330_v40 = vadd.f32 %v1329_v37, %v1328_v34  ;;  %v1331_v41 = vpop.f32.mrb[6].mxu1 }
 0x11f   : > { %v945_v39 = vadd.f32 %v1308_v35, %v905_v30  ;;  %v1332_v42 = vpop.f32.mrb[7].mxu1 }
 0x121   : > { %v985_v43 = vadd.f32 %v1330_v40, %v945_v39 }
 0x122 PF: > { %p1238_p5 = scmp.ne.s32.totalorder %s1441_s15, 0 }
 0x123   : > { %vm1002_vm1 = vcmask (!%p1238_p5), 254976   ;;  %v1014_v45 = vmul.f32 (!%p1238_p5), %v985_v43, %v985_v43  ;;  %v1001_v57 = vld [vmem:[#allocation2] sm:$0x1] (!%p1238_p5)  ;;  %v1013_v60 = vld [vmem:[#allocation3] sm:$0x1] (!%p1238_p5)  ;;  %vm1011_vm2 = vcmask (!%p1238_p5), 253952  }
 0x124   : > { %1000 = sbr.rel (%p1238_p5) target bundleno = 309 (0x135), region = 44  ;;  %v1003_v46 = vsel (!%p1238_p5), %vm1002_vm1, %v985_v43, 0.0  ;;  %1024 = vst.msk [vmem:[%s1740_s4] sm:$0x3] (!%p1238_p5), %vm1002_vm1, %v985_v43 }
 0x125   : > { %v1004_v47 = vrot.slane (!%p1238_p5), %v1003_v46, 4  ;;  %v1015_v48 = vsel (!%p1238_p5), %vm1002_vm1, %v1014_v45, 0.0 }
 0x126   : > { %v1016_v49 = vrot.slane (!%p1238_p5), %v1015_v48, 4 }
 0x127   : > { %v1005_v50 = vadd.f32 (!%p1238_p5), %v1004_v47, %v1003_v46 }
 0x128   : > { %v1017_v51 = vadd.f32 (!%p1238_p5), %v1016_v49, %v1015_v48 }
 0x129   : > { %v1006_v52 = vrot.slane (!%p1238_p5), %v1005_v50, 2 }
 0x12a   : > { %v1018_v53 = vrot.slane (!%p1238_p5), %v1017_v51, 2 }
 0x12b   : > { %v1007_v54 = vadd.f32 %v1006_v52, %v1005_v50 }
 0x12c   : > { %v1019_v55 = vadd.f32 %v1018_v53, %v1017_v51 }
 0x12d   : > { %v1008_v56 = vrot.slane %v1007_v54, 1 }
 0x12e   : > { %v1020_v58 = vrot.slane %v1019_v55, 1 }
 0x12f   : > { %v1009_v59 = vadd.f32 %v1008_v56, %v1007_v54 }
 0x130   : > { %v1021_v61 = vadd.f32 %v1020_v58, %v1019_v55 }
 0x131   : > { %v1010_v62 = vadd.f32 %v1009_v59, %v1001_v57 }
 0x132   : > { %v1022_v63 = vadd.f32 %v1021_v61, %v1013_v60 }
 0x133   : > { %1012 = vst.msk [vmem:[#allocation2] sm:$0x1] %vm1011_vm2, %v1010_v62 }
 0x134   : > { %1023 = vst.msk [vmem:[#allocation3] sm:$0x1] %vm1011_vm2, %v1022_v63 }
 0x135 PF: > { %p1239_p6 = scmp.ne.s32.totalorder %s1441_s15, 1 }
 0x136   : > { %v1038_v7 = vsub.s32 (!%p1239_p6), 0, %v1594_v33  ;;  %v1240_v12 = vld [vmem:[%s1738_s2] ss:$0 sm:$0xff] (!%p1239_p6)  ;;  %vm1070_vm4 = vcmask (!%p1239_p6), 254976  }
 0x137   : > { %1028 = sbr.rel (%p1239_p6) target bundleno = 346 (0x15a), region = 48  ;;  %v1241_v14 = vld [vmem:[%s1739_s3] ss:$0 sm:$0xff] (!%p1239_p6) }
 0x13a   : > { %v1029_v0 = vld [vmem:[#allocation2] sm:$0x1] (!%p1239_p6) }
 0x13b   : > { %v1031_v1 = vld [vmem:[#allocation3] sm:$0x1] (!%p1239_p6)  ;;  %v1030_v2 = vmul.f32 (!%p1239_p6), 0.5, %v1029_v0 }
 0x13c   : > { %v1032_v3 = vmul.f32 (!%p1239_p6), 0.5, %v1031_v1 }
 0x13d   : > { %v1033_v4 = vmul.f32 (!%p1239_p6), %v1030_v2, %v1030_v2  ;;  %v1039_v8 = vrot.slane (!%p1239_p6), %v1030_v2, %v1038_v7 }
 0x13f   : > { %v1034_v5 = vsub.f32 %v1032_v3, %v1033_v4  ;;  %v1041_v9 = vsub.f32 %v985_v43, %v1039_v8 }
 0x141   : > { %v1042_v6 = vadd.f32 1e-05, %v1034_v5 }
 0x143   : > { %1425 = vrsqrt.f32 %v1042_v6 }
 0x14d   : > { %v1426_v10 = vpop.eup %1425 }
 0x14e   : > { %v1048_v11 = vrot.slane %v1426_v10, %v1038_v7 }
 0x150   : > { %v1050_v13 = vmul.f32 %v1048_v11, %v1041_v9 }
 0x152   : > { %v1058_v15 = vmul.f32 %v1240_v12, %v1050_v13 }
 0x154   : > { %v1066_v16 = vadd.f32 %v1241_v14, %v1058_v15 }
 0x156   : > { %vm1067_vm3 = vcmp.gt.f32.partialorder %v1066_v16, 0.0  ;;  %v1068_v17 = vmul.f32 0.2, %v1066_v16 }
 0x158   : > { %v1069_v18 = vsel %vm1067_vm3, %v1066_v16, %v1068_v17 }
 0x159   : > { %1071 = vst.msk [vmem:[%s1740_s4] sm:$0x3] %vm1070_vm4, %v1069_v18 }
 0x15a PF: > { %s14_s17 = sadd.s32 1, %s1449_s17   ;;  %s1741_s15 = smov %s1445_s16 }
 0x15b   : > { %p11_p7 = scmp.ge.s32.totalorder %s14_s17, 4   ;;  %s1742_s16 = smov %s1744_s18 }
 0x15d   :  { %13 = sbr.rel (!%p11_p7) target bundleno = 2 (0x2), region = 81 }

// kernel: coupled_vae_forward.40
= control target key start
LH: loop header
LB: loop body
LE: loop exit
PB: predicated region body
PF: predicated region fallthrough
CT: control target
= control target key end

     0   :  { %12 = vsyncpa [#allocation4], 0  ;;  %s845_s21 = smov 0   ;;  %s995_s0 = inlined_call_operand.vmem [shape: f32[9,4,384], index: 0, kind: input, shape index: {}]   ;;  %s996_s1 = inlined_call_operand.vmem [shape: f32[4,128], index: 1, kind: input, shape index: {}]   ;;  %s997_s2 = inlined_call_operand.vmem [shape: s32[4,1], index: 2, kind: input, shape index: {}]   ;;  %s998_s3 = inlined_call_operand.vmem [shape: bf16[128,384], index: 3, kind: input, shape index: {}]   ;;  %s999_s4 = inlined_call_operand.vmem [shape: f32[1,384], index: 4, kind: input, shape index: {}]   ;;  %s1000_s5 = inlined_call_operand.vmem [shape: f32[9,4,128], index: 5, kind: output, shape index: {0}]   ;;  %s1001_s6 = inlined_call_operand.hbm [shape: f32[4,128], index: 6, kind: output, shape index: {1}]  }
   0x1 LB: > { %s851_s22 = sadd.s32 4294967295, %s804_s21   ;;  %p644_p0 = scmp.ge.s32.totalorder %s804_s21, 1  ;;  %s804_s21 = sphi %s845_s21, %s18_s21  }
   0x2   : > { %p211_p1 = scmp.lt.s32.totalorder %s804_s21, 10 }
   0x4   : > { %p212_p2 = pnand %p644_p0, %p211_p1 }
   0x5   : > { %p240_p3 = scmp.lt.s32.totalorder (!%p212_p2), %s851_s22, 8  ;;  %p647_p4 = scmp.ne.s32.totalorder (!%p212_p2), %s851_s22, 0 }
   0x6   : > { %215 = sbr.rel (%p212_p2) target bundleno = 337 (0x151), region = 40 }
   0xd   : > { %s241_s23 = scalar_select %p240_p3, %s851_s22, 8 }
   0xe   : > { %253 = sbr.rel (%p647_p4) target bundleno = 21 (0x15), region = 44  ;;  %v254_v0 = vld [vmem:[%s996_s1] sm:$0xf] (!%p647_p4) }
   0xf   : > { %s706_s24 = smul.u32 12, %s241_s23  ;;  %s646_s25 = sshll.u32 %s241_s23, 2  ;;  %255 = vst [vmem:[#allocation2] sm:$0xf] (!%p647_p4), %v254_v0 }
  0x10   : > { %s860_s28 = scalar_lea.vmem %s1000_s5, %s646_s25 }
  0x11   : > { %s865_s7 = scalar_lea.vmem %s995_s0, %s706_s24 }
  0x15 PF: > { %v726_v1 = vld [vmem:[%s998_s3 + $0x4] ss:$12 sps:$4 sm:$0xff]   ;;  %v728_v2 = vld [vmem:[%s998_s3] ss:$12 sps:$4 sm:$0xff]   ;;  %v806_v3 = vmov 0.0   ;;  %v807_v4 = vmov 0   ;;  %v541_v17 = vstv %s851_s22  ;;  %v294_v33 = vlaneseq }
  0x16   : > { %686 = vmatprep.subr.bf16.mxu1 %v806_v3  ;;  %469 = vmatprep.mubr.bf16.mxu0 %v807_v4  ;;  %v729_v5 = vld [vmem:[%s998_s3 + $0x1c] ss:$12 sps:$4 sm:$0xff]   ;;  %vm808_vm0 = vmmov 0   ;;  %v731_v6 = vld [vmem:[%s998_s3 + $0x18] ss:$12 sps:$4 sm:$0xff]   ;;  %s809_s24 = smov [#allocation3]  }
  0x17   : > { %437 = vmatprep.subr.bf16.mxu0 %v726_v1  ;;  %702 = vmatprep.mubr.msk.bf16.mxu1 %vm808_vm0, %v806_v3  ;;  %v732_v7 = vld [vmem:[%s998_s3 + $0x34] ss:$12 sps:$4 sm:$0xff]   ;;  %v734_v8 = vld [vmem:[%s998_s3 + $0x30] ss:$12 sps:$4 sm:$0xff]   ;;  %v735_v9 = vld [vmem:[%s998_s3 + $0x4c] ss:$12 sps:$4 sm:$0xff]  }
  0x18   : > { %438 = vmatpush1.bf16.msra.mxu0 %v728_v2  ;;  %725 = vset.pattern.permute.xlu0 %v807_v4  ;;  %v737_v10 = vld [vmem:[%s998_s3 + $0x48] ss:$12 sps:$4 sm:$0xff]   ;;  %v738_v12 = vld [vmem:[%s998_s3 + $0x64] ss:$12 sps:$4 sm:$0xff]   ;;  %v751_v13 = vld [vmem:[%s998_s3 + $0x20] ss:$12 sps:$4 sm:$0xff]  }
  0x19   : > { %439 = vmatprep.subr.bf16.mxu0 %v729_v5  ;;  %v749_v11 = vld [vmem:[%s998_s3 + $0x8] ss:$12 sps:$4 sm:$0xff]   ;;  %v740_v14 = vld [vmem:[%s998_s3 + $0x60] ss:$12 sps:$4 sm:$0xff]   ;;  %v752_v16 = vld [vmem:[%s998_s3 + $0x38] ss:$12 sps:$4 sm:$0xff]  }
  0x1a   : > { %687 = vmatpush3.bf16.msra.mxu1 %v749_v11  ;;  %v741_v15 = vld [vmem:[%s998_s3 + $0x7c] ss:$12 sps:$4 sm:$0xff]   ;;  %v743_v18 = vld [vmem:[%s998_s3 + $0x78] ss:$12 sps:$4 sm:$0xff]   ;;  %v540_v19 = vld [vmem:[%s997_s2] sm:$0xf] }
  0x1b   : > { %688 = vmatprep.subr.bf16.mxu1 %v806_v3  ;;  %v744_v20 = vld [vmem:[%s998_s3 + $0x94] ss:$12 sps:$4 sm:$0xff]   ;;  %vm542_vm1 = vcmp.gt.s32.totalorder %v540_v19, %v541_v17  ;;  %v753_v21 = vld [vmem:[%s998_s3 + $0x50] ss:$12 sps:$4 sm:$0xff]   ;;  %v747_v25 = vld [vmem:[%s998_s3 + $0xac] ss:$12 sps:$4 sm:$0xff]  }
  0x1c   : > { %440 = vmatpush1.bf16.msra.mxu0 %v731_v6  ;;  %v672_v22 = vsel %vm542_vm1, 1.0, %v806_v3  ;;  %v746_v24 = vld [vmem:[%s998_s3 + $0x90] ss:$12 sps:$4 sm:$0xff]   ;;  %v754_v26 = vld [vmem:[%s998_s3 + $0x68] ss:$12 sps:$4 sm:$0xff]   ;;  %v295_v34 = vshrl.u32 %v294_v33, 7 }
  0x1d   : > { %441 = vmatprep.subr.bf16.mxu0 %v732_v7  ;;  %v551_v23 = vsub.f32 1.0, %v672_v22  ;;  %547 = vperm.xlu0 %725, %v672_v22   ;;  %v750_v27 = vld [vmem:[%s998_s3 + $0xa8] ss:$12 sps:$4 sm:$0xff]   ;;  %v945_v28 = vld [vmem:[#allocation2] sm:$0xf]  ;;  %s577_s25 = sshll.u32 %s809_s24, 4  ;;  %s578_s25 = int_to_ptr.vmem [resolvable:$true] %s577_s25 }
  0x1e   : > { %689 = vmatpush3.bf16.msra.mxu1 %v751_v13  ;;  %v755_v29 = vld [vmem:[%s998_s3 + $0x80] ss:$12 sps:$4 sm:$0xff]   ;;  %v259_v30 = vpack.c.bf16 %v945_v28, %v945_v28  ;;  %v756_v31 = vld [vmem:[%s998_s3 + $0x98] ss:$12 sps:$4 sm:$0xff]   ;;  %v757_v32 = vld [vmem:[%s998_s3 + $0xb0] ss:$12 sps:$4 sm:$0xff]   ;;  %p775_p9 = scmp.lt.s32.totalorder %s578_s25, %s578_s25 }
  0x1f   : > { %690 = vmatprep.subr.bf16.mxu1 %v806_v3  ;;  %v296_v35 = vsub.s32 0, %v295_v34  ;;  %v292_v36 = vld [vmem:[%s999_s4] sm:$0x7]  ;;  %v300_v37 = vsub.s32 1, %v295_v34  ;;  %v304_v60 = vsub.s32 2, %v295_v34  ;;  %p711_p5 = scmp.eq.s32.totalorder %s851_s22, 8 }
  0x20   : > { %442 = vmatpush1.bf16.msra.mxu0 %v734_v8  ;;  %v256_v38 = vld [vmem:[%s865_s7] sm:$0xff]  ;;  %v257_v2 = vld [vmem:[%s865_s7 + $0x8] sm:$0xf]  ;;  %s768_s7 = scalar_lea.vmem %s578_s25, 64 }
  0x21   : > { %443 = vmatprep.subr.bf16.mxu0 %v735_v9  ;;  %554 = vperm.xlu0 %725, %v551_v23   ;;  %v297_v39 = vrot.slane %v292_v36, %v296_v35  ;;  %v301_v40 = vrot.slane %v292_v36, %v300_v37  ;;  %v525_v42 = vrot.slane %v256_v38, 4  ;;  %v305_v61 = vrot.slane %v292_v36, %v304_v60  ;;  %p769_p6 = scmp.ne.s32.totalorder %s578_s25, %s768_s7  ;;  %p776_p10 = scmp.lt.s32.totalorder %s768_s7, %s768_s7 }
  0x22   : > { %691 = vmatpush3.bf16.msra.mxu1 %v752_v16 }
  0x23   : > { %692 = vmatprep.subr.bf16.mxu1 %v806_v3  ;;  %p770_p7 = pnand %p769_p6, %p711_p5  ;;  %p777_p11 = por %p776_p10, %p775_p9 }
  0x24   : > { %444 = vmatpush1.bf16.msra.mxu0 %v737_v10 }
  0x25   : > { %445 = vmatprep.subr.bf16.mxu0 %v738_v12  ;;  %p771_p8 = pneg %p770_p7 }
  0x26   : > { %693 = vmatpush3.bf16.msra.mxu1 %v753_v21 }
  0x27   : > { %694 = vmatprep.subr.bf16.mxu1 %v806_v3  ;;  %p778_p12 = pnand %p777_p11, %p771_p8 }
  0x28   : > { %446 = vmatpush1.bf16.msra.mxu0 %v740_v14 }
  0x29   : > { %447 = vmatprep.subr.bf16.mxu0 %v741_v15 }
  0x2a   : > { %695 = vmatpush3.bf16.msra.mxu1 %v754_v26 }
  0x2b   : > { %696 = vmatprep.subr.bf16.mxu1 %v806_v3 }
  0x2c   : > { %448 = vmatpush1.bf16.msra.mxu0 %v743_v18 }
  0x2d   : > { %449 = vmatprep.subr.bf16.mxu0 %v744_v20 }
  0x2e   : > { %697 = vmatpush3.bf16.msra.mxu1 %v755_v29 }
  0x2f   : > { %698 = vmatprep.subr.bf16.mxu1 %v806_v3 }
  0x30   : > { %450 = vmatpush1.bf16.msra.mxu0 %v746_v24 }
  0x31   : > { %451 = vmatprep.subr.bf16.mxu0 %v747_v25 }
  0x32   : > { %699 = vmatpush3.bf16.msra.mxu1 %v756_v31 }
  0x33   : > { %700 = vmatprep.subr.bf16.mxu1 %v806_v3 }
  0x34   : > { %452 = vmatpush1.bf16.msra.mxu0 %v750_v27 }
  0x36   : > { %701 = vmatpush3.bf16.msra.mxu1 %v757_v32 }
  0x37   : > { %470 = vmatmul.mubr.bf16.vlgmr.msra.gmra.mrb[0].mxu0 %v259_v30 }
  0x39   : > { %703 = vmatmul.mubr.bf16.vlgmr.msra.gmra.mrb[0].mxu1 %v259_v30 }
  0x9c   : > { %v548_v6 = vpop.permute.xlu0 %547 }
  0xa0   : > { %v555_v11 = vpop.permute.xlu0 %554 }
  0xa1   : > { %v557_v14 = vmul.f32 %v555_v11, %v945_v28 }
 0x10a   : > { %v471_v41 = vpop.f32.mrb[0].mxu0 }
 0x10b   : > { %v472_v43 = vadd.f32 %v471_v41, %v297_v39  ;;  %v473_v44 = vpop.f32.mrb[1].mxu0 }
 0x10c   : > { %v474_v45 = vadd.f32 %v473_v44, %v301_v40  ;;  %v475_v46 = vpop.f32.mrb[2].mxu0  ;;  %v512_v53 = vpop.f32.mrb[0].mxu1 }
 0x10d   : > { %v518_v47 = vadd.f32 %v472_v43, %v256_v38  ;;  %v476_v48 = vpop.f32.mrb[3].mxu0  ;;  %v704_v54 = vpop.f32.mrb[1].mxu1  ;;  %v513_v0 = vadd.f32 %v512_v53, %v305_v61 }
 0x10e   : > { %v527_v49 = vadd.f32 %v525_v42, %v474_v45  ;;  %v515_v56 = vpop.f32.mrb[2].mxu1 }
 0x10f   : > { %v519_v50 = vsub.f32 0.0, %v518_v47  ;;  %v705_v57 = vpop.f32.mrb[3].mxu1 }
 0x110   : > { %v528_v52 = vsub.f32 0.0, %v527_v49 }
 0x111   : > { %v520_v51 = vmul.f32 1.442695, %v519_v50 }
 0x112   : > { %v529_v55 = vmul.f32 1.442695, %v528_v52 }
 0x113   : > { %758 = vpow2.f32 %v520_v51 }
 0x114   : > { %760 = vpow2.f32 %v529_v55 }
 0x11d   : > { %v759_v58 = vpop.eup %758 }
 0x11e   : > { %v522_v59 = vadd.f32 1.0, %v759_v58  ;;  %v761_v62 = vpop.eup %760 }
 0x11f   : > { %v531_v63 = vadd.f32 1.0, %v761_v62 }
 0x120   : > { %762 = vrcp.f32 %v522_v59 }
 0x121   : > { %764 = vrcp.f32 %v531_v63 }
 0x12a   : > { %v763_v1 = vpop.eup %762 }
 0x12b   : > { %v533_v3 = vmul.f32 %v763_v1, %v513_v0  ;;  %v765_v5 = vpop.eup %764 }
 0x12c   : > { %v536_v7 = vsub.f32 1.0, %v765_v5  ;;  %v538_v10 = vmul.f32 %v765_v5, %v945_v28 }
 0x12d   : > { %v534_v4 = vadd.f32 %v533_v3, %v257_v2 }
 0x12f   : > { %766 = vtanh.f32 %v534_v4 }
 0x139   : > { %v767_v8 = vpop.eup %766 }
 0x13a   : > { %v537_v9 = vmul.f32 %v767_v8, %v536_v7 }
 0x13c   : > { %v539_v12 = vadd.f32 %v538_v10, %v537_v9 }
 0x13e   : > { %v550_v13 = vmul.f32 %v548_v6, %v539_v12 }
 0x140   : > { %v558_v15 = vadd.f32 %v557_v14, %v550_v13 }
 0x142   : > { %559 = vst [vmem:[#allocation2] sm:$0xf] %v558_v15  ;;  %v560_v16 = vmul.f32 %v558_v15, %v548_v6  ;;  %562 = vst [vmem:[#allocation3] sm:$0xf] %v558_v15 }
 0x143   : > { %781 = shalt.err (!%p778_p12)
}
 0x144   : > { %s782_s29 = scalar_lea.hbm %s1001_s6, 64 }
 0x145   : > { %p783_p13 = scmp.ne.s32.totalorder %s1001_s6, %s782_s29  ;;  %p788_p2 = scmp.lt.u32.totalorder %s782_s29, %s1001_s6 }
 0x147   : > { %p784_p0 = pnand %p783_p13, %p711_p5 }
 0x149   : > { %p785_p1 = pneg %p784_p0 }
 0x14b   : > { %p790_p3 = pnand %p788_p2, %p785_p1 }
 0x14d   : > { %793 = shalt.err (!%p790_p3)
}
 0x14e   : > { %708 = dma.vmem_to_hbm [thread:$0]  (%p711_p5), %s578_s25, 64, %s1001_s6, [#allocation4]   ;;  %561 = vst [vmem:[%s860_s28] sm:$0xf] %v560_v16 }
 0x14f   : > { %799 = dma.done.wait (%p711_p5), [#allocation4], 64  }
 0x150   : > { %801 = vsyncadd (%p711_p5), [#allocation4], 4294967232 }
 0x151 PF: > { %s18_s21 = sadd.s32 1, %s804_s21  }
 0x152   : > { %p15_p4 = scmp.ge.s32.totalorder %s18_s21, 11  }
 0x154   :  { %17 = sbr.rel (!%p15_p4) target bundleno = 1 (0x1), region = 83 }
 0x15b   :  { %597 = vsyncpa [#allocation4], 1 }
 0x15c   :  { %599 = vsyncpa [#allocation4 + $0x1], 1 }

// kernel: coupled_vae_forward.41
= control target key start
LH: loop header
LB: loop body
LE: loop exit
PB: predicated region body
PF: predicated region fallthrough
CT: control target
= control target key end

     0   :  { %vm52_vm0 = vcmask 261120   ;;  %s186_s1 = inlined_call_operand.vmem [shape: bf16[32,128], index: 1, kind: input, shape index: {}]   ;;  %s187_s0 = inlined_call_operand.vmem [shape: bf16[32,32], index: 0, kind: input, shape index: {}]   ;;  %s188_s2 = inlined_call_operand.vmem [shape: f32[1,128], index: 2, kind: input, shape index: {}]   ;;  %s189_s3 = inlined_call_operand.vmem [shape: f32[32,128], index: 3, kind: output, shape index: {}]  }
   0x1   :  { %v135_v0 = vld [vmem:[%s186_s1] sm:$0xff]   ;;  %v136_v1 = vld [vmem:[%s186_s1 + $0x8] sm:$0xff]  }
   0x2   :  { %127 = vmatprep.subr.bf16.mxu0 %v135_v0  ;;  %v137_v2 = vld [vmem:[%s187_s0] sm:$0xff]   ;;  %v138_v3 = vld [vmem:[%s187_s0 + $0x8] sm:$0xff]  }
   0x3   :  { %128 = vmatpush3.bf16.msra.mxu0 %v135_v0  ;;  %131 = vmatprep.mubr.msk.bf16.mxu0 %vm52_vm0, %v137_v2  ;;  %v116_v4 = vld [vmem:[%s188_s2] ss:$0 sm:$0xff] }
   0x4   :  { %129 = vmatprep.subr.bf16.mxu0 %v136_v1 }
   0x7   :  { %130 = vmatpush3.bf16.msra.mxu0 %v136_v1 }
   0xa   :  { %132 = vmatmul.mubr.msk.bf16.vlgmr.msra.gmra.mrb[0].mxu0 %vm52_vm0, %v138_v3 }
  0xdd   :  { %v133_v5 = vpop.f32.mrb[0].mxu0 }
  0xde   :  { %v102_v6 = vadd.f32 %v133_v5, %v116_v4  ;;  %v93_v7 = vpop.f32.mrb[1].mxu0 }
  0xdf   :  { %v94_v8 = vadd.f32 %v116_v4, %v93_v7  ;;  %v134_v9 = vpop.f32.mrb[2].mxu0 }
  0xe0   :  { %110 = vst [vmem:[%s189_s3 + $0x10] sm:$0xff] %v102_v6  ;;  %v105_v10 = vadd.f32 %v134_v9, %v116_v4  ;;  %v96_v11 = vpop.f32.mrb[3].mxu0 }
  0xe1   :  { %108 = vst [vmem:[%s189_s3] sm:$0xff] %v94_v8  ;;  %v97_v12 = vadd.f32 %v116_v4, %v96_v11 }
  0xe2   :  { %111 = vst [vmem:[%s189_s3 + $0x18] sm:$0xff] %v105_v10 }
  0xe3   :  { %109 = vst [vmem:[%s189_s3 + $0x8] sm:$0xff] %v97_v12 }

// kernel: coupled_vae_forward.29
= control target key start
LH: loop header
LB: loop body
LE: loop exit
PB: predicated region body
PF: predicated region fallthrough
CT: control target
= control target key end

     0   :  { %s2203_s15 = smov 0   ;;  %s2205_s16 = smov 0   ;;  %s3592_s0 = inlined_call_operand.vmem [shape: bf16[4,512,64], index: 0, kind: input, shape index: {}]   ;;  %s3593_s1 = inlined_call_operand.vmem [shape: bf16[4,64,8], index: 1, kind: input, shape index: {}]   ;;  %s3594_s2 = inlined_call_operand.vmem [shape: f32[1,8], index: 2, kind: input, shape index: {}]   ;;  %s3595_s3 = inlined_call_operand.vmem [shape: f32[1,8], index: 3, kind: input, shape index: {}]   ;;  %s3596_s4 = inlined_call_operand.vmem [shape: f32[4,512,8], index: 4, kind: output, shape index: {}]  }
   0x1   :  { %s2207_s17 = smov 0   ;;  %s2209_s18 = smov 0  }
   0x2   :  { %s2211_s19 = smov 0  }
   0x3 LB: > { %s29_s20 = sadd.s32 1, %s2167_s17  ;;  %s33_s21 = sadd.s32 1, %s2171_s18  ;;  %s2175_s19 = sphi %s2211_s19, %s14_s19   ;;  %s2171_s18 = sphi %s2209_s18, %s3806_s18   ;;  %s2167_s17 = sphi %s2207_s17, %s3805_s17   ;;  %s2163_s16 = sphi %s2205_s16, %s3804_s16   ;;  %s2159_s15 = sphi %s2203_s15, %s3803_s15  }
   0x4   : > { %p31_p0 = scmp.ge.s32.totalorder %s29_s20, 4  ;;  %p1856_p1 = scmp.ge.s32.totalorder %s2175_s19, 1 }
   0x5   : > { %p200_p2 = scmp.lt.s32.totalorder %s2175_s19, 9 }
   0x6   : > { %s3808_s20 = smov (%p31_p0, %s29_s20), 0  ;;  %s3810_s21 = smov (!%p31_p0, %s33_s21), %s2171_s18 }
   0x7   : > { %p201_p3 = pnand %p1856_p1, %p200_p2  ;;  %p35_p4 = scmp.ge.s32.totalorder %s3810_s21, 2 }
   0x9   : > { %s3812_s21 = smov (%p35_p4, %s3810_s21), 0  ;;  %204 = sbr.rel (%p201_p3) target bundleno = 626 (0x272), region = 36 }
  0x10   : > { %p240_p5 = scmp.lt.s32.totalorder %s2159_s15, 3  ;;  %vm525_vm0 = vcmask 523264   ;;  %p265_p6 = scmp.eq.s32.totalorder %s2159_s15, 0 }
  0x11   : > { %p911_p7 = scmp.eq.s32.totalorder %s2163_s16, 0 }
  0x12   : > { %s241_s22 = scalar_select %p240_p5, %s2159_s15, 3 }
  0x13   : > { %p2318_p8 = pnand %p911_p7, %p265_p6 }
  0x14   : > { %s1938_s23 = sshll.u32 %s241_s22, 8  ;;  %s1939_s24 = sshll.u32 %s241_s22, 5  ;;  %vm916_vm1 = vcmask (!%p2318_p8), 57344  }
  0x15   : > { %s253_s27 = scalar_lea.vmem %s3593_s1, %s1939_s24  ;;  %s1940_s28 = sshll.u32 %s241_s22, 9 }
  0x16   : > { %v2099_v0 = vld [vmem:[%s253_s27] sm:$0xff]   ;;  %s2245_s5 = scalar_lea.vmem %s3592_s0, %s1938_s23  ;;  %s2250_s8 = scalar_lea.vmem %s3596_s4, %s1940_s28  ;;  %v2100_v1 = vld [vmem:[%s253_s27 + $0x8] sm:$0xff]   ;;  %v2101_v2 = vld [vmem:[%s253_s27 + $0x10] sm:$0xff]  }
  0x17   : > { %1978 = vmatprep.subr.bf16.mxu0 %v2099_v0  ;;  %2050 = vmatprep.subr.bf16.mxu1 %v2099_v0  ;;  %v2103_v3 = vld [vmem:[%s2245_s5] sm:$0xff]   ;;  %v2102_v5 = vld [vmem:[%s253_s27 + $0x18] sm:$0xff]   ;;  %v2105_v6 = vld [vmem:[%s2245_s5 + $0x8] sm:$0xff]  }
  0x18   : > { %1979 = vmatpush3.bf16.msra.mxu0 %v2099_v0  ;;  %2054 = vmatpush3.bf16.msra.mxu1 %v2099_v0  ;;  %v2104_v4 = vld [vmem:[%s2245_s5 + $0x80] sm:$0xff]   ;;  %v2106_v7 = vld [vmem:[%s2245_s5 + $0x88] sm:$0xff]   ;;  %v2107_v8 = vld [vmem:[%s2245_s5 + $0x10] sm:$0xff]  }
  0x19   : > { %1980 = vmatprep.subr.bf16.mxu0 %v2100_v1  ;;  %2051 = vmatprep.subr.bf16.mxu1 %v2100_v1  ;;  %v2108_v9 = vld [vmem:[%s2245_s5 + $0x90] sm:$0xff]   ;;  %v2109_v10 = vld [vmem:[%s2245_s5 + $0x18] sm:$0xff]   ;;  %v2111_v12 = vld [vmem:[%s2245_s5 + $0x20] sm:$0xff]  }
  0x1a   : > { %1986 = vmatprep.mubr.msk.bf16.mxu0 %vm525_vm0, %v2103_v3  ;;  %2018 = vmatprep.mubr.msk.bf16.mxu1 %vm525_vm0, %v2104_v4  ;;  %v2110_v11 = vld [vmem:[%s2245_s5 + $0x98] sm:$0xff]   ;;  %v2112_v13 = vld [vmem:[%s2245_s5 + $0xa0] sm:$0xff]   ;;  %v2113_v14 = vld [vmem:[%s2245_s5 + $0x28] sm:$0xff]  }
  0x1b   : > { %v2114_v15 = vld [vmem:[%s2245_s5 + $0xa8] sm:$0xff]   ;;  %v2115_v16 = vld [vmem:[%s2245_s5 + $0x30] sm:$0xff]   ;;  %v2117_v18 = vld [vmem:[%s2245_s5 + $0x38] sm:$0xff]  }
  0x1c   : > { %1981 = vmatpush3.bf16.msra.mxu0 %v2100_v1  ;;  %2055 = vmatpush3.bf16.msra.mxu1 %v2100_v1  ;;  %v2116_v17 = vld [vmem:[%s2245_s5 + $0xb0] sm:$0xff]   ;;  %v2118_v19 = vld [vmem:[%s2245_s5 + $0xb8] sm:$0xff]   ;;  %v2119_v20 = vld [vmem:[%s2245_s5 + $0x40] sm:$0xff]  }
  0x1d   : > { %1982 = vmatprep.subr.bf16.mxu0 %v2101_v2  ;;  %2052 = vmatprep.subr.bf16.mxu1 %v2101_v2  ;;  %v2120_v21 = vld [vmem:[%s2245_s5 + $0xc0] sm:$0xff]   ;;  %v2121_v22 = vld [vmem:[%s2245_s5 + $0x48] sm:$0xff]   ;;  %v2123_v24 = vld [vmem:[%s2245_s5 + $0x50] sm:$0xff]  }
  0x1e   : > { %v2122_v23 = vld [vmem:[%s2245_s5 + $0xc8] sm:$0xff]   ;;  %v2124_v25 = vld [vmem:[%s2245_s5 + $0xd0] sm:$0xff]   ;;  %v2125_v26 = vld [vmem:[%s2245_s5 + $0x58] sm:$0xff]  }
  0x1f   : > { %v2126_v27 = vld [vmem:[%s2245_s5 + $0xd8] sm:$0xff]   ;;  %v2127_v28 = vld [vmem:[%s2245_s5 + $0x60] sm:$0xff]   ;;  %v2129_v30 = vld [vmem:[%s2245_s5 + $0x68] sm:$0xff]  }
  0x20   : > { %1983 = vmatpush3.bf16.msra.mxu0 %v2101_v2  ;;  %2056 = vmatpush3.bf16.msra.mxu1 %v2101_v2  ;;  %v2128_v29 = vld [vmem:[%s2245_s5 + $0xe0] sm:$0xff]   ;;  %v2130_v31 = vld [vmem:[%s2245_s5 + $0xe8] sm:$0xff]   ;;  %v2131_v32 = vld [vmem:[%s2245_s5 + $0x70] sm:$0xff]  }
  0x21   : > { %1984 = vmatprep.subr.bf16.mxu0 %v2102_v5  ;;  %2053 = vmatprep.subr.bf16.mxu1 %v2102_v5  ;;  %v2132_v33 = vld [vmem:[%s2245_s5 + $0xf0] sm:$0xff]   ;;  %v2133_v34 = vld [vmem:[%s2245_s5 + $0x78] sm:$0xff]  }
  0x22   : > { %v2134_v35 = vld [vmem:[%s2245_s5 + $0xf8] sm:$0xff]  }
  0x24   : > { %1985 = vmatpush3.bf16.msra.mxu0 %v2102_v5  ;;  %2057 = vmatpush3.bf16.msra.mxu1 %v2102_v5 }
  0x27   : > { %1987 = vmatmul.mubr.msk.bf16.vlgmr.msra.gmra.mrb[0].mxu0 %vm525_vm0, %v2105_v6  ;;  %2019 = vmatmul.mubr.msk.bf16.vlgmr.msra.gmra.mrb[0].mxu1 %vm525_vm0, %v2106_v7 }
  0x28   : > { %1990 = vmatprep.mubr.msk.bf16.mxu0 %vm525_vm0, %v2107_v8  ;;  %2022 = vmatprep.mubr.msk.bf16.mxu1 %vm525_vm0, %v2108_v9 }
  0x2f   : > { %1991 = vmatmul.mubr.msk.bf16.gmra.mrb[4].mxu0 %vm525_vm0, %v2109_v10  ;;  %2023 = vmatmul.mubr.msk.bf16.gmra.mrb[4].mxu1 %vm525_vm0, %v2110_v11 }
  0x30   : > { %1994 = vmatprep.mubr.msk.bf16.mxu0 %vm525_vm0, %v2111_v12  ;;  %2026 = vmatprep.mubr.msk.bf16.mxu1 %vm525_vm0, %v2112_v13 }
  0x37   : > { %1995 = vmatmul.mubr.msk.bf16.gmra.mrb[8].mxu0 %vm525_vm0, %v2113_v14  ;;  %2027 = vmatmul.mubr.msk.bf16.gmra.mrb[8].mxu1 %vm525_vm0, %v2114_v15 }
  0x38   : > { %1998 = vmatprep.mubr.msk.bf16.mxu0 %vm525_vm0, %v2115_v16  ;;  %2030 = vmatprep.mubr.msk.bf16.mxu1 %vm525_vm0, %v2116_v17 }
  0x3f   : > { %1999 = vmatmul.mubr.msk.bf16.gmra.mrb[12].mxu0 %vm525_vm0, %v2117_v18  ;;  %2031 = vmatmul.mubr.msk.bf16.gmra.mrb[12].mxu1 %vm525_vm0, %v2118_v19 }
  0x40   : > { %2002 = vmatprep.mubr.msk.bf16.mxu0 %vm525_vm0, %v2119_v20  ;;  %2034 = vmatprep.mubr.msk.bf16.mxu1 %vm525_vm0, %v2120_v21 }
  0x47   : > { %2003 = vmatmul.mubr.msk.bf16.gmra.mrb[16].mxu0 %vm525_vm0, %v2121_v22  ;;  %2035 = vmatmul.mubr.msk.bf16.gmra.mrb[16].mxu1 %vm525_vm0, %v2122_v23 }
  0x48   : > { %2006 = vmatprep.mubr.msk.bf16.mxu0 %vm525_vm0, %v2123_v24  ;;  %2038 = vmatprep.mubr.msk.bf16.mxu1 %vm525_vm0, %v2124_v25 }
  0x4f   : > { %2007 = vmatmul.mubr.msk.bf16.gmra.mrb[20].mxu0 %vm525_vm0, %v2125_v26  ;;  %2039 = vmatmul.mubr.msk.bf16.gmra.mrb[20].mxu1 %vm525_vm0, %v2126_v27 }
  0x50   : > { %2010 = vmatprep.mubr.msk.bf16.mxu0 %vm525_vm0, %v2127_v28  ;;  %2042 = vmatprep.mubr.msk.bf16.mxu1 %vm525_vm0, %v2128_v29 }
  0x57   : > { %2011 = vmatmul.mubr.msk.bf16.gmra.mrb[24].mxu0 %vm525_vm0, %v2129_v30  ;;  %2043 = vmatmul.mubr.msk.bf16.gmra.mrb[24].mxu1 %vm525_vm0, %v2130_v31 }
  0x58   : > { %2014 = vmatprep.mubr.msk.bf16.mxu0 %vm525_vm0, %v2131_v32  ;;  %2046 = vmatprep.mubr.msk.bf16.mxu1 %vm525_vm0, %v2132_v33 }
  0x5f   : > { %2015 = vmatmul.mubr.msk.bf16.gmra.mrb[28].mxu0 %vm525_vm0, %v2133_v34  ;;  %2047 = vmatmul.mubr.msk.bf16.gmra.mrb[28].mxu1 %vm525_vm0, %v2134_v35 }
  0xfa   : > { %v2322_v36 = vpop.f32.mrb[0].mxu0  ;;  %v2324_v37 = vpop.f32.mrb[0].mxu1 }
  0xfb   : > { %3664 = vst [vmem:[#allocation4_spill] sm:$0xff] %v2322_v36  ;;  %3665 = vst [vmem:[#allocation5_spill] sm:$0xff] %v2324_v37  ;;  %v2326_v38 = vpop.f32.mrb[1].mxu0  ;;  %v2328_v39 = vpop.f32.mrb[1].mxu1 }
  0xfc   : > { %3666 = vst [vmem:[#allocation6_spill] sm:$0xff] %v2326_v38  ;;  %3667 = vst [vmem:[#allocation7_spill] sm:$0xff] %v2328_v39  ;;  %v2330_v40 = vpop.f32.mrb[2].mxu0  ;;  %v2332_v41 = vpop.f32.mrb[2].mxu1 }
  0xfd   : > { %3668 = vst [vmem:[#allocation8_spill] sm:$0xff] %v2330_v40  ;;  %3669 = vst [vmem:[#allocation9_spill] sm:$0xff] %v2332_v41  ;;  %v2334_v42 = vpop.f32.mrb[3].mxu0  ;;  %v2336_v43 = vpop.f32.mrb[3].mxu1 }
  0xfe   : > { %3670 = vst [vmem:[#allocation10_spill] sm:$0xff] %v2334_v42  ;;  %3671 = vst [vmem:[#allocation11_spill] sm:$0xff] %v2336_v43 }
 0x102   : > { %v2338_v44 = vpop.f32.mrb[4].mxu0  ;;  %v2340_v45 = vpop.f32.mrb[4].mxu1 }
 0x103   : > { %3672 = vst [vmem:[#allocation12_spill] sm:$0xff] %v2340_v45  ;;  %v2342_v46 = vpop.f32.mrb[5].mxu0  ;;  %v2344_v47 = vpop.f32.mrb[5].mxu1 }
 0x104   : > { %3673 = vst [vmem:[#allocation13_spill] sm:$0xff] %v2342_v46  ;;  %3674 = vst [vmem:[#allocation14_spill] sm:$0xff] %v2344_v47  ;;  %v2346_v48 = vpop.f32.mrb[6].mxu0  ;;  %v2348_v49 = vpop.f32.mrb[6].mxu1 }
 0x105   : > { %3675 = vst [vmem:[#allocation15_spill] sm:$0xff] %v2348_v49  ;;  %v2350_v50 = vpop.f32.mrb[7].mxu0  ;;  %v2352_v51 = vpop.f32.mrb[7].mxu1 }
 0x106   : > { %3676 = vst [vmem:[#allocation16_spill] sm:$0xff] %v2352_v51 }
 0x10a   : > { %v2354_v52 = vpop.f32.mrb[8].mxu0  ;;  %v2356_v53 = vpop.f32.mrb[8].mxu1 }
 0x10b   : > { %3677 = vst [vmem:[#allocation17_spill] sm:$0xff] %v2356_v53  ;;  %v2358_v54 = vpop.f32.mrb[9].mxu0  ;;  %v2360_v55 = vpop.f32.mrb[9].mxu1 }
 0x10c   : > { %3678 = vst [vmem:[#allocation18_spill] sm:$0xff] %v2360_v55  ;;  %v2362_v56 = vpop.f32.mrb[10].mxu0  ;;  %v2364_v57 = vpop.f32.mrb[10].mxu1 }
 0x10d   : > { %3679 = vst [vmem:[#allocation19_spill] sm:$0xff] %v2364_v57  ;;  %v2366_v58 = vpop.f32.mrb[11].mxu0  ;;  %v2368_v59 = vpop.f32.mrb[11].mxu1 }
 0x10e   : > { %3680 = vst [vmem:[#allocation20_spill] sm:$0xff] %v2368_v59 }
 0x112   : > { %v2370_v60 = vpop.f32.mrb[12].mxu0  ;;  %v2372_v61 = vpop.f32.mrb[12].mxu1 }
 0x113   : > { %3681 = vst [vmem:[#allocation21_spill] sm:$0xff] %v2372_v61  ;;  %v2374_v62 = vpop.f32.mrb[13].mxu0  ;;  %v2376_v63 = vpop.f32.mrb[13].mxu1 }
 0x114   : > { %3682 = vst [vmem:[#allocation22_spill] sm:$0xff] %v2376_v63  ;;  %v2378_v0 = vpop.f32.mrb[14].mxu0  ;;  %v2380_v1 = vpop.f32.mrb[14].mxu1 }
 0x115   : > { %v2382_v2 = vpop.f32.mrb[15].mxu0  ;;  %v2384_v3 = vpop.f32.mrb[15].mxu1 }
 0x116   : > { %3683 = vst [vmem:[#allocation23_spill] sm:$0xff] %v2384_v3 }
 0x11a   : > { %v2386_v4 = vpop.f32.mrb[16].mxu0  ;;  %v2388_v5 = vpop.f32.mrb[16].mxu1 }
 0x11b   : > { %3684 = vst [vmem:[#allocation24_spill] sm:$0xff] %v2388_v5  ;;  %v2390_v6 = vpop.f32.mrb[17].mxu0  ;;  %v2392_v7 = vpop.f32.mrb[17].mxu1 }
 0x11c   : > { %3685 = vst [vmem:[#allocation25_spill] sm:$0xff] %v2392_v7  ;;  %v2394_v8 = vpop.f32.mrb[18].mxu0  ;;  %v2396_v9 = vpop.f32.mrb[18].mxu1 }
 0x11d   : > { %3686 = vst [vmem:[#allocation26_spill] sm:$0xff] %v2396_v9  ;;  %v2398_v10 = vpop.f32.mrb[19].mxu0  ;;  %v2400_v11 = vpop.f32.mrb[19].mxu1 }
 0x11e   : > { %3687 = vst [vmem:[#allocation27_spill] sm:$0xff] %v2400_v11 }
 0x122   : > { %v2402_v12 = vpop.f32.mrb[20].mxu0  ;;  %v2404_v13 = vpop.f32.mrb[20].mxu1 }
 0x123   : > { %3688 = vst [vmem:[#allocation28_spill] sm:$0xff] %v2404_v13  ;;  %v2406_v14 = vpop.f32.mrb[21].mxu0  ;;  %v2408_v15 = vpop.f32.mrb[21].mxu1 }
 0x124   : > { %3689 = vst [vmem:[#allocation29_spill] sm:$0xff] %v2408_v15  ;;  %v2410_v16 = vpop.f32.mrb[22].mxu0  ;;  %v2412_v17 = vpop.f32.mrb[22].mxu1 }
 0x125   : > { %3690 = vst [vmem:[#allocation30_spill] sm:$0xff] %v2412_v17  ;;  %v2414_v18 = vpop.f32.mrb[23].mxu0  ;;  %v2416_v19 = vpop.f32.mrb[23].mxu1 }
 0x126   : > { %3691 = vst [vmem:[#allocation31_spill] sm:$0xff] %v2416_v19 }
 0x12a   : > { %v2418_v20 = vpop.f32.mrb[24].mxu0  ;;  %v2420_v21 = vpop.f32.mrb[24].mxu1 }
 0x12b   : > { %3692 = vst [vmem:[#allocation32_spill] sm:$0xff] %v2420_v21  ;;  %v2422_v22 = vpop.f32.mrb[25].mxu0  ;;  %v2424_v23 = vpop.f32.mrb[25].mxu1 }
 0x12c   : > { %3693 = vst [vmem:[#allocation33_spill] sm:$0xff] %v2424_v23  ;;  %v2426_v24 = vpop.f32.mrb[26].mxu0  ;;  %v2428_v25 = vpop.f32.mrb[26].mxu1 }
 0x12d   : > { %3694 = vst [vmem:[#allocation34_spill] sm:$0xff] %v2428_v25  ;;  %v2430_v26 = vpop.f32.mrb[27].mxu0  ;;  %v2432_v27 = vpop.f32.mrb[27].mxu1  ;;  %v2177_v25 = vmov (!%p2318_p8), 0.0  }
 0x12e   : > { %3695 = vst [vmem:[#allocation35_spill] sm:$0xff] %v2432_v27  ;;  %917 = vst.msk [vmem:[#allocation2] sm:$0x1] (!%p2318_p8), %vm916_vm1, %v2177_v25 }
 0x12f   : > { %918 = vst.msk [vmem:[#allocation3] sm:$0x1] (!%p2318_p8), %vm916_vm1, %v2177_v25 }
 0x130   : > { %915 = sbr.rel (%p2318_p8) target bundleno = 311 (0x137), region = 40 }
 0x132   : > { %v2434_v28 = vpop.f32.mrb[28].mxu0  ;;  %v2436_v29 = vpop.f32.mrb[28].mxu1 }
 0x133   : > { %3696 = vst [vmem:[#allocation36_spill] sm:$0xff] %v2436_v29  ;;  %v2438_v30 = vpop.f32.mrb[29].mxu0  ;;  %v2440_v31 = vpop.f32.mrb[29].mxu1 }
 0x134   : > { %3697 = vst [vmem:[#allocation37_spill] sm:$0xff] %v2440_v31  ;;  %v2442_v32 = vpop.f32.mrb[30].mxu0  ;;  %v2444_v33 = vpop.f32.mrb[30].mxu1 }
 0x135   : > { %3698 = vst [vmem:[#allocation38_spill] sm:$0xff] %v2444_v33  ;;  %v2446_v34 = vpop.f32.mrb[31].mxu0  ;;  %v2448_v35 = vpop.f32.mrb[31].mxu1 }
 0x136   : > { %3699 = vst [vmem:[#allocation39_spill] sm:$0xff] %v2448_v35 }
 0x137 PF: > { %p1932_p9 = scmp.ne.s32.totalorder %s2163_s16, 0 }
 0x138   : > { %vm923_vm2 = vcmask (!%p1932_p9), 64512   ;;  %vm1058_vm3 = vcmask (!%p1932_p9), 57344  }
 0x139   : > { %921 = sbr.rel (%p1932_p9) target bundleno = 514 (0x202), region = 44  ;;  %v2455_v25 = vsel (!%p1932_p9), %vm923_vm2, %v2326_v38, 0.0  ;;  %v2459_v33 = vsel (!%p1932_p9), %vm923_vm2, %v2334_v42, 0.0  ;;  %v2463_v29 = vsel (!%p1932_p9), %vm923_vm2, %v2322_v36, 0.0  ;;  %1260 = vst.msk [vmem:[%s2250_s8] sm:$0xff] (!%p1932_p9), %vm923_vm2, %v2326_v38  ;;  %1261 = vst.msk [vmem:[%s2250_s8 + $0x8] sm:$0xff] (!%p1932_p9), %vm923_vm2, %v2334_v42 }
 0x13a   : > { %1262 = vst.msk [vmem:[%s2250_s8 + $0x10] sm:$0xff] (!%p1932_p9), %vm923_vm2, %v2322_v36  ;;  %1263 = vst.msk [vmem:[%s2250_s8 + $0x18] sm:$0xff] (!%p1932_p9), %vm923_vm2, %v2330_v40 }
 0x13b   : > { %1264 = vst.msk [vmem:[%s2250_s8 + $0x20] sm:$0xff] (!%p1932_p9), %vm923_vm2, %v2342_v46  ;;  %1265 = vst.msk [vmem:[%s2250_s8 + $0x28] sm:$0xff] (!%p1932_p9), %vm923_vm2, %v2350_v50 }
 0x13c   : > { %1266 = vst.msk [vmem:[%s2250_s8 + $0x30] sm:$0xff] (!%p1932_p9), %vm923_vm2, %v2338_v44  ;;  %1267 = vst.msk [vmem:[%s2250_s8 + $0x38] sm:$0xff] (!%p1932_p9), %vm923_vm2, %v2346_v48 }
 0x13d   : > { %1268 = vst.msk [vmem:[%s2250_s8 + $0x40] sm:$0xff] (!%p1932_p9), %vm923_vm2, %v2358_v54  ;;  %1269 = vst.msk [vmem:[%s2250_s8 + $0x48] sm:$0xff] (!%p1932_p9), %vm923_vm2, %v2366_v58 }
 0x13e   : > { %1270 = vst.msk [vmem:[%s2250_s8 + $0x50] sm:$0xff] (!%p1932_p9), %vm923_vm2, %v2354_v52  ;;  %1271 = vst.msk [vmem:[%s2250_s8 + $0x58] sm:$0xff] (!%p1932_p9), %vm923_vm2, %v2362_v56 }
 0x13f   : > { %1272 = vst.msk [vmem:[%s2250_s8 + $0x60] sm:$0xff] (!%p1932_p9), %vm923_vm2, %v2374_v62  ;;  %1273 = vst.msk [vmem:[%s2250_s8 + $0x68] sm:$0xff] (!%p1932_p9), %vm923_vm2, %v2382_v2 }
 0x140   : > { %1274 = vst.msk [vmem:[%s2250_s8 + $0x70] sm:$0xff] %vm923_vm2, %v2370_v60  ;;  %1275 = vst.msk [vmem:[%s2250_s8 + $0x78] sm:$0xff] %vm923_vm2, %v2378_v0 }
 0x141   : > { %1276 = vst.msk [vmem:[%s2250_s8 + $0x80] sm:$0xff] %vm923_vm2, %v2390_v6  ;;  %1277 = vst.msk [vmem:[%s2250_s8 + $0x88] sm:$0xff] %vm923_vm2, %v2398_v10 }
 0x142   : > { %1278 = vst.msk [vmem:[%s2250_s8 + $0x90] sm:$0xff] %vm923_vm2, %v2386_v4  ;;  %1279 = vst.msk [vmem:[%s2250_s8 + $0x98] sm:$0xff] %vm923_vm2, %v2394_v8 }
 0x143   : > { %1280 = vst.msk [vmem:[%s2250_s8 + $0xa0] sm:$0xff] %vm923_vm2, %v2406_v14  ;;  %1281 = vst.msk [vmem:[%s2250_s8 + $0xa8] sm:$0xff] %vm923_vm2, %v2414_v18 }
 0x144   : > { %1282 = vst.msk [vmem:[%s2250_s8 + $0xb0] sm:$0xff] %vm923_vm2, %v2402_v12  ;;  %1283 = vst.msk [vmem:[%s2250_s8 + $0xb8] sm:$0xff] %vm923_vm2, %v2410_v16 }
 0x145   : > { %1284 = vst.msk [vmem:[%s2250_s8 + $0xc0] sm:$0xff] %vm923_vm2, %v2422_v22  ;;  %1285 = vst.msk [vmem:[%s2250_s8 + $0xc8] sm:$0xff] %vm923_vm2, %v2430_v26 }
 0x146   : > { %1286 = vst.msk [vmem:[%s2250_s8 + $0xd0] sm:$0xff] %vm923_vm2, %v2418_v20  ;;  %1287 = vst.msk [vmem:[%s2250_s8 + $0xd8] sm:$0xff] %vm923_vm2, %v2426_v24 }
 0x147   : > { %1288 = vst.msk [vmem:[%s2250_s8 + $0xe0] sm:$0xff] %vm923_vm2, %v2438_v30  ;;  %1289 = vst.msk [vmem:[%s2250_s8 + $0xe8] sm:$0xff] %vm923_vm2, %v2446_v34 }
 0x148   : > { %1290 = vst.msk [vmem:[%s2250_s8 + $0xf0] sm:$0xff] %vm923_vm2, %v2434_v28  ;;  %1291 = vst.msk [vmem:[%s2250_s8 + $0xf8] sm:$0xff] %vm923_vm2, %v2442_v32 }
 0x149   : > { %1292 = vst.msk [vmem:[%s2250_s8 + $0x100] sm:$0xff] %vm923_vm2, %v2328_v39  ;;  %1293 = vst.msk [vmem:[%s2250_s8 + $0x108] sm:$0xff] %vm923_vm2, %v2336_v43 }
 0x14a   : > { %1294 = vst.msk [vmem:[%s2250_s8 + $0x110] sm:$0xff] %vm923_vm2, %v2324_v37  ;;  %1295 = vst.msk [vmem:[%s2250_s8 + $0x118] sm:$0xff] %vm923_vm2, %v2332_v41 }
 0x14b   : > { %1296 = vst.msk [vmem:[%s2250_s8 + $0x120] sm:$0xff] %vm923_vm2, %v2344_v47  ;;  %1297 = vst.msk [vmem:[%s2250_s8 + $0x128] sm:$0xff] %vm923_vm2, %v2352_v51 }
 0x14c   : > { %1298 = vst.msk [vmem:[%s2250_s8 + $0x130] sm:$0xff] %vm923_vm2, %v2340_v45  ;;  %1299 = vst.msk [vmem:[%s2250_s8 + $0x138] sm:$0xff] %vm923_vm2, %v2348_v49 }
 0x14d   : > { %1300 = vst.msk [vmem:[%s2250_s8 + $0x140] sm:$0xff] %vm923_vm2, %v2360_v55  ;;  %1301 = vst.msk [vmem:[%s2250_s8 + $0x148] sm:$0xff] %vm923_vm2, %v2368_v59 }
 0x14e   : > { %1302 = vst.msk [vmem:[%s2250_s8 + $0x150] sm:$0xff] %vm923_vm2, %v2356_v53  ;;  %1303 = vst.msk [vmem:[%s2250_s8 + $0x158] sm:$0xff] %vm923_vm2, %v2364_v57 }
 0x14f   : > { %1304 = vst.msk [vmem:[%s2250_s8 + $0x160] sm:$0xff] %vm923_vm2, %v2376_v63  ;;  %1305 = vst.msk [vmem:[%s2250_s8 + $0x168] sm:$0xff] %vm923_vm2, %v2384_v3 }
 0x150   : > { %1306 = vst.msk [vmem:[%s2250_s8 + $0x170] sm:$0xff] %vm923_vm2, %v2372_v61  ;;  %1307 = vst.msk [vmem:[%s2250_s8 + $0x178] sm:$0xff] %vm923_vm2, %v2380_v1 }
 0x151   : > { %1308 = vst.msk [vmem:[%s2250_s8 + $0x180] sm:$0xff] %vm923_vm2, %v2392_v7  ;;  %1309 = vst.msk [vmem:[%s2250_s8 + $0x188] sm:$0xff] %vm923_vm2, %v2400_v11 }
 0x152   : > { %1310 = vst.msk [vmem:[%s2250_s8 + $0x190] sm:$0xff] %vm923_vm2, %v2388_v5  ;;  %1311 = vst.msk [vmem:[%s2250_s8 + $0x198] sm:$0xff] %vm923_vm2, %v2396_v9  ;;  %v3700_v9 = vld [vmem:[#allocation34_spill] sm:$0xff] }
 0x153   : > { %1312 = vst.msk [vmem:[%s2250_s8 + $0x1a0] sm:$0xff] %vm923_vm2, %v2408_v15  ;;  %1313 = vst.msk [vmem:[%s2250_s8 + $0x1a8] sm:$0xff] %vm923_vm2, %v2416_v19  ;;  %v939_v15 = vsel %vm923_vm2, %v2358_v54, 0.0 }
 0x154   : > { %1314 = vst.msk [vmem:[%s2250_s8 + $0x1b0] sm:$0xff] %vm923_vm2, %v2404_v13  ;;  %1315 = vst.msk [vmem:[%s2250_s8 + $0x1b8] sm:$0xff] %vm923_vm2, %v2412_v17  ;;  %v3701_v13 = vld [vmem:[#allocation36_spill] sm:$0xff]  ;;  %v3702_v17 = vld [vmem:[#allocation38_spill] sm:$0xff] }
 0x155   : > { %1316 = vst.msk [vmem:[%s2250_s8 + $0x1c0] sm:$0xff] %vm923_vm2, %v2424_v23  ;;  %1317 = vst.msk [vmem:[%s2250_s8 + $0x1c8] sm:$0xff] %vm923_vm2, %v2432_v27  ;;  %v926_v27 = vadd.f32 %v2459_v33, %v2455_v25  ;;  %v937_v33 = vsel %vm923_vm2, %v2346_v48, 0.0 }
 0x156   : > { %1318 = vst.msk [vmem:[%s2250_s8 + $0x1d0] sm:$0xff] %vm923_vm2, %v2420_v21  ;;  %1319 = vst.msk [vmem:[%s2250_s8 + $0x1d8] sm:$0xff] %vm923_vm2, %v3700_v9  ;;  %v929_v21 = vsel %vm923_vm2, %v2330_v40, 0.0 }
 0x157   : > { %1320 = vst.msk [vmem:[%s2250_s8 + $0x1e0] sm:$0xff] %vm923_vm2, %v2440_v31  ;;  %1321 = vst.msk [vmem:[%s2250_s8 + $0x1e8] sm:$0xff] %vm923_vm2, %v2448_v35  ;;  %v928_v9 = vadd.f32 %v2463_v29, %v926_v27  ;;  %v931_v31 = vsel %vm923_vm2, %v2342_v46, 0.0  ;;  %v933_v35 = vsel %vm923_vm2, %v2350_v50, 0.0  ;;  %v941_v29 = vsel %vm923_vm2, %v2366_v58, 0.0 }
 0x158   : > { %1322 = vst.msk [vmem:[%s2250_s8 + $0x1f0] sm:$0xff] %vm923_vm2, %v3701_v13  ;;  %1323 = vst.msk [vmem:[%s2250_s8 + $0x1f8] sm:$0xff] %vm923_vm2, %v3702_v17  ;;  %v935_v13 = vsel %vm923_vm2, %v2338_v44, 0.0 }
 0x159   : > { %v930_v23 = vadd.f32 %v929_v21, %v928_v9  ;;  %v943_v21 = vsel %vm923_vm2, %v2354_v52, 0.0 }
 0x15b   : > { %v932_v19 = vadd.f32 %v931_v31, %v930_v23  ;;  %v945_v31 = vsel %vm923_vm2, %v2362_v56, 0.0 }
 0x15d   : > { %v934_v17 = vadd.f32 %v933_v35, %v932_v19  ;;  %v947_v35 = vsel %vm923_vm2, %v2374_v62, 0.0 }
 0x15f   : > { %v936_v25 = vadd.f32 %v935_v13, %v934_v17  ;;  %v949_v17 = vsel %vm923_vm2, %v2382_v2, 0.0 }
 0x161   : > { %v938_v27 = vadd.f32 %v937_v33, %v936_v25  ;;  %v951_v25 = vsel %vm923_vm2, %v2370_v60, 0.0 }
 0x163   : > { %v940_v9 = vadd.f32 %v939_v15, %v938_v27  ;;  %v953_v27 = vsel %vm923_vm2, %v2378_v0, 0.0 }
 0x165   : > { %v942_v23 = vadd.f32 %v941_v29, %v940_v9  ;;  %v955_v9 = vsel %vm923_vm2, %v2390_v6, 0.0 }
 0x167   : > { %v944_v19 = vadd.f32 %v943_v21, %v942_v23  ;;  %v957_v23 = vsel %vm923_vm2, %v2398_v10, 0.0 }
 0x169   : > { %v946_v13 = vadd.f32 %v945_v31, %v944_v19  ;;  %v959_v19 = vsel %vm923_vm2, %v2386_v4, 0.0 }
 0x16b   : > { %v948_v33 = vadd.f32 %v947_v35, %v946_v13  ;;  %v1061_v35 = vmul.f32 %v2326_v38, %v2326_v38  ;;  %v1062_v13 = vmul.f32 %v2334_v42, %v2334_v42  ;;  %v965_v38 = vsel %vm923_vm2, %v2414_v18, 0.0 }
 0x16d   : > { %v950_v15 = vadd.f32 %v949_v17, %v948_v33  ;;  %v1063_v17 = vmul.f32 %v2322_v36, %v2322_v36  ;;  %v1126_v42 = vsel %vm923_vm2, %v1062_v13, 0.0 }
 0x16f   : > { %v952_v29 = vadd.f32 %v951_v25, %v950_v15  ;;  %v961_v25 = vsel %vm923_vm2, %v2394_v8, 0.0  ;;  %v1064_v15 = vmul.f32 %v2330_v40, %v2330_v40  ;;  %v1128_v36 = vsel %vm923_vm2, %v1063_v17, 0.0 }
 0x171   : > { %v954_v21 = vadd.f32 %v953_v27, %v952_v29  ;;  %v963_v29 = vsel %vm923_vm2, %v2406_v14, 0.0 }
 0x173   : > { %v956_v31 = vadd.f32 %v955_v9, %v954_v21  ;;  %v1065_v9 = vmul.f32 %v2342_v46, %v2342_v46  ;;  %v1125_v21 = vsel %vm923_vm2, %v1061_v35, 0.0  ;;  %v967_v46 = vsel %vm923_vm2, %v2402_v12, 0.0 }
 0x174   : > { %v1067_v35 = vmul.f32 %v2338_v44, %v2338_v44 }
 0x175   : > { %v958_v33 = vadd.f32 %v957_v23, %v956_v31  ;;  %v1127_v31 = vadd.f32 %v1126_v42, %v1125_v21  ;;  %v1132_v13 = vsel %vm923_vm2, %v1065_v9, 0.0  ;;  %v971_v21 = vsel %vm923_vm2, %v2422_v22, 0.0 }
 0x176   : > { %v1136_v9 = vsel %vm923_vm2, %v1067_v35, 0.0 }
 0x177   : > { %v960_v27 = vadd.f32 %v959_v19, %v958_v33  ;;  %v1066_v19 = vmul.f32 %v2350_v50, %v2350_v50  ;;  %v1130_v33 = vsel %vm923_vm2, %v1064_v15, 0.0  ;;  %v1129_v5 = vadd.f32 %v1128_v36, %v1127_v31 }
 0x178   : > { %v1070_v31 = vmul.f32 %v2366_v58, %v2366_v58 }
 0x179   : > { %v962_v23 = vadd.f32 %v961_v25, %v960_v27  ;;  %v1131_v42 = vadd.f32 %v1130_v33, %v1129_v5  ;;  %v969_v25 = vsel %vm923_vm2, %v2410_v16, 0.0  ;;  %v1068_v27 = vmul.f32 %v2346_v48, %v2346_v48 }
 0x17a   : > { %v1134_v15 = vsel %vm923_vm2, %v1066_v19, 0.0  ;;  %v973_v5 = vsel %vm923_vm2, %v2430_v26, 0.0 }
 0x17b   : > { %v964_v40 = vadd.f32 %v963_v29, %v962_v23  ;;  %v1133_v36 = vadd.f32 %v1132_v13, %v1131_v42  ;;  %v1069_v23 = vmul.f32 %v2358_v54, %v2358_v54  ;;  %v1138_v19 = vsel %vm923_vm2, %v1068_v27, 0.0 }
 0x17c   : > { %v975_v13 = vsel %vm923_vm2, %v2418_v20, 0.0  ;;  %v1142_v27 = vsel %vm923_vm2, %v1070_v31, 0.0 }
 0x17d   : > { %v966_v17 = vadd.f32 %v965_v38, %v964_v40  ;;  %v1135_v40 = vadd.f32 %v1134_v15, %v1133_v36  ;;  %v1140_v35 = vsel %vm923_vm2, %v1069_v23, 0.0  ;;  %v977_v15 = vsel %vm923_vm2, %v2426_v24, 0.0 }
 0x17f   : > { %v968_v29 = vadd.f32 %v967_v46, %v966_v17  ;;  %v1137_v33 = vadd.f32 %v1136_v9, %v1135_v40  ;;  %v1071_v17 = vmul.f32 %v2354_v52, %v2354_v52  ;;  %v979_v9 = vsel %vm923_vm2, %v2438_v30, 0.0 }
 0x181   : > { %v970_v38 = vadd.f32 %v969_v25, %v968_v29  ;;  %v1139_v25 = vadd.f32 %v1138_v19, %v1137_v33  ;;  %v1072_v29 = vmul.f32 %v2362_v56, %v2362_v56  ;;  %v1144_v23 = vsel %vm923_vm2, %v1071_v17, 0.0 }
 0x182   : > { %v981_v19 = vsel %vm923_vm2, %v2446_v34, 0.0 }
 0x183   : > { %v972_v46 = vadd.f32 %v971_v21, %v970_v38  ;;  %v1141_v21 = vadd.f32 %v1140_v35, %v1139_v25  ;;  %v1073_v38 = vmul.f32 %v2374_v62, %v2374_v62  ;;  %v1146_v31 = vsel %vm923_vm2, %v1072_v29, 0.0 }
 0x184   : > { %v983_v35 = vsel %vm923_vm2, %v2434_v28, 0.0 }
 0x185   : > { %v974_v42 = vadd.f32 %v973_v5, %v972_v46  ;;  %v1143_v5 = vadd.f32 %v1142_v27, %v1141_v21  ;;  %v1074_v46 = vmul.f32 %v2382_v2, %v2382_v2  ;;  %v1148_v17 = vsel %vm923_vm2, %v1073_v38, 0.0 }
 0x186   : > { %v985_v27 = vsel %vm923_vm2, %v2442_v32, 0.0 }
 0x187   : > { %v976_v36 = vadd.f32 %v975_v13, %v974_v42  ;;  %v1145_v13 = vadd.f32 %v1144_v23, %v1143_v5  ;;  %v1075_v42 = vmul.f32 %v2370_v60, %v2370_v60  ;;  %v1150_v29 = vsel %vm923_vm2, %v1074_v46, 0.0 }
 0x188   : > { %v987_v23 = vsel %vm923_vm2, %v2328_v39, 0.0 }
 0x189   : > { %v978_v40 = vadd.f32 %v977_v15, %v976_v36  ;;  %v1147_v15 = vadd.f32 %v1146_v31, %v1145_v13  ;;  %v1076_v36 = vmul.f32 %v2378_v0, %v2378_v0  ;;  %v1152_v38 = vsel %vm923_vm2, %v1075_v42, 0.0 }
 0x18a   : > { %v989_v31 = vsel %vm923_vm2, %v2336_v43, 0.0 }
 0x18b   : > { %v980_v33 = vadd.f32 %v979_v9, %v978_v40  ;;  %v1149_v9 = vadd.f32 %v1148_v17, %v1147_v15  ;;  %v1077_v40 = vmul.f32 %v2390_v6, %v2390_v6  ;;  %v1154_v46 = vsel %vm923_vm2, %v1076_v36, 0.0 }
 0x18c   : > { %v991_v17 = vsel %vm923_vm2, %v2324_v37, 0.0 }
 0x18d   : > { %v982_v25 = vadd.f32 %v981_v19, %v980_v33  ;;  %v1151_v19 = vadd.f32 %v1150_v29, %v1149_v9  ;;  %v1078_v33 = vmul.f32 %v2398_v10, %v2398_v10  ;;  %v1156_v42 = vsel %vm923_vm2, %v1077_v40, 0.0 }
 0x18e   : > { %v993_v29 = vsel %vm923_vm2, %v2332_v41, 0.0 }
 0x18f   : > { %v984_v21 = vadd.f32 %v983_v35, %v982_v25  ;;  %v1153_v35 = vadd.f32 %v1152_v38, %v1151_v19  ;;  %v1079_v25 = vmul.f32 %v2386_v4, %v2386_v4  ;;  %v1158_v36 = vsel %vm923_vm2, %v1078_v33, 0.0 }
 0x190   : > { %v995_v38 = vsel %vm923_vm2, %v2344_v47, 0.0 }
 0x191   : > { %v986_v5 = vadd.f32 %v985_v27, %v984_v21  ;;  %v1155_v27 = vadd.f32 %v1154_v46, %v1153_v35  ;;  %v1080_v21 = vmul.f32 %v2394_v8, %v2394_v8  ;;  %v1160_v40 = vsel %vm923_vm2, %v1079_v25, 0.0 }
 0x192   : > { %v997_v46 = vsel %vm923_vm2, %v2352_v51, 0.0 }
 0x193   : > { %v988_v13 = vadd.f32 %v987_v23, %v986_v5  ;;  %v1157_v23 = vadd.f32 %v1156_v42, %v1155_v27  ;;  %v1081_v5 = vmul.f32 %v2406_v14, %v2406_v14  ;;  %v1162_v33 = vsel %vm923_vm2, %v1080_v21, 0.0 }
 0x194   : > { %v999_v42 = vsel %vm923_vm2, %v2340_v45, 0.0 }
 0x195   : > { %v990_v15 = vadd.f32 %v989_v31, %v988_v13  ;;  %v1159_v31 = vadd.f32 %v1158_v36, %v1157_v23  ;;  %v1082_v13 = vmul.f32 %v2414_v18, %v2414_v18  ;;  %v1164_v25 = vsel %vm923_vm2, %v1081_v5, 0.0 }
 0x196   : > { %v1001_v36 = vsel %vm923_vm2, %v2348_v49, 0.0 }
 0x197   : > { %v992_v9 = vadd.f32 %v991_v17, %v990_v15  ;;  %v1161_v17 = vadd.f32 %v1160_v40, %v1159_v31  ;;  %v1083_v15 = vmul.f32 %v2402_v12, %v2402_v12  ;;  %v1166_v21 = vsel %vm923_vm2, %v1082_v13, 0.0 }
 0x198   : > { %v1003_v40 = vsel %vm923_vm2, %v2360_v55, 0.0 }
 0x199   : > { %v994_v19 = vadd.f32 %v993_v29, %v992_v9  ;;  %v1163_v29 = vadd.f32 %v1162_v33, %v1161_v17  ;;  %v1084_v9 = vmul.f32 %v2410_v16, %v2410_v16  ;;  %v1168_v5 = vsel %vm923_vm2, %v1083_v15, 0.0 }
 0x19a   : > { %v1005_v33 = vsel %vm923_vm2, %v2368_v59, 0.0 }
 0x19b   : > { %v996_v35 = vadd.f32 %v995_v38, %v994_v19  ;;  %v1165_v38 = vadd.f32 %v1164_v25, %v1163_v29  ;;  %v1085_v19 = vmul.f32 %v2422_v22, %v2422_v22  ;;  %v1170_v13 = vsel %vm923_vm2, %v1084_v9, 0.0 }
 0x19c   : > { %v1007_v25 = vsel %vm923_vm2, %v2356_v53, 0.0 }
 0x19d   : > { %v998_v27 = vadd.f32 %v997_v46, %v996_v35  ;;  %v1167_v46 = vadd.f32 %v1166_v21, %v1165_v38  ;;  %v1086_v35 = vmul.f32 %v2430_v26, %v2430_v26  ;;  %v1172_v15 = vsel %vm923_vm2, %v1085_v19, 0.0 }
 0x19e   : > { %v1009_v21 = vsel %vm923_vm2, %v2364_v57, 0.0 }
 0x19f   : > { %v1000_v23 = vadd.f32 %v999_v42, %v998_v27  ;;  %v1169_v42 = vadd.f32 %v1168_v5, %v1167_v46  ;;  %v1087_v27 = vmul.f32 %v2418_v20, %v2418_v20  ;;  %v1174_v9 = vsel %vm923_vm2, %v1086_v35, 0.0 }
 0x1a0   : > { %v1011_v5 = vsel %vm923_vm2, %v2376_v63, 0.0 }
 0x1a1   : > { %v1002_v31 = vadd.f32 %v1001_v36, %v1000_v23  ;;  %v1171_v36 = vadd.f32 %v1170_v13, %v1169_v42  ;;  %v1088_v23 = vmul.f32 %v2426_v24, %v2426_v24  ;;  %v1176_v19 = vsel %vm923_vm2, %v1087_v27, 0.0 }
 0x1a2   : > { %v1013_v13 = vsel %vm923_vm2, %v2384_v3, 0.0 }
 0x1a3   : > { %v1004_v17 = vadd.f32 %v1003_v40, %v1002_v31  ;;  %v1173_v40 = vadd.f32 %v1172_v15, %v1171_v36  ;;  %v1089_v31 = vmul.f32 %v2438_v30, %v2438_v30  ;;  %v1178_v35 = vsel %vm923_vm2, %v1088_v23, 0.0 }
 0x1a4   : > { %v1015_v15 = vsel %vm923_vm2, %v2372_v61, 0.0 }
 0x1a5   : > { %v1006_v29 = vadd.f32 %v1005_v33, %v1004_v17  ;;  %v1175_v33 = vadd.f32 %v1174_v9, %v1173_v40  ;;  %v1090_v17 = vmul.f32 %v2446_v34, %v2446_v34  ;;  %v1180_v27 = vsel %vm923_vm2, %v1089_v31, 0.0 }
 0x1a6   : > { %v1017_v9 = vsel %vm923_vm2, %v2380_v1, 0.0 }
 0x1a7   : > { %v1008_v38 = vadd.f32 %v1007_v25, %v1006_v29  ;;  %v1177_v25 = vadd.f32 %v1176_v19, %v1175_v33  ;;  %v1091_v29 = vmul.f32 %v2434_v28, %v2434_v28  ;;  %v1182_v23 = vsel %vm923_vm2, %v1090_v17, 0.0 }
 0x1a8   : > { %v1019_v19 = vsel %vm923_vm2, %v2392_v7, 0.0 }
 0x1a9   : > { %v1010_v46 = vadd.f32 %v1009_v21, %v1008_v38  ;;  %v1179_v21 = vadd.f32 %v1178_v35, %v1177_v25  ;;  %v1092_v38 = vmul.f32 %v2442_v32, %v2442_v32  ;;  %v1184_v31 = vsel %vm923_vm2, %v1091_v29, 0.0 }
 0x1aa   : > { %v1021_v35 = vsel %vm923_vm2, %v2400_v11, 0.0 }
 0x1ab   : > { %v1012_v42 = vadd.f32 %v1011_v5, %v1010_v46  ;;  %v1181_v5 = vadd.f32 %v1180_v27, %v1179_v21  ;;  %v1093_v46 = vmul.f32 %v2328_v39, %v2328_v39  ;;  %v1186_v17 = vsel %vm923_vm2, %v1092_v38, 0.0  ;;  %v3703_v27 = vld [vmem:[#allocation24_spill] sm:$0xff] }
 0x1ac   : > { %v1095_v21 = vmul.f32 %v2324_v37, %v2324_v37  ;;  %v1097_v37 = vmul.f32 %v2344_v47, %v2344_v47  ;;  %v1099_v47 = vmul.f32 %v2340_v45, %v2340_v45  ;;  %v1101_v45 = vmul.f32 %v2360_v55, %v2360_v55 }
 0x1ad   : > { %v1014_v36 = vadd.f32 %v1013_v13, %v1012_v42  ;;  %v1183_v13 = vadd.f32 %v1182_v23, %v1181_v5  ;;  %v1094_v42 = vmul.f32 %v2336_v43, %v2336_v43  ;;  %v1188_v29 = vsel %vm923_vm2, %v1093_v46, 0.0 }
 0x1ae   : > { %v1096_v43 = vmul.f32 %v2332_v41, %v2332_v41  ;;  %v1192_v46 = vsel %vm923_vm2, %v1095_v21, 0.0  ;;  %v1098_v41 = vmul.f32 %v2352_v51, %v2352_v51  ;;  %v1196_v21 = vsel %vm923_vm2, %v1097_v37, 0.0 }
 0x1af   : > { %v1016_v40 = vadd.f32 %v1015_v15, %v1014_v36  ;;  %v1185_v15 = vadd.f32 %v1184_v31, %v1183_v13  ;;  %v1023_v36 = vsel %vm923_vm2, %v3703_v27, 0.0  ;;  %v1190_v38 = vsel %vm923_vm2, %v1094_v42, 0.0 }
 0x1b0   : > { %v1194_v42 = vsel %vm923_vm2, %v1096_v43, 0.0  ;;  %v1100_v51 = vmul.f32 %v2348_v49, %v2348_v49  ;;  %v1198_v43 = vsel %vm923_vm2, %v1098_v41, 0.0  ;;  %v1200_v37 = vsel %vm923_vm2, %v1099_v47, 0.0 }
 0x1b1   : > { %v1018_v33 = vadd.f32 %v1017_v9, %v1016_v40  ;;  %v1187_v23 = vadd.f32 %v1186_v17, %v1185_v15  ;;  %v3704_v40 = vld [vmem:[#allocation26_spill] sm:$0xff]  ;;  %v1102_v49 = vmul.f32 %v2368_v59, %v2368_v59  ;;  %v1103_v55 = vmul.f32 %v2356_v53, %v2356_v53 }
 0x1b2   : > { %v1025_v5 = vsel %vm923_vm2, %v3704_v40, 0.0  ;;  %v1202_v41 = vsel %vm923_vm2, %v1100_v51, 0.0  ;;  %v1204_v47 = vsel %vm923_vm2, %v1101_v45, 0.0  ;;  %v1104_v59 = vmul.f32 %v2364_v57, %v2364_v57 }
 0x1b3   : > { %v1020_v25 = vadd.f32 %v1019_v19, %v1018_v33  ;;  %v1189_v31 = vadd.f32 %v1188_v29, %v1187_v23  ;;  %v3705_v33 = vld [vmem:[#allocation29_spill] sm:$0xff]  ;;  %v1206_v51 = vsel %vm923_vm2, %v1102_v49, 0.0  ;;  %v1105_v53 = vmul.f32 %v2376_v63, %v2376_v63 }
 0x1b4   : > { %v1027_v13 = vsel %vm923_vm2, %v3705_v33, 0.0  ;;  %v1208_v45 = vsel %vm923_vm2, %v1103_v55, 0.0  ;;  %v1106_v57 = vmul.f32 %v2384_v3, %v2384_v3  ;;  %v1210_v49 = vsel %vm923_vm2, %v1104_v59, 0.0 }
 0x1b5   : > { %v1022_v9 = vadd.f32 %v1021_v35, %v1020_v25  ;;  %v1191_v17 = vadd.f32 %v1190_v38, %v1189_v31  ;;  %v3706_v25 = vld [vmem:[#allocation31_spill] sm:$0xff]  ;;  %v1107_v63 = vmul.f32 %v2372_v61, %v2372_v61  ;;  %v1212_v55 = vsel %vm923_vm2, %v1105_v53, 0.0 }
 0x1b6   : > { %v1029_v15 = vsel %vm923_vm2, %v3706_v25, 0.0  ;;  %v1108_v3 = vmul.f32 %v2380_v1, %v2380_v1  ;;  %v1214_v59 = vsel %vm923_vm2, %v1106_v57, 0.0  ;;  %v1110_v53 = vmul.f32 %v2400_v11, %v2400_v11 }
 0x1b7   : > { %v1024_v19 = vadd.f32 %v1023_v36, %v1022_v9  ;;  %v1193_v29 = vadd.f32 %v1192_v46, %v1191_v17  ;;  %v3707_v9 = vld [vmem:[#allocation28_spill] sm:$0xff] }
 0x1b8   : > { %v1031_v23 = vsel %vm923_vm2, %v3707_v9, 0.0 }
 0x1b9   : > { %v1026_v35 = vadd.f32 %v1025_v5, %v1024_v19  ;;  %v1195_v38 = vadd.f32 %v1194_v42, %v1193_v29  ;;  %v3708_v19 = vld [vmem:[#allocation30_spill] sm:$0xff] }
 0x1ba   : > { %v1033_v31 = vsel %vm923_vm2, %v3708_v19, 0.0 }
 0x1bb   : > { %v1028_v36 = vadd.f32 %v1027_v13, %v1026_v35  ;;  %v1197_v46 = vadd.f32 %v1196_v21, %v1195_v38  ;;  %v3709_v35 = vld [vmem:[#allocation33_spill] sm:$0xff] }
 0x1bc   : > { %v1035_v17 = vsel %vm923_vm2, %v3709_v35, 0.0 }
 0x1bd   : > { %v1030_v5 = vadd.f32 %v1029_v15, %v1028_v36  ;;  %v1199_v42 = vadd.f32 %v1198_v43, %v1197_v46  ;;  %v3710_v36 = vld [vmem:[#allocation35_spill] sm:$0xff] }
 0x1be   : > { %v1037_v29 = vsel %vm923_vm2, %v3710_v36, 0.0 }
 0x1bf   : > { %v1032_v13 = vadd.f32 %v1031_v23, %v1030_v5  ;;  %v1201_v21 = vadd.f32 %v1200_v37, %v1199_v42  ;;  %v3711_v5 = vld [vmem:[#allocation32_spill] sm:$0xff] }
 0x1c0   : > { %v1039_v38 = vsel %vm923_vm2, %v3711_v5, 0.0 }
 0x1c1   : > { %v1034_v15 = vadd.f32 %v1033_v31, %v1032_v13  ;;  %v1203_v43 = vadd.f32 %v1202_v41, %v1201_v21  ;;  %v3712_v13 = vld [vmem:[#allocation34_spill] sm:$0xff] }
 0x1c2   : > { %v1041_v46 = vsel %vm923_vm2, %v3712_v13, 0.0 }
 0x1c3   : > { %v1036_v23 = vadd.f32 %v1035_v17, %v1034_v15  ;;  %v1205_v37 = vadd.f32 %v1204_v47, %v1203_v43  ;;  %v3713_v15 = vld [vmem:[#allocation37_spill] sm:$0xff] }
 0x1c4   : > { %v1043_v42 = vsel %vm923_vm2, %v3713_v15, 0.0 }
 0x1c5   : > { %v1038_v31 = vadd.f32 %v1037_v29, %v1036_v23  ;;  %v1207_v41 = vadd.f32 %v1206_v51, %v1205_v37  ;;  %v3714_v23 = vld [vmem:[#allocation39_spill] sm:$0xff] }
 0x1c6   : > { %v1045_v21 = vsel %vm923_vm2, %v3714_v23, 0.0 }
 0x1c7   : > { %v1040_v17 = vadd.f32 %v1039_v38, %v1038_v31  ;;  %v1209_v47 = vadd.f32 %v1208_v45, %v1207_v41  ;;  %v3715_v31 = vld [vmem:[#allocation36_spill] sm:$0xff]  ;;  %v1216_v41 = vsel %vm923_vm2, %v1107_v63, 0.0  ;;  %v1222_v63 = vsel %vm923_vm2, %v1110_v53, 0.0 }
 0x1c8   : > { %v1047_v43 = vsel %vm923_vm2, %v3715_v31, 0.0 }
 0x1c9   : > { %v1042_v29 = vadd.f32 %v1041_v46, %v1040_v17  ;;  %v1211_v51 = vadd.f32 %v1210_v49, %v1209_v47  ;;  %v3716_v17 = vld [vmem:[#allocation38_spill] sm:$0xff]  ;;  %v1111_v47 = vmul.f32 %v3703_v27, %v3703_v27  ;;  %v1114_v27 = vmul.f32 %v3706_v25, %v3706_v25 }
 0x1ca   : > { %v1049_v37 = vsel %vm923_vm2, %v3716_v17, 0.0 }
 0x1cb   : > { %v1044_v38 = vadd.f32 %v1043_v42, %v1042_v29  ;;  %v1213_v45 = vadd.f32 %v1212_v55, %v1211_v51  ;;  %v1109_v29 = vmul.f32 %v2392_v7, %v2392_v7 }
 0x1cd   : > { %v1046_v46 = vadd.f32 %v1045_v21, %v1044_v38  ;;  %v1215_v39 = vadd.f32 %v1214_v59, %v1213_v45  ;;  %v1218_v21 = vsel %vm923_vm2, %v1108_v3, 0.0  ;;  %v1220_v57 = vsel %vm923_vm2, %v1109_v29, 0.0 }
 0x1ce   : > { %v1113_v59 = vmul.f32 %v3705_v33, %v3705_v33  ;;  %v1224_v3 = vsel %vm923_vm2, %v1111_v47, 0.0  ;;  %v1116_v33 = vmul.f32 %v3708_v19, %v3708_v19  ;;  %v1119_v19 = vmul.f32 %v3711_v5, %v3711_v5 }
 0x1cf   : > { %v1048_v42 = vadd.f32 %v1047_v43, %v1046_v46  ;;  %v1217_v38 = vadd.f32 %v1216_v41, %v1215_v39  ;;  %v1112_v46 = vmul.f32 %v3704_v40, %v3704_v40  ;;  %v922_v41 = vld [vmem:[#allocation2] sm:$0x1]  ;;  %v1115_v40 = vmul.f32 %v3707_v9, %v3707_v9 }
 0x1d0   : > { %v1228_v53 = vsel %vm923_vm2, %v1113_v59, 0.0 }
 0x1d1   : > { %v1050_v61 = vadd.f32 %v1049_v37, %v1048_v42  ;;  %v1219_v55 = vadd.f32 %v1218_v21, %v1217_v38  ;;  %v1230_v38 = vsel %vm923_vm2, %v1114_v27, 0.0  ;;  %v1122_v27 = vmul.f32 %v3714_v23, %v3714_v23 }
 0x1d3   : > { %v1051_v49 = vrot.slane %v1050_v61, 4  ;;  %v1221_v37 = vadd.f32 %v1220_v57, %v1219_v55  ;;  %v1117_v57 = vmul.f32 %v3709_v35, %v3709_v35  ;;  %v1118_v55 = vmul.f32 %v3710_v36, %v3710_v36 }
 0x1d4   : > { %v1120_v35 = vmul.f32 %v3712_v13, %v3712_v13  ;;  %v1240_v36 = vsel %vm923_vm2, %v1119_v19, 0.0 }
 0x1d5   : > { %v1052_v43 = vadd.f32 %v1051_v49, %v1050_v61  ;;  %v1223_v42 = vadd.f32 %v1222_v63, %v1221_v37  ;;  %v1226_v61 = vsel %vm923_vm2, %v1112_v46, 0.0  ;;  %v1234_v46 = vsel %vm923_vm2, %v1116_v33, 0.0 }
 0x1d6   : > { %v1238_v59 = vsel %vm923_vm2, %v1118_v55, 0.0  ;;  %v1242_v5 = vsel %vm923_vm2, %v1120_v35, 0.0 }
 0x1d7   : > { %v1053_v51 = vrot.slane %v1052_v43, 2  ;;  %v1225_v29 = vadd.f32 %v1224_v3, %v1223_v42 }
 0x1d9   : > { %v1054_v39 = vadd.f32 %v1053_v51, %v1052_v43  ;;  %v1227_v49 = vadd.f32 %v1226_v61, %v1225_v29  ;;  %v1232_v43 = vsel %vm923_vm2, %v1115_v40, 0.0  ;;  %v1236_v51 = vsel %vm923_vm2, %v1117_v57, 0.0 }
 0x1db   : > { %v1055_v45 = vrot.slane %v1054_v39, 1  ;;  %v1229_v25 = vadd.f32 %v1228_v53, %v1227_v49 }
 0x1dd   : > { %v1056_v21 = vadd.f32 %v1055_v45, %v1054_v39  ;;  %v1231_v9 = vadd.f32 %v1230_v38, %v1229_v25  ;;  %v1121_v39 = vmul.f32 %v3713_v15, %v3713_v15  ;;  %v1123_v45 = vmul.f32 %v3715_v31, %v3715_v31 }
 0x1de   : > { %v1246_v15 = vsel %vm923_vm2, %v1122_v27, 0.0 }
 0x1df   : > { %v1057_v47 = vadd.f32 %v1056_v21, %v922_v41  ;;  %v1233_v63 = vadd.f32 %v1232_v43, %v1231_v9  ;;  %v1244_v13 = vsel %vm923_vm2, %v1121_v39, 0.0  ;;  %v1124_v41 = vmul.f32 %v3716_v17, %v3716_v17  ;;  %v1060_v43 = vld [vmem:[#allocation3] sm:$0x1] }
 0x1e0   : > { %v1248_v53 = vsel %vm923_vm2, %v1123_v45, 0.0 }
 0x1e1   : > { %1059 = vst.msk [vmem:[#allocation2] sm:$0x1] %vm1058_vm3, %v1057_v47  ;;  %v1235_v37 = vadd.f32 %v1234_v46, %v1233_v63  ;;  %v1250_v23 = vsel %vm923_vm2, %v1124_v41, 0.0 }
 0x1e3   : > { %v1237_v3 = vadd.f32 %v1236_v51, %v1235_v37 }
 0x1e5   : > { %v1239_v42 = vadd.f32 %v1238_v59, %v1237_v3 }
 0x1e7   : > { %v1241_v61 = vadd.f32 %v1240_v36, %v1239_v42 }
 0x1e9   : > { %v1243_v29 = vadd.f32 %v1242_v5, %v1241_v61 }
 0x1eb   : > { %v1245_v40 = vadd.f32 %v1244_v13, %v1243_v29 }
 0x1ed   : > { %v1247_v21 = vadd.f32 %v1246_v15, %v1245_v40 }
 0x1ef   : > { %v1249_v49 = vadd.f32 %v1248_v53, %v1247_v21 }
 0x1f1   : > { %v1251_v33 = vadd.f32 %v1250_v23, %v1249_v49 }
 0x1f3   : > { %v1252_v38 = vrot.slane %v1251_v33, 4 }
 0x1f5   : > { %v1253_v47 = vadd.f32 %v1252_v38, %v1251_v33 }
 0x1f7   : > { %v1254_v25 = vrot.slane %v1253_v47, 2 }
 0x1f9   : > { %v1255_v31 = vadd.f32 %v1254_v25, %v1253_v47 }
 0x1fb   : > { %v1256_v57 = vrot.slane %v1255_v31, 1 }
 0x1fd   : > { %v1257_v9 = vadd.f32 %v1256_v57, %v1255_v31 }
 0x1ff   : > { %v1258_v55 = vadd.f32 %v1257_v9, %v1060_v43 }
 0x201   : > { %1259 = vst.msk [vmem:[#allocation3] sm:$0x1] %vm1058_vm3, %v1258_v55 }
 0x202 PF: > { %p1933_p10 = scmp.ne.s32.totalorder %s2163_s16, 1 }
 0x203   : > { %v1328_v17 = vld [vmem:[#allocation2] sm:$0x1] (!%p1933_p10)  ;;  %v1335_v63 = vlaneseq (!%p1933_p10)  ;;  %v3717_v42 = vld [vmem:[#allocation6_spill] sm:$0xff] (!%p1933_p10)  ;;  %v3719_v45 = vld [vmem:[#allocation4_spill] sm:$0xff] (!%p1933_p10)  ;;  %vm1682_vm4 = vcmask (!%p1933_p10), 64512  }
 0x204   : > { %1327 = sbr.rel (%p1933_p10) target bundleno = 626 (0x272), region = 48  ;;  %v1329_v19 = vmul.f32 (!%p1933_p10), 0.00048828125, %v1328_v17  ;;  %v3718_v5 = vld [vmem:[#allocation10_spill] sm:$0xff] (!%p1933_p10)  ;;  %v3720_v29 = vld [vmem:[#allocation8_spill] sm:$0xff] (!%p1933_p10)  ;;  %v3721_v15 = vld [vmem:[#allocation13_spill] sm:$0xff] (!%p1933_p10) }
 0x205   : > { %v1336_v37 = vshrl.u32 (!%p1933_p10), %v1335_v63, 7  ;;  %v3733_v63 = vld [vmem:[#allocation19_spill] sm:$0xff] (!%p1933_p10)  ;;  %v3734_v25 = vld [vmem:[#allocation22_spill] sm:$0xff] (!%p1933_p10) }
 0x206   : > { %v1332_v35 = vmul.f32 (!%p1933_p10), %v1329_v19, %v1329_v19  ;;  %v3084_v17 = vld [vmem:[%s3594_s2] ss:$0 sm:$0xff] (!%p1933_p10) }
 0x207   : > { %v1337_v59 = vsub.s32 (!%p1933_p10), 0, %v1336_v37  ;;  %v3730_v37 = vld [vmem:[#allocation18_spill] sm:$0xff] (!%p1933_p10)  ;;  %v3101_v47 = vld [vmem:[%s3595_s3] ss:$0 sm:$0xff] (!%p1933_p10) }
 0x208   : > { %v1330_v46 = vld [vmem:[#allocation3] sm:$0x1] (!%p1933_p10) }
 0x209   : > { %v1331_v51 = vmul.f32 (!%p1933_p10), 0.00048828125, %v1330_v46  ;;  %v2977_v39 = vrot.slane (!%p1933_p10), %v1329_v19, %v1337_v59  ;;  %v3732_v19 = vld [vmem:[#allocation17_spill] sm:$0xff] (!%p1933_p10) }
 0x20b   : > { %v1333_v3 = vsub.f32 %v1331_v51, %v1332_v35  ;;  %v1340_v27 = vsub.f32 %v3717_v42, %v2977_v39  ;;  %v1341_v61 = vsub.f32 %v3718_v5, %v2977_v39  ;;  %v1342_v13 = vsub.f32 %v3719_v45, %v2977_v39  ;;  %v3722_v45 = vld [vmem:[#allocation7_spill] sm:$0xff]  ;;  %v3724_v35 = vld [vmem:[#allocation5_spill] sm:$0xff]  ;;  %v3727_v42 = vld [vmem:[#allocation16_spill] sm:$0xff] }
 0x20c   : > { %v1343_v41 = vsub.f32 %v3720_v29, %v2977_v39  ;;  %v1344_v40 = vsub.f32 %v3721_v15, %v2977_v39  ;;  %v1345_v53 = vsub.f32 %v2350_v50, %v2977_v39  ;;  %v1346_v21 = vsub.f32 %v2338_v44, %v2977_v39  ;;  %v3723_v15 = vld [vmem:[#allocation11_spill] sm:$0xff]  ;;  %v3728_v5 = vld [vmem:[#allocation12_spill] sm:$0xff]  ;;  %v3736_v44 = vld [vmem:[#allocation21_spill] sm:$0xff] }
 0x20d   : > { %v1404_v36 = vadd.f32 1e-05, %v1333_v3  ;;  %v1347_v23 = vsub.f32 %v2346_v48, %v2977_v39  ;;  %v3725_v3 = vld [vmem:[#allocation9_spill] sm:$0xff]  ;;  %v3729_v29 = vld [vmem:[#allocation15_spill] sm:$0xff]  ;;  %v3731_v51 = vld [vmem:[#allocation20_spill] sm:$0xff] }
 0x20e   : > { %v3735_v48 = vld [vmem:[#allocation23_spill] sm:$0xff] }
 0x20f   : > { %2135 = vrsqrt.f32 %v1404_v36  ;;  %v3726_v36 = vld [vmem:[#allocation14_spill] sm:$0xff] }
 0x219   : > { %v2136_v31 = vpop.eup %2135 }
 0x21a   : > { %v3073_v50 = vrot.slane %v2136_v31, %v1337_v59 }
 0x21c   : > { %v1412_v33 = vmul.f32 %v3073_v50, %v1340_v27  ;;  %v1413_v46 = vmul.f32 %v3073_v50, %v1341_v61  ;;  %v1414_v49 = vmul.f32 %v3073_v50, %v1342_v13  ;;  %v1415_v11 = vmul.f32 %v3073_v50, %v1343_v41 }
 0x21d   : > { %v1416_v31 = vmul.f32 %v3073_v50, %v1344_v40  ;;  %v1417_v43 = vmul.f32 %v3073_v50, %v1345_v53  ;;  %v1418_v9 = vmul.f32 %v3073_v50, %v1346_v21  ;;  %v1419_v57 = vmul.f32 %v3073_v50, %v1347_v23 }
 0x21e   : > { %v1483_v27 = vmul.f32 %v3084_v17, %v1412_v33  ;;  %v1484_v61 = vmul.f32 %v3084_v17, %v1413_v46  ;;  %v1485_v13 = vmul.f32 %v3084_v17, %v1414_v49  ;;  %v1486_v41 = vmul.f32 %v3084_v17, %v1415_v11 }
 0x21f   : > { %v1487_v38 = vmul.f32 %v3084_v17, %v1416_v31  ;;  %v1488_v59 = vmul.f32 %v3084_v17, %v1417_v43  ;;  %v1489_v40 = vmul.f32 %v3084_v17, %v1418_v9  ;;  %v1490_v53 = vmul.f32 %v3084_v17, %v1419_v57 }
 0x220   : > { %v1554_v21 = vadd.f32 %v3101_v47, %v1483_v27  ;;  %v1555_v23 = vadd.f32 %v3101_v47, %v1484_v61  ;;  %v1556_v33 = vadd.f32 %v3101_v47, %v1485_v13  ;;  %v1557_v49 = vadd.f32 %v3101_v47, %v1486_v41 }
 0x221   : > { %v1558_v11 = vadd.f32 %v3101_v47, %v1487_v38  ;;  %v1559_v43 = vadd.f32 %v3101_v47, %v1488_v59  ;;  %v1560_v9 = vadd.f32 %v3101_v47, %v1489_v40  ;;  %v1561_v57 = vadd.f32 %v3101_v47, %v1490_v53 }
 0x222   : > { %v1618_v46 = vmax.f32 %v1554_v21, 0.0  ;;  %v1619_v31 = vmax.f32 %v1555_v23, 0.0  ;;  %v1620_v27 = vmax.f32 %v1556_v33, 0.0  ;;  %v1621_v61 = vmax.f32 %v1557_v49, 0.0 }
 0x223   : > { %v1622_v13 = vmax.f32 %v1558_v11, 0.0  ;;  %v1623_v55 = vmax.f32 %v1559_v43, 0.0  ;;  %v1624_v41 = vmax.f32 %v1560_v9, 0.0  ;;  %v1625_v7 = vmax.f32 %v1561_v57, 0.0 }
 0x224   : > { %1683 = vst.msk [vmem:[%s2250_s8] sm:$0xff] %vm1682_vm4, %v1618_v46  ;;  %1684 = vst.msk [vmem:[%s2250_s8 + $0x8] sm:$0xff] %vm1682_vm4, %v1619_v31  ;;  %v3741_v38 = vsub.f32 %v2358_v54, %v2977_v39  ;;  %v3742_v40 = vsub.f32 %v2366_v58, %v2977_v39  ;;  %v3743_v21 = vsub.f32 %v2354_v52, %v2977_v39 }
 0x225   : > { %1685 = vst.msk [vmem:[%s2250_s8 + $0x10] sm:$0xff] %vm1682_vm4, %v1620_v27  ;;  %1686 = vst.msk [vmem:[%s2250_s8 + $0x18] sm:$0xff] %vm1682_vm4, %v1621_v61  ;;  %v3744_v33 = vsub.f32 %v2362_v56, %v2977_v39  ;;  %v3745_v54 = vsub.f32 %v2374_v62, %v2977_v39  ;;  %v3746_v58 = vsub.f32 %v2382_v2, %v2977_v39 }
 0x226   : > { %v1420_v59 = vmul.f32 %v3073_v50, %v3741_v38  ;;  %v1421_v53 = vmul.f32 %v3073_v50, %v3742_v40  ;;  %v1422_v23 = vmul.f32 %v3073_v50, %v3743_v21  ;;  %1687 = vst.msk [vmem:[%s2250_s8 + $0x20] sm:$0xff] %vm1682_vm4, %v1622_v13  ;;  %1688 = vst.msk [vmem:[%s2250_s8 + $0x28] sm:$0xff] %vm1682_vm4, %v1623_v55 }
 0x227   : > { %v1423_v49 = vmul.f32 %v3073_v50, %v3744_v33  ;;  %1689 = vst.msk [vmem:[%s2250_s8 + $0x30] sm:$0xff] %vm1682_vm4, %v1624_v41  ;;  %1690 = vst.msk [vmem:[%s2250_s8 + $0x38] sm:$0xff] %vm1682_vm4, %v1625_v7  ;;  %v1424_v52 = vmul.f32 %v3073_v50, %v3745_v54  ;;  %v1425_v56 = vmul.f32 %v3073_v50, %v3746_v58 }
 0x228   : > { %v3747_v11 = vsub.f32 %v2370_v60, %v2977_v39  ;;  %v3748_v55 = vsub.f32 %v2378_v0, %v2977_v39  ;;  %v1491_v9 = vmul.f32 %v3084_v17, %v1420_v59  ;;  %v1492_v62 = vmul.f32 %v3084_v17, %v1421_v53 }
 0x229   : > { %v1493_v57 = vmul.f32 %v3084_v17, %v1422_v23  ;;  %v1494_v2 = vmul.f32 %v3084_v17, %v1423_v49  ;;  %v1495_v46 = vmul.f32 %v3084_v17, %v1424_v52  ;;  %v1496_v31 = vmul.f32 %v3084_v17, %v1425_v56 }
 0x22a   : > { %v1426_v43 = vmul.f32 %v3073_v50, %v3747_v11  ;;  %v1427_v7 = vmul.f32 %v3073_v50, %v3748_v55  ;;  %v1562_v0 = vadd.f32 %v3101_v47, %v1491_v9  ;;  %v1563_v61 = vadd.f32 %v3101_v47, %v1492_v62 }
 0x22b   : > { %v1564_v13 = vadd.f32 %v3101_v47, %v1493_v57  ;;  %v1565_v41 = vadd.f32 %v3101_v47, %v1494_v2  ;;  %v1566_v38 = vadd.f32 %v3101_v47, %v1495_v46  ;;  %v1567_v59 = vadd.f32 %v3101_v47, %v1496_v31 }
 0x22c   : > { %v1497_v60 = vmul.f32 %v3084_v17, %v1426_v43  ;;  %v1498_v27 = vmul.f32 %v3084_v17, %v1427_v7  ;;  %v1626_v21 = vmax.f32 %v1562_v0, 0.0  ;;  %v1627_v23 = vmax.f32 %v1563_v61, 0.0 }
 0x22d   : > { %v1628_v33 = vmax.f32 %v1564_v13, 0.0  ;;  %v1629_v49 = vmax.f32 %v1565_v41, 0.0  ;;  %v1630_v54 = vmax.f32 %v1566_v38, 0.0  ;;  %v1631_v52 = vmax.f32 %v1567_v59, 0.0 }
 0x22e   : > { %v1568_v40 = vadd.f32 %v3101_v47, %v1497_v60  ;;  %v1569_v53 = vadd.f32 %v3101_v47, %v1498_v27  ;;  %1691 = vst.msk [vmem:[%s2250_s8 + $0x40] sm:$0xff] %vm1682_vm4, %v1626_v21  ;;  %1692 = vst.msk [vmem:[%s2250_s8 + $0x48] sm:$0xff] %vm1682_vm4, %v1627_v23  ;;  %v3749_v11 = vsub.f32 %v2390_v6, %v2977_v39 }
 0x22f   : > { %1693 = vst.msk [vmem:[%s2250_s8 + $0x50] sm:$0xff] %vm1682_vm4, %v1628_v33  ;;  %1694 = vst.msk [vmem:[%s2250_s8 + $0x58] sm:$0xff] %vm1682_vm4, %v1629_v49  ;;  %v3750_v55 = vsub.f32 %v2398_v10, %v2977_v39  ;;  %v3751_v9 = vsub.f32 %v2386_v4, %v2977_v39  ;;  %v3752_v57 = vsub.f32 %v2394_v8, %v2977_v39 }
 0x230   : > { %v1632_v58 = vmax.f32 %v1568_v40, 0.0  ;;  %v1633_v56 = vmax.f32 %v1569_v53, 0.0  ;;  %v1428_v43 = vmul.f32 %v3073_v50, %v3749_v11  ;;  %1695 = vst.msk [vmem:[%s2250_s8 + $0x60] sm:$0xff] %vm1682_vm4, %v1630_v54  ;;  %1696 = vst.msk [vmem:[%s2250_s8 + $0x68] sm:$0xff] %vm1682_vm4, %v1631_v52  ;;  %v3753_v6 = vsub.f32 %v2406_v14, %v2977_v39 }
 0x231   : > { %v1429_v7 = vmul.f32 %v3073_v50, %v3750_v55  ;;  %v1430_v62 = vmul.f32 %v3073_v50, %v3751_v9  ;;  %v1431_v2 = vmul.f32 %v3073_v50, %v3752_v57  ;;  %v3754_v10 = vsub.f32 %v2414_v18, %v2977_v39 }
 0x232   : > { %1697 = vst.msk [vmem:[%s2250_s8 + $0x70] sm:$0xff] %vm1682_vm4, %v1632_v58  ;;  %1698 = vst.msk [vmem:[%s2250_s8 + $0x78] sm:$0xff] %vm1682_vm4, %v1633_v56  ;;  %v1432_v4 = vmul.f32 %v3073_v50, %v3753_v6  ;;  %v3755_v46 = vsub.f32 %v2402_v12, %v2977_v39  ;;  %v3756_v60 = vsub.f32 %v2410_v16, %v2977_v39 }
 0x233   : > { %v1433_v8 = vmul.f32 %v3073_v50, %v3754_v10  ;;  %v1499_v0 = vmul.f32 %v3084_v17, %v1428_v43  ;;  %v1500_v14 = vmul.f32 %v3084_v17, %v1429_v7  ;;  %v1501_v61 = vmul.f32 %v3084_v17, %v1430_v62 }
 0x234   : > { %v1434_v31 = vmul.f32 %v3073_v50, %v3755_v46  ;;  %v1435_v27 = vmul.f32 %v3073_v50, %v3756_v60  ;;  %v1502_v18 = vmul.f32 %v3084_v17, %v1431_v2  ;;  %v1503_v13 = vmul.f32 %v3084_v17, %v1432_v4 }
 0x235   : > { %v1504_v41 = vmul.f32 %v3084_v17, %v1433_v8  ;;  %v1570_v16 = vadd.f32 %v3101_v47, %v1499_v0  ;;  %v1571_v59 = vadd.f32 %v3101_v47, %v1500_v14  ;;  %v1572_v40 = vadd.f32 %v3101_v47, %v1501_v61 }
 0x236   : > { %v1505_v12 = vmul.f32 %v3084_v17, %v1434_v31  ;;  %v1506_v38 = vmul.f32 %v3084_v17, %v1435_v27  ;;  %v1573_v53 = vadd.f32 %v3101_v47, %v1502_v18  ;;  %v1574_v21 = vadd.f32 %v3101_v47, %v1503_v13 }
 0x237   : > { %v1575_v23 = vadd.f32 %v3101_v47, %v1504_v41  ;;  %v1634_v54 = vmax.f32 %v1570_v16, 0.0  ;;  %v1635_v52 = vmax.f32 %v1571_v59, 0.0  ;;  %v1636_v58 = vmax.f32 %v1572_v40, 0.0 }
 0x238   : > { %v1576_v33 = vadd.f32 %v3101_v47, %v1505_v12  ;;  %v1577_v49 = vadd.f32 %v3101_v47, %v1506_v38  ;;  %v1637_v56 = vmax.f32 %v1573_v53, 0.0  ;;  %v1638_v11 = vmax.f32 %v1574_v21, 0.0 }
 0x239   : > { %v1639_v43 = vmax.f32 %v1575_v23, 0.0  ;;  %1699 = vst.msk [vmem:[%s2250_s8 + $0x80] sm:$0xff] %vm1682_vm4, %v1634_v54  ;;  %1700 = vst.msk [vmem:[%s2250_s8 + $0x88] sm:$0xff] %vm1682_vm4, %v1635_v52  ;;  %v3757_v9 = vsub.f32 %v2422_v22, %v2977_v39  ;;  %v3758_v57 = vsub.f32 %v2430_v26, %v2977_v39  ;;  %v3759_v6 = vsub.f32 %v2418_v20, %v2977_v39 }
 0x23a   : > { %v1640_v55 = vmax.f32 %v1576_v33, 0.0  ;;  %v1641_v7 = vmax.f32 %v1577_v49, 0.0  ;;  %1701 = vst.msk [vmem:[%s2250_s8 + $0x90] sm:$0xff] %vm1682_vm4, %v1636_v58  ;;  %1702 = vst.msk [vmem:[%s2250_s8 + $0x98] sm:$0xff] %vm1682_vm4, %v1637_v56  ;;  %v3760_v10 = vsub.f32 %v2426_v24, %v2977_v39  ;;  %v3761_v22 = vsub.f32 %v2438_v30, %v2977_v39 }
 0x23b   : > { %v1436_v62 = vmul.f32 %v3073_v50, %v3757_v9  ;;  %v1437_v2 = vmul.f32 %v3073_v50, %v3758_v57  ;;  %v1438_v4 = vmul.f32 %v3073_v50, %v3759_v6  ;;  %1703 = vst.msk [vmem:[%s2250_s8 + $0xa0] sm:$0xff] %vm1682_vm4, %v1638_v11  ;;  %1704 = vst.msk [vmem:[%s2250_s8 + $0xa8] sm:$0xff] %vm1682_vm4, %v1639_v43 }
 0x23c   : > { %v1439_v8 = vmul.f32 %v3073_v50, %v3760_v10  ;;  %1705 = vst.msk [vmem:[%s2250_s8 + $0xb0] sm:$0xff] %vm1682_vm4, %v1640_v55  ;;  %1706 = vst.msk [vmem:[%s2250_s8 + $0xb8] sm:$0xff] %vm1682_vm4, %v1641_v7  ;;  %v1440_v20 = vmul.f32 %v3073_v50, %v3761_v22  ;;  %v3762_v26 = vsub.f32 %v2446_v34, %v2977_v39 }
 0x23d   : > { %v3763_v46 = vsub.f32 %v2434_v28, %v2977_v39  ;;  %v3764_v60 = vsub.f32 %v2442_v32, %v2977_v39  ;;  %v1507_v0 = vmul.f32 %v3084_v17, %v1436_v62  ;;  %v1508_v30 = vmul.f32 %v3084_v17, %v1437_v2 }
 0x23e   : > { %v1441_v24 = vmul.f32 %v3073_v50, %v3762_v26  ;;  %v1509_v14 = vmul.f32 %v3084_v17, %v1438_v4  ;;  %v1510_v34 = vmul.f32 %v3084_v17, %v1439_v8  ;;  %v1511_v61 = vmul.f32 %v3084_v17, %v1440_v20 }
 0x23f   : > { %v1442_v31 = vmul.f32 %v3073_v50, %v3763_v46  ;;  %v1443_v27 = vmul.f32 %v3073_v50, %v3764_v60  ;;  %v1578_v32 = vadd.f32 %v3101_v47, %v1507_v0  ;;  %v1579_v41 = vadd.f32 %v3101_v47, %v1508_v30 }
 0x240   : > { %v1512_v18 = vmul.f32 %v3084_v17, %v1441_v24  ;;  %v1580_v12 = vadd.f32 %v3101_v47, %v1509_v14  ;;  %v1581_v38 = vadd.f32 %v3101_v47, %v1510_v34  ;;  %v1582_v16 = vadd.f32 %v3101_v47, %v1511_v61 }
 0x241   : > { %v1513_v28 = vmul.f32 %v3084_v17, %v1442_v31  ;;  %v1514_v13 = vmul.f32 %v3084_v17, %v1443_v27  ;;  %v1642_v21 = vmax.f32 %v1578_v32, 0.0  ;;  %v1643_v23 = vmax.f32 %v1579_v41, 0.0 }
 0x242   : > { %v1583_v59 = vadd.f32 %v3101_v47, %v1512_v18  ;;  %v1644_v33 = vmax.f32 %v1580_v12, 0.0  ;;  %v1645_v49 = vmax.f32 %v1581_v38, 0.0  ;;  %v1646_v54 = vmax.f32 %v1582_v16, 0.0 }
 0x243   : > { %v1584_v40 = vadd.f32 %v3101_v47, %v1513_v28  ;;  %v1585_v53 = vadd.f32 %v3101_v47, %v1514_v13  ;;  %1707 = vst.msk [vmem:[%s2250_s8 + $0xc0] sm:$0xff] %vm1682_vm4, %v1642_v21  ;;  %1708 = vst.msk [vmem:[%s2250_s8 + $0xc8] sm:$0xff] %vm1682_vm4, %v1643_v23  ;;  %v3765_v11 = vsub.f32 %v3722_v45, %v2977_v39 }
 0x244   : > { %v1647_v52 = vmax.f32 %v1583_v59, 0.0  ;;  %1709 = vst.msk [vmem:[%s2250_s8 + $0xd0] sm:$0xff] %vm1682_vm4, %v1644_v33  ;;  %1710 = vst.msk [vmem:[%s2250_s8 + $0xd8] sm:$0xff] %vm1682_vm4, %v1645_v49  ;;  %v3766_v55 = vsub.f32 %v3723_v15, %v2977_v39  ;;  %v3767_v9 = vsub.f32 %v3724_v35, %v2977_v39  ;;  %v3768_v57 = vsub.f32 %v3725_v3, %v2977_v39 }
 0x245   : > { %v1648_v58 = vmax.f32 %v1584_v40, 0.0  ;;  %v1649_v56 = vmax.f32 %v1585_v53, 0.0  ;;  %v1444_v43 = vmul.f32 %v3073_v50, %v3765_v11  ;;  %1711 = vst.msk [vmem:[%s2250_s8 + $0xe0] sm:$0xff] %vm1682_vm4, %v1646_v54  ;;  %v3769_v45 = vsub.f32 %v3726_v36, %v2977_v39 }
 0x246   : > { %v1445_v7 = vmul.f32 %v3073_v50, %v3766_v55  ;;  %v1446_v62 = vmul.f32 %v3073_v50, %v3767_v9  ;;  %v1447_v2 = vmul.f32 %v3073_v50, %v3768_v57  ;;  %1712 = vst.msk [vmem:[%s2250_s8 + $0xe8] sm:$0xff] %vm1682_vm4, %v1647_v52  ;;  %v3770_v15 = vsub.f32 %v3727_v42, %v2977_v39 }
 0x247   : > { %1713 = vst.msk [vmem:[%s2250_s8 + $0xf0] sm:$0xff] %vm1682_vm4, %v1648_v58  ;;  %1714 = vst.msk [vmem:[%s2250_s8 + $0xf8] sm:$0xff] %vm1682_vm4, %v1649_v56  ;;  %v1448_v35 = vmul.f32 %v3073_v50, %v3769_v45  ;;  %v3771_v6 = vsub.f32 %v3728_v5, %v2977_v39  ;;  %v3772_v10 = vsub.f32 %v3729_v29, %v2977_v39 }
 0x248   : > { %v1449_v3 = vmul.f32 %v3073_v50, %v3770_v15  ;;  %v1515_v22 = vmul.f32 %v3084_v17, %v1444_v43  ;;  %v1516_v36 = vmul.f32 %v3084_v17, %v1445_v7  ;;  %v1517_v20 = vmul.f32 %v3084_v17, %v1446_v62 }
 0x249   : > { %v1450_v4 = vmul.f32 %v3073_v50, %v3771_v6  ;;  %v1451_v8 = vmul.f32 %v3073_v50, %v3772_v10  ;;  %v1518_v42 = vmul.f32 %v3084_v17, %v1447_v2  ;;  %v1519_v26 = vmul.f32 %v3084_v17, %v1448_v35 }
 0x24a   : > { %v1520_v24 = vmul.f32 %v3084_v17, %v1449_v3  ;;  %v1586_v29 = vadd.f32 %v3101_v47, %v1515_v22  ;;  %v1587_v31 = vadd.f32 %v3101_v47, %v1516_v36  ;;  %v1588_v60 = vadd.f32 %v3101_v47, %v1517_v20 }
 0x24b   : > { %v1521_v5 = vmul.f32 %v3084_v17, %v1450_v4  ;;  %v1522_v46 = vmul.f32 %v3084_v17, %v1451_v8  ;;  %v1589_v27 = vadd.f32 %v3101_v47, %v1518_v42  ;;  %v1590_v0 = vadd.f32 %v3101_v47, %v1519_v26  ;;  %v3781_v26 = vld [vmem:[#allocation25_spill] sm:$0xff] }
 0x24c   : > { %v1591_v30 = vadd.f32 %v3101_v47, %v1520_v24  ;;  %v1650_v61 = vmax.f32 %v1586_v29, 0.0  ;;  %v1651_v18 = vmax.f32 %v1587_v31, 0.0  ;;  %v1652_v28 = vmax.f32 %v1588_v60, 0.0  ;;  %v3785_v60 = vld [vmem:[#allocation24_spill] sm:$0xff] }
 0x24d   : > { %v1592_v14 = vadd.f32 %v3101_v47, %v1521_v5  ;;  %v1593_v34 = vadd.f32 %v3101_v47, %v1522_v46  ;;  %v1653_v13 = vmax.f32 %v1589_v27, 0.0  ;;  %v1654_v32 = vmax.f32 %v1590_v0, 0.0  ;;  %v3783_v46 = vld [vmem:[#allocation27_spill] sm:$0xff] }
 0x24e   : > { %v1655_v41 = vmax.f32 %v1591_v30, 0.0  ;;  %1715 = vst.msk [vmem:[%s2250_s8 + $0x100] sm:$0xff] %vm1682_vm4, %v1650_v61  ;;  %1716 = vst.msk [vmem:[%s2250_s8 + $0x108] sm:$0xff] %vm1682_vm4, %v1651_v18  ;;  %v3773_v16 = vsub.f32 %v3730_v37, %v2977_v39  ;;  %v3774_v40 = vsub.f32 %v3731_v51, %v2977_v39  ;;  %v3775_v21 = vsub.f32 %v3732_v19, %v2977_v39  ;;  %v3787_v30 = vld [vmem:[#allocation26_spill] sm:$0xff]  ;;  %v3789_v61 = vld [vmem:[#allocation29_spill] sm:$0xff] }
 0x24f   : > { %v1656_v12 = vmax.f32 %v1592_v14, 0.0  ;;  %v1657_v38 = vmax.f32 %v1593_v34, 0.0  ;;  %1717 = vst.msk [vmem:[%s2250_s8 + $0x110] sm:$0xff] %vm1682_vm4, %v1652_v28  ;;  %1718 = vst.msk [vmem:[%s2250_s8 + $0x118] sm:$0xff] %vm1682_vm4, %v1653_v13  ;;  %v3776_v33 = vsub.f32 %v3733_v63, %v2977_v39  ;;  %v3777_v51 = vsub.f32 %v3734_v25, %v2977_v39  ;;  %v3791_v13 = vld [vmem:[#allocation31_spill] sm:$0xff] }
 0x250   : > { %v1452_v59 = vmul.f32 %v3073_v50, %v3773_v16  ;;  %v1453_v53 = vmul.f32 %v3073_v50, %v3774_v40  ;;  %v1454_v23 = vmul.f32 %v3073_v50, %v3775_v21  ;;  %1719 = vst.msk [vmem:[%s2250_s8 + $0x120] sm:$0xff] %vm1682_vm4, %v1654_v32  ;;  %1720 = vst.msk [vmem:[%s2250_s8 + $0x128] sm:$0xff] %vm1682_vm4, %v1655_v41  ;;  %v3794_v16 = vld [vmem:[#allocation30_spill] sm:$0xff] }
 0x251   : > { %v1455_v49 = vmul.f32 %v3073_v50, %v3776_v33  ;;  %1721 = vst.msk [vmem:[%s2250_s8 + $0x130] sm:$0xff] %vm1682_vm4, %v1656_v12  ;;  %1722 = vst.msk [vmem:[%s2250_s8 + $0x138] sm:$0xff] %vm1682_vm4, %v1657_v38  ;;  %v1456_v19 = vmul.f32 %v3073_v50, %v3777_v51  ;;  %v3778_v37 = vsub.f32 %v3735_v48, %v2977_v39  ;;  %v3793_v12 = vld [vmem:[#allocation28_spill] sm:$0xff] }
 0x252   : > { %v3779_v54 = vsub.f32 %v3736_v44, %v2977_v39  ;;  %v3780_v58 = vsub.f32 %v2380_v1, %v2977_v39  ;;  %v1523_v11 = vmul.f32 %v3084_v17, %v1452_v59  ;;  %v1524_v25 = vmul.f32 %v3084_v17, %v1453_v53 }
 0x253   : > { %v1457_v63 = vmul.f32 %v3073_v50, %v3778_v37  ;;  %v1525_v43 = vmul.f32 %v3084_v17, %v1454_v23  ;;  %v1526_v48 = vmul.f32 %v3084_v17, %v1455_v49  ;;  %v1527_v55 = vmul.f32 %v3084_v17, %v1456_v19 }
 0x254   : > { %v1458_v52 = vmul.f32 %v3073_v50, %v3779_v54  ;;  %v1459_v56 = vmul.f32 %v3073_v50, %v3780_v58  ;;  %v1594_v1 = vadd.f32 %v3101_v47, %v1523_v11  ;;  %v1595_v62 = vadd.f32 %v3101_v47, %v1524_v25 }
 0x255   : > { %v1528_v7 = vmul.f32 %v3084_v17, %v1457_v63  ;;  %v1596_v57 = vadd.f32 %v3101_v47, %v1525_v43  ;;  %v1597_v2 = vadd.f32 %v3101_v47, %v1526_v48  ;;  %v1598_v45 = vadd.f32 %v3101_v47, %v1527_v55 }
 0x256   : > { %v1529_v44 = vmul.f32 %v3084_v17, %v1458_v52  ;;  %v1530_v9 = vmul.f32 %v3084_v17, %v1459_v56  ;;  %v1658_v6 = vmax.f32 %v1594_v1, 0.0  ;;  %v1659_v4 = vmax.f32 %v1595_v62, 0.0 }
 0x257   : > { %v1599_v35 = vadd.f32 %v3101_v47, %v1528_v7  ;;  %v1660_v10 = vmax.f32 %v1596_v57, 0.0  ;;  %v1661_v8 = vmax.f32 %v1597_v2, 0.0  ;;  %v1662_v22 = vmax.f32 %v1598_v45, 0.0  ;;  %v3795_v57 = vld [vmem:[#allocation33_spill] sm:$0xff]  ;;  %v3796_v45 = vld [vmem:[#allocation35_spill] sm:$0xff] }
 0x258   : > { %v1600_v15 = vadd.f32 %v3101_v47, %v1529_v44  ;;  %v1601_v3 = vadd.f32 %v3101_v47, %v1530_v9  ;;  %1723 = vst.msk [vmem:[%s2250_s8 + $0x140] sm:$0xff] %vm1682_vm4, %v1658_v6  ;;  %1724 = vst.msk [vmem:[%s2250_s8 + $0x148] sm:$0xff] %vm1682_vm4, %v1659_v4  ;;  %v3782_v24 = vsub.f32 %v3781_v26, %v2977_v39  ;;  %v3798_v6 = vld [vmem:[#allocation34_spill] sm:$0xff] }
 0x259   : > { %v1663_v36 = vmax.f32 %v1599_v35, 0.0  ;;  %1725 = vst.msk [vmem:[%s2250_s8 + $0x150] sm:$0xff] %vm1682_vm4, %v1660_v10  ;;  %1726 = vst.msk [vmem:[%s2250_s8 + $0x158] sm:$0xff] %vm1682_vm4, %v1661_v8  ;;  %v3784_v29 = vsub.f32 %v3783_v46, %v2977_v39  ;;  %v3786_v27 = vsub.f32 %v3785_v60, %v2977_v39  ;;  %v3788_v14 = vsub.f32 %v3787_v30, %v2977_v39  ;;  %v3801_v60 = vld [vmem:[#allocation36_spill] sm:$0xff] }
 0x25a   : > { %v1664_v20 = vmax.f32 %v1600_v15, 0.0  ;;  %v1665_v42 = vmax.f32 %v1601_v3, 0.0  ;;  %v1460_v5 = vmul.f32 %v3073_v50, %v3782_v24  ;;  %1727 = vst.msk [vmem:[%s2250_s8 + $0x160] sm:$0xff] %vm1682_vm4, %v1662_v22  ;;  %v3790_v18 = vsub.f32 %v3789_v61, %v2977_v39  ;;  %v3797_v15 = vld [vmem:[#allocation32_spill] sm:$0xff]  ;;  %v3799_v22 = vld [vmem:[#allocation37_spill] sm:$0xff] }
 0x25b   : > { %v1461_v31 = vmul.f32 %v3073_v50, %v3784_v29  ;;  %v1462_v0 = vmul.f32 %v3073_v50, %v3786_v27  ;;  %v1463_v34 = vmul.f32 %v3073_v50, %v3788_v14  ;;  %1728 = vst.msk [vmem:[%s2250_s8 + $0x168] sm:$0xff] %vm1682_vm4, %v1663_v36  ;;  %v3792_v32 = vsub.f32 %v3791_v13, %v2977_v39 }
 0x25c   : > { %1729 = vst.msk [vmem:[%s2250_s8 + $0x170] sm:$0xff] %vm1682_vm4, %v1664_v20  ;;  %1730 = vst.msk [vmem:[%s2250_s8 + $0x178] sm:$0xff] %vm1682_vm4, %v1665_v42  ;;  %v1464_v28 = vmul.f32 %v3073_v50, %v3790_v18  ;;  %v1394_v38 = vsub.f32 %v3793_v12, %v2977_v39  ;;  %v1395_v59 = vsub.f32 %v3794_v16, %v2977_v39  ;;  %v3800_v20 = vld [vmem:[#allocation39_spill] sm:$0xff] }
 0x25d   : > { %v1465_v41 = vmul.f32 %v3073_v50, %v3792_v32  ;;  %v1531_v40 = vmul.f32 %v3084_v17, %v1460_v5  ;;  %v1532_v53 = vmul.f32 %v3084_v17, %v1461_v31  ;;  %v1533_v21 = vmul.f32 %v3084_v17, %v1462_v0  ;;  %v3802_v0 = vld [vmem:[#allocation38_spill] sm:$0xff] }
 0x25e   : > { %v1534_v23 = vmul.f32 %v3084_v17, %v1463_v34  ;;  %v1535_v33 = vmul.f32 %v3084_v17, %v1464_v28  ;;  %v1466_v51 = vmul.f32 %v3073_v50, %v1394_v38  ;;  %v1467_v19 = vmul.f32 %v3073_v50, %v1395_v59 }
 0x25f   : > { %v1536_v49 = vmul.f32 %v3084_v17, %v1465_v41  ;;  %v1602_v37 = vadd.f32 %v3101_v47, %v1531_v40  ;;  %v1603_v63 = vadd.f32 %v3101_v47, %v1532_v53  ;;  %v1604_v54 = vadd.f32 %v3101_v47, %v1533_v21 }
 0x260   : > { %v1605_v52 = vadd.f32 %v3101_v47, %v1534_v23  ;;  %v1606_v58 = vadd.f32 %v3101_v47, %v1535_v33  ;;  %v1537_v11 = vmul.f32 %v3084_v17, %v1466_v51  ;;  %v1538_v25 = vmul.f32 %v3084_v17, %v1467_v19 }
 0x261   : > { %v1607_v56 = vadd.f32 %v3101_v47, %v1536_v49  ;;  %v1666_v43 = vmax.f32 %v1602_v37, 0.0  ;;  %v1667_v48 = vmax.f32 %v1603_v63, 0.0  ;;  %v1668_v55 = vmax.f32 %v1604_v54, 0.0 }
 0x262   : > { %v1669_v7 = vmax.f32 %v1605_v52, 0.0  ;;  %v1670_v44 = vmax.f32 %v1606_v58, 0.0  ;;  %v1608_v1 = vadd.f32 %v3101_v47, %v1537_v11  ;;  %v1609_v62 = vadd.f32 %v3101_v47, %v1538_v25 }
 0x263   : > { %v1671_v9 = vmax.f32 %v1607_v56, 0.0  ;;  %1731 = vst.msk [vmem:[%s2250_s8 + $0x180] sm:$0xff] %vm1682_vm4, %v1666_v43  ;;  %1732 = vst.msk [vmem:[%s2250_s8 + $0x188] sm:$0xff] %vm1682_vm4, %v1667_v48  ;;  %v1396_v2 = vsub.f32 %v3795_v57, %v2977_v39  ;;  %v1397_v35 = vsub.f32 %v3796_v45, %v2977_v39  ;;  %v1398_v3 = vsub.f32 %v3797_v15, %v2977_v39 }
 0x264   : > { %1733 = vst.msk [vmem:[%s2250_s8 + $0x190] sm:$0xff] %vm1682_vm4, %v1668_v55  ;;  %1734 = vst.msk [vmem:[%s2250_s8 + $0x198] sm:$0xff] %vm1682_vm4, %v1669_v7  ;;  %v1399_v4 = vsub.f32 %v3798_v6, %v2977_v39  ;;  %v1672_v10 = vmax.f32 %v1608_v1, 0.0  ;;  %v1673_v8 = vmax.f32 %v1609_v62, 0.0  ;;  %v1400_v36 = vsub.f32 %v3799_v22, %v2977_v39 }
 0x265   : > { %1735 = vst.msk [vmem:[%s2250_s8 + $0x1a0] sm:$0xff] %vm1682_vm4, %v1670_v44  ;;  %1736 = vst.msk [vmem:[%s2250_s8 + $0x1a8] sm:$0xff] %vm1682_vm4, %v1671_v9  ;;  %v1401_v42 = vsub.f32 %v3800_v20, %v2977_v39  ;;  %v1468_v26 = vmul.f32 %v3073_v50, %v1396_v2  ;;  %v1469_v24 = vmul.f32 %v3073_v50, %v1397_v35 }
 0x266   : > { %v1470_v5 = vmul.f32 %v3073_v50, %v1398_v3  ;;  %v1471_v46 = vmul.f32 %v3073_v50, %v1399_v4  ;;  %1737 = vst.msk [vmem:[%s2250_s8 + $0x1b0] sm:$0xff] %vm1682_vm4, %v1672_v10  ;;  %1738 = vst.msk [vmem:[%s2250_s8 + $0x1b8] sm:$0xff] %vm1682_vm4, %v1673_v8  ;;  %v1472_v29 = vmul.f32 %v3073_v50, %v1400_v36 }
 0x267   : > { %v1473_v31 = vmul.f32 %v3073_v50, %v1401_v42  ;;  %v1402_v27 = vsub.f32 %v3801_v60, %v2977_v39  ;;  %v1403_v30 = vsub.f32 %v3802_v0, %v2977_v39  ;;  %v1539_v14 = vmul.f32 %v3084_v17, %v1468_v26 }
 0x268   : > { %v1540_v34 = vmul.f32 %v3084_v17, %v1469_v24  ;;  %v1541_v61 = vmul.f32 %v3084_v17, %v1470_v5  ;;  %v1542_v18 = vmul.f32 %v3084_v17, %v1471_v46  ;;  %v1543_v28 = vmul.f32 %v3084_v17, %v1472_v29 }
 0x269   : > { %v1544_v13 = vmul.f32 %v3084_v17, %v1473_v31  ;;  %v1474_v32 = vmul.f32 %v3073_v50, %v1402_v27  ;;  %v1475_v41 = vmul.f32 %v3073_v50, %v1403_v30  ;;  %v1610_v12 = vadd.f32 %v3101_v47, %v1539_v14 }
 0x26a   : > { %v1611_v39 = vadd.f32 %v3101_v47, %v1540_v34  ;;  %v1612_v38 = vadd.f32 %v3101_v47, %v1541_v61  ;;  %v1613_v16 = vadd.f32 %v3101_v47, %v1542_v18  ;;  %v1614_v59 = vadd.f32 %v3101_v47, %v1543_v28 }
 0x26b   : > { %v1615_v40 = vadd.f32 %v3101_v47, %v1544_v13  ;;  %v1545_v50 = vmul.f32 %v3084_v17, %v1474_v32  ;;  %v1546_v53 = vmul.f32 %v3084_v17, %v1475_v41  ;;  %v1674_v21 = vmax.f32 %v1610_v12, 0.0 }
 0x26c   : > { %v1675_v23 = vmax.f32 %v1611_v39, 0.0  ;;  %v1676_v33 = vmax.f32 %v1612_v38, 0.0  ;;  %v1677_v49 = vmax.f32 %v1613_v16, 0.0  ;;  %v1678_v51 = vmax.f32 %v1614_v59, 0.0 }
 0x26d   : > { %v1679_v19 = vmax.f32 %v1615_v40, 0.0  ;;  %v1616_v37 = vadd.f32 %v3101_v47, %v1545_v50  ;;  %v1617_v63 = vadd.f32 %v3101_v47, %v1546_v53  ;;  %1739 = vst.msk [vmem:[%s2250_s8 + $0x1c0] sm:$0xff] %vm1682_vm4, %v1674_v21 }
 0x26e   : > { %1740 = vst.msk [vmem:[%s2250_s8 + $0x1c8] sm:$0xff] %vm1682_vm4, %v1675_v23  ;;  %1741 = vst.msk [vmem:[%s2250_s8 + $0x1d0] sm:$0xff] %vm1682_vm4, %v1676_v33 }
 0x26f   : > { %1742 = vst.msk [vmem:[%s2250_s8 + $0x1d8] sm:$0xff] %vm1682_vm4, %v1677_v49  ;;  %1743 = vst.msk [vmem:[%s2250_s8 + $0x1e0] sm:$0xff] %vm1682_vm4, %v1678_v51  ;;  %v1680_v17 = vmax.f32 %v1616_v37, 0.0  ;;  %v1681_v54 = vmax.f32 %v1617_v63, 0.0 }
 0x270   : > { %1744 = vst.msk [vmem:[%s2250_s8 + $0x1e8] sm:$0xff] %vm1682_vm4, %v1679_v19 }
 0x271   : > { %1745 = vst.msk [vmem:[%s2250_s8 + $0x1f0] sm:$0xff] %vm1682_vm4, %v1680_v17  ;;  %1746 = vst.msk [vmem:[%s2250_s8 + $0x1f8] sm:$0xff] %vm1682_vm4, %v1681_v54 }
 0x272 PF: > { %s14_s19 = sadd.s32 1, %s2175_s19   ;;  %s3803_s15 = smov %s2167_s17 }
 0x273   : > { %p11_p11 = scmp.ge.s32.totalorder %s14_s19, 10   ;;  %s3804_s16 = smov %s2171_s18 }
 0x274   : > { %s3805_s17 = smov %s3808_s20  ;;  %s3806_s18 = smov %s3812_s21 }
 0x275   :  { %13 = sbr.rel (!%p11_p11) target bundleno = 3 (0x3), region = 81 }

// kernel: coupled_vae_forward.37
= control target key start
LH: loop header
LB: loop body
LE: loop exit
PB: predicated region body
PF: predicated region fallthrough
CT: control target
= control target key end

     0   :  { %s1506_s9 = smov 0   ;;  %s1508_s10 = smov 0   ;;  %s1760_s0 = inlined_call_operand.vmem [shape: bf16[4,2048,32], index: 0, kind: input, shape index: {}]   ;;  %s1761_s1 = inlined_call_operand.vmem [shape: bf16[4,32,3], index: 1, kind: input, shape index: {}]   ;;  %s1762_s2 = inlined_call_operand.vmem [shape: f32[4,2048,3], index: 2, kind: output, shape index: {}]  }
   0x1   :  { %s1510_s11 = smov 0   ;;  %s1512_s12 = smov 0  }
   0x2   :  { %s1514_s13 = smov 0  }
   0x3 LB: > { %s21_s14 = sadd.s32 1, %s1481_s11  ;;  %s24_s15 = sadd.s32 1, %s1485_s12  ;;  %s1489_s13 = sphi %s1514_s13, %s12_s13   ;;  %s1485_s12 = sphi %s1512_s12, %s1766_s12   ;;  %s1481_s11 = sphi %s1510_s11, %s1765_s11   ;;  %s1477_s10 = sphi %s1508_s10, %s1764_s10   ;;  %s1473_s9 = sphi %s1506_s9, %s1763_s9  }
   0x4   : > { %p22_p0 = scmp.ge.s32.totalorder %s21_s14, 4  ;;  %p1065_p1 = scmp.ge.s32.totalorder %s1489_s13, 1 }
   0x5   : > { %p143_p2 = scmp.lt.s32.totalorder %s1489_s13, 17 }
   0x6   : > { %s1768_s14 = smov (%p22_p0, %s21_s14), 0  ;;  %s1770_s15 = smov (!%p22_p0, %s24_s15), %s1485_s12 }
   0x7   : > { %p144_p3 = pnand %p1065_p1, %p143_p2  ;;  %p26_p4 = scmp.ge.s32.totalorder %s1770_s15, 4 }
   0x8   : > { %s1066_s16 = sshll.u32 (!%p144_p3), %s1473_s9, 6  ;;  %p179_p5 = scmp.lt.s32.totalorder (!%p144_p3), %s1477_s10, 3  ;;  %vm444_vm0 = vcmask (!%p144_p3), 261120   ;;  %vm894_vm1 = vcmask (!%p144_p3), 23552  }
   0x9   : > { %s1772_s15 = smov (%p26_p4, %s1770_s15), 0  ;;  %147 = sbr.rel (%p144_p3) target bundleno = 318 (0x13e), region = 28 }
   0xa   : > { %p181_p6 = scmp.lt.s32.totalorder (!%p144_p3), %s1066_s16, 255 }
  0x10   : > { %s1774_s10 = smov (!%p179_p5, %s1477_s10), 3  ;;  %s1776_s16 = smov (!%p181_p6, %s1066_s16), 255 }
  0x11   : > { %s1067_s17 = sshll.u32 %s1774_s10, 8  ;;  %s1142_s18 = sshll.u32 %s1774_s10, 4 }
  0x12   : > { %s1536_s19 = sadd.s32 %s1067_s17, %s1776_s16  ;;  %s192_s22 = scalar_lea.vmem %s1761_s1, %s1142_s18 }
  0x13   : > { %s1068_s23 = sshll.u32 %s1536_s19, 2  ;;  %v1289_v0 = vld [vmem:[%s192_s22] sm:$0xff]   ;;  %v1290_v1 = vld [vmem:[%s192_s22 + $0x8] sm:$0xff]   ;;  %s1073_s27 = sshll.u32 %s1536_s19, 3 }
  0x14   : > { %s1545_s26 = scalar_lea.vmem %s1760_s0, %s1068_s23  ;;  %1177 = vmatprep.subr.bf16.mxu0 %v1289_v0  ;;  %1245 = vmatprep.subr.bf16.mxu1 %v1289_v0  ;;  %s1615_s30 = scalar_lea.vmem %s1762_s2, %s1073_s27 }
  0x15   : > { %v1291_v2 = vld [vmem:[%s1545_s26] sm:$0xff]   ;;  %1178 = vmatpush3.bf16.msra.mxu0 %v1289_v0  ;;  %1247 = vmatpush3.bf16.msra.mxu1 %v1289_v0  ;;  %v1293_v4 = vld [vmem:[%s1545_s26 + $0x8] sm:$0xff]   ;;  %v1295_v6 = vld [vmem:[%s1545_s26 + $0x10] sm:$0xff]  }
  0x16   : > { %v1292_v3 = vld [vmem:[%s1545_s26 + $0x80] sm:$0xff]   ;;  %1179 = vmatprep.subr.bf16.mxu0 %v1290_v1  ;;  %1246 = vmatprep.subr.bf16.mxu1 %v1290_v1  ;;  %v1294_v5 = vld [vmem:[%s1545_s26 + $0x88] sm:$0xff]   ;;  %v1296_v7 = vld [vmem:[%s1545_s26 + $0x90] sm:$0xff]  }
  0x17   : > { %1181 = vmatprep.mubr.msk.bf16.mxu0 %vm444_vm0, %v1291_v2  ;;  %1213 = vmatprep.mubr.msk.bf16.mxu1 %vm444_vm0, %v1292_v3  ;;  %v1297_v8 = vld [vmem:[%s1545_s26 + $0x18] sm:$0xff]   ;;  %v1299_v10 = vld [vmem:[%s1545_s26 + $0x20] sm:$0xff]   ;;  %v1301_v12 = vld [vmem:[%s1545_s26 + $0x28] sm:$0xff]  }
  0x18   : > { %v1298_v9 = vld [vmem:[%s1545_s26 + $0x98] sm:$0xff]   ;;  %v1300_v11 = vld [vmem:[%s1545_s26 + $0xa0] sm:$0xff]   ;;  %v1302_v13 = vld [vmem:[%s1545_s26 + $0xa8] sm:$0xff]  }
  0x19   : > { %1180 = vmatpush3.bf16.msra.mxu0 %v1290_v1  ;;  %1248 = vmatpush3.bf16.msra.mxu1 %v1290_v1  ;;  %v1303_v14 = vld [vmem:[%s1545_s26 + $0x30] sm:$0xff]   ;;  %v1305_v16 = vld [vmem:[%s1545_s26 + $0x38] sm:$0xff]   ;;  %v1307_v18 = vld [vmem:[%s1545_s26 + $0x40] sm:$0xff]  }
  0x1a   : > { %v1304_v15 = vld [vmem:[%s1545_s26 + $0xb0] sm:$0xff]   ;;  %v1306_v17 = vld [vmem:[%s1545_s26 + $0xb8] sm:$0xff]   ;;  %v1308_v19 = vld [vmem:[%s1545_s26 + $0xc0] sm:$0xff]  }
  0x1b   : > { %v1309_v20 = vld [vmem:[%s1545_s26 + $0x48] sm:$0xff]   ;;  %v1311_v22 = vld [vmem:[%s1545_s26 + $0x50] sm:$0xff]   ;;  %v1313_v24 = vld [vmem:[%s1545_s26 + $0x58] sm:$0xff]  }
  0x1c   : > { %1182 = vmatmul.mubr.msk.bf16.vlgmr.msra.gmra.mrb[0].mxu0 %vm444_vm0, %v1293_v4  ;;  %1214 = vmatmul.mubr.msk.bf16.vlgmr.msra.gmra.mrb[0].mxu1 %vm444_vm0, %v1294_v5  ;;  %v1310_v21 = vld [vmem:[%s1545_s26 + $0xc8] sm:$0xff]   ;;  %v1312_v23 = vld [vmem:[%s1545_s26 + $0xd0] sm:$0xff]   ;;  %v1314_v25 = vld [vmem:[%s1545_s26 + $0xd8] sm:$0xff]  }
  0x1d   : > { %1185 = vmatprep.mubr.msk.bf16.mxu0 %vm444_vm0, %v1295_v6  ;;  %1217 = vmatprep.mubr.msk.bf16.mxu1 %vm444_vm0, %v1296_v7  ;;  %v1315_v26 = vld [vmem:[%s1545_s26 + $0x60] sm:$0xff]   ;;  %v1317_v28 = vld [vmem:[%s1545_s26 + $0x68] sm:$0xff]   ;;  %v1319_v30 = vld [vmem:[%s1545_s26 + $0x70] sm:$0xff]  }
  0x1e   : > { %v1316_v27 = vld [vmem:[%s1545_s26 + $0xe0] sm:$0xff]   ;;  %v1318_v29 = vld [vmem:[%s1545_s26 + $0xe8] sm:$0xff]   ;;  %v1320_v31 = vld [vmem:[%s1545_s26 + $0xf0] sm:$0xff]  }
  0x1f   : > { %v1321_v32 = vld [vmem:[%s1545_s26 + $0x78] sm:$0xff]  }
  0x20   : > { %v1322_v33 = vld [vmem:[%s1545_s26 + $0xf8] sm:$0xff]  }
  0x24   : > { %1186 = vmatmul.mubr.msk.bf16.gmra.mrb[4].mxu0 %vm444_vm0, %v1297_v8  ;;  %1218 = vmatmul.mubr.msk.bf16.gmra.mrb[4].mxu1 %vm444_vm0, %v1298_v9 }
  0x25   : > { %1189 = vmatprep.mubr.msk.bf16.mxu0 %vm444_vm0, %v1299_v10  ;;  %1221 = vmatprep.mubr.msk.bf16.mxu1 %vm444_vm0, %v1300_v11 }
  0x2c   : > { %1190 = vmatmul.mubr.msk.bf16.gmra.mrb[8].mxu0 %vm444_vm0, %v1301_v12  ;;  %1222 = vmatmul.mubr.msk.bf16.gmra.mrb[8].mxu1 %vm444_vm0, %v1302_v13 }
  0x2d   : > { %1193 = vmatprep.mubr.msk.bf16.mxu0 %vm444_vm0, %v1303_v14  ;;  %1225 = vmatprep.mubr.msk.bf16.mxu1 %vm444_vm0, %v1304_v15 }
  0x34   : > { %1194 = vmatmul.mubr.msk.bf16.gmra.mrb[12].mxu0 %vm444_vm0, %v1305_v16  ;;  %1226 = vmatmul.mubr.msk.bf16.gmra.mrb[12].mxu1 %vm444_vm0, %v1306_v17 }
  0x35   : > { %1197 = vmatprep.mubr.msk.bf16.mxu0 %vm444_vm0, %v1307_v18  ;;  %1229 = vmatprep.mubr.msk.bf16.mxu1 %vm444_vm0, %v1308_v19 }
  0x3c   : > { %1198 = vmatmul.mubr.msk.bf16.gmra.mrb[16].mxu0 %vm444_vm0, %v1309_v20  ;;  %1230 = vmatmul.mubr.msk.bf16.gmra.mrb[16].mxu1 %vm444_vm0, %v1310_v21 }
  0x3d   : > { %1201 = vmatprep.mubr.msk.bf16.mxu0 %vm444_vm0, %v1311_v22  ;;  %1233 = vmatprep.mubr.msk.bf16.mxu1 %vm444_vm0, %v1312_v23 }
  0x44   : > { %1202 = vmatmul.mubr.msk.bf16.gmra.mrb[20].mxu0 %vm444_vm0, %v1313_v24  ;;  %1234 = vmatmul.mubr.msk.bf16.gmra.mrb[20].mxu1 %vm444_vm0, %v1314_v25 }
  0x45   : > { %1205 = vmatprep.mubr.msk.bf16.mxu0 %vm444_vm0, %v1315_v26  ;;  %1237 = vmatprep.mubr.msk.bf16.mxu1 %vm444_vm0, %v1316_v27 }
  0x4c   : > { %1206 = vmatmul.mubr.msk.bf16.gmra.mrb[24].mxu0 %vm444_vm0, %v1317_v28  ;;  %1238 = vmatmul.mubr.msk.bf16.gmra.mrb[24].mxu1 %vm444_vm0, %v1318_v29 }
  0x4d   : > { %1209 = vmatprep.mubr.msk.bf16.mxu0 %vm444_vm0, %v1319_v30  ;;  %1241 = vmatprep.mubr.msk.bf16.mxu1 %vm444_vm0, %v1320_v31 }
  0x54   : > { %1210 = vmatmul.mubr.msk.bf16.gmra.mrb[28].mxu0 %vm444_vm0, %v1321_v32  ;;  %1242 = vmatmul.mubr.msk.bf16.gmra.mrb[28].mxu1 %vm444_vm0, %v1322_v33 }
  0xef   : > { %v1183_v34 = vpop.f32.mrb[0].mxu0  ;;  %v1215_v35 = vpop.f32.mrb[0].mxu1 }
  0xf0   : > { %1323 = vtanh.f32 %v1183_v34  ;;  %v575_v36 = vpop.f32.mrb[1].mxu0  ;;  %v703_v37 = vpop.f32.mrb[1].mxu1 }
  0xf1   : > { %1325 = vtanh.f32 %v1215_v35  ;;  %v1184_v38 = vpop.f32.mrb[2].mxu0  ;;  %v1216_v39 = vpop.f32.mrb[2].mxu1 }
  0xf2   : > { %1327 = vtanh.f32 %v575_v36  ;;  %v578_v40 = vpop.f32.mrb[3].mxu0  ;;  %v706_v41 = vpop.f32.mrb[3].mxu1 }
  0xf3   : > { %1329 = vtanh.f32 %v703_v37 }
  0xf4   : > { %1331 = vtanh.f32 %v1184_v38 }
  0xf5   : > { %1333 = vtanh.f32 %v1216_v39 }
  0xf6   : > { %1335 = vtanh.f32 %v578_v40 }
  0xf7   : > { %1337 = vtanh.f32 %v706_v41  ;;  %v1187_v42 = vpop.f32.mrb[4].mxu0  ;;  %v1219_v43 = vpop.f32.mrb[4].mxu1 }
  0xf8   : > { %1339 = vtanh.f32 %v1187_v42  ;;  %v591_v44 = vpop.f32.mrb[5].mxu0  ;;  %v719_v45 = vpop.f32.mrb[5].mxu1 }
  0xf9   : > { %1341 = vtanh.f32 %v1219_v43  ;;  %v1188_v46 = vpop.f32.mrb[6].mxu0  ;;  %v1220_v47 = vpop.f32.mrb[6].mxu1 }
  0xfa   : > { %v1324_v48 = vpop.eup %1323  ;;  %1343 = vtanh.f32 %v591_v44  ;;  %v594_v49 = vpop.f32.mrb[7].mxu0 }
  0xfb   : > { %v722_v50 = vpop.f32.mrb[7].mxu1  ;;  %v1326_v51 = vpop.eup %1325  ;;  %897 = vst.msk [vmem:[%s1615_s30 + $0x10] sm:$0xff] %vm894_vm1, %v1324_v48  ;;  %1345 = vtanh.f32 %v719_v45 }
  0xfc   : > { %v1328_v52 = vpop.eup %1327  ;;  %929 = vst.msk [vmem:[%s1615_s30 + $0x110] sm:$0xff] %vm894_vm1, %v1326_v51  ;;  %1347 = vtanh.f32 %v1188_v46 }
  0xfd   : > { %v1330_v53 = vpop.eup %1329  ;;  %895 = vst.msk [vmem:[%s1615_s30] sm:$0xff] %vm894_vm1, %v1328_v52  ;;  %1349 = vtanh.f32 %v1220_v47 }
  0xfe   : > { %v1332_v54 = vpop.eup %1331  ;;  %927 = vst.msk [vmem:[%s1615_s30 + $0x100] sm:$0xff] %vm894_vm1, %v1330_v53  ;;  %1351 = vtanh.f32 %v594_v49 }
  0xff   : > { %v1334_v55 = vpop.eup %1333  ;;  %898 = vst.msk [vmem:[%s1615_s30 + $0x18] sm:$0xff] %vm894_vm1, %v1332_v54  ;;  %1353 = vtanh.f32 %v722_v50  ;;  %v1191_v56 = vpop.f32.mrb[8].mxu0 }
 0x100   : > { %v1223_v57 = vpop.f32.mrb[8].mxu1  ;;  %v1336_v58 = vpop.eup %1335  ;;  %930 = vst.msk [vmem:[%s1615_s30 + $0x118] sm:$0xff] %vm894_vm1, %v1334_v55  ;;  %1355 = vtanh.f32 %v1191_v56 }
 0x101   : > { %v607_v59 = vpop.f32.mrb[9].mxu0  ;;  %v735_v60 = vpop.f32.mrb[9].mxu1  ;;  %896 = vst.msk [vmem:[%s1615_s30 + $0x8] sm:$0xff] %vm894_vm1, %v1336_v58  ;;  %1357 = vtanh.f32 %v1223_v57 }
 0x102   : > { %v1338_v61 = vpop.eup %1337  ;;  %v1192_v62 = vpop.f32.mrb[10].mxu0  ;;  %1359 = vtanh.f32 %v607_v59 }
 0x103   : > { %v1224_v63 = vpop.f32.mrb[10].mxu1  ;;  %v1340_v0 = vpop.eup %1339  ;;  %928 = vst.msk [vmem:[%s1615_s30 + $0x108] sm:$0xff] %vm894_vm1, %v1338_v61  ;;  %1361 = vtanh.f32 %v735_v60 }
 0x104   : > { %v610_v1 = vpop.f32.mrb[11].mxu0  ;;  %v738_v2 = vpop.f32.mrb[11].mxu1  ;;  %901 = vst.msk [vmem:[%s1615_s30 + $0x30] sm:$0xff] %vm894_vm1, %v1340_v0  ;;  %1363 = vtanh.f32 %v1192_v62 }
 0x105   : > { %v1342_v3 = vpop.eup %1341  ;;  %1365 = vtanh.f32 %v1224_v63 }
 0x106   : > { %v1344_v4 = vpop.eup %1343  ;;  %933 = vst.msk [vmem:[%s1615_s30 + $0x130] sm:$0xff] %vm894_vm1, %v1342_v3  ;;  %1367 = vtanh.f32 %v610_v1 }
 0x107   : > { %v1346_v5 = vpop.eup %1345  ;;  %899 = vst.msk [vmem:[%s1615_s30 + $0x20] sm:$0xff] %vm894_vm1, %v1344_v4  ;;  %1369 = vtanh.f32 %v738_v2  ;;  %v1195_v8 = vpop.f32.mrb[12].mxu0 }
 0x108   : > { %v1348_v6 = vpop.eup %1347  ;;  %931 = vst.msk [vmem:[%s1615_s30 + $0x120] sm:$0xff] %vm894_vm1, %v1346_v5  ;;  %v1227_v9 = vpop.f32.mrb[12].mxu1  ;;  %1371 = vtanh.f32 %v1195_v8 }
 0x109   : > { %v1350_v7 = vpop.eup %1349  ;;  %902 = vst.msk [vmem:[%s1615_s30 + $0x38] sm:$0xff] %vm894_vm1, %v1348_v6  ;;  %v623_v11 = vpop.f32.mrb[13].mxu0  ;;  %1373 = vtanh.f32 %v1227_v9 }
 0x10a   : > { %v1352_v10 = vpop.eup %1351  ;;  %934 = vst.msk [vmem:[%s1615_s30 + $0x138] sm:$0xff] %vm894_vm1, %v1350_v7  ;;  %v751_v12 = vpop.f32.mrb[13].mxu1  ;;  %1375 = vtanh.f32 %v623_v11 }
 0x10b   : > { %v1354_v13 = vpop.eup %1353  ;;  %900 = vst.msk [vmem:[%s1615_s30 + $0x28] sm:$0xff] %vm894_vm1, %v1352_v10  ;;  %v1196_v14 = vpop.f32.mrb[14].mxu0  ;;  %1377 = vtanh.f32 %v751_v12 }
 0x10c   : > { %v1228_v15 = vpop.f32.mrb[14].mxu1  ;;  %v1356_v16 = vpop.eup %1355  ;;  %932 = vst.msk [vmem:[%s1615_s30 + $0x128] sm:$0xff] %vm894_vm1, %v1354_v13  ;;  %1379 = vtanh.f32 %v1196_v14 }
 0x10d   : > { %v626_v17 = vpop.f32.mrb[15].mxu0  ;;  %v754_v18 = vpop.f32.mrb[15].mxu1  ;;  %905 = vst.msk [vmem:[%s1615_s30 + $0x50] sm:$0xff] %vm894_vm1, %v1356_v16  ;;  %1381 = vtanh.f32 %v1228_v15 }
 0x10e   : > { %v1358_v19 = vpop.eup %1357  ;;  %1383 = vtanh.f32 %v626_v17 }
 0x10f   : > { %v1360_v20 = vpop.eup %1359  ;;  %937 = vst.msk [vmem:[%s1615_s30 + $0x150] sm:$0xff] %vm894_vm1, %v1358_v19  ;;  %1385 = vtanh.f32 %v754_v18  ;;  %v1199_v24 = vpop.f32.mrb[16].mxu0 }
 0x110   : > { %v1362_v21 = vpop.eup %1361  ;;  %903 = vst.msk [vmem:[%s1615_s30 + $0x40] sm:$0xff] %vm894_vm1, %v1360_v20  ;;  %v1231_v25 = vpop.f32.mrb[16].mxu1  ;;  %1387 = vtanh.f32 %v1199_v24 }
 0x111   : > { %v1364_v22 = vpop.eup %1363  ;;  %935 = vst.msk [vmem:[%s1615_s30 + $0x140] sm:$0xff] %vm894_vm1, %v1362_v21  ;;  %v639_v27 = vpop.f32.mrb[17].mxu0  ;;  %1389 = vtanh.f32 %v1231_v25 }
 0x112   : > { %v1366_v23 = vpop.eup %1365  ;;  %906 = vst.msk [vmem:[%s1615_s30 + $0x58] sm:$0xff] %vm894_vm1, %v1364_v22  ;;  %v767_v28 = vpop.f32.mrb[17].mxu1  ;;  %1391 = vtanh.f32 %v639_v27 }
 0x113   : > { %v1368_v26 = vpop.eup %1367  ;;  %938 = vst.msk [vmem:[%s1615_s30 + $0x158] sm:$0xff] %vm894_vm1, %v1366_v23  ;;  %v1200_v30 = vpop.f32.mrb[18].mxu0  ;;  %1393 = vtanh.f32 %v767_v28 }
 0x114   : > { %v1370_v29 = vpop.eup %1369  ;;  %904 = vst.msk [vmem:[%s1615_s30 + $0x48] sm:$0xff] %vm894_vm1, %v1368_v26  ;;  %v1232_v31 = vpop.f32.mrb[18].mxu1  ;;  %1395 = vtanh.f32 %v1200_v30 }
 0x115   : > { %v1372_v32 = vpop.eup %1371  ;;  %936 = vst.msk [vmem:[%s1615_s30 + $0x148] sm:$0xff] %vm894_vm1, %v1370_v29  ;;  %v642_v33 = vpop.f32.mrb[19].mxu0  ;;  %1397 = vtanh.f32 %v1232_v31 }
 0x116   : > { %v770_v34 = vpop.f32.mrb[19].mxu1  ;;  %v1374_v35 = vpop.eup %1373  ;;  %909 = vst.msk [vmem:[%s1615_s30 + $0x70] sm:$0xff] %vm894_vm1, %v1372_v32  ;;  %1399 = vtanh.f32 %v642_v33 }
 0x117   : > { %v1376_v36 = vpop.eup %1375  ;;  %941 = vst.msk [vmem:[%s1615_s30 + $0x170] sm:$0xff] %vm894_vm1, %v1374_v35  ;;  %1401 = vtanh.f32 %v770_v34  ;;  %v1203_v40 = vpop.f32.mrb[20].mxu0 }
 0x118   : > { %v1378_v37 = vpop.eup %1377  ;;  %907 = vst.msk [vmem:[%s1615_s30 + $0x60] sm:$0xff] %vm894_vm1, %v1376_v36  ;;  %v1235_v41 = vpop.f32.mrb[20].mxu1  ;;  %1403 = vtanh.f32 %v1203_v40 }
 0x119   : > { %v1380_v38 = vpop.eup %1379  ;;  %939 = vst.msk [vmem:[%s1615_s30 + $0x160] sm:$0xff] %vm894_vm1, %v1378_v37  ;;  %v655_v43 = vpop.f32.mrb[21].mxu0  ;;  %1405 = vtanh.f32 %v1235_v41 }
 0x11a   : > { %v1382_v39 = vpop.eup %1381  ;;  %910 = vst.msk [vmem:[%s1615_s30 + $0x78] sm:$0xff] %vm894_vm1, %v1380_v38  ;;  %v783_v44 = vpop.f32.mrb[21].mxu1  ;;  %1407 = vtanh.f32 %v655_v43 }
 0x11b   : > { %v1384_v42 = vpop.eup %1383  ;;  %942 = vst.msk [vmem:[%s1615_s30 + $0x178] sm:$0xff] %vm894_vm1, %v1382_v39  ;;  %v1204_v46 = vpop.f32.mrb[22].mxu0  ;;  %1409 = vtanh.f32 %v783_v44 }
 0x11c   : > { %v1386_v45 = vpop.eup %1385  ;;  %908 = vst.msk [vmem:[%s1615_s30 + $0x68] sm:$0xff] %vm894_vm1, %v1384_v42  ;;  %v1236_v47 = vpop.f32.mrb[22].mxu1  ;;  %1411 = vtanh.f32 %v1204_v46 }
 0x11d   : > { %v1388_v48 = vpop.eup %1387  ;;  %940 = vst.msk [vmem:[%s1615_s30 + $0x168] sm:$0xff] %vm894_vm1, %v1386_v45  ;;  %v658_v49 = vpop.f32.mrb[23].mxu0  ;;  %1413 = vtanh.f32 %v1236_v47 }
 0x11e   : > { %v786_v50 = vpop.f32.mrb[23].mxu1  ;;  %v1390_v51 = vpop.eup %1389  ;;  %913 = vst.msk [vmem:[%s1615_s30 + $0x90] sm:$0xff] %vm894_vm1, %v1388_v48  ;;  %1415 = vtanh.f32 %v658_v49 }
 0x11f   : > { %v1392_v52 = vpop.eup %1391  ;;  %945 = vst.msk [vmem:[%s1615_s30 + $0x190] sm:$0xff] %vm894_vm1, %v1390_v51  ;;  %1417 = vtanh.f32 %v786_v50  ;;  %v1207_v56 = vpop.f32.mrb[24].mxu0 }
 0x120   : > { %v1394_v53 = vpop.eup %1393  ;;  %911 = vst.msk [vmem:[%s1615_s30 + $0x80] sm:$0xff] %vm894_vm1, %v1392_v52  ;;  %v1239_v57 = vpop.f32.mrb[24].mxu1  ;;  %1419 = vtanh.f32 %v1207_v56 }
 0x121   : > { %v1396_v54 = vpop.eup %1395  ;;  %943 = vst.msk [vmem:[%s1615_s30 + $0x180] sm:$0xff] %vm894_vm1, %v1394_v53  ;;  %v671_v59 = vpop.f32.mrb[25].mxu0  ;;  %1421 = vtanh.f32 %v1239_v57 }
 0x122   : > { %v1398_v55 = vpop.eup %1397  ;;  %914 = vst.msk [vmem:[%s1615_s30 + $0x98] sm:$0xff] %vm894_vm1, %v1396_v54  ;;  %v799_v60 = vpop.f32.mrb[25].mxu1  ;;  %1423 = vtanh.f32 %v671_v59 }
 0x123   : > { %v1400_v58 = vpop.eup %1399  ;;  %946 = vst.msk [vmem:[%s1615_s30 + $0x198] sm:$0xff] %vm894_vm1, %v1398_v55  ;;  %v1208_v62 = vpop.f32.mrb[26].mxu0  ;;  %1425 = vtanh.f32 %v799_v60 }
 0x124   : > { %v1402_v61 = vpop.eup %1401  ;;  %912 = vst.msk [vmem:[%s1615_s30 + $0x88] sm:$0xff] %vm894_vm1, %v1400_v58  ;;  %v1240_v63 = vpop.f32.mrb[26].mxu1  ;;  %1427 = vtanh.f32 %v1208_v62 }
 0x125   : > { %v1404_v0 = vpop.eup %1403  ;;  %944 = vst.msk [vmem:[%s1615_s30 + $0x188] sm:$0xff] %vm894_vm1, %v1402_v61  ;;  %v674_v1 = vpop.f32.mrb[27].mxu0  ;;  %1429 = vtanh.f32 %v1240_v63 }
 0x126   : > { %v802_v2 = vpop.f32.mrb[27].mxu1  ;;  %v1406_v3 = vpop.eup %1405  ;;  %917 = vst.msk [vmem:[%s1615_s30 + $0xb0] sm:$0xff] %vm894_vm1, %v1404_v0  ;;  %1431 = vtanh.f32 %v674_v1 }
 0x127   : > { %v1408_v4 = vpop.eup %1407  ;;  %949 = vst.msk [vmem:[%s1615_s30 + $0x1b0] sm:$0xff] %vm894_vm1, %v1406_v3  ;;  %1433 = vtanh.f32 %v802_v2  ;;  %v1211_v8 = vpop.f32.mrb[28].mxu0 }
 0x128   : > { %v1410_v5 = vpop.eup %1409  ;;  %915 = vst.msk [vmem:[%s1615_s30 + $0xa0] sm:$0xff] %vm894_vm1, %v1408_v4  ;;  %v1243_v9 = vpop.f32.mrb[28].mxu1  ;;  %1435 = vtanh.f32 %v1211_v8 }
 0x129   : > { %v1412_v6 = vpop.eup %1411  ;;  %947 = vst.msk [vmem:[%s1615_s30 + $0x1a0] sm:$0xff] %vm894_vm1, %v1410_v5  ;;  %v687_v11 = vpop.f32.mrb[29].mxu0  ;;  %1437 = vtanh.f32 %v1243_v9 }
 0x12a   : > { %v1414_v7 = vpop.eup %1413  ;;  %918 = vst.msk [vmem:[%s1615_s30 + $0xb8] sm:$0xff] %vm894_vm1, %v1412_v6  ;;  %v815_v12 = vpop.f32.mrb[29].mxu1  ;;  %1439 = vtanh.f32 %v687_v11 }
 0x12b   : > { %v1416_v10 = vpop.eup %1415  ;;  %950 = vst.msk [vmem:[%s1615_s30 + $0x1b8] sm:$0xff] %vm894_vm1, %v1414_v7  ;;  %v1212_v14 = vpop.f32.mrb[30].mxu0  ;;  %1441 = vtanh.f32 %v815_v12 }
 0x12c   : > { %v1418_v13 = vpop.eup %1417  ;;  %916 = vst.msk [vmem:[%s1615_s30 + $0xa8] sm:$0xff] %vm894_vm1, %v1416_v10  ;;  %v1244_v15 = vpop.f32.mrb[30].mxu1  ;;  %1443 = vtanh.f32 %v1212_v14 }
 0x12d   : > { %v1420_v16 = vpop.eup %1419  ;;  %948 = vst.msk [vmem:[%s1615_s30 + $0x1a8] sm:$0xff] %vm894_vm1, %v1418_v13  ;;  %v690_v17 = vpop.f32.mrb[31].mxu0  ;;  %1445 = vtanh.f32 %v1244_v15 }
 0x12e   : > { %v818_v18 = vpop.f32.mrb[31].mxu1  ;;  %v1422_v19 = vpop.eup %1421  ;;  %921 = vst.msk [vmem:[%s1615_s30 + $0xd0] sm:$0xff] %vm894_vm1, %v1420_v16  ;;  %1447 = vtanh.f32 %v690_v17 }
 0x12f   : > { %v1424_v20 = vpop.eup %1423  ;;  %953 = vst.msk [vmem:[%s1615_s30 + $0x1d0] sm:$0xff] %vm894_vm1, %v1422_v19  ;;  %1449 = vtanh.f32 %v818_v18 }
 0x130   : > { %v1426_v21 = vpop.eup %1425  ;;  %919 = vst.msk [vmem:[%s1615_s30 + $0xc0] sm:$0xff] %vm894_vm1, %v1424_v20 }
 0x131   : > { %v1428_v22 = vpop.eup %1427  ;;  %951 = vst.msk [vmem:[%s1615_s30 + $0x1c0] sm:$0xff] %vm894_vm1, %v1426_v21 }
 0x132   : > { %v1430_v23 = vpop.eup %1429  ;;  %922 = vst.msk [vmem:[%s1615_s30 + $0xd8] sm:$0xff] %vm894_vm1, %v1428_v22 }
 0x133   : > { %v1432_v24 = vpop.eup %1431  ;;  %954 = vst.msk [vmem:[%s1615_s30 + $0x1d8] sm:$0xff] %vm894_vm1, %v1430_v23 }
 0x134   : > { %v1434_v25 = vpop.eup %1433  ;;  %920 = vst.msk [vmem:[%s1615_s30 + $0xc8] sm:$0xff] %vm894_vm1, %v1432_v24 }
 0x135   : > { %v1436_v26 = vpop.eup %1435  ;;  %952 = vst.msk [vmem:[%s1615_s30 + $0x1c8] sm:$0xff] %vm894_vm1, %v1434_v25 }
 0x136   : > { %v1438_v27 = vpop.eup %1437  ;;  %925 = vst.msk [vmem:[%s1615_s30 + $0xf0] sm:$0xff] %vm894_vm1, %v1436_v26 }
 0x137   : > { %v1440_v28 = vpop.eup %1439  ;;  %957 = vst.msk [vmem:[%s1615_s30 + $0x1f0] sm:$0xff] %vm894_vm1, %v1438_v27 }
 0x138   : > { %v1442_v29 = vpop.eup %1441  ;;  %923 = vst.msk [vmem:[%s1615_s30 + $0xe0] sm:$0xff] %vm894_vm1, %v1440_v28 }
 0x139   : > { %v1444_v30 = vpop.eup %1443  ;;  %955 = vst.msk [vmem:[%s1615_s30 + $0x1e0] sm:$0xff] %vm894_vm1, %v1442_v29 }
 0x13a   : > { %v1446_v31 = vpop.eup %1445  ;;  %926 = vst.msk [vmem:[%s1615_s30 + $0xf8] sm:$0xff] %vm894_vm1, %v1444_v30 }
 0x13b   : > { %v1448_v32 = vpop.eup %1447  ;;  %958 = vst.msk [vmem:[%s1615_s30 + $0x1f8] sm:$0xff] %vm894_vm1, %v1446_v31 }
 0x13c   : > { %v1450_v33 = vpop.eup %1449  ;;  %924 = vst.msk [vmem:[%s1615_s30 + $0xe8] sm:$0xff] %vm894_vm1, %v1448_v32 }
 0x13d   : > { %956 = vst.msk [vmem:[%s1615_s30 + $0x1e8] sm:$0xff] %vm894_vm1, %v1450_v33 }
 0x13e PF: > { %s12_s13 = sadd.s32 1, %s1489_s13   ;;  %s1763_s9 = smov %s1481_s11 }
 0x13f   : > { %p9_p7 = scmp.ge.s32.totalorder %s12_s13, 18   ;;  %s1764_s10 = smov %s1485_s12 }
 0x140   : > { %s1765_s11 = smov %s1768_s14  ;;  %s1766_s12 = smov %s1772_s15 }
 0x141   :  { %11 = sbr.rel (!%p9_p7) target bundleno = 3 (0x3), region = 61 }

</bundles_post_ra>
